<compile_context>
chip_gen: v6e
topology: v6e:2x2x1
jax: 0.10.0
libtpu: 0.0.40
codegen_flags: <defaults>
</compile_context>

<pallas_src>
import math

import numpy as np

import jax
import jax.numpy as jnp
from jax.experimental import pallas as pl
from jax.experimental.pallas import tpu as pltpu

PAD = 3     # max dilation of the HDC stack (per-item zero padding, host side)
OFF = 8     # sublane-aligned margin used inside the encoder scratch buffers
M0 = 8      # sublane-aligned top margin of the interaction volume scratch
LANE = 128  # lane width


def _round_up(x, m):
    return ((x + m - 1) // m) * m


def _row_stride(seq):
    # per-depth-slice row stride inside the interaction scratch: >= seq+1 zero
    # rows of separation, rounded to a multiple of 8 so all stores are aligned.
    return _round_up(seq + 1, 8)


# ---------------------------------------------------------------------------
# Kernel 1: fused HDC extractor (3 dilated conv levels, one pallas_call)
# ---------------------------------------------------------------------------
def _pick_groups(N, P, Cin, Fp, budget=20 * 1024 * 1024):
    """Smallest grid (largest row tile) whose per-step footprint (double-buffered
    input/output blocks + the two margin-padded scratches) fits a conservative
    VMEM budget that is safe on v5e/v6e/v7x default scoped limits."""
    for G in range(1, N + 1):
        if N % G:
            continue
        R = (N // G) * P
        blocks = 2 * (R * Cin * 4 + 3 * R * Fp * 2)          # 2x: double buffering
        scratch = (R + 2 * OFF) * (Cin + Fp) * 4
        if blocks + scratch <= budget:
            return G
    return N


def hdc_encoder(feat, enc):
    # feat: [N, seq, Cin] f32  ->  [3, N, P, Fp] bf16  (level-major, P = seq+2*PAD,
    # rows PAD..PAD+seq of each item are the valid ones, Fp = filters rounded to 128)
    N, seq, Cin = feat.shape
    Fp = enc["w1"].shape[-1]
    P = seq + 2 * PAD
    G = _pick_groups(N, P, Cin, Fp)
    TN = N // G
    R = TN * P

    # host-side: per-item zero padding + flatten items into the row axis
    xp = jnp.pad(feat, ((0, 0), (PAD, PAD), (0, 0))).reshape(G, R, Cin)
    base = ((np.arange(P) >= PAD) & (np.arange(P) < PAD + seq)).astype(np.float32)
    mask = jnp.asarray(np.tile(base, TN).reshape(R, 1))     # 1 on real rows, 0 on pads

    def kernel(x_ref, m_ref, w1_ref, b1_ref, w2_ref, b2_ref, w3_ref, b3_ref,
               o_ref, xpad, hpad):
        msk = m_ref[...]                                     # [R, 1]
        # only the OFF-row top/bottom margins need zeros; rows OFF..OFF+R are fully
        # overwritten below -> no full-buffer memset per grid step.
        zx = jnp.zeros((OFF, Cin), jnp.float32)
        zh = jnp.zeros((OFF, Fp), jnp.float32)
        xpad[0:OFF, :] = zx
        xpad[OFF + R:OFF + R + OFF, :] = zx
        hpad[0:OFF, :] = zh
        hpad[OFF + R:OFF + R + OFF, :] = zh
        xpad[OFF:OFF + R, :] = x_ref[0]

        def level(pad_ref, w_ref, b_ref, dil):
            xv = pad_ref[...]                                # [R+2*OFF, cin]
            # merge the 3 dilated taps into ONE matmul: [R, 3*cin] @ [3*cin, Fp]
            win = jnp.concatenate(
                [xv[OFF - dil:OFF - dil + R, :],
                 xv[OFF:OFF + R, :],
                 xv[OFF + dil:OFF + dil + R, :]],
                axis=1).astype(jnp.bfloat16)
            y = jnp.dot(win, w_ref[...], preferred_element_type=jnp.float32)
            return jnp.maximum(y + b_ref[...], 0.0)

        d1 = level(xpad, w1_ref, b1_ref, 1) * msk            # zero item-pad rows:
        hpad[OFF:OFF + R, :] = d1                            # they feed next level
        o_ref[0, 0] = d1.astype(jnp.bfloat16)
        d2 = level(hpad, w2_ref, b2_ref, 2) * msk
        hpad[OFF:OFF + R, :] = d2
        o_ref[1, 0] = d2.astype(jnp.bfloat16)
        d3 = level(hpad, w3_ref, b3_ref, 3)                  # pad rows of last level
        o_ref[2, 0] = d3.astype(jnp.bfloat16)                # never read -> no mask

    out = pl.pallas_call(
        kernel,
        out_shape=jax.ShapeDtypeStruct((3, G, R, Fp), jnp.bfloat16),
        grid=(G,),
        in_specs=[
            pl.BlockSpec((1, R, Cin), lambda i: (i, 0, 0)),
            pl.BlockSpec((R, 1), lambda i: (0, 0)),
            pl.BlockSpec((3 * Cin, Fp), lambda i: (0, 0)),
            pl.BlockSpec((1, Fp), lambda i: (0, 0)),
            pl.BlockSpec((3 * Fp, Fp), lambda i: (0, 0)),
            pl.BlockSpec((1, Fp), lambda i: (0, 0)),
            pl.BlockSpec((3 * Fp, Fp), lambda i: (0, 0)),
            pl.BlockSpec((1, Fp), lambda i: (0, 0)),
        ],
        out_specs=pl.BlockSpec((3, 1, R, Fp), lambda i: (0, i, 0, 0)),
        scratch_shapes=[pltpu.VMEM((R + 2 * OFF, Cin), jnp.float32),
                        pltpu.VMEM((R + 2 * OFF, Fp), jnp.float32)],
        compiler_params=pltpu.CompilerParams(
            dimension_semantics=("parallel",),
            vmem_limit_bytes=48 * 1024 * 1024),
    )(xp, mask, enc["w1"], enc["b1"], enc["w2"], enc["b2"], enc["w3"], enc["b3"])

    # level-major output: (3, G, TN*P, Fp) -> (3, N, P, Fp) is metadata-only.
    return out.reshape(3, N, P, Fp)


def new_encoder_fwd(enc, word_emb, cat_idx, subcat_idx):
    cat = jnp.take(enc["cat_emb"], cat_idx.astype(jnp.int32), axis=0)[:, None, :]
    sub = jnp.take(enc["subcat_emb"], subcat_idx.astype(jnp.int32), axis=0)[:, None, :]
    feat = jnp.concatenate([word_emb, cat, sub], axis=1)     # [N, seq, Dw]
    return hdc_encoder(feat, enc)                            # [3, N, P, Fp] bf16


# ---------------------------------------------------------------------------
# Kernel 2: fused interaction layer (cross match + Conv3d + ReLU + pool + FC)
# ---------------------------------------------------------------------------
def interaction_fwd(inter, user_rep, new_rep, *, B, S):
    # new_rep : [3, B*S, P, Fp] bf16 (candidate encodings, level-major)
    # user_rep: [3, C*B, P, Fp] bf16 (clicked encodings, item index = c*B + b)
    L = 3
    P, Fp = new_rep.shape[2], new_rep.shape[3]
    C = user_rep.shape[1] // B
    Tq = P - 2 * PAD
    HB = _row_stride(Tq)                # row stride per depth (clicked-news) slice
    X2C = L * Tq
    X2Cp = inter["wband"].shape[1]      # lane-padded scratch width (128-multiple)
    NLE = inter["wband"].shape[2]       # lane-padded conv output width (128-multiple)
    Racc, NL = inter["wexp"].shape      # valid pooling domain rows, F3*Tq lanes
    assert Racc == C * HB and NL + 2 <= NLE and X2C <= X2Cp
    Racc_ext = Racc + 2 * HB + 2        # + room so pooling shifts are plain slices
    X2R = M0 + Racc_ext + 2 * HB + 2    # scratch rows (padded interaction volume)
    rows_tall = Racc_ext + 2 * HB       # kh-shifted slab height (covers all kd)

    # merge (level, clicked) into the leading axis so the per-user click block is a
    # contiguous 4-D slice (metadata-only reshape).
    click = user_rep.reshape(3 * C, B, P, Fp)

    def kernel(cand_ref, click_ref, wband_ref, bias_ref, wexp_ref, o_ref, x2, acc):
        # zero only rows the per-candidate writes below never touch: top margin +
        # depth "-1" pad slice, and the depth "C" pad tail (8-row aligned stores).
        x2[0:M0 + HB, :] = jnp.zeros((M0 + HB, X2Cp), jnp.float32)
        x2[M0 + (C + 1) * HB:X2R, :] = jnp.zeros(
            (X2R - M0 - (C + 1) * HB, X2Cp), jnp.float32)

        bias = bias_ref[...]
        wexp = wexp_ref[...]
        zlane = jnp.zeros((Tq, X2Cp - X2C), jnp.float32)
        zsep = jnp.zeros((HB - Tq, X2Cp), jnp.float32)

        # ---- fine-grained cross matching: ONE [S*Tq, Fp] @ [Fp, C*Tq] MXU matmul
        # per HDC level, shared by all S candidates of this user (the 1/sqrt(F)
        # matching scale is folded into the Conv3d band weights host-side).
        match = []
        for l in range(L):
            lhs = jnp.concatenate(
                [cand_ref[l, s, PAD:PAD + Tq, :] for s in range(S)], axis=0)
            rhs = jnp.concatenate(
                [click_ref[l * C + c, 0, PAD:PAD + Tq, :] for c in range(C)], axis=0)
            match.append(jax.lax.dot_general(
                lhs, rhs, (((1,), (1,)), ((), ())),
                preferred_element_type=jnp.float32))          # [S*Tq, C*Tq] f32

        scores = []
        for s in range(S):
            # scatter this candidate's interaction volume into the padded scratch
            # (depth=clicked news, height=cand word, width=clicked word, chan=level);
            # every store is 8-row / 128-lane dense.
            for c in range(C):
                parts = [match[l][s * Tq:(s + 1) * Tq, c * Tq:(c + 1) * Tq]
                         for l in range(L)]
                if X2Cp > X2C:
                    parts.append(zlane)
                blk = jnp.concatenate(parts, axis=1)          # [Tq, X2Cp]
                x2[M0 + (c + 1) * HB:M0 + (c + 2) * HB, :] = jnp.concatenate(
                    [blk, zsep], axis=0)                      # [HB, X2Cp]

            # ---- 3x3x3 Conv3d: the 3 row-unaligned kh-shifted slabs are built once
            # and reused across kd; 9 banded matmuls (kw + width zero padding folded
            # into Toeplitz weights) accumulated into a VMEM scratch.
            slabs = [x2[M0 + kh - 1:M0 + kh - 1 + rows_tall, :].astype(jnp.bfloat16)
                     for kh in range(3)]
            for kd in range(3):
                part = None
                for kh in range(3):
                    t = jnp.dot(slabs[kh][kd * HB:kd * HB + Racc_ext, :],
                                wband_ref[kd * 3 + kh],
                                preferred_element_type=jnp.float32)
                    part = t if part is None else part + t
                if kd == 0:
                    acc[...] = part
                else:
                    acc[...] += part
            a = jnp.maximum(acc[...] + bias, 0.0)             # bias + ReLU

            # ---- fused MaxPool3d(kernel=3, stride=3) via shifted maxima
            mw = jnp.maximum(jnp.maximum(a[:, 0:NL], a[:, 1:NL + 1]),
                             a[:, 2:NL + 2])                  # width window
            rh = Racc + 2 * HB
            mh = jnp.maximum(jnp.maximum(mw[0:rh, :], mw[1:rh + 1, :]),
                             mw[2:rh + 2, :])                 # height window
            md = jnp.maximum(jnp.maximum(mh[0:Racc, :], mh[HB:HB + Racc, :]),
                             mh[2 * HB:2 * HB + Racc, :])     # depth window

            # ---- fused FC scorer: VPU multiply + reduce against the
            # pool-position-expanded weight map (fc bias added host-side)
            sc = jnp.sum(md * wexp, axis=1, keepdims=True)    # [Racc, 1]
            scores.append(jnp.sum(sc, axis=0, keepdims=True)) # [1, 1]

        o_ref[0] = jnp.concatenate(scores, axis=1)            # [1, S]

    out = pl.pallas_call(
        kernel,
        out_shape=jax.ShapeDtypeStruct((B, 1, S), jnp.float32),
        grid=(B,),
        in_specs=[
            pl.BlockSpec((3, S, P, Fp), lambda b: (0, b, 0, 0)),
            pl.BlockSpec((3 * C, 1, P, Fp), lambda b: (0, b, 0, 0)),
            pl.BlockSpec((9, X2Cp, NLE), lambda b: (0, 0, 0)),
            pl.BlockSpec((1, NLE), lambda b: (0, 0)),
            pl.BlockSpec((Racc, NL), lambda b: (0, 0)),
        ],
        out_specs=pl.BlockSpec((1, 1, S), lambda b: (b, 0, 0)),
        scratch_shapes=[pltpu.VMEM((X2R, X2Cp), jnp.float32),
                        pltpu.VMEM((Racc_ext, NLE), jnp.float32)],
        compiler_params=pltpu.CompilerParams(
            dimension_semantics=("parallel",),
            vmem_limit_bytes=48 * 1024 * 1024),
    )(new_rep, click, inter["wband"], inter["bias_exp"], inter["wexp"])

    return out.reshape(B, S) + inter["bfc"]


# ---------------------------------------------------------------------------
# FIM forward (the per-sample / per-clicked-news loops of the PyTorch code are
# vectorized by flattening; semantics are identical)
# ---------------------------------------------------------------------------
def fim_forward(params, cand_word, clicked_word, cand_cat, clicked_cat,
                cand_sub, clicked_sub):
    B, S, T, Dw = cand_word.shape
    C = clicked_word.shape[0]

    new_rep = new_encoder_fwd(params["news_enc"],
                              cand_word.reshape(B * S, T, Dw),
                              cand_cat.reshape(B * S), cand_sub.reshape(B * S))
    user_rep = new_encoder_fwd(params["user_enc"],
                               clicked_word.reshape(C * B, T, Dw),
                               clicked_cat.reshape(C * B),
                               clicked_sub.reshape(C * B))
    return interaction_fwd(params["inter"], user_rep, new_rep, B=B, S=S)


# ---------------------------------------------------------------------------
# Deterministic parameter initialization + host-side kernel-ready precompute
# ---------------------------------------------------------------------------
def init_params(key, Dw, cat_size, subcat_size, filters, feat3d, C, seq):
    ks = jax.random.split(key, 3)

    def enc_params(kk):
        k = jax.random.split(kk, 5)
        return {
            "cat_emb": (jax.random.normal(k[0], (cat_size, Dw)) * 0.1).astype(jnp.float32),
            "subcat_emb": (jax.random.normal(k[1], (subcat_size, Dw)) * 0.1).astype(jnp.float32),
            "w1": (jax.random.normal(k[2], (3, Dw, filters)) / math.sqrt(3 * Dw)).astype(jnp.float32),
            "b1": jnp.zeros((filters,), jnp.float32),
            "w2": (jax.random.normal(k[3], (3, filters, filters)) / math.sqrt(3 * filters)).astype(jnp.float32),
            "b2": jnp.zeros((filters,), jnp.float32),
            "w3": (jax.random.normal(k[4], (3, filters, filters)) / math.sqrt(3 * filters)).astype(jnp.float32),
            "b3": jnp.zeros((filters,), jnp.float32),
        }

    L = 3
    pooled = feat3d * (C // 3) * (seq // 3) * (seq // 3)
    ki = jax.random.split(ks[2], 2)
    inter = {
        "w3d": (jax.random.normal(ki[0], (feat3d, L, 3, 3, 3)) / math.sqrt(L * 27)).astype(jnp.float32),
        "b3d": jnp.zeros((feat3d,), jnp.float32),
        "wfc": (jax.random.normal(ki[1], (pooled, 1)) / math.sqrt(pooled)).astype(jnp.float32),
        "bfc": jnp.zeros((1,), jnp.float32),
    }
    return {"news_enc": enc_params(ks[0]), "user_enc": enc_params(ks[1]), "inter": inter}


def prepare_params(raw, *, seq, C):
    """Host-side precompute: lane-padded, tap-merged bf16 conv1d weights, banded
    (Toeplitz) Conv3d weights with the 1/sqrt(F) matching scale folded in, and the
    pool-position-expanded FC weight map."""
    L = 3
    Tq = seq
    HB = _row_stride(seq)
    assert seq % 3 == 0 and C % 3 == 0, "MaxPool3d(3, stride 3) needs seq, C % 3 == 0"

    def prep_enc(enc):
        Dw = enc["w1"].shape[1]
        Fh = enc["w1"].shape[2]
        Fp = _round_up(Fh, LANE)

        def pad_w(w, cin, cp):
            wp = np.zeros((3, cp, Fp), np.float32)
            wp[:, :cin, :Fh] = np.asarray(w)
            return jnp.asarray(wp.reshape(3 * cp, Fp)).astype(jnp.bfloat16)

        def pad_b(b):
            bp = np.zeros((1, Fp), np.float32)
            bp[0, :Fh] = np.asarray(b)
            return jnp.asarray(bp)

        return {
            "cat_emb": enc["cat_emb"],
            "subcat_emb": enc["subcat_emb"],
            "w1": pad_w(enc["w1"], Dw, Dw), "b1": pad_b(enc["b1"]),
            "w2": pad_w(enc["w2"], Fh, Fp), "b2": pad_b(enc["b2"]),
            "w3": pad_w(enc["w3"], Fh, Fp), "b3": pad_b(enc["b3"]),
        }

    Fh = np.asarray(raw["news_enc"]["w1"]).shape[2]
    scale = 1.0 / math.sqrt(Fh)                       # conv is linear in its input
    w3d = np.asarray(raw["inter"]["w3d"])             # [F3, L, 3, 3, 3]
    b3d = np.asarray(raw["inter"]["b3d"])
    wfc = np.asarray(raw["inter"]["wfc"])
    F3 = w3d.shape[0]
    NL = F3 * Tq
    NLE = _round_up(NL + 2, LANE)                     # +2 spare lanes for pool shifts
    X2C = L * Tq
    X2Cp = _round_up(X2C, LANE)

    # Banded Conv3d weights: one [X2Cp, NLE] block per (kd, kh) tap; the kw taps and
    # the zero padding along w are folded into the band structure; scale folded in.
    wband = np.zeros((9, X2Cp, NLE), np.float32)
    cols = np.arange(F3) * Tq
    for kd in range(3):
        for kh in range(3):
            t = kd * 3 + kh
            for l in range(L):
                for kw in range(3):
                    for w in range(Tq):
                        wp = w + kw - 1
                        if 0 <= wp < Tq:
                            wband[t, l * Tq + wp, cols + w] = w3d[:, l, kd, kh, kw]
    wband *= scale

    bias_exp = np.zeros((1, NLE), np.float32)
    bias_exp[0, :NL] = np.repeat(b3d, Tq)

    # FC weights placed at pooling-window start positions, zero elsewhere.
    wfc4 = wfc.reshape(F3, C // 3, Tq // 3, Tq // 3)
    wexp = np.zeros((C * HB, NL), np.float32)
    for f3 in range(F3):
        for dq in range(C // 3):
            for hq in range(Tq // 3):
                for wq in range(Tq // 3):
                    wexp[3 * dq * HB + 3 * hq, f3 * Tq + 3 * wq] = wfc4[f3, dq, hq, wq]

    inter = {
        "wband": jnp.asarray(wband).astype(jnp.bfloat16),
        "bias_exp": jnp.asarray(bias_exp),
        "wexp": jnp.asarray(wexp),
        "bfc": raw["inter"]["bfc"],
    }
    return {"news_enc": prep_enc(raw["news_enc"]),
            "user_enc": prep_enc(raw["user_enc"]),
            "inter": inter}


if __name__ == "__main__":
    # Small shapes consistent with the module's forward
    B = 2                 # user batch
    S = 2                 # sample_num (candidate news per user)
    C = 3                 # user_clicked_new_num
    T = 10                # title_word_size
    Dw = 32               # word/category/subcategory embedding dim
    cat_size = subcat_size = 8
    filters = 16          # HDC level width
    feat3d = 16           # 3D conv filters (feature_dim)
    seq = T + 2           # news_feature_size

    key = jax.random.PRNGKey(0)
    k1, k2, k3, k4, k5, k6, kp = jax.random.split(key, 7)
    cand_word = jax.random.normal(k1, (B, S, T, Dw), dtype=jnp.float32)
    clicked_word = jax.random.normal(k2, (C, B, T, Dw), dtype=jnp.float32)
    cand_cat = jax.random.randint(k3, (B, S), 0, cat_size, dtype=jnp.int32)
    clicked_cat = jax.random.randint(k4, (C, B), 0, cat_size, dtype=jnp.int32)
    cand_sub = jax.random.randint(k5, (B, S), 0, subcat_size, dtype=jnp.int32)
    clicked_sub = jax.random.randint(k6, (C, B), 0, subcat_size, dtype=jnp.int32)

    raw = init_params(kp, Dw, cat_size, subcat_size, filters, feat3d, C, seq)
    params = prepare_params(raw, seq=seq, C=C)

    score = jax.jit(fim_forward)(params, cand_word, clicked_word, cand_cat,
                                 clicked_cat, cand_sub, clicked_sub)
    score = jax.block_until_ready(score)
    assert score.shape == (B, S) and score.dtype == jnp.float32
    print("KERNEL_OK")
</pallas_src>

<mosaic_0001>
module attributes {stable_mosaic.version = 11 : i64} {
  func.func @kernel(%arg0: i32, %arg1: memref<1x108x32xf32, #tpu.memory_space<vmem>>, %arg2: memref<108x1xf32, #tpu.memory_space<vmem>>, %arg3: memref<96x128xbf16, #tpu.memory_space<vmem>>, %arg4: memref<1x128xf32, #tpu.memory_space<vmem>>, %arg5: memref<384x128xbf16, #tpu.memory_space<vmem>>, %arg6: memref<1x128xf32, #tpu.memory_space<vmem>>, %arg7: memref<384x128xbf16, #tpu.memory_space<vmem>>, %arg8: memref<1x128xf32, #tpu.memory_space<vmem>>, %arg9: memref<3x1x108x128xbf16, #tpu.memory_space<vmem>>, %arg10: memref<124x32xf32, #tpu.memory_space<vmem>>, %arg11: memref<124x128xf32, #tpu.memory_space<vmem>>) attributes {dimension_semantics = [#tpu.dimension_semantics<parallel>], iteration_bounds = array<i64: 1>, scalar_prefetch = 0 : i64, scratch_operands = 2 : i64, tpu.core_type = #tpu.core_type<tc>, window_params = [{transform_indices = @transform_0, window_bounds = array<i64: 1, 108, 32>}, {pipeline_mode = #tpu.pipeline_mode<synchronous>, transform_indices = @transform_1, window_bounds = array<i64: 108, 1>}, {pipeline_mode = #tpu.pipeline_mode<synchronous>, transform_indices = @transform_2, window_bounds = array<i64: 96, 128>}, {pipeline_mode = #tpu.pipeline_mode<synchronous>, transform_indices = @transform_3, window_bounds = array<i64: 1, 128>}, {pipeline_mode = #tpu.pipeline_mode<synchronous>, transform_indices = @transform_4, window_bounds = array<i64: 384, 128>}, {pipeline_mode = #tpu.pipeline_mode<synchronous>, transform_indices = @transform_5, window_bounds = array<i64: 1, 128>}, {pipeline_mode = #tpu.pipeline_mode<synchronous>, transform_indices = @transform_6, window_bounds = array<i64: 384, 128>}, {pipeline_mode = #tpu.pipeline_mode<synchronous>, transform_indices = @transform_7, window_bounds = array<i64: 1, 128>}, {transform_indices = @transform_8, window_bounds = array<i64: 3, 1, 108, 128>}]} {
    %c0 = arith.constant 0 : index
    %c0_0 = arith.constant 0 : index
    %0 = vector.load %arg2[%c0, %c0_0] : memref<108x1xf32, #tpu.memory_space<vmem>>, vector<108x1xf32>
    %cst = arith.constant 0.000000e+00 : f32
    %1 = vector.broadcast %cst : f32 to vector<8x32xf32>
    %cst_1 = arith.constant 0.000000e+00 : f32
    %2 = vector.broadcast %cst_1 : f32 to vector<8x128xf32>
    %c0_2 = arith.constant 0 : index
    %c0_3 = arith.constant 0 : index
    %3 = vector.load %arg10[%c0_2, %c0_3] : memref<124x32xf32, #tpu.memory_space<vmem>>, vector<8x32xf32>
    tpu.vector_store %arg10[%c0_2, %c0_3], %1 {strides = array<i32>} : memref<124x32xf32, #tpu.memory_space<vmem>>, vector<8x32xf32>,
    %c116 = arith.constant 116 : index
    %c0_4 = arith.constant 0 : index
    %4 = vector.load %arg10[%c116, %c0_4] : memref<124x32xf32, #tpu.memory_space<vmem>>, vector<8x32xf32>
    tpu.vector_store %arg10[%c116, %c0_4], %1 {strides = array<i32>} : memref<124x32xf32, #tpu.memory_space<vmem>>, vector<8x32xf32>,
    %c0_5 = arith.constant 0 : index
    %c0_6 = arith.constant 0 : index
    %5 = vector.load %arg11[%c0_5, %c0_6] : memref<124x128xf32, #tpu.memory_space<vmem>>, vector<8x128xf32>
    tpu.vector_store %arg11[%c0_5, %c0_6], %2 {strides = array<i32>} : memref<124x128xf32, #tpu.memory_space<vmem>>, vector<8x128xf32>,
    %c116_7 = arith.constant 116 : index
    %c0_8 = arith.constant 0 : index
    %6 = vector.load %arg11[%c116_7, %c0_8] : memref<124x128xf32, #tpu.memory_space<vmem>>, vector<8x128xf32>
    tpu.vector_store %arg11[%c116_7, %c0_8], %2 {strides = array<i32>} : memref<124x128xf32, #tpu.memory_space<vmem>>, vector<8x128xf32>,
    %c0_9 = arith.constant 0 : index
    %c0_10 = arith.constant 0 : index
    %c0_11 = arith.constant 0 : index
    %7 = vector.load %arg1[%c0_9, %c0_10, %c0_11] : memref<1x108x32xf32, #tpu.memory_space<vmem>>, vector<1x108x32xf32>
    %8 = vector.shape_cast %7 : vector<1x108x32xf32> to vector<108x32xf32>
    %c8 = arith.constant 8 : index
    %c0_12 = arith.constant 0 : index
    %9 = vector.load %arg10[%c8, %c0_12] : memref<124x32xf32, #tpu.memory_space<vmem>>, vector<108x32xf32>
    tpu.vector_store %arg10[%c8, %c0_12], %8 {strides = array<i32>} : memref<124x32xf32, #tpu.memory_space<vmem>>, vector<108x32xf32>,
    %c0_13 = arith.constant 0 : index
    %c0_14 = arith.constant 0 : index
    %10 = vector.load %arg10[%c0_13, %c0_14] : memref<124x32xf32, #tpu.memory_space<vmem>>, vector<124x32xf32>
    %11 = vector.extract_strided_slice %10 {offsets = [7, 0], sizes = [108, 32], strides = [1, 1]} : vector<124x32xf32> to vector<108x32xf32>
    %12 = vector.extract_strided_slice %10 {offsets = [8, 0], sizes = [108, 32], strides = [1, 1]} : vector<124x32xf32> to vector<108x32xf32>
    %13 = vector.extract_strided_slice %10 {offsets = [9, 0], sizes = [108, 32], strides = [1, 1]} : vector<124x32xf32> to vector<108x32xf32>
    %14 = tpu.concatenate %11, %12, %13 in 1 : vector<108x32xf32>, vector<108x32xf32>, vector<108x32xf32> -> vector<108x96xf32>
    %15 = arith.truncf %14 : vector<108x96xf32> to vector<108x96xbf16>
    %c0_15 = arith.constant 0 : index
    %c0_16 = arith.constant 0 : index
    %16 = vector.load %arg3[%c0_15, %c0_16] : memref<96x128xbf16, #tpu.memory_space<vmem>>, vector<96x128xbf16>
    %cst_17 = arith.constant dense<0.000000e+00> : vector<108x128xf32>
    %17 = tpu.matmul %15, %16, %cst_17 {dimension_numbers = #tpu.dot_dimension_numbers<[1], [0], [0], [1], [0, 0, 1, 1], [], []>} : vector<108x96xbf16>, vector<96x128xbf16>, vector<108x128xf32> -> vector<108x128xf32>
    %c0_18 = arith.constant 0 : index
    %c0_19 = arith.constant 0 : index
    %18 = vector.load %arg4[%c0_18, %c0_19] : memref<1x128xf32, #tpu.memory_space<vmem>>, vector<1x128xf32>
    %19 = vector.broadcast %18 : vector<1x128xf32> to vector<108x128xf32>
    %20 = arith.addf %17, %19 : vector<108x128xf32>
    %cst_20 = arith.constant 0.000000e+00 : f32
    %21 = vector.broadcast %cst_20 : f32 to vector<108x128xf32>
    %22 = arith.maximumf %20, %21 : vector<108x128xf32>
    %23 = vector.broadcast %0 : vector<108x1xf32> to vector<108x128xf32>
    %24 = arith.mulf %22, %23 : vector<108x128xf32>
    %c8_21 = arith.constant 8 : index
    %c0_22 = arith.constant 0 : index
    %25 = vector.load %arg11[%c8_21, %c0_22] : memref<124x128xf32, #tpu.memory_space<vmem>>, vector<108x128xf32>
    tpu.vector_store %arg11[%c8_21, %c0_22], %24 {strides = array<i32>} : memref<124x128xf32, #tpu.memory_space<vmem>>, vector<108x128xf32>,
    %26 = arith.truncf %24 : vector<108x128xf32> to vector<108x128xbf16>
    %c0_23 = arith.constant 0 : index
    %c0_24 = arith.constant 0 : index
    %c0_25 = arith.constant 0 : index
    %c0_26 = arith.constant 0 : index
    %27 = vector.load %arg9[%c0_23, %c0_24, %c0_25, %c0_26] : memref<3x1x108x128xbf16, #tpu.memory_space<vmem>>, vector<1x1x108x128xbf16>
    %28 = vector.shape_cast %27 : vector<1x1x108x128xbf16> to vector<108x128xbf16>
    %29 = vector.shape_cast %26 : vector<108x128xbf16> to vector<1x1x108x128xbf16>
    tpu.vector_store %arg9[%c0_23, %c0_24, %c0_25, %c0_26], %29 {strides = array<i32>} : memref<3x1x108x128xbf16, #tpu.memory_space<vmem>>, vector<1x1x108x128xbf16>,
    %c0_27 = arith.constant 0 : index
    %c0_28 = arith.constant 0 : index
    %30 = vector.load %arg11[%c0_27, %c0_28] : memref<124x128xf32, #tpu.memory_space<vmem>>, vector<124x128xf32>
    %31 = vector.extract_strided_slice %30 {offsets = [6, 0], sizes = [108, 128], strides = [1, 1]} : vector<124x128xf32> to vector<108x128xf32>
    %32 = vector.extract_strided_slice %30 {offsets = [8, 0], sizes = [108, 128], strides = [1, 1]} : vector<124x128xf32> to vector<108x128xf32>
    %33 = vector.extract_strided_slice %30 {offsets = [10, 0], sizes = [108, 128], strides = [1, 1]} : vector<124x128xf32> to vector<108x128xf32>
    %34 = tpu.concatenate %31, %32, %33 in 1 : vector<108x128xf32>, vector<108x128xf32>, vector<108x128xf32> -> vector<108x384xf32>
    %35 = arith.truncf %34 : vector<108x384xf32> to vector<108x384xbf16>
    %c0_29 = arith.constant 0 : index
    %c0_30 = arith.constant 0 : index
    %36 = vector.load %arg5[%c0_29, %c0_30] : memref<384x128xbf16, #tpu.memory_space<vmem>>, vector<384x128xbf16>
    %cst_31 = arith.constant dense<0.000000e+00> : vector<108x128xf32>
    %37 = tpu.matmul %35, %36, %cst_31 {dimension_numbers = #tpu.dot_dimension_numbers<[1], [0], [0], [1], [0, 0, 1, 1], [], []>} : vector<108x384xbf16>, vector<384x128xbf16>, vector<108x128xf32> -> vector<108x128xf32>
    %c0_32 = arith.constant 0 : index
    %c0_33 = arith.constant 0 : index
    %38 = vector.load %arg6[%c0_32, %c0_33] : memref<1x128xf32, #tpu.memory_space<vmem>>, vector<1x128xf32>
    %39 = vector.broadcast %38 : vector<1x128xf32> to vector<108x128xf32>
    %40 = arith.addf %37, %39 : vector<108x128xf32>
    %cst_34 = arith.constant 0.000000e+00 : f32
    %41 = vector.broadcast %cst_34 : f32 to vector<108x128xf32>
    %42 = arith.maximumf %40, %41 : vector<108x128xf32>
    %43 = vector.broadcast %0 : vector<108x1xf32> to vector<108x128xf32>
    %44 = arith.mulf %42, %43 : vector<108x128xf32>
    %c8_35 = arith.constant 8 : index
    %c0_36 = arith.constant 0 : index
    %45 = vector.load %arg11[%c8_35, %c0_36] : memref<124x128xf32, #tpu.memory_space<vmem>>, vector<108x128xf32>
    tpu.vector_store %arg11[%c8_35, %c0_36], %44 {strides = array<i32>} : memref<124x128xf32, #tpu.memory_space<vmem>>, vector<108x128xf32>,
    %46 = arith.truncf %44 : vector<108x128xf32> to vector<108x128xbf16>
    %c1 = arith.constant 1 : index
    %c0_37 = arith.constant 0 : index
    %c0_38 = arith.constant 0 : index
    %c0_39 = arith.constant 0 : index
    %47 = vector.load %arg9[%c1, %c0_37, %c0_38, %c0_39] : memref<3x1x108x128xbf16, #tpu.memory_space<vmem>>, vector<1x1x108x128xbf16>
    %48 = vector.shape_cast %47 : vector<1x1x108x128xbf16> to vector<108x128xbf16>
    %49 = vector.shape_cast %46 : vector<108x128xbf16> to vector<1x1x108x128xbf16>
    tpu.vector_store %arg9[%c1, %c0_37, %c0_38, %c0_39], %49 {strides = array<i32>} : memref<3x1x108x128xbf16, #tpu.memory_space<vmem>>, vector<1x1x108x128xbf16>,
    %c0_40 = arith.constant 0 : index
    %c0_41 = arith.constant 0 : index
    %50 = vector.load %arg11[%c0_40, %c0_41] : memref<124x128xf32, #tpu.memory_space<vmem>>, vector<124x128xf32>
    %51 = vector.extract_strided_slice %50 {offsets = [5, 0], sizes = [108, 128], strides = [1, 1]} : vector<124x128xf32> to vector<108x128xf32>
    %52 = vector.extract_strided_slice %50 {offsets = [8, 0], sizes = [108, 128], strides = [1, 1]} : vector<124x128xf32> to vector<108x128xf32>
    %53 = vector.extract_strided_slice %50 {offsets = [11, 0], sizes = [108, 128], strides = [1, 1]} : vector<124x128xf32> to vector<108x128xf32>
    %54 = tpu.concatenate %51, %52, %53 in 1 : vector<108x128xf32>, vector<108x128xf32>, vector<108x128xf32> -> vector<108x384xf32>
    %55 = arith.truncf %54 : vector<108x384xf32> to vector<108x384xbf16>
    %c0_42 = arith.constant 0 : index
    %c0_43 = arith.constant 0 : index
    %56 = vector.load %arg7[%c0_42, %c0_43] : memref<384x128xbf16, #tpu.memory_space<vmem>>, vector<384x128xbf16>
    %cst_44 = arith.constant dense<0.000000e+00> : vector<108x128xf32>
    %57 = tpu.matmul %55, %56, %cst_44 {dimension_numbers = #tpu.dot_dimension_numbers<[1], [0], [0], [1], [0, 0, 1, 1], [], []>} : vector<108x384xbf16>, vector<384x128xbf16>, vector<108x128xf32> -> vector<108x128xf32>
    %c0_45 = arith.constant 0 : index
    %c0_46 = arith.constant 0 : index
    %58 = vector.load %arg8[%c0_45, %c0_46] : memref<1x128xf32, #tpu.memory_space<vmem>>, vector<1x128xf32>
    %59 = vector.broadcast %58 : vector<1x128xf32> to vector<108x128xf32>
    %60 = arith.addf %57, %59 : vector<108x128xf32>
    %cst_47 = arith.constant 0.000000e+00 : f32
    %61 = vector.broadcast %cst_47 : f32 to vector<108x128xf32>
    %62 = arith.maximumf %60, %61 : vector<108x128xf32>
    %63 = arith.truncf %62 : vector<108x128xf32> to vector<108x128xbf16>
    %c2 = arith.constant 2 : index
    %c0_48 = arith.constant 0 : index
    %c0_49 = arith.constant 0 : index
    %c0_50 = arith.constant 0 : index
    %64 = vector.load %arg9[%c2, %c0_48, %c0_49, %c0_50] : memref<3x1x108x128xbf16, #tpu.memory_space<vmem>>, vector<1x1x108x128xbf16>
    %65 = vector.shape_cast %64 : vector<1x1x108x128xbf16> to vector<108x128xbf16>
    %66 = vector.shape_cast %63 : vector<108x128xbf16> to vector<1x1x108x128xbf16>
    tpu.vector_store %arg9[%c2, %c0_48, %c0_49, %c0_50], %66 {strides = array<i32>} : memref<3x1x108x128xbf16, #tpu.memory_space<vmem>>, vector<1x1x108x128xbf16>,
    return
  }
  func.func @transform_0(%arg0: i32) -> (i32, i32, i32) {
    %c0_i32 = arith.constant 0 : i32
    %c0_i32_0 = arith.constant 0 : i32
    %c0_i32_1 = arith.constant 0 : i32
    return %arg0, %c0_i32, %c0_i32_0 : i32, i32, i32
  }
  func.func @transform_1(%arg0: i32) -> (i32, i32) {
    %c0_i32 = arith.constant 0 : i32
    %c0_i32_0 = arith.constant 0 : i32
    %c0_i32_1 = arith.constant 0 : i32
    return %c0_i32, %c0_i32_0 : i32, i32
  }
  func.func @transform_2(%arg0: i32) -> (i32, i32) {
    %c0_i32 = arith.constant 0 : i32
    %c0_i32_0 = arith.constant 0 : i32
    %c0_i32_1 = arith.constant 0 : i32
    return %c0_i32, %c0_i32_0 : i32, i32
  }
  func.func @transform_3(%arg0: i32) -> (i32, i32) {
    %c0_i32 = arith.constant 0 : i32
    %c0_i32_0 = arith.constant 0 : i32
    %c0_i32_1 = arith.constant 0 : i32
    return %c0_i32, %c0_i32_0 : i32, i32
  }
  func.func @transform_4(%arg0: i32) -> (i32, i32) {
    %c0_i32 = arith.constant 0 : i32
    %c0_i32_0 = arith.constant 0 : i32
    %c0_i32_1 = arith.constant 0 : i32
    return %c0_i32, %c0_i32_0 : i32, i32
  }
  func.func @transform_5(%arg0: i32) -> (i32, i32) {
    %c0_i32 = arith.constant 0 : i32
    %c0_i32_0 = arith.constant 0 : i32
    %c0_i32_1 = arith.constant 0 : i32
    return %c0_i32, %c0_i32_0 : i32, i32
  }
  func.func @transform_6(%arg0: i32) -> (i32, i32) {
    %c0_i32 = arith.constant 0 : i32
    %c0_i32_0 = arith.constant 0 : i32
    %c0_i32_1 = arith.constant 0 : i32
    return %c0_i32, %c0_i32_0 : i32, i32
  }
  func.func @transform_7(%arg0: i32) -> (i32, i32) {
    %c0_i32 = arith.constant 0 : i32
    %c0_i32_0 = arith.constant 0 : i32
    %c0_i32_1 = arith.constant 0 : i32
    return %c0_i32, %c0_i32_0 : i32, i32
  }
  func.func @transform_8(%arg0: i32) -> (i32, i32, i32, i32) {
    %c0_i32 = arith.constant 0 : i32
    %c0_i32_0 = arith.constant 0 : i32
    %c0_i32_1 = arith.constant 0 : i32
    %c0_i32_2 = arith.constant 0 : i32
    return %c0_i32, %arg0, %c0_i32_0, %c0_i32_1 : i32, i32, i32, i32
  }
}

module attributes {stable_mosaic.version = 11 : i64} {
  func.func @kernel(%arg0: i32, %arg1: memref<1x72x32xf32, #tpu.memory_space<vmem>>, %arg2: memref<72x1xf32, #tpu.memory_space<vmem>>, %arg3: memref<96x128xbf16, #tpu.memory_space<vmem>>, %arg4: memref<1x128xf32, #tpu.memory_space<vmem>>, %arg5: memref<384x128xbf16, #tpu.memory_space<vmem>>, %arg6: memref<1x128xf32, #tpu.memory_space<vmem>>, %arg7: memref<384x128xbf16, #tpu.memory_space<vmem>>, %arg8: memref<1x128xf32, #tpu.memory_space<vmem>>, %arg9: memref<3x1x72x128xbf16, #tpu.memory_space<vmem>>, %arg10: memref<88x32xf32, #tpu.memory_space<vmem>>, %arg11: memref<88x128xf32, #tpu.memory_space<vmem>>) attributes {dimension_semantics = [#tpu.dimension_semantics<parallel>], iteration_bounds = array<i64: 1>, scalar_prefetch = 0 : i64, scratch_operands = 2 : i64, tpu.core_type = #tpu.core_type<tc>, window_params = [{transform_indices = @transform_0, window_bounds = array<i64: 1, 72, 32>}, {pipeline_mode = #tpu.pipeline_mode<synchronous>, transform_indices = @transform_1, window_bounds = array<i64: 72, 1>}, {pipeline_mode = #tpu.pipeline_mode<synchronous>, transform_indices = @transform_2, window_bounds = array<i64: 96, 128>}, {pipeline_mode = #tpu.pipeline_mode<synchronous>, transform_indices = @transform_3, window_bounds = array<i64: 1, 128>}, {pipeline_mode = #tpu.pipeline_mode<synchronous>, transform_indices = @transform_4, window_bounds = array<i64: 384, 128>}, {pipeline_mode = #tpu.pipeline_mode<synchronous>, transform_indices = @transform_5, window_bounds = array<i64: 1, 128>}, {pipeline_mode = #tpu.pipeline_mode<synchronous>, transform_indices = @transform_6, window_bounds = array<i64: 384, 128>}, {pipeline_mode = #tpu.pipeline_mode<synchronous>, transform_indices = @transform_7, window_bounds = array<i64: 1, 128>}, {transform_indices = @transform_8, window_bounds = array<i64: 3, 1, 72, 128>}]} {
    %c0 = arith.constant 0 : index
    %c0_0 = arith.constant 0 : index
    %0 = vector.load %arg2[%c0, %c0_0] : memref<72x1xf32, #tpu.memory_space<vmem>>, vector<72x1xf32>
    %cst = arith.constant 0.000000e+00 : f32
    %1 = vector.broadcast %cst : f32 to vector<8x32xf32>
    %cst_1 = arith.constant 0.000000e+00 : f32
    %2 = vector.broadcast %cst_1 : f32 to vector<8x128xf32>
    %c0_2 = arith.constant 0 : index
    %c0_3 = arith.constant 0 : index
    %3 = vector.load %arg10[%c0_2, %c0_3] : memref<88x32xf32, #tpu.memory_space<vmem>>, vector<8x32xf32>
    tpu.vector_store %arg10[%c0_2, %c0_3], %1 {strides = array<i32>} : memref<88x32xf32, #tpu.memory_space<vmem>>, vector<8x32xf32>,
    %c80 = arith.constant 80 : index
    %c0_4 = arith.constant 0 : index
    %4 = vector.load %arg10[%c80, %c0_4] : memref<88x32xf32, #tpu.memory_space<vmem>>, vector<8x32xf32>
    tpu.vector_store %arg10[%c80, %c0_4], %1 {strides = array<i32>} : memref<88x32xf32, #tpu.memory_space<vmem>>, vector<8x32xf32>,
    %c0_5 = arith.constant 0 : index
    %c0_6 = arith.constant 0 : index
    %5 = vector.load %arg11[%c0_5, %c0_6] : memref<88x128xf32, #tpu.memory_space<vmem>>, vector<8x128xf32>
    tpu.vector_store %arg11[%c0_5, %c0_6], %2 {strides = array<i32>} : memref<88x128xf32, #tpu.memory_space<vmem>>, vector<8x128xf32>,
    %c80_7 = arith.constant 80 : index
    %c0_8 = arith.constant 0 : index
    %6 = vector.load %arg11[%c80_7, %c0_8] : memref<88x128xf32, #tpu.memory_space<vmem>>, vector<8x128xf32>
    tpu.vector_store %arg11[%c80_7, %c0_8], %2 {strides = array<i32>} : memref<88x128xf32, #tpu.memory_space<vmem>>, vector<8x128xf32>,
    %c0_9 = arith.constant 0 : index
    %c0_10 = arith.constant 0 : index
    %c0_11 = arith.constant 0 : index
    %7 = vector.load %arg1[%c0_9, %c0_10, %c0_11] : memref<1x72x32xf32, #tpu.memory_space<vmem>>, vector<1x72x32xf32>
    %8 = vector.shape_cast %7 : vector<1x72x32xf32> to vector<72x32xf32>
    %c8 = arith.constant 8 : index
    %c0_12 = arith.constant 0 : index
    %9 = vector.load %arg10[%c8, %c0_12] : memref<88x32xf32, #tpu.memory_space<vmem>>, vector<72x32xf32>
    tpu.vector_store %arg10[%c8, %c0_12], %8 {strides = array<i32>} : memref<88x32xf32, #tpu.memory_space<vmem>>, vector<72x32xf32>,
    %c0_13 = arith.constant 0 : index
    %c0_14 = arith.constant 0 : index
    %10 = vector.load %arg10[%c0_13, %c0_14] : memref<88x32xf32, #tpu.memory_space<vmem>>, vector<88x32xf32>
    %11 = vector.extract_strided_slice %10 {offsets = [7, 0], sizes = [72, 32], strides = [1, 1]} : vector<88x32xf32> to vector<72x32xf32>
    %12 = vector.extract_strided_slice %10 {offsets = [8, 0], sizes = [72, 32], strides = [1, 1]} : vector<88x32xf32> to vector<72x32xf32>
    %13 = vector.extract_strided_slice %10 {offsets = [9, 0], sizes = [72, 32], strides = [1, 1]} : vector<88x32xf32> to vector<72x32xf32>
    %14 = tpu.concatenate %11, %12, %13 in 1 : vector<72x32xf32>, vector<72x32xf32>, vector<72x32xf32> -> vector<72x96xf32>
    %15 = arith.truncf %14 : vector<72x96xf32> to vector<72x96xbf16>
    %c0_15 = arith.constant 0 : index
    %c0_16 = arith.constant 0 : index
    %16 = vector.load %arg3[%c0_15, %c0_16] : memref<96x128xbf16, #tpu.memory_space<vmem>>, vector<96x128xbf16>
    %cst_17 = arith.constant dense<0.000000e+00> : vector<72x128xf32>
    %17 = tpu.matmul %15, %16, %cst_17 {dimension_numbers = #tpu.dot_dimension_numbers<[1], [0], [0], [1], [0, 0, 1, 1], [], []>} : vector<72x96xbf16>, vector<96x128xbf16>, vector<72x128xf32> -> vector<72x128xf32>
    %c0_18 = arith.constant 0 : index
    %c0_19 = arith.constant 0 : index
    %18 = vector.load %arg4[%c0_18, %c0_19] : memref<1x128xf32, #tpu.memory_space<vmem>>, vector<1x128xf32>
    %19 = vector.broadcast %18 : vector<1x128xf32> to vector<72x128xf32>
    %20 = arith.addf %17, %19 : vector<72x128xf32>
    %cst_20 = arith.constant 0.000000e+00 : f32
    %21 = vector.broadcast %cst_20 : f32 to vector<72x128xf32>
    %22 = arith.maximumf %20, %21 : vector<72x128xf32>
    %23 = vector.broadcast %0 : vector<72x1xf32> to vector<72x128xf32>
    %24 = arith.mulf %22, %23 : vector<72x128xf32>
    %c8_21 = arith.constant 8 : index
    %c0_22 = arith.constant 0 : index
    %25 = vector.load %arg11[%c8_21, %c0_22] : memref<88x128xf32, #tpu.memory_space<vmem>>, vector<72x128xf32>
    tpu.vector_store %arg11[%c8_21, %c0_22], %24 {strides = array<i32>} : memref<88x128xf32, #tpu.memory_space<vmem>>, vector<72x128xf32>,
    %26 = arith.truncf %24 : vector<72x128xf32> to vector<72x128xbf16>
    %c0_23 = arith.constant 0 : index
    %c0_24 = arith.constant 0 : index
    %c0_25 = arith.constant 0 : index
    %c0_26 = arith.constant 0 : index
    %27 = vector.load %arg9[%c0_23, %c0_24, %c0_25, %c0_26] : memref<3x1x72x128xbf16, #tpu.memory_space<vmem>>, vector<1x1x72x128xbf16>
    %28 = vector.shape_cast %27 : vector<1x1x72x128xbf16> to vector<72x128xbf16>
    %29 = vector.shape_cast %26 : vector<72x128xbf16> to vector<1x1x72x128xbf16>
    tpu.vector_store %arg9[%c0_23, %c0_24, %c0_25, %c0_26], %29 {strides = array<i32>} : memref<3x1x72x128xbf16, #tpu.memory_space<vmem>>, vector<1x1x72x128xbf16>,
    %c0_27 = arith.constant 0 : index
    %c0_28 = arith.constant 0 : index
    %30 = vector.load %arg11[%c0_27, %c0_28] : memref<88x128xf32, #tpu.memory_space<vmem>>, vector<88x128xf32>
    %31 = vector.extract_strided_slice %30 {offsets = [6, 0], sizes = [72, 128], strides = [1, 1]} : vector<88x128xf32> to vector<72x128xf32>
    %32 = vector.extract_strided_slice %30 {offsets = [8, 0], sizes = [72, 128], strides = [1, 1]} : vector<88x128xf32> to vector<72x128xf32>
    %33 = vector.extract_strided_slice %30 {offsets = [10, 0], sizes = [72, 128], strides = [1, 1]} : vector<88x128xf32> to vector<72x128xf32>
    %34 = tpu.concatenate %31, %32, %33 in 1 : vector<72x128xf32>, vector<72x128xf32>, vector<72x128xf32> -> vector<72x384xf32>
    %35 = arith.truncf %34 : vector<72x384xf32> to vector<72x384xbf16>
    %c0_29 = arith.constant 0 : index
    %c0_30 = arith.constant 0 : index
    %36 = vector.load %arg5[%c0_29, %c0_30] : memref<384x128xbf16, #tpu.memory_space<vmem>>, vector<384x128xbf16>
    %cst_31 = arith.constant dense<0.000000e+00> : vector<72x128xf32>
    %37 = tpu.matmul %35, %36, %cst_31 {dimension_numbers = #tpu.dot_dimension_numbers<[1], [0], [0], [1], [0, 0, 1, 1], [], []>} : vector<72x384xbf16>, vector<384x128xbf16>, vector<72x128xf32> -> vector<72x128xf32>
    %c0_32 = arith.constant 0 : index
    %c0_33 = arith.constant 0 : index
    %38 = vector.load %arg6[%c0_32, %c0_33] : memref<1x128xf32, #tpu.memory_space<vmem>>, vector<1x128xf32>
    %39 = vector.broadcast %38 : vector<1x128xf32> to vector<72x128xf32>
    %40 = arith.addf %37, %39 : vector<72x128xf32>
    %cst_34 = arith.constant 0.000000e+00 : f32
    %41 = vector.broadcast %cst_34 : f32 to vector<72x128xf32>
    %42 = arith.maximumf %40, %41 : vector<72x128xf32>
    %43 = vector.broadcast %0 : vector<72x1xf32> to vector<72x128xf32>
    %44 = arith.mulf %42, %43 : vector<72x128xf32>
    %c8_35 = arith.constant 8 : index
    %c0_36 = arith.constant 0 : index
    %45 = vector.load %arg11[%c8_35, %c0_36] : memref<88x128xf32, #tpu.memory_space<vmem>>, vector<72x128xf32>
    tpu.vector_store %arg11[%c8_35, %c0_36], %44 {strides = array<i32>} : memref<88x128xf32, #tpu.memory_space<vmem>>, vector<72x128xf32>,
    %46 = arith.truncf %44 : vector<72x128xf32> to vector<72x128xbf16>
    %c1 = arith.constant 1 : index
    %c0_37 = arith.constant 0 : index
    %c0_38 = arith.constant 0 : index
    %c0_39 = arith.constant 0 : index
    %47 = vector.load %arg9[%c1, %c0_37, %c0_38, %c0_39] : memref<3x1x72x128xbf16, #tpu.memory_space<vmem>>, vector<1x1x72x128xbf16>
    %48 = vector.shape_cast %47 : vector<1x1x72x128xbf16> to vector<72x128xbf16>
    %49 = vector.shape_cast %46 : vector<72x128xbf16> to vector<1x1x72x128xbf16>
    tpu.vector_store %arg9[%c1, %c0_37, %c0_38, %c0_39], %49 {strides = array<i32>} : memref<3x1x72x128xbf16, #tpu.memory_space<vmem>>, vector<1x1x72x128xbf16>,
    %c0_40 = arith.constant 0 : index
    %c0_41 = arith.constant 0 : index
    %50 = vector.load %arg11[%c0_40, %c0_41] : memref<88x128xf32, #tpu.memory_space<vmem>>, vector<88x128xf32>
    %51 = vector.extract_strided_slice %50 {offsets = [5, 0], sizes = [72, 128], strides = [1, 1]} : vector<88x128xf32> to vector<72x128xf32>
    %52 = vector.extract_strided_slice %50 {offsets = [8, 0], sizes = [72, 128], strides = [1, 1]} : vector<88x128xf32> to vector<72x128xf32>
    %53 = vector.extract_strided_slice %50 {offsets = [11, 0], sizes = [72, 128], strides = [1, 1]} : vector<88x128xf32> to vector<72x128xf32>
    %54 = tpu.concatenate %51, %52, %53 in 1 : vector<72x128xf32>, vector<72x128xf32>, vector<72x128xf32> -> vector<72x384xf32>
    %55 = arith.truncf %54 : vector<72x384xf32> to vector<72x384xbf16>
    %c0_42 = arith.constant 0 : index
    %c0_43 = arith.constant 0 : index
    %56 = vector.load %arg7[%c0_42, %c0_43] : memref<384x128xbf16, #tpu.memory_space<vmem>>, vector<384x128xbf16>
    %cst_44 = arith.constant dense<0.000000e+00> : vector<72x128xf32>
    %57 = tpu.matmul %55, %56, %cst_44 {dimension_numbers = #tpu.dot_dimension_numbers<[1], [0], [0], [1], [0, 0, 1, 1], [], []>} : vector<72x384xbf16>, vector<384x128xbf16>, vector<72x128xf32> -> vector<72x128xf32>
    %c0_45 = arith.constant 0 : index
    %c0_46 = arith.constant 0 : index
    %58 = vector.load %arg8[%c0_45, %c0_46] : memref<1x128xf32, #tpu.memory_space<vmem>>, vector<1x128xf32>
    %59 = vector.broadcast %58 : vector<1x128xf32> to vector<72x128xf32>
    %60 = arith.addf %57, %59 : vector<72x128xf32>
    %cst_47 = arith.constant 0.000000e+00 : f32
    %61 = vector.broadcast %cst_47 : f32 to vector<72x128xf32>
    %62 = arith.maximumf %60, %61 : vector<72x128xf32>
    %63 = arith.truncf %62 : vector<72x128xf32> to vector<72x128xbf16>
    %c2 = arith.constant 2 : index
    %c0_48 = arith.constant 0 : index
    %c0_49 = arith.constant 0 : index
    %c0_50 = arith.constant 0 : index
    %64 = vector.load %arg9[%c2, %c0_48, %c0_49, %c0_50] : memref<3x1x72x128xbf16, #tpu.memory_space<vmem>>, vector<1x1x72x128xbf16>
    %65 = vector.shape_cast %64 : vector<1x1x72x128xbf16> to vector<72x128xbf16>
    %66 = vector.shape_cast %63 : vector<72x128xbf16> to vector<1x1x72x128xbf16>
    tpu.vector_store %arg9[%c2, %c0_48, %c0_49, %c0_50], %66 {strides = array<i32>} : memref<3x1x72x128xbf16, #tpu.memory_space<vmem>>, vector<1x1x72x128xbf16>,
    return
  }
  func.func @transform_0(%arg0: i32) -> (i32, i32, i32) {
    %c0_i32 = arith.constant 0 : i32
    %c0_i32_0 = arith.constant 0 : i32
    %c0_i32_1 = arith.constant 0 : i32
    return %arg0, %c0_i32, %c0_i32_0 : i32, i32, i32
  }
  func.func @transform_1(%arg0: i32) -> (i32, i32) {
    %c0_i32 = arith.constant 0 : i32
    %c0_i32_0 = arith.constant 0 : i32
    %c0_i32_1 = arith.constant 0 : i32
    return %c0_i32, %c0_i32_0 : i32, i32
  }
  func.func @transform_2(%arg0: i32) -> (i32, i32) {
    %c0_i32 = arith.constant 0 : i32
    %c0_i32_0 = arith.constant 0 : i32
    %c0_i32_1 = arith.constant 0 : i32
    return %c0_i32, %c0_i32_0 : i32, i32
  }
  func.func @transform_3(%arg0: i32) -> (i32, i32) {
    %c0_i32 = arith.constant 0 : i32
    %c0_i32_0 = arith.constant 0 : i32
    %c0_i32_1 = arith.constant 0 : i32
    return %c0_i32, %c0_i32_0 : i32, i32
  }
  func.func @transform_4(%arg0: i32) -> (i32, i32) {
    %c0_i32 = arith.constant 0 : i32
    %c0_i32_0 = arith.constant 0 : i32
    %c0_i32_1 = arith.constant 0 : i32
    return %c0_i32, %c0_i32_0 : i32, i32
  }
  func.func @transform_5(%arg0: i32) -> (i32, i32) {
    %c0_i32 = arith.constant 0 : i32
    %c0_i32_0 = arith.constant 0 : i32
    %c0_i32_1 = arith.constant 0 : i32
    return %c0_i32, %c0_i32_0 : i32, i32
  }
  func.func @transform_6(%arg0: i32) -> (i32, i32) {
    %c0_i32 = arith.constant 0 : i32
    %c0_i32_0 = arith.constant 0 : i32
    %c0_i32_1 = arith.constant 0 : i32
    return %c0_i32, %c0_i32_0 : i32, i32
  }
  func.func @transform_7(%arg0: i32) -> (i32, i32) {
    %c0_i32 = arith.constant 0 : i32
    %c0_i32_0 = arith.constant 0 : i32
    %c0_i32_1 = arith.constant 0 : i32
    return %c0_i32, %c0_i32_0 : i32, i32
  }
  func.func @transform_8(%arg0: i32) -> (i32, i32, i32, i32) {
    %c0_i32 = arith.constant 0 : i32
    %c0_i32_0 = arith.constant 0 : i32
    %c0_i32_1 = arith.constant 0 : i32
    %c0_i32_2 = arith.constant 0 : i32
    return %c0_i32, %arg0, %c0_i32_0, %c0_i32_1 : i32, i32, i32, i32
  }
}

module attributes {stable_mosaic.version = 11 : i64} {
  func.func @kernel(%arg0: i32, %arg1: memref<3x2x18x128xbf16, #tpu.memory_space<vmem>>, %arg2: memref<9x1x18x128xbf16, #tpu.memory_space<vmem>>, %arg3: memref<9x128x256xbf16, #tpu.memory_space<vmem>>, %arg4: memref<1x256xf32, #tpu.memory_space<vmem>>, %arg5: memref<48x192xf32, #tpu.memory_space<vmem>>, %arg6: memref<1x1x2xf32, #tpu.memory_space<vmem>>, %arg7: memref<124x128xf32, #tpu.memory_space<vmem>>, %arg8: memref<82x256xf32, #tpu.memory_space<vmem>>) attributes {dimension_semantics = [#tpu.dimension_semantics<parallel>], iteration_bounds = array<i64: 2>, scalar_prefetch = 0 : i64, scratch_operands = 2 : i64, tpu.core_type = #tpu.core_type<tc>, window_params = [{transform_indices = @transform_0, window_bounds = array<i64: 3, 2, 18, 128>}, {transform_indices = @transform_1, window_bounds = array<i64: 9, 1, 18, 128>}, {pipeline_mode = #tpu.pipeline_mode<synchronous>, transform_indices = @transform_2, window_bounds = array<i64: 9, 128, 256>}, {pipeline_mode = #tpu.pipeline_mode<synchronous>, transform_indices = @transform_3, window_bounds = array<i64: 1, 256>}, {pipeline_mode = #tpu.pipeline_mode<synchronous>, transform_indices = @transform_4, window_bounds = array<i64: 48, 192>}, {transform_indices = @transform_5, window_bounds = array<i64: 1, 1, 2>}]} {
    %cst = arith.constant 0.000000e+00 : f32
    %0 = vector.broadcast %cst : f32 to vector<24x128xf32>
    %c0 = arith.constant 0 : index
    %c0_0 = arith.constant 0 : index
    %1 = vector.load %arg7[%c0, %c0_0] : memref<124x128xf32, #tpu.memory_space<vmem>>, vector<24x128xf32>
    tpu.vector_store %arg7[%c0, %c0_0], %0 {strides = array<i32>} : memref<124x128xf32, #tpu.memory_space<vmem>>, vector<24x128xf32>,
    %cst_1 = arith.constant 0.000000e+00 : f32
    %2 = vector.broadcast %cst_1 : f32 to vector<52x128xf32>
    %c72 = arith.constant 72 : index
    %c0_2 = arith.constant 0 : index
    %3 = vector.load %arg7[%c72, %c0_2] : memref<124x128xf32, #tpu.memory_space<vmem>>, vector<52x128xf32>
    tpu.vector_store %arg7[%c72, %c0_2], %2 {strides = array<i32>} : memref<124x128xf32, #tpu.memory_space<vmem>>, vector<52x128xf32>,
    %c0_3 = arith.constant 0 : index
    %c0_4 = arith.constant 0 : index
    %4 = vector.load %arg4[%c0_3, %c0_4] : memref<1x256xf32, #tpu.memory_space<vmem>>, vector<1x256xf32>
    %c0_5 = arith.constant 0 : index
    %c0_6 = arith.constant 0 : index
    %5 = vector.load %arg5[%c0_5, %c0_6] : memref<48x192xf32, #tpu.memory_space<vmem>>, vector<48x192xf32>
    %cst_7 = arith.constant 0.000000e+00 : f32
    %6 = vector.broadcast %cst_7 : f32 to vector<12x92xf32>
    %cst_8 = arith.constant 0.000000e+00 : f32
    %7 = vector.broadcast %cst_8 : f32 to vector<4x128xf32>
    %c0_9 = arith.constant 0 : index
    %c0_10 = arith.constant 0 : index
    %c3 = arith.constant 3 : index
    %c0_11 = arith.constant 0 : index
    %8 = vector.load %arg1[%c0_9, %c0_10, %c3, %c0_11] : memref<3x2x18x128xbf16, #tpu.memory_space<vmem>>, vector<1x1x12x128xbf16>
    %9 = vector.shape_cast %8 : vector<1x1x12x128xbf16> to vector<12x128xbf16>
    %c0_12 = arith.constant 0 : index
    %c1 = arith.constant 1 : index
    %c3_13 = arith.constant 3 : index
    %c0_14 = arith.constant 0 : index
    %10 = vector.load %arg1[%c0_12, %c1, %c3_13, %c0_14] : memref<3x2x18x128xbf16, #tpu.memory_space<vmem>>, vector<1x1x12x128xbf16>
    %11 = vector.shape_cast %10 : vector<1x1x12x128xbf16> to vector<12x128xbf16>
    %12 = tpu.concatenate %9, %11 in 0 : vector<12x128xbf16>, vector<12x128xbf16> -> vector<24x128xbf16>
    %c0_15 = arith.constant 0 : index
    %c0_16 = arith.constant 0 : index
    %c3_17 = arith.constant 3 : index
    %c0_18 = arith.constant 0 : index
    %13 = vector.load %arg2[%c0_15, %c0_16, %c3_17, %c0_18] : memref<9x1x18x128xbf16, #tpu.memory_space<vmem>>, vector<1x1x12x128xbf16>
    %14 = vector.shape_cast %13 : vector<1x1x12x128xbf16> to vector<12x128xbf16>
    %c1_19 = arith.constant 1 : index
    %c0_20 = arith.constant 0 : index
    %c3_21 = arith.constant 3 : index
    %c0_22 = arith.constant 0 : index
    %15 = vector.load %arg2[%c1_19, %c0_20, %c3_21, %c0_22] : memref<9x1x18x128xbf16, #tpu.memory_space<vmem>>, vector<1x1x12x128xbf16>
    %16 = vector.shape_cast %15 : vector<1x1x12x128xbf16> to vector<12x128xbf16>
    %c2 = arith.constant 2 : index
    %c0_23 = arith.constant 0 : index
    %c3_24 = arith.constant 3 : index
    %c0_25 = arith.constant 0 : index
    %17 = vector.load %arg2[%c2, %c0_23, %c3_24, %c0_25] : memref<9x1x18x128xbf16, #tpu.memory_space<vmem>>, vector<1x1x12x128xbf16>
    %18 = vector.shape_cast %17 : vector<1x1x12x128xbf16> to vector<12x128xbf16>
    %19 = tpu.concatenate %14, %16, %18 in 0 : vector<12x128xbf16>, vector<12x128xbf16>, vector<12x128xbf16> -> vector<36x128xbf16>
    %cst_26 = arith.constant dense<0.000000e+00> : vector<24x36xf32>
    %20 = tpu.matmul %12, %19, %cst_26 {dimension_numbers = #tpu.dot_dimension_numbers<[1], [1], [0], [0], [0, 0, 1, 0], [], []>} : vector<24x128xbf16>, vector<36x128xbf16>, vector<24x36xf32> -> vector<24x36xf32>
    %c1_27 = arith.constant 1 : index
    %c0_28 = arith.constant 0 : index
    %c3_29 = arith.constant 3 : index
    %c0_30 = arith.constant 0 : index
    %21 = vector.load %arg1[%c1_27, %c0_28, %c3_29, %c0_30] : memref<3x2x18x128xbf16, #tpu.memory_space<vmem>>, vector<1x1x12x128xbf16>
    %22 = vector.shape_cast %21 : vector<1x1x12x128xbf16> to vector<12x128xbf16>
    %c1_31 = arith.constant 1 : index
    %c1_32 = arith.constant 1 : index
    %c3_33 = arith.constant 3 : index
    %c0_34 = arith.constant 0 : index
    %23 = vector.load %arg1[%c1_31, %c1_32, %c3_33, %c0_34] : memref<3x2x18x128xbf16, #tpu.memory_space<vmem>>, vector<1x1x12x128xbf16>
    %24 = vector.shape_cast %23 : vector<1x1x12x128xbf16> to vector<12x128xbf16>
    %25 = tpu.concatenate %22, %24 in 0 : vector<12x128xbf16>, vector<12x128xbf16> -> vector<24x128xbf16>
    %c3_35 = arith.constant 3 : index
    %c0_36 = arith.constant 0 : index
    %c3_37 = arith.constant 3 : index
    %c0_38 = arith.constant 0 : index
    %26 = vector.load %arg2[%c3_35, %c0_36, %c3_37, %c0_38] : memref<9x1x18x128xbf16, #tpu.memory_space<vmem>>, vector<1x1x12x128xbf16>
    %27 = vector.shape_cast %26 : vector<1x1x12x128xbf16> to vector<12x128xbf16>
    %c4 = arith.constant 4 : index
    %c0_39 = arith.constant 0 : index
    %c3_40 = arith.constant 3 : index
    %c0_41 = arith.constant 0 : index
    %28 = vector.load %arg2[%c4, %c0_39, %c3_40, %c0_41] : memref<9x1x18x128xbf16, #tpu.memory_space<vmem>>, vector<1x1x12x128xbf16>
    %29 = vector.shape_cast %28 : vector<1x1x12x128xbf16> to vector<12x128xbf16>
    %c5 = arith.constant 5 : index
    %c0_42 = arith.constant 0 : index
    %c3_43 = arith.constant 3 : index
    %c0_44 = arith.constant 0 : index
    %30 = vector.load %arg2[%c5, %c0_42, %c3_43, %c0_44] : memref<9x1x18x128xbf16, #tpu.memory_space<vmem>>, vector<1x1x12x128xbf16>
    %31 = vector.shape_cast %30 : vector<1x1x12x128xbf16> to vector<12x128xbf16>
    %32 = tpu.concatenate %27, %29, %31 in 0 : vector<12x128xbf16>, vector<12x128xbf16>, vector<12x128xbf16> -> vector<36x128xbf16>
    %cst_45 = arith.constant dense<0.000000e+00> : vector<24x36xf32>
    %33 = tpu.matmul %25, %32, %cst_45 {dimension_numbers = #tpu.dot_dimension_numbers<[1], [1], [0], [0], [0, 0, 1, 0], [], []>} : vector<24x128xbf16>, vector<36x128xbf16>, vector<24x36xf32> -> vector<24x36xf32>
    %c2_46 = arith.constant 2 : index
    %c0_47 = arith.constant 0 : index
    %c3_48 = arith.constant 3 : index
    %c0_49 = arith.constant 0 : index
    %34 = vector.load %arg1[%c2_46, %c0_47, %c3_48, %c0_49] : memref<3x2x18x128xbf16, #tpu.memory_space<vmem>>, vector<1x1x12x128xbf16>
    %35 = vector.shape_cast %34 : vector<1x1x12x128xbf16> to vector<12x128xbf16>
    %c2_50 = arith.constant 2 : index
    %c1_51 = arith.constant 1 : index
    %c3_52 = arith.constant 3 : index
    %c0_53 = arith.constant 0 : index
    %36 = vector.load %arg1[%c2_50, %c1_51, %c3_52, %c0_53] : memref<3x2x18x128xbf16, #tpu.memory_space<vmem>>, vector<1x1x12x128xbf16>
    %37 = vector.shape_cast %36 : vector<1x1x12x128xbf16> to vector<12x128xbf16>
    %38 = tpu.concatenate %35, %37 in 0 : vector<12x128xbf16>, vector<12x128xbf16> -> vector<24x128xbf16>
    %c6 = arith.constant 6 : index
    %c0_54 = arith.constant 0 : index
    %c3_55 = arith.constant 3 : index
    %c0_56 = arith.constant 0 : index
    %39 = vector.load %arg2[%c6, %c0_54, %c3_55, %c0_56] : memref<9x1x18x128xbf16, #tpu.memory_space<vmem>>, vector<1x1x12x128xbf16>
    %40 = vector.shape_cast %39 : vector<1x1x12x128xbf16> to vector<12x128xbf16>
    %c7 = arith.constant 7 : index
    %c0_57 = arith.constant 0 : index
    %c3_58 = arith.constant 3 : index
    %c0_59 = arith.constant 0 : index
    %41 = vector.load %arg2[%c7, %c0_57, %c3_58, %c0_59] : memref<9x1x18x128xbf16, #tpu.memory_space<vmem>>, vector<1x1x12x128xbf16>
    %42 = vector.shape_cast %41 : vector<1x1x12x128xbf16> to vector<12x128xbf16>
    %c8 = arith.constant 8 : index
    %c0_60 = arith.constant 0 : index
    %c3_61 = arith.constant 3 : index
    %c0_62 = arith.constant 0 : index
    %43 = vector.load %arg2[%c8, %c0_60, %c3_61, %c0_62] : memref<9x1x18x128xbf16, #tpu.memory_space<vmem>>, vector<1x1x12x128xbf16>
    %44 = vector.shape_cast %43 : vector<1x1x12x128xbf16> to vector<12x128xbf16>
    %45 = tpu.concatenate %40, %42, %44 in 0 : vector<12x128xbf16>, vector<12x128xbf16>, vector<12x128xbf16> -> vector<36x128xbf16>
    %cst_63 = arith.constant dense<0.000000e+00> : vector<24x36xf32>
    %46 = tpu.matmul %38, %45, %cst_63 {dimension_numbers = #tpu.dot_dimension_numbers<[1], [1], [0], [0], [0, 0, 1, 0], [], []>} : vector<24x128xbf16>, vector<36x128xbf16>, vector<24x36xf32> -> vector<24x36xf32>
    %47 = vector.extract_strided_slice %20 {offsets = [0, 0], sizes = [12, 12], strides = [1, 1]} : vector<24x36xf32> to vector<12x12xf32>
    %48 = vector.extract_strided_slice %33 {offsets = [0, 0], sizes = [12, 12], strides = [1, 1]} : vector<24x36xf32> to vector<12x12xf32>
    %49 = vector.extract_strided_slice %46 {offsets = [0, 0], sizes = [12, 12], strides = [1, 1]} : vector<24x36xf32> to vector<12x12xf32>
    %50 = tpu.concatenate %47, %48, %49, %6 in 1 : vector<12x12xf32>, vector<12x12xf32>, vector<12x12xf32>, vector<12x92xf32> -> vector<12x128xf32>
    %51 = tpu.concatenate %50, %7 in 0 : vector<12x128xf32>, vector<4x128xf32> -> vector<16x128xf32>
    %c24 = arith.constant 24 : index
    %c0_64 = arith.constant 0 : index
    %52 = vector.load %arg7[%c24, %c0_64] : memref<124x128xf32, #tpu.memory_space<vmem>>, vector<16x128xf32>
    tpu.vector_store %arg7[%c24, %c0_64], %51 {strides = array<i32>} : memref<124x128xf32, #tpu.memory_space<vmem>>, vector<16x128xf32>,
    %53 = vector.extract_strided_slice %20 {offsets = [0, 12], sizes = [12, 12], strides = [1, 1]} : vector<24x36xf32> to vector<12x12xf32>
    %54 = vector.extract_strided_slice %33 {offsets = [0, 12], sizes = [12, 12], strides = [1, 1]} : vector<24x36xf32> to vector<12x12xf32>
    %55 = vector.extract_strided_slice %46 {offsets = [0, 12], sizes = [12, 12], strides = [1, 1]} : vector<24x36xf32> to vector<12x12xf32>
    %56 = tpu.concatenate %53, %54, %55, %6 in 1 : vector<12x12xf32>, vector<12x12xf32>, vector<12x12xf32>, vector<12x92xf32> -> vector<12x128xf32>
    %57 = tpu.concatenate %56, %7 in 0 : vector<12x128xf32>, vector<4x128xf32> -> vector<16x128xf32>
    %c40 = arith.constant 40 : index
    %c0_65 = arith.constant 0 : index
    %58 = vector.load %arg7[%c40, %c0_65] : memref<124x128xf32, #tpu.memory_space<vmem>>, vector<16x128xf32>
    tpu.vector_store %arg7[%c40, %c0_65], %57 {strides = array<i32>} : memref<124x128xf32, #tpu.memory_space<vmem>>, vector<16x128xf32>,
    %59 = vector.extract_strided_slice %20 {offsets = [0, 24], sizes = [12, 12], strides = [1, 1]} : vector<24x36xf32> to vector<12x12xf32>
    %60 = vector.extract_strided_slice %33 {offsets = [0, 24], sizes = [12, 12], strides = [1, 1]} : vector<24x36xf32> to vector<12x12xf32>
    %61 = vector.extract_strided_slice %46 {offsets = [0, 24], sizes = [12, 12], strides = [1, 1]} : vector<24x36xf32> to vector<12x12xf32>
    %62 = tpu.concatenate %59, %60, %61, %6 in 1 : vector<12x12xf32>, vector<12x12xf32>, vector<12x12xf32>, vector<12x92xf32> -> vector<12x128xf32>
    %63 = tpu.concatenate %62, %7 in 0 : vector<12x128xf32>, vector<4x128xf32> -> vector<16x128xf32>
    %c56 = arith.constant 56 : index
    %c0_66 = arith.constant 0 : index
    %64 = vector.load %arg7[%c56, %c0_66] : memref<124x128xf32, #tpu.memory_space<vmem>>, vector<16x128xf32>
    tpu.vector_store %arg7[%c56, %c0_66], %63 {strides = array<i32>} : memref<124x128xf32, #tpu.memory_space<vmem>>, vector<16x128xf32>,
    %c7_67 = arith.constant 7 : index
    %c0_68 = arith.constant 0 : index
    %65 = vector.load %arg7[%c7_67, %c0_68] : memref<124x128xf32, #tpu.memory_space<vmem>>, vector<114x128xf32>
    %66 = arith.truncf %65 : vector<114x128xf32> to vector<114x128xbf16>
    %c8_69 = arith.constant 8 : index
    %c0_70 = arith.constant 0 : index
    %67 = vector.load %arg7[%c8_69, %c0_70] : memref<124x128xf32, #tpu.memory_space<vmem>>, vector<114x128xf32>
    %68 = arith.truncf %67 : vector<114x128xf32> to vector<114x128xbf16>
    %c9 = arith.constant 9 : index
    %c0_71 = arith.constant 0 : index
    %69 = vector.load %arg7[%c9, %c0_71] : memref<124x128xf32, #tpu.memory_space<vmem>>, vector<114x128xf32>
    %70 = arith.truncf %69 : vector<114x128xf32> to vector<114x128xbf16>
    %71 = vector.extract_strided_slice %66 {offsets = [0, 0], sizes = [82, 128], strides = [1, 1]} : vector<114x128xbf16> to vector<82x128xbf16>
    %c0_72 = arith.constant 0 : index
    %c0_73 = arith.constant 0 : index
    %c0_74 = arith.constant 0 : index
    %72 = vector.load %arg3[%c0_72, %c0_73, %c0_74] : memref<9x128x256xbf16, #tpu.memory_space<vmem>>, vector<1x128x256xbf16>
    %73 = vector.shape_cast %72 : vector<1x128x256xbf16> to vector<128x256xbf16>
    %cst_75 = arith.constant dense<0.000000e+00> : vector<82x256xf32>
    %74 = tpu.matmul %71, %73, %cst_75 {dimension_numbers = #tpu.dot_dimension_numbers<[1], [0], [0], [1], [0, 0, 1, 1], [], []>} : vector<82x128xbf16>, vector<128x256xbf16>, vector<82x256xf32> -> vector<82x256xf32>
    %75 = vector.extract_strided_slice %68 {offsets = [0, 0], sizes = [82, 128], strides = [1, 1]} : vector<114x128xbf16> to vector<82x128xbf16>
    %c1_76 = arith.constant 1 : index
    %c0_77 = arith.constant 0 : index
    %c0_78 = arith.constant 0 : index
    %76 = vector.load %arg3[%c1_76, %c0_77, %c0_78] : memref<9x128x256xbf16, #tpu.memory_space<vmem>>, vector<1x128x256xbf16>
    %77 = vector.shape_cast %76 : vector<1x128x256xbf16> to vector<128x256xbf16>
    %cst_79 = arith.constant dense<0.000000e+00> : vector<82x256xf32>
    %78 = tpu.matmul %75, %77, %cst_79 {dimension_numbers = #tpu.dot_dimension_numbers<[1], [0], [0], [1], [0, 0, 1, 1], [], []>} : vector<82x128xbf16>, vector<128x256xbf16>, vector<82x256xf32> -> vector<82x256xf32>
    %79 = arith.addf %74, %78 : vector<82x256xf32>
    %80 = vector.extract_strided_slice %70 {offsets = [0, 0], sizes = [82, 128], strides = [1, 1]} : vector<114x128xbf16> to vector<82x128xbf16>
    %c2_80 = arith.constant 2 : index
    %c0_81 = arith.constant 0 : index
    %c0_82 = arith.constant 0 : index
    %81 = vector.load %arg3[%c2_80, %c0_81, %c0_82] : memref<9x128x256xbf16, #tpu.memory_space<vmem>>, vector<1x128x256xbf16>
    %82 = vector.shape_cast %81 : vector<1x128x256xbf16> to vector<128x256xbf16>
    %cst_83 = arith.constant dense<0.000000e+00> : vector<82x256xf32>
    %83 = tpu.matmul %80, %82, %cst_83 {dimension_numbers = #tpu.dot_dimension_numbers<[1], [0], [0], [1], [0, 0, 1, 1], [], []>} : vector<82x128xbf16>, vector<128x256xbf16>, vector<82x256xf32> -> vector<82x256xf32>
    %84 = arith.addf %79, %83 : vector<82x256xf32>
    %c0_84 = arith.constant 0 : index
    %c0_85 = arith.constant 0 : index
    %85 = vector.load %arg8[%c0_84, %c0_85] : memref<82x256xf32, #tpu.memory_space<vmem>>, vector<82x256xf32>
    tpu.vector_store %arg8[%c0_84, %c0_85], %84 {strides = array<i32>} : memref<82x256xf32, #tpu.memory_space<vmem>>, vector<82x256xf32>,
    %86 = vector.extract_strided_slice %66 {offsets = [16, 0], sizes = [82, 128], strides = [1, 1]} : vector<114x128xbf16> to vector<82x128xbf16>
    %c3_86 = arith.constant 3 : index
    %c0_87 = arith.constant 0 : index
    %c0_88 = arith.constant 0 : index
    %87 = vector.load %arg3[%c3_86, %c0_87, %c0_88] : memref<9x128x256xbf16, #tpu.memory_space<vmem>>, vector<1x128x256xbf16>
    %88 = vector.shape_cast %87 : vector<1x128x256xbf16> to vector<128x256xbf16>
    %cst_89 = arith.constant dense<0.000000e+00> : vector<82x256xf32>
    %89 = tpu.matmul %86, %88, %cst_89 {dimension_numbers = #tpu.dot_dimension_numbers<[1], [0], [0], [1], [0, 0, 1, 1], [], []>} : vector<82x128xbf16>, vector<128x256xbf16>, vector<82x256xf32> -> vector<82x256xf32>
    %90 = vector.extract_strided_slice %68 {offsets = [16, 0], sizes = [82, 128], strides = [1, 1]} : vector<114x128xbf16> to vector<82x128xbf16>
    %c4_90 = arith.constant 4 : index
    %c0_91 = arith.constant 0 : index
    %c0_92 = arith.constant 0 : index
    %91 = vector.load %arg3[%c4_90, %c0_91, %c0_92] : memref<9x128x256xbf16, #tpu.memory_space<vmem>>, vector<1x128x256xbf16>
    %92 = vector.shape_cast %91 : vector<1x128x256xbf16> to vector<128x256xbf16>
    %cst_93 = arith.constant dense<0.000000e+00> : vector<82x256xf32>
    %93 = tpu.matmul %90, %92, %cst_93 {dimension_numbers = #tpu.dot_dimension_numbers<[1], [0], [0], [1], [0, 0, 1, 1], [], []>} : vector<82x128xbf16>, vector<128x256xbf16>, vector<82x256xf32> -> vector<82x256xf32>
    %94 = arith.addf %89, %93 : vector<82x256xf32>
    %95 = vector.extract_strided_slice %70 {offsets = [16, 0], sizes = [82, 128], strides = [1, 1]} : vector<114x128xbf16> to vector<82x128xbf16>
    %c5_94 = arith.constant 5 : index
    %c0_95 = arith.constant 0 : index
    %c0_96 = arith.constant 0 : index
    %96 = vector.load %arg3[%c5_94, %c0_95, %c0_96] : memref<9x128x256xbf16, #tpu.memory_space<vmem>>, vector<1x128x256xbf16>
    %97 = vector.shape_cast %96 : vector<1x128x256xbf16> to vector<128x256xbf16>
    %cst_97 = arith.constant dense<0.000000e+00> : vector<82x256xf32>
    %98 = tpu.matmul %95, %97, %cst_97 {dimension_numbers = #tpu.dot_dimension_numbers<[1], [0], [0], [1], [0, 0, 1, 1], [], []>} : vector<82x128xbf16>, vector<128x256xbf16>, vector<82x256xf32> -> vector<82x256xf32>
    %99 = arith.addf %94, %98 : vector<82x256xf32>
    %c0_98 = arith.constant 0 : index
    %c0_99 = arith.constant 0 : index
    %100 = vector.load %arg8[%c0_98, %c0_99] : memref<82x256xf32, #tpu.memory_space<vmem>>, vector<82x256xf32>
    %101 = arith.addf %100, %99 : vector<82x256xf32>
    %c0_100 = arith.constant 0 : index
    %c0_101 = arith.constant 0 : index
    %102 = vector.load %arg8[%c0_100, %c0_101] : memref<82x256xf32, #tpu.memory_space<vmem>>, vector<82x256xf32>
    tpu.vector_store %arg8[%c0_100, %c0_101], %101 {strides = array<i32>} : memref<82x256xf32, #tpu.memory_space<vmem>>, vector<82x256xf32>,
    %103 = vector.extract_strided_slice %66 {offsets = [32, 0], sizes = [82, 128], strides = [1, 1]} : vector<114x128xbf16> to vector<82x128xbf16>
    %c6_102 = arith.constant 6 : index
    %c0_103 = arith.constant 0 : index
    %c0_104 = arith.constant 0 : index
    %104 = vector.load %arg3[%c6_102, %c0_103, %c0_104] : memref<9x128x256xbf16, #tpu.memory_space<vmem>>, vector<1x128x256xbf16>
    %105 = vector.shape_cast %104 : vector<1x128x256xbf16> to vector<128x256xbf16>
    %cst_105 = arith.constant dense<0.000000e+00> : vector<82x256xf32>
    %106 = tpu.matmul %103, %105, %cst_105 {dimension_numbers = #tpu.dot_dimension_numbers<[1], [0], [0], [1], [0, 0, 1, 1], [], []>} : vector<82x128xbf16>, vector<128x256xbf16>, vector<82x256xf32> -> vector<82x256xf32>
    %107 = vector.extract_strided_slice %68 {offsets = [32, 0], sizes = [82, 128], strides = [1, 1]} : vector<114x128xbf16> to vector<82x128xbf16>
    %c7_106 = arith.constant 7 : index
    %c0_107 = arith.constant 0 : index
    %c0_108 = arith.constant 0 : index
    %108 = vector.load %arg3[%c7_106, %c0_107, %c0_108] : memref<9x128x256xbf16, #tpu.memory_space<vmem>>, vector<1x128x256xbf16>
    %109 = vector.shape_cast %108 : vector<1x128x256xbf16> to vector<128x256xbf16>
    %cst_109 = arith.constant dense<0.000000e+00> : vector<82x256xf32>
    %110 = tpu.matmul %107, %109, %cst_109 {dimension_numbers = #tpu.dot_dimension_numbers<[1], [0], [0], [1], [0, 0, 1, 1], [], []>} : vector<82x128xbf16>, vector<128x256xbf16>, vector<82x256xf32> -> vector<82x256xf32>
    %111 = arith.addf %106, %110 : vector<82x256xf32>
    %112 = vector.extract_strided_slice %70 {offsets = [32, 0], sizes = [82, 128], strides = [1, 1]} : vector<114x128xbf16> to vector<82x128xbf16>
    %c8_110 = arith.constant 8 : index
    %c0_111 = arith.constant 0 : index
    %c0_112 = arith.constant 0 : index
    %113 = vector.load %arg3[%c8_110, %c0_111, %c0_112] : memref<9x128x256xbf16, #tpu.memory_space<vmem>>, vector<1x128x256xbf16>
    %114 = vector.shape_cast %113 : vector<1x128x256xbf16> to vector<128x256xbf16>
    %cst_113 = arith.constant dense<0.000000e+00> : vector<82x256xf32>
    %115 = tpu.matmul %112, %114, %cst_113 {dimension_numbers = #tpu.dot_dimension_numbers<[1], [0], [0], [1], [0, 0, 1, 1], [], []>} : vector<82x128xbf16>, vector<128x256xbf16>, vector<82x256xf32> -> vector<82x256xf32>
    %116 = arith.addf %111, %115 : vector<82x256xf32>
    %c0_114 = arith.constant 0 : index
    %c0_115 = arith.constant 0 : index
    %117 = vector.load %arg8[%c0_114, %c0_115] : memref<82x256xf32, #tpu.memory_space<vmem>>, vector<82x256xf32>
    %118 = arith.addf %117, %116 : vector<82x256xf32>
    %c0_116 = arith.constant 0 : index
    %c0_117 = arith.constant 0 : index
    %119 = vector.load %arg8[%c0_116, %c0_117] : memref<82x256xf32, #tpu.memory_space<vmem>>, vector<82x256xf32>
    tpu.vector_store %arg8[%c0_116, %c0_117], %118 {strides = array<i32>} : memref<82x256xf32, #tpu.memory_space<vmem>>, vector<82x256xf32>,
    %c0_118 = arith.constant 0 : index
    %c0_119 = arith.constant 0 : index
    %120 = vector.load %arg8[%c0_118, %c0_119] : memref<82x256xf32, #tpu.memory_space<vmem>>, vector<82x256xf32>
    %121 = vector.broadcast %4 : vector<1x256xf32> to vector<82x256xf32>
    %122 = arith.addf %120, %121 : vector<82x256xf32>
    %cst_120 = arith.constant 0.000000e+00 : f32
    %123 = vector.broadcast %cst_120 : f32 to vector<82x256xf32>
    %124 = arith.maximumf %122, %123 : vector<82x256xf32>
    %125 = vector.extract_strided_slice %124 {offsets = [0, 0], sizes = [82, 192], strides = [1, 1]} : vector<82x256xf32> to vector<82x192xf32>
    %126 = vector.extract_strided_slice %124 {offsets = [0, 1], sizes = [82, 192], strides = [1, 1]} : vector<82x256xf32> to vector<82x192xf32>
    %127 = arith.maximumf %125, %126 : vector<82x192xf32>
    %128 = vector.extract_strided_slice %124 {offsets = [0, 2], sizes = [82, 192], strides = [1, 1]} : vector<82x256xf32> to vector<82x192xf32>
    %129 = arith.maximumf %127, %128 : vector<82x192xf32>
    %130 = vector.extract_strided_slice %129 {offsets = [0, 0], sizes = [80, 192], strides = [1, 1]} : vector<82x192xf32> to vector<80x192xf32>
    %131 = vector.extract_strided_slice %129 {offsets = [1, 0], sizes = [80, 192], strides = [1, 1]} : vector<82x192xf32> to vector<80x192xf32>
    %132 = arith.maximumf %130, %131 : vector<80x192xf32>
    %133 = vector.extract_strided_slice %129 {offsets = [2, 0], sizes = [80, 192], strides = [1, 1]} : vector<82x192xf32> to vector<80x192xf32>
    %134 = arith.maximumf %132, %133 : vector<80x192xf32>
    %135 = vector.extract_strided_slice %134 {offsets = [0, 0], sizes = [48, 192], strides = [1, 1]} : vector<80x192xf32> to vector<48x192xf32>
    %136 = vector.extract_strided_slice %134 {offsets = [16, 0], sizes = [48, 192], strides = [1, 1]} : vector<80x192xf32> to vector<48x192xf32>
    %137 = arith.maximumf %135, %136 : vector<48x192xf32>
    %138 = vector.extract_strided_slice %134 {offsets = [32, 0], sizes = [48, 192], strides = [1, 1]} : vector<80x192xf32> to vector<48x192xf32>
    %139 = arith.maximumf %137, %138 : vector<48x192xf32>
    %140 = arith.mulf %139, %5 : vector<48x192xf32>
    %cst_121 = arith.constant dense<0.000000e+00> : vector<48xf32>
    %141 = vector.multi_reduction <add>, %140, %cst_121 [1] : vector<48x192xf32> to vector<48xf32>
    %142 = vector.shape_cast %141 : vector<48xf32> to vector<48x1xf32>
    %cst_122 = arith.constant dense<0.000000e+00> : vector<1xf32>
    %143 = vector.multi_reduction <add>, %142, %cst_122 [0] : vector<48x1xf32> to vector<1xf32>
    %144 = vector.shape_cast %143 : vector<1xf32> to vector<1x1xf32>
    %145 = vector.extract_strided_slice %20 {offsets = [12, 0], sizes = [12, 12], strides = [1, 1]} : vector<24x36xf32> to vector<12x12xf32>
    %146 = vector.extract_strided_slice %33 {offsets = [12, 0], sizes = [12, 12], strides = [1, 1]} : vector<24x36xf32> to vector<12x12xf32>
    %147 = vector.extract_strided_slice %46 {offsets = [12, 0], sizes = [12, 12], strides = [1, 1]} : vector<24x36xf32> to vector<12x12xf32>
    %148 = tpu.concatenate %145, %146, %147, %6 in 1 : vector<12x12xf32>, vector<12x12xf32>, vector<12x12xf32>, vector<12x92xf32> -> vector<12x128xf32>
    %149 = tpu.concatenate %148, %7 in 0 : vector<12x128xf32>, vector<4x128xf32> -> vector<16x128xf32>
    %c24_123 = arith.constant 24 : index
    %c0_124 = arith.constant 0 : index
    %150 = vector.load %arg7[%c24_123, %c0_124] : memref<124x128xf32, #tpu.memory_space<vmem>>, vector<16x128xf32>
    tpu.vector_store %arg7[%c24_123, %c0_124], %149 {strides = array<i32>} : memref<124x128xf32, #tpu.memory_space<vmem>>, vector<16x128xf32>,
    %151 = vector.extract_strided_slice %20 {offsets = [12, 12], sizes = [12, 12], strides = [1, 1]} : vector<24x36xf32> to vector<12x12xf32>
    %152 = vector.extract_strided_slice %33 {offsets = [12, 12], sizes = [12, 12], strides = [1, 1]} : vector<24x36xf32> to vector<12x12xf32>
    %153 = vector.extract_strided_slice %46 {offsets = [12, 12], sizes = [12, 12], strides = [1, 1]} : vector<24x36xf32> to vector<12x12xf32>
    %154 = tpu.concatenate %151, %152, %153, %6 in 1 : vector<12x12xf32>, vector<12x12xf32>, vector<12x12xf32>, vector<12x92xf32> -> vector<12x128xf32>
    %155 = tpu.concatenate %154, %7 in 0 : vector<12x128xf32>, vector<4x128xf32> -> vector<16x128xf32>
    %c40_125 = arith.constant 40 : index
    %c0_126 = arith.constant 0 : index
    %156 = vector.load %arg7[%c40_125, %c0_126] : memref<124x128xf32, #tpu.memory_space<vmem>>, vector<16x128xf32>
    tpu.vector_store %arg7[%c40_125, %c0_126], %155 {strides = array<i32>} : memref<124x128xf32, #tpu.memory_space<vmem>>, vector<16x128xf32>,
    %157 = vector.extract_strided_slice %20 {offsets = [12, 24], sizes = [12, 12], strides = [1, 1]} : vector<24x36xf32> to vector<12x12xf32>
    %158 = vector.extract_strided_slice %33 {offsets = [12, 24], sizes = [12, 12], strides = [1, 1]} : vector<24x36xf32> to vector<12x12xf32>
    %159 = vector.extract_strided_slice %46 {offsets = [12, 24], sizes = [12, 12], strides = [1, 1]} : vector<24x36xf32> to vector<12x12xf32>
    %160 = tpu.concatenate %157, %158, %159, %6 in 1 : vector<12x12xf32>, vector<12x12xf32>, vector<12x12xf32>, vector<12x92xf32> -> vector<12x128xf32>
    %161 = tpu.concatenate %160, %7 in 0 : vector<12x128xf32>, vector<4x128xf32> -> vector<16x128xf32>
    %c56_127 = arith.constant 56 : index
    %c0_128 = arith.constant 0 : index
    %162 = vector.load %arg7[%c56_127, %c0_128] : memref<124x128xf32, #tpu.memory_space<vmem>>, vector<16x128xf32>
    tpu.vector_store %arg7[%c56_127, %c0_128], %161 {strides = array<i32>} : memref<124x128xf32, #tpu.memory_space<vmem>>, vector<16x128xf32>,
    %c7_129 = arith.constant 7 : index
    %c0_130 = arith.constant 0 : index
    %163 = vector.load %arg7[%c7_129, %c0_130] : memref<124x128xf32, #tpu.memory_space<vmem>>, vector<114x128xf32>
    %164 = arith.truncf %163 : vector<114x128xf32> to vector<114x128xbf16>
    %c8_131 = arith.constant 8 : index
    %c0_132 = arith.constant 0 : index
    %165 = vector.load %arg7[%c8_131, %c0_132] : memref<124x128xf32, #tpu.memory_space<vmem>>, vector<114x128xf32>
    %166 = arith.truncf %165 : vector<114x128xf32> to vector<114x128xbf16>
    %c9_133 = arith.constant 9 : index
    %c0_134 = arith.constant 0 : index
    %167 = vector.load %arg7[%c9_133, %c0_134] : memref<124x128xf32, #tpu.memory_space<vmem>>, vector<114x128xf32>
    %168 = arith.truncf %167 : vector<114x128xf32> to vector<114x128xbf16>
    %169 = vector.extract_strided_slice %164 {offsets = [0, 0], sizes = [82, 128], strides = [1, 1]} : vector<114x128xbf16> to vector<82x128xbf16>
    %c0_135 = arith.constant 0 : index
    %c0_136 = arith.constant 0 : index
    %c0_137 = arith.constant 0 : index
    %170 = vector.load %arg3[%c0_135, %c0_136, %c0_137] : memref<9x128x256xbf16, #tpu.memory_space<vmem>>, vector<1x128x256xbf16>
    %171 = vector.shape_cast %170 : vector<1x128x256xbf16> to vector<128x256xbf16>
    %cst_138 = arith.constant dense<0.000000e+00> : vector<82x256xf32>
    %172 = tpu.matmul %169, %171, %cst_138 {dimension_numbers = #tpu.dot_dimension_numbers<[1], [0], [0], [1], [0, 0, 1, 1], [], []>} : vector<82x128xbf16>, vector<128x256xbf16>, vector<82x256xf32> -> vector<82x256xf32>
    %173 = vector.extract_strided_slice %166 {offsets = [0, 0], sizes = [82, 128], strides = [1, 1]} : vector<114x128xbf16> to vector<82x128xbf16>
    %c1_139 = arith.constant 1 : index
    %c0_140 = arith.constant 0 : index
    %c0_141 = arith.constant 0 : index
    %174 = vector.load %arg3[%c1_139, %c0_140, %c0_141] : memref<9x128x256xbf16, #tpu.memory_space<vmem>>, vector<1x128x256xbf16>
    %175 = vector.shape_cast %174 : vector<1x128x256xbf16> to vector<128x256xbf16>
    %cst_142 = arith.constant dense<0.000000e+00> : vector<82x256xf32>
    %176 = tpu.matmul %173, %175, %cst_142 {dimension_numbers = #tpu.dot_dimension_numbers<[1], [0], [0], [1], [0, 0, 1, 1], [], []>} : vector<82x128xbf16>, vector<128x256xbf16>, vector<82x256xf32> -> vector<82x256xf32>
    %177 = arith.addf %172, %176 : vector<82x256xf32>
    %178 = vector.extract_strided_slice %168 {offsets = [0, 0], sizes = [82, 128], strides = [1, 1]} : vector<114x128xbf16> to vector<82x128xbf16>
    %c2_143 = arith.constant 2 : index
    %c0_144 = arith.constant 0 : index
    %c0_145 = arith.constant 0 : index
    %179 = vector.load %arg3[%c2_143, %c0_144, %c0_145] : memref<9x128x256xbf16, #tpu.memory_space<vmem>>, vector<1x128x256xbf16>
    %180 = vector.shape_cast %179 : vector<1x128x256xbf16> to vector<128x256xbf16>
    %cst_146 = arith.constant dense<0.000000e+00> : vector<82x256xf32>
    %181 = tpu.matmul %178, %180, %cst_146 {dimension_numbers = #tpu.dot_dimension_numbers<[1], [0], [0], [1], [0, 0, 1, 1], [], []>} : vector<82x128xbf16>, vector<128x256xbf16>, vector<82x256xf32> -> vector<82x256xf32>
    %182 = arith.addf %177, %181 : vector<82x256xf32>
    %c0_147 = arith.constant 0 : index
    %c0_148 = arith.constant 0 : index
    %183 = vector.load %arg8[%c0_147, %c0_148] : memref<82x256xf32, #tpu.memory_space<vmem>>, vector<82x256xf32>
    tpu.vector_store %arg8[%c0_147, %c0_148], %182 {strides = array<i32>} : memref<82x256xf32, #tpu.memory_space<vmem>>, vector<82x256xf32>,
    %184 = vector.extract_strided_slice %164 {offsets = [16, 0], sizes = [82, 128], strides = [1, 1]} : vector<114x128xbf16> to vector<82x128xbf16>
    %c3_149 = arith.constant 3 : index
    %c0_150 = arith.constant 0 : index
    %c0_151 = arith.constant 0 : index
    %185 = vector.load %arg3[%c3_149, %c0_150, %c0_151] : memref<9x128x256xbf16, #tpu.memory_space<vmem>>, vector<1x128x256xbf16>
    %186 = vector.shape_cast %185 : vector<1x128x256xbf16> to vector<128x256xbf16>
    %cst_152 = arith.constant dense<0.000000e+00> : vector<82x256xf32>
    %187 = tpu.matmul %184, %186, %cst_152 {dimension_numbers = #tpu.dot_dimension_numbers<[1], [0], [0], [1], [0, 0, 1, 1], [], []>} : vector<82x128xbf16>, vector<128x256xbf16>, vector<82x256xf32> -> vector<82x256xf32>
    %188 = vector.extract_strided_slice %166 {offsets = [16, 0], sizes = [82, 128], strides = [1, 1]} : vector<114x128xbf16> to vector<82x128xbf16>
    %c4_153 = arith.constant 4 : index
    %c0_154 = arith.constant 0 : index
    %c0_155 = arith.constant 0 : index
    %189 = vector.load %arg3[%c4_153, %c0_154, %c0_155] : memref<9x128x256xbf16, #tpu.memory_space<vmem>>, vector<1x128x256xbf16>
    %190 = vector.shape_cast %189 : vector<1x128x256xbf16> to vector<128x256xbf16>
    %cst_156 = arith.constant dense<0.000000e+00> : vector<82x256xf32>
    %191 = tpu.matmul %188, %190, %cst_156 {dimension_numbers = #tpu.dot_dimension_numbers<[1], [0], [0], [1], [0, 0, 1, 1], [], []>} : vector<82x128xbf16>, vector<128x256xbf16>, vector<82x256xf32> -> vector<82x256xf32>
    %192 = arith.addf %187, %191 : vector<82x256xf32>
    %193 = vector.extract_strided_slice %168 {offsets = [16, 0], sizes = [82, 128], strides = [1, 1]} : vector<114x128xbf16> to vector<82x128xbf16>
    %c5_157 = arith.constant 5 : index
    %c0_158 = arith.constant 0 : index
    %c0_159 = arith.constant 0 : index
    %194 = vector.load %arg3[%c5_157, %c0_158, %c0_159] : memref<9x128x256xbf16, #tpu.memory_space<vmem>>, vector<1x128x256xbf16>
    %195 = vector.shape_cast %194 : vector<1x128x256xbf16> to vector<128x256xbf16>
    %cst_160 = arith.constant dense<0.000000e+00> : vector<82x256xf32>
    %196 = tpu.matmul %193, %195, %cst_160 {dimension_numbers = #tpu.dot_dimension_numbers<[1], [0], [0], [1], [0, 0, 1, 1], [], []>} : vector<82x128xbf16>, vector<128x256xbf16>, vector<82x256xf32> -> vector<82x256xf32>
    %197 = arith.addf %192, %196 : vector<82x256xf32>
    %c0_161 = arith.constant 0 : index
    %c0_162 = arith.constant 0 : index
    %198 = vector.load %arg8[%c0_161, %c0_162] : memref<82x256xf32, #tpu.memory_space<vmem>>, vector<82x256xf32>
    %199 = arith.addf %198, %197 : vector<82x256xf32>
    %c0_163 = arith.constant 0 : index
    %c0_164 = arith.constant 0 : index
    %200 = vector.load %arg8[%c0_163, %c0_164] : memref<82x256xf32, #tpu.memory_space<vmem>>, vector<82x256xf32>
    tpu.vector_store %arg8[%c0_163, %c0_164], %199 {strides = array<i32>} : memref<82x256xf32, #tpu.memory_space<vmem>>, vector<82x256xf32>,
    %201 = vector.extract_strided_slice %164 {offsets = [32, 0], sizes = [82, 128], strides = [1, 1]} : vector<114x128xbf16> to vector<82x128xbf16>
    %c6_165 = arith.constant 6 : index
    %c0_166 = arith.constant 0 : index
    %c0_167 = arith.constant 0 : index
    %202 = vector.load %arg3[%c6_165, %c0_166, %c0_167] : memref<9x128x256xbf16, #tpu.memory_space<vmem>>, vector<1x128x256xbf16>
    %203 = vector.shape_cast %202 : vector<1x128x256xbf16> to vector<128x256xbf16>
    %cst_168 = arith.constant dense<0.000000e+00> : vector<82x256xf32>
    %204 = tpu.matmul %201, %203, %cst_168 {dimension_numbers = #tpu.dot_dimension_numbers<[1], [0], [0], [1], [0, 0, 1, 1], [], []>} : vector<82x128xbf16>, vector<128x256xbf16>, vector<82x256xf32> -> vector<82x256xf32>
    %205 = vector.extract_strided_slice %166 {offsets = [32, 0], sizes = [82, 128], strides = [1, 1]} : vector<114x128xbf16> to vector<82x128xbf16>
    %c7_169 = arith.constant 7 : index
    %c0_170 = arith.constant 0 : index
    %c0_171 = arith.constant 0 : index
    %206 = vector.load %arg3[%c7_169, %c0_170, %c0_171] : memref<9x128x256xbf16, #tpu.memory_space<vmem>>, vector<1x128x256xbf16>
    %207 = vector.shape_cast %206 : vector<1x128x256xbf16> to vector<128x256xbf16>
    %cst_172 = arith.constant dense<0.000000e+00> : vector<82x256xf32>
    %208 = tpu.matmul %205, %207, %cst_172 {dimension_numbers = #tpu.dot_dimension_numbers<[1], [0], [0], [1], [0, 0, 1, 1], [], []>} : vector<82x128xbf16>, vector<128x256xbf16>, vector<82x256xf32> -> vector<82x256xf32>
    %209 = arith.addf %204, %208 : vector<82x256xf32>
    %210 = vector.extract_strided_slice %168 {offsets = [32, 0], sizes = [82, 128], strides = [1, 1]} : vector<114x128xbf16> to vector<82x128xbf16>
    %c8_173 = arith.constant 8 : index
    %c0_174 = arith.constant 0 : index
    %c0_175 = arith.constant 0 : index
    %211 = vector.load %arg3[%c8_173, %c0_174, %c0_175] : memref<9x128x256xbf16, #tpu.memory_space<vmem>>, vector<1x128x256xbf16>
    %212 = vector.shape_cast %211 : vector<1x128x256xbf16> to vector<128x256xbf16>
    %cst_176 = arith.constant dense<0.000000e+00> : vector<82x256xf32>
    %213 = tpu.matmul %210, %212, %cst_176 {dimension_numbers = #tpu.dot_dimension_numbers<[1], [0], [0], [1], [0, 0, 1, 1], [], []>} : vector<82x128xbf16>, vector<128x256xbf16>, vector<82x256xf32> -> vector<82x256xf32>
    %214 = arith.addf %209, %213 : vector<82x256xf32>
    %c0_177 = arith.constant 0 : index
    %c0_178 = arith.constant 0 : index
    %215 = vector.load %arg8[%c0_177, %c0_178] : memref<82x256xf32, #tpu.memory_space<vmem>>, vector<82x256xf32>
    %216 = arith.addf %215, %214 : vector<82x256xf32>
    %c0_179 = arith.constant 0 : index
    %c0_180 = arith.constant 0 : index
    %217 = vector.load %arg8[%c0_179, %c0_180] : memref<82x256xf32, #tpu.memory_space<vmem>>, vector<82x256xf32>
    tpu.vector_store %arg8[%c0_179, %c0_180], %216 {strides = array<i32>} : memref<82x256xf32, #tpu.memory_space<vmem>>, vector<82x256xf32>,
    %c0_181 = arith.constant 0 : index
    %c0_182 = arith.constant 0 : index
    %218 = vector.load %arg8[%c0_181, %c0_182] : memref<82x256xf32, #tpu.memory_space<vmem>>, vector<82x256xf32>
    %219 = vector.broadcast %4 : vector<1x256xf32> to vector<82x256xf32>
    %220 = arith.addf %218, %219 : vector<82x256xf32>
    %cst_183 = arith.constant 0.000000e+00 : f32
    %221 = vector.broadcast %cst_183 : f32 to vector<82x256xf32>
    %222 = arith.maximumf %220, %221 : vector<82x256xf32>
    %223 = vector.extract_strided_slice %222 {offsets = [0, 0], sizes = [82, 192], strides = [1, 1]} : vector<82x256xf32> to vector<82x192xf32>
    %224 = vector.extract_strided_slice %222 {offsets = [0, 1], sizes = [82, 192], strides = [1, 1]} : vector<82x256xf32> to vector<82x192xf32>
    %225 = arith.maximumf %223, %224 : vector<82x192xf32>
    %226 = vector.extract_strided_slice %222 {offsets = [0, 2], sizes = [82, 192], strides = [1, 1]} : vector<82x256xf32> to vector<82x192xf32>
    %227 = arith.maximumf %225, %226 : vector<82x192xf32>
    %228 = vector.extract_strided_slice %227 {offsets = [0, 0], sizes = [80, 192], strides = [1, 1]} : vector<82x192xf32> to vector<80x192xf32>
    %229 = vector.extract_strided_slice %227 {offsets = [1, 0], sizes = [80, 192], strides = [1, 1]} : vector<82x192xf32> to vector<80x192xf32>
    %230 = arith.maximumf %228, %229 : vector<80x192xf32>
    %231 = vector.extract_strided_slice %227 {offsets = [2, 0], sizes = [80, 192], strides = [1, 1]} : vector<82x192xf32> to vector<80x192xf32>
    %232 = arith.maximumf %230, %231 : vector<80x192xf32>
    %233 = vector.extract_strided_slice %232 {offsets = [0, 0], sizes = [48, 192], strides = [1, 1]} : vector<80x192xf32> to vector<48x192xf32>
    %234 = vector.extract_strided_slice %232 {offsets = [16, 0], sizes = [48, 192], strides = [1, 1]} : vector<80x192xf32> to vector<48x192xf32>
    %235 = arith.maximumf %233, %234 : vector<48x192xf32>
    %236 = vector.extract_strided_slice %232 {offsets = [32, 0], sizes = [48, 192], strides = [1, 1]} : vector<80x192xf32> to vector<48x192xf32>
    %237 = arith.maximumf %235, %236 : vector<48x192xf32>
    %238 = arith.mulf %237, %5 : vector<48x192xf32>
    %cst_184 = arith.constant dense<0.000000e+00> : vector<48xf32>
    %239 = vector.multi_reduction <add>, %238, %cst_184 [1] : vector<48x192xf32> to vector<48xf32>
    %240 = vector.shape_cast %239 : vector<48xf32> to vector<48x1xf32>
    %cst_185 = arith.constant dense<0.000000e+00> : vector<1xf32>
    %241 = vector.multi_reduction <add>, %240, %cst_185 [0] : vector<48x1xf32> to vector<1xf32>
    %242 = vector.shape_cast %241 : vector<1xf32> to vector<1x1xf32>
    %243 = tpu.concatenate %144, %242 in 1 : vector<1x1xf32>, vector<1x1xf32> -> vector<1x2xf32>
    %c0_186 = arith.constant 0 : index
    %c0_187 = arith.constant 0 : index
    %c0_188 = arith.constant 0 : index
    %244 = vector.load %arg6[%c0_186, %c0_187, %c0_188] : memref<1x1x2xf32, #tpu.memory_space<vmem>>, vector<1x1x2xf32>
    %245 = vector.shape_cast %244 : vector<1x1x2xf32> to vector<1x2xf32>
    %246 = vector.shape_cast %243 : vector<1x2xf32> to vector<1x1x2xf32>
    tpu.vector_store %arg6[%c0_186, %c0_187, %c0_188], %246 {strides = array<i32>} : memref<1x1x2xf32, #tpu.memory_space<vmem>>, vector<1x1x2xf32>,
    return
  }
  func.func @transform_0(%arg0: i32) -> (i32, i32, i32, i32) {
    %c0_i32 = arith.constant 0 : i32
    %c0_i32_0 = arith.constant 0 : i32
    %c0_i32_1 = arith.constant 0 : i32
    %c0_i32_2 = arith.constant 0 : i32
    return %c0_i32, %arg0, %c0_i32_0, %c0_i32_1 : i32, i32, i32, i32
  }
  func.func @transform_1(%arg0: i32) -> (i32, i32, i32, i32) {
    %c0_i32 = arith.constant 0 : i32
    %c0_i32_0 = arith.constant 0 : i32
    %c0_i32_1 = arith.constant 0 : i32
    %c0_i32_2 = arith.constant 0 : i32
    return %c0_i32, %arg0, %c0_i32_0, %c0_i32_1 : i32, i32, i32, i32
  }
  func.func @transform_2(%arg0: i32) -> (i32, i32, i32) {
    %c0_i32 = arith.constant 0 : i32
    %c0_i32_0 = arith.constant 0 : i32
    %c0_i32_1 = arith.constant 0 : i32
    %c0_i32_2 = arith.constant 0 : i32
    return %c0_i32, %c0_i32_0, %c0_i32_1 : i32, i32, i32
  }
  func.func @transform_3(%arg0: i32) -> (i32, i32) {
    %c0_i32 = arith.constant 0 : i32
    %c0_i32_0 = arith.constant 0 : i32
    %c0_i32_1 = arith.constant 0 : i32
    return %c0_i32, %c0_i32_0 : i32, i32
  }
  func.func @transform_4(%arg0: i32) -> (i32, i32) {
    %c0_i32 = arith.constant 0 : i32
    %c0_i32_0 = arith.constant 0 : i32
    %c0_i32_1 = arith.constant 0 : i32
    return %c0_i32, %c0_i32_0 : i32, i32
  }
  func.func @transform_5(%arg0: i32) -> (i32, i32, i32) {
    %c0_i32 = arith.constant 0 : i32
    %c0_i32_0 = arith.constant 0 : i32
    %c0_i32_1 = arith.constant 0 : i32
    return %arg0, %c0_i32, %c0_i32_0 : i32, i32, i32
  }
}

</mosaic_0001>

<bundles_post_ra>
// kernel: fim_forward.3
= control target key start
LH: loop header
LB: loop body
LE: loop exit
PB: predicated region body
PF: predicated region fallthrough
CT: control target
= control target key end

     0   :  { %vm39_vm0 = vcmask 261120   ;;  %v2291_v3 = vmov 0.0   ;;  %vm82_vm1 = vcmask 1046528   ;;  %vm131_vm2 = vcmask 1045504   ;;  %s2292_s30 = smov 32   ;;  %s2293_s9 = smov 64   ;;  %s3034_s0 = inlined_call_operand.vmem [shape: f32[1,72,32], index: 0, kind: input, shape index: {}]   ;;  %s3035_s2 = inlined_call_operand.vmem [shape: bf16[96,128], index: 2, kind: input, shape index: {}]   ;;  %s3036_s1 = inlined_call_operand.vmem [shape: f32[72,1], index: 1, kind: input, shape index: {}]   ;;  %s3037_s4 = inlined_call_operand.vmem [shape: bf16[384,128], index: 4, kind: input, shape index: {}]   ;;  %s3038_s6 = inlined_call_operand.vmem [shape: bf16[384,128], index: 6, kind: input, shape index: {}]   ;;  %s3039_s3 = inlined_call_operand.vmem [shape: f32[1,128], index: 3, kind: input, shape index: {}]   ;;  %s3040_s8 = inlined_call_operand.vmem [shape: bf16[3,1,72,128], index: 8, kind: output, shape index: {}]   ;;  %s3041_s5 = inlined_call_operand.vmem [shape: f32[1,128], index: 5, kind: input, shape index: {}]   ;;  %s3042_s7 = inlined_call_operand.vmem [shape: f32[1,128], index: 7, kind: input, shape index: {}]  }
   0x1   :  { %v44_v0 = vld [vmem:[%s3034_s0] sm:$0xff]  ;;  %v45_v1 = vld [vmem:[%s3034_s0 + $0x8] sm:$0xff]  ;;  %v46_v2 = vld [vmem:[%s3034_s0 + $0x10] sm:$0xff]  ;;  %41 = vst.msk [vmem:[#allocation2 + $0x50] sm:$0xff] %vm39_vm0, %v2291_v3  ;;  %2060 = vmatprep.subr.bf16.mxu0 %v2291_v3  ;;  %vm2294_vm3 = vmmov 0   ;;  %vm191_vm4 = vcmask 523264  }
   0x2   :  { %40 = vst.msk [vmem:[#allocation2] sm:$0xff] %vm39_vm0, %v2291_v3  ;;  %53 = vst.msk [vmem:[#allocation2 + $0x8] sm:$0xff] %vm39_vm0, %v44_v0  ;;  %v47_v4 = vld [vmem:[%s3034_s0 + $0x18] sm:$0xff]  ;;  %v48_v5 = vld [vmem:[%s3034_s0 + $0x20] sm:$0xff]  ;;  %2072 = vmatprep.mubr.msk.bf16.mxu0 %vm2294_vm3, %v2291_v3  ;;  %vm226_vm5 = vsmask.f32 4352 }
   0x3   :  { %54 = vst.msk [vmem:[#allocation2 + $0x10] sm:$0xff] %vm39_vm0, %v45_v1  ;;  %55 = vst.msk [vmem:[#allocation2 + $0x18] sm:$0xff] %vm39_vm0, %v46_v2  ;;  %v49_v6 = vld [vmem:[%s3034_s0 + $0x28] sm:$0xff]  ;;  %v50_v7 = vld [vmem:[%s3034_s0 + $0x30] sm:$0xff]  ;;  %vm307_vm6 = vcmask 785408   ;;  %vm561_vm7 = vcmask 1043456  }
   0x4   :  { %56 = vst.msk [vmem:[#allocation2 + $0x20] sm:$0xff] %vm39_vm0, %v47_v4  ;;  %57 = vst.msk [vmem:[#allocation2 + $0x28] sm:$0xff] %vm39_vm0, %v48_v5  ;;  %v51_v8 = vld [vmem:[%s3034_s0 + $0x38] sm:$0xff]  ;;  %v52_v9 = vld [vmem:[%s3034_s0 + $0x40] sm:$0xff]  ;;  %vm676_vm8 = vcmask 1044480   ;;  %vm1130_vm9 = vcmask 1041408  }
   0x5   :  { %58 = vst.msk [vmem:[#allocation2 + $0x30] sm:$0xff] %vm39_vm0, %v49_v6  ;;  %59 = vst.msk [vmem:[#allocation2 + $0x38] sm:$0xff] %vm39_vm0, %v50_v7  ;;  %v2237_v10 = vld [vmem:[%s3035_s2 + $0x28] sm:$0xff]   ;;  %v2238_v11 = vld [vmem:[%s3035_s2 + $0x20] sm:$0xff]   ;;  %vm1230_vm10 = vsmask.f32 5376 }
   0x6   :  { %60 = vst.msk [vmem:[#allocation2 + $0x40] sm:$0xff] %vm39_vm0, %v51_v8  ;;  %61 = vst.msk [vmem:[#allocation2 + $0x48] sm:$0xff] %vm39_vm0, %v52_v9  ;;  %2061 = vmatpush3.bf16.msra.mxu0 %v2237_v10  ;;  %v2239_v12 = vld [vmem:[%s3035_s2 + $0x18] sm:$0xff]   ;;  %v2240_v41 = vld [vmem:[%s3035_s2 + $0x10] sm:$0xff]   ;;  %v2295_v9 = vmov 0  }
   0x7   :  { %2062 = vmatprep.subr.bf16.mxu0 %v2291_v3  ;;  %v2241_v56 = vld [vmem:[%s3035_s2 + $0x8] sm:$0xff]   ;;  %v2242_v0 = vld [vmem:[%s3035_s2] sm:$0xff]   ;;  %2236 = vset.pattern.permute.xlu1 %v2295_v9 }
   0x8   :  { %v72_v46 = vld [vmem:[#allocation2 + $0x50] sm:$0xff]  ;;  %v31_v10 = vld [vmem:[%s3036_s1 + $0x8] sm:$0xff]  ;;  %2235 = vset.pattern.permute.xlu0 %v2295_v9 }
   0x9   :  { %v2392_v13 = vld [vmem:[#allocation2 + $0x8] sm:$0xff]  ;;  %v149_v55 = vrot.slane %v72_v46, 2 }
   0xa   :  { %v2394_v14 = vld [vmem:[#allocation2 + $0x10] sm:$0xff]  ;;  %v2396_v15 = vld [vmem:[#allocation2 + $0x18] sm:$0xff]  ;;  %v83_v16 = vrot.slane %v2392_v13, 1  ;;  %v132_v18 = vrot.slane %v2392_v13, 2  ;;  %2063 = vmatpush3.bf16.msra.mxu0 %v2238_v11  ;;  %v30_v11 = vld [vmem:[%s3036_s1] sm:$0xff] }
   0xb   :  { %v84_v17 = vrot.slane %v2394_v14, 1  ;;  %v133_v19 = vrot.slane %v2394_v14, 2  ;;  %v2402_v20 = vld [vmem:[#allocation2 + $0x20] sm:$0xff]  ;;  %v2404_v21 = vld [vmem:[#allocation2 + $0x28] sm:$0xff]  ;;  %v86_v22 = vrot.slane %v2396_v15, 1  ;;  %v135_v24 = vrot.slane %v2396_v15, 2  ;;  %2064 = vmatprep.subr.bf16.mxu0 %v2291_v3 }
   0xc   :  { %v88_v23 = vrot.slane %v2402_v20, 1  ;;  %v137_v25 = vrot.slane %v2402_v20, 2  ;;  %v2410_v26 = vld [vmem:[#allocation2 + $0x30] sm:$0xff]  ;;  %v90_v29 = vrot.slane %v2404_v21, 1  ;;  %v2417_v31 = vld [vmem:[#allocation2 + $0x38] sm:$0xff]  ;;  %v139_v44 = vrot.slane %v2404_v21, 2 }
   0xd   :  { %v85_v27 = vsel %vm82_vm1, %v83_v16, %v84_v17  ;;  %v134_v28 = vsel %vm131_vm2, %v132_v18, %v133_v19  ;;  %v92_v30 = vrot.slane %v2410_v26, 1  ;;  %v87_v34 = vsel %vm82_vm1, %v84_v17, %v86_v22  ;;  %v2421_v36 = vld [vmem:[#allocation2 + $0x40] sm:$0xff]  ;;  %v2437_v50 = vld [vmem:[#allocation2 + $0x48] sm:$0xff] }
   0xe   :  { %v2185_v32 = vpack.i.bf16 %v85_v27, %v83_v16  ;;  %v2195_v33 = vpack.i.bf16 %v134_v28, %v132_v18  ;;  %v89_v35 = vsel %vm82_vm1, %v86_v22, %v88_v23  ;;  %v136_v38 = vsel %vm131_vm2, %v133_v19, %v135_v24  ;;  %2065 = vmatpush3.bf16.msra.mxu0 %v2239_v12  ;;  %v32_v12 = vld [vmem:[%s3036_s1 + $0x10] sm:$0xff]  ;;  %v33_v16 = vld [vmem:[%s3036_s1 + $0x18] sm:$0xff]  ;;  %v34_v17 = vld [vmem:[%s3036_s1 + $0x20] sm:$0xff] }
   0xf   :  { %v2190_v37 = vpack.i.bf16 %v89_v35, %v87_v34  ;;  %v138_v39 = vsel %vm131_vm2, %v135_v24, %v137_v25  ;;  %v91_v40 = vsel %vm82_vm1, %v88_v23, %v90_v29  ;;  %v93_v43 = vsel %vm82_vm1, %v90_v29, %v92_v30  ;;  %2066 = vmatprep.subr.bf16.mxu0 %v2291_v3  ;;  %v2244_v18 = vld [vmem:[%s3037_s4 + $0x78] sm:$0xff]   ;;  %v35_v22 = vld [vmem:[%s3036_s1 + $0x28] sm:$0xff]  ;;  %v2247_v23 = vld [vmem:[%s3037_s4 + $0x70] sm:$0xff]  }
  0x10   :  { %2186 = vrot.lane.b32.xlu0 %v2185_v32, %s2292_s30  ;;  %2196 = vrot.lane.b32.xlu1 %v2195_v33, %s2293_s9  ;;  %v2200_v42 = vpack.i.bf16 %v138_v39, %v136_v38  ;;  %v141_v45 = vrot.slane %v2410_v26, 2  ;;  %v94_v47 = vrot.slane %v2417_v31, 1  ;;  %v96_v48 = vrot.slane %v2421_v36, 1  ;;  %v2245_v19 = vld [vmem:[%s3037_s4 + $0x38] sm:$0xff]   ;;  %v36_v24 = vld [vmem:[%s3036_s1 + $0x30] sm:$0xff]  ;;  %v62_v28 = vld [vmem:[#allocation2] sm:$0xff] }
  0x11   :  { %v143_v49 = vrot.slane %v2417_v31, 2  ;;  %v140_v51 = vsel %vm131_vm2, %v137_v25, %v139_v44  ;;  %v145_v53 = vrot.slane %v2421_v36, 2  ;;  %v2205_v54 = vpack.i.bf16 %v93_v43, %v91_v40  ;;  %1942 = vmatprep.subr.bf16.mxu1 %v2244_v18  ;;  %v37_v25 = vld [vmem:[%s3036_s1 + $0x38] sm:$0xff]  ;;  %v38_v27 = vld [vmem:[%s3036_s1 + $0x40] sm:$0xff] }
  0x12   :  { %v142_v52 = vsel %vm131_vm2, %v139_v44, %v141_v45  ;;  %2067 = vmatpush3.bf16.msra.mxu0 %v2240_v41  ;;  %v95_v58 = vsel %vm82_vm1, %v92_v30, %v94_v47  ;;  %v97_v59 = vsel %vm82_vm1, %v94_v47, %v96_v48  ;;  %v98_v60 = vrot.slane %v2437_v50, 1  ;;  %1943 = vmatpush3.bf16.msra.mxu1 %v2245_v19 }
  0x13   :  { %v2210_v57 = vpack.i.bf16 %v142_v52, %v140_v51  ;;  %v144_v61 = vsel %vm131_vm2, %v141_v45, %v143_v49  ;;  %v146_v62 = vsel %vm131_vm2, %v143_v49, %v145_v53  ;;  %v147_v63 = vrot.slane %v2437_v50, 2  ;;  %2068 = vmatprep.subr.bf16.mxu0 %v2291_v3  ;;  %1944 = vmatprep.subr.bf16.mxu1 %v2247_v23 }
  0x14   :  { %2191 = vrot.lane.b32.xlu0 %v2190_v37, %s2292_s30  ;;  %2201 = vrot.lane.b32.xlu1 %v2200_v42, %s2293_s9  ;;  %v2215_v1 = vpack.i.bf16 %v97_v59, %v95_v58  ;;  %v2220_v2 = vpack.i.bf16 %v146_v62, %v144_v61  ;;  %v99_v4 = vsel %vm82_vm1, %v96_v48, %v98_v60 }
  0x15   :  { %v148_v5 = vsel %vm131_vm2, %v145_v53, %v147_v63  ;;  %v150_v6 = vsel %vm131_vm2, %v147_v63, %v149_v55  ;;  %v2225_v7 = vpack.i.bf16 %v98_v60, %v99_v4 }
  0x16   :  { %2069 = vmatpush3.bf16.msra.mxu0 %v2241_v56  ;;  %v2230_v8 = vpack.i.bf16 %v150_v6, %v148_v5 }
  0x17   :  { %2070 = vmatprep.subr.bf16.mxu0 %v2291_v3 }
  0x18   :  { %2206 = vrot.lane.b32.xlu0 %v2205_v54, %s2292_s30  ;;  %2211 = vrot.lane.b32.xlu1 %v2210_v57, %s2293_s9 }
  0x1a   :  { %2071 = vmatpush3.bf16.msra.mxu0 %v2242_v0 }
  0x1b   :  { %2092 = vmatprep.subr.bf16.mxu0 %v2291_v3 }
  0x1c   :  { %2216 = vrot.lane.b32.xlu0 %v2215_v1, %s2292_s30  ;;  %2221 = vrot.lane.b32.xlu1 %v2220_v2, %s2293_s9 }
  0x20   :  { %2226 = vrot.lane.b32.xlu0 %v2225_v7, %s2292_s30  ;;  %2231 = vrot.lane.b32.xlu1 %v2230_v8, %s2293_s9 }
  0x24   :  { %411 = vperm.xlu1 %2236, %v31_v10   ;;  %406 = vperm.xlu0 %2235, %v30_v11  }
  0x28   :  { %416 = vperm.xlu1 %2236, %v32_v12   ;;  %421 = vperm.xlu0 %2235, %v33_v16  }
  0x2c   :  { %426 = vperm.xlu1 %2236, %v34_v17   ;;  %431 = vperm.xlu0 %2235, %v35_v22  }
  0x30   :  { %436 = vperm.xlu1 %2236, %v36_v24   ;;  %441 = vperm.xlu0 %2235, %v37_v25  }
  0x34   :  { %446 = vperm.xlu1 %2236, %v38_v27  }
  0x82   :  { %v2187_v29 = vpop.permute.xlu0 %2186  ;;  %v2197_v30 = vpop.permute.xlu1 %2196 }
  0x83   :  { %v2189_v32 = vunpack.i.h.bf16 %v2187_v29  ;;  %v2188_v33 = vunpack.i.l.bf16 %v2187_v29  ;;  %v2199_v34 = vunpack.i.h.bf16 %v2197_v30  ;;  %v2198_v35 = vunpack.i.l.bf16 %v2197_v30 }
  0x85   :  { %v182_v37 = vsel %vm39_vm0, %v2392_v13, %v2189_v32  ;;  %v181_v38 = vsel %vm39_vm0, %v62_v28, %v2188_v33 }
  0x86   :  { %v192_v39 = vsel %vm191_vm4, %v181_v38, %v2198_v35  ;;  %v193_v40 = vsel %vm191_vm4, %v182_v37, %v2199_v34  ;;  %v2192_v41 = vpop.permute.xlu0 %2191  ;;  %v2202_v42 = vpop.permute.xlu1 %2201  ;;  %v2246_v38 = vld [vmem:[%s3037_s4 + $0xb0] sm:$0xff]  }
  0x87   :  { %v202_v43 = vpack.c.bf16 %v193_v40, %v192_v39  ;;  %v2194_v44 = vunpack.i.h.bf16 %v2192_v41  ;;  %v2193_v45 = vunpack.i.l.bf16 %v2192_v41  ;;  %v2204_v46 = vunpack.i.h.bf16 %v2202_v42 }
  0x88   :  { %v2203_v47 = vunpack.i.l.bf16 %v2202_v42 }
  0x89   :  { %v228_v48 = vshrl.u32 %v202_v43, 16  ;;  %v231_v49 = vshll.u32 %v202_v43, 16  ;;  %v184_v51 = vsel %vm39_vm0, %v2396_v15, %v2194_v44  ;;  %v183_v13 = vsel %vm39_vm0, %v2394_v14, %v2193_v45 }
  0x8a   :  { %v194_v52 = vsel %vm191_vm4, %v183_v13, %v2203_v47  ;;  %v195_v53 = vsel %vm191_vm4, %v184_v51, %v2204_v46  ;;  %v2207_v54 = vpop.permute.xlu0 %2206  ;;  %v2212_v55 = vpop.permute.xlu1 %2211 }
  0x8b   :  { %v203_v56 = vpack.c.bf16 %v195_v53, %v194_v52  ;;  %v2209_v57 = vunpack.i.h.bf16 %v2207_v54  ;;  %v230_v58 = vrot.slane %v228_v48, 3  ;;  %v2208_v59 = vunpack.i.l.bf16 %v2207_v54  ;;  %v2248_v54 = vld [vmem:[%s3037_s4 + $0x30] sm:$0xff]  }
  0x8c   :  { %v2214_v60 = vunpack.i.h.bf16 %v2212_v55  ;;  %v2213_v61 = vunpack.i.l.bf16 %v2212_v55  ;;  %v233_v62 = vrot.slane %v231_v49, 4  ;;  %1945 = vmatpush3.bf16.msra.mxu1 %v2248_v54  ;;  %v2249_v55 = vld [vmem:[%s3037_s4 + $0x68] sm:$0xff]  }
  0x8d   :  { %v236_v63 = vshrl.u32 %v203_v56, 16  ;;  %v239_v0 = vshll.u32 %v203_v56, 16  ;;  %v186_v15 = vsel %vm39_vm0, %v2404_v21, %v2209_v57  ;;  %v185_v14 = vsel %vm39_vm0, %v2402_v20, %v2208_v59  ;;  %v2243_v20 = vld [vmem:[%s3037_s4 + $0xb8] sm:$0xff]   ;;  %v2250_v56 = vld [vmem:[%s3037_s4 + $0xa8] sm:$0xff]   ;;  %1946 = vmatprep.subr.bf16.mxu1 %v2249_v55  ;;  %v2253_v59 = vld [vmem:[%s3037_s4 + $0xa0] sm:$0xff]  }
  0x8e   :  { %v197_v1 = vsel %vm191_vm4, %v186_v15, %v2214_v60  ;;  %v2217_v2 = vpop.permute.xlu0 %2216  ;;  %v2222_v4 = vpop.permute.xlu1 %2221  ;;  %v196_v7 = vsel %vm191_vm4, %v185_v14, %v2213_v61  ;;  %v234_v16 = vor.u32 %v233_v62, %v230_v58  ;;  %v2251_v57 = vld [vmem:[%s3037_s4 + $0x28] sm:$0xff]   ;;  %v2252_v58 = vld [vmem:[%s3037_s4 + $0x60] sm:$0xff]   ;;  %v2255_v61 = vld [vmem:[%s3037_s4 + $0x58] sm:$0xff]  }
  0x8f   :  { %v238_v5 = vrot.slane %v236_v63, 3  ;;  %v241_v6 = vrot.slane %v239_v0, 4  ;;  %v2219_v8 = vunpack.i.h.bf16 %v2217_v2  ;;  %v204_v9 = vpack.c.bf16 %v197_v1, %v196_v7  ;;  %v2254_v60 = vld [vmem:[%s3037_s4 + $0x20] sm:$0xff]   ;;  %v2256_v62 = vld [vmem:[%s3037_s4 + $0x98] sm:$0xff]   ;;  %v2258_v0 = vld [vmem:[%s3037_s4 + $0x50] sm:$0xff]  }
  0x90   :  { %v2218_v10 = vunpack.i.l.bf16 %v2217_v2  ;;  %v2224_v11 = vunpack.i.h.bf16 %v2222_v4  ;;  %v2223_v12 = vunpack.i.l.bf16 %v2222_v4  ;;  %1947 = vmatpush3.bf16.msra.mxu1 %v2251_v57  ;;  %v2257_v63 = vld [vmem:[%s3037_s4 + $0x18] sm:$0xff]   ;;  %v2259_v15 = vld [vmem:[%s3037_s4 + $0x90] sm:$0xff]   ;;  %v2261_v1 = vld [vmem:[%s3037_s4 + $0x48] sm:$0xff]  }
  0x91   :  { %v188_v21 = vsel %vm39_vm0, %v2417_v31, %v2219_v8  ;;  %v242_v17 = vor.u32 %v241_v6, %v238_v5  ;;  %v245_v18 = vshrl.u32 %v204_v9, 16  ;;  %v248_v19 = vshll.u32 %v204_v9, 16  ;;  %1948 = vmatprep.subr.bf16.mxu1 %v2252_v58  ;;  %v2260_v14 = vld [vmem:[%s3037_s4 + $0x10] sm:$0xff]   ;;  %v2262_v2 = vld [vmem:[%s3037_s4 + $0x88] sm:$0xff]   ;;  %v2264_v5 = vld [vmem:[%s3037_s4 + $0x40] sm:$0xff]  }
  0x92   :  { %v187_v22 = vsel %vm39_vm0, %v2410_v26, %v2218_v10  ;;  %v199_v23 = vsel %vm191_vm4, %v188_v21, %v2224_v11  ;;  %v2227_v24 = vpop.permute.xlu0 %2226  ;;  %v2232_v25 = vpop.permute.xlu1 %2231  ;;  %v2263_v4 = vld [vmem:[%s3037_s4 + $0x8] sm:$0xff]   ;;  %v2265_v6 = vld [vmem:[%s3037_s4 + $0x80] sm:$0xff]   ;;  %v2267_v8 = vld [vmem:[%s3038_s6 + $0x78] sm:$0xff]  }
  0x93   :  { %v198_v27 = vsel %vm191_vm4, %v187_v22, %v2223_v12  ;;  %v243_v31 = vsel %vm226_vm5, %v234_v16, %v242_v17  ;;  %v2229_v28 = vunpack.i.h.bf16 %v2227_v24  ;;  %v2228_v29 = vunpack.i.l.bf16 %v2227_v24  ;;  %v2266_v7 = vld [vmem:[%s3037_s4] sm:$0xff]  }
  0x94   :  { %v247_v30 = vrot.slane %v245_v18, 3  ;;  %v250_v32 = vrot.slane %v248_v19, 4  ;;  %v205_v33 = vpack.c.bf16 %v199_v23, %v198_v27  ;;  %2073 = vmatmul.mubr.msk.bf16.vlgmr.msra.gmra.mxu0 %vm307_vm6, %v243_v31  ;;  %v2234_v34 = vunpack.i.h.bf16 %v2232_v25  ;;  %1949 = vmatpush3.bf16.msra.mxu1 %v2254_v60  ;;  %v2632_v9 = vld [vmem:[%s3039_s3] ss:$0 sm:$0xff] }
  0x95   :  { %v190_v35 = vsel %vm39_vm0, %v2437_v50, %v2229_v28  ;;  %v189_v26 = vsel %vm39_vm0, %v2421_v36, %v2228_v29  ;;  %v2233_v37 = vunpack.i.l.bf16 %v2232_v25  ;;  %2076 = vmatprep.mubr.msk.bf16.mxu0 %vm2294_vm3, %v2291_v3  ;;  %2093 = vmatpush3.bf16.msra.mxu0 %v2243_v20 }
  0x96   :  { %2094 = vmatprep.subr.bf16.mxu0 %v2291_v3  ;;  %v254_v39 = vshrl.u32 %v205_v33, 16  ;;  %v257_v40 = vshll.u32 %v205_v33, 16  ;;  %v251_v41 = vor.u32 %v250_v32, %v247_v30  ;;  %v201_v50 = vsel %vm191_vm4, %v190_v35, %v2234_v34  ;;  %1950 = vmatprep.subr.bf16.mxu1 %v2255_v61 }
  0x97   :  { %v200_v42 = vsel %vm191_vm4, %v189_v26, %v2233_v37 }
  0x98   :  { %v256_v36 = vrot.slane %v254_v39, 3  ;;  %v259_v43 = vrot.slane %v257_v40, 4  ;;  %v206_v44 = vpack.c.bf16 %v201_v50, %v200_v42  ;;  %v252_v45 = vsel %vm226_vm5, %v242_v17, %v251_v41  ;;  %1951 = vmatpush3.bf16.msra.mxu1 %v2257_v63 }
  0x99   :  { %2095 = vmatpush3.bf16.msra.mxu0 %v2246_v38  ;;  %1952 = vmatprep.subr.bf16.mxu1 %v2258_v0 }
  0x9a   :  { %2096 = vmatprep.subr.bf16.mxu0 %v2291_v3  ;;  %v263_v46 = vshrl.u32 %v206_v44, 16  ;;  %v266_v47 = vshll.u32 %v206_v44, 16  ;;  %v260_v48 = vor.u32 %v259_v43, %v256_v36 }
  0x9c   :  { %2077 = vmatmul.mubr.msk.bf16.gmra.mxu0 %vm307_vm6, %v252_v45  ;;  %v265_v49 = vrot.slane %v263_v46, 3  ;;  %v268_v51 = vrot.slane %v266_v47, 4  ;;  %v261_v13 = vsel %vm226_vm5, %v251_v41, %v260_v48  ;;  %1953 = vmatpush3.bf16.msra.mxu1 %v2260_v14 }
  0x9d   :  { %2080 = vmatprep.mubr.msk.bf16.mxu0 %vm2294_vm3, %v2291_v3  ;;  %2097 = vmatpush3.bf16.msra.mxu0 %v2250_v56 }
  0x9e   :  { %v269_v52 = vor.u32 %v268_v51, %v265_v49  ;;  %2098 = vmatprep.subr.bf16.mxu0 %v2291_v3  ;;  %1954 = vmatprep.subr.bf16.mxu1 %v2261_v1 }
  0x9f   :  { %v2636_v20 = vpop.permute.xlu1 %411  ;;  %v2638_v22 = vpop.permute.xlu0 %406 }
  0xa0   :  { %v270_v53 = vsel %vm226_vm5, %v260_v48, %v269_v52  ;;  %1955 = vmatpush3.bf16.msra.mxu1 %v2263_v4 }
  0xa1   :  { %2099 = vmatpush3.bf16.msra.mxu0 %v2253_v59  ;;  %1956 = vmatprep.subr.bf16.mxu1 %v2264_v5 }
  0xa2   :  { %2100 = vmatprep.subr.bf16.mxu0 %v2291_v3 }
  0xa3   :  { %v2643_v33 = vpop.permute.xlu1 %416  ;;  %v2652_v50 = vpop.permute.xlu0 %421 }
  0xa4   :  { %2081 = vmatmul.mubr.msk.bf16.gmra.mxu0 %vm307_vm6, %v261_v13  ;;  %1957 = vmatpush3.bf16.msra.mxu1 %v2266_v7 }
  0xa5   :  { %2084 = vmatprep.mubr.msk.bf16.mxu0 %vm2294_vm3, %v2291_v3  ;;  %2101 = vmatpush3.bf16.msra.mxu0 %v2256_v62 }
  0xa6   :  { %2102 = vmatprep.subr.bf16.mxu0 %v2291_v3  ;;  %2001 = vmatprep.subr.bf16.mxu1 %v2267_v8 }
  0xa7   :  { %v2662_v56 = vpop.permute.xlu1 %426  ;;  %v2673_v7 = vpop.permute.xlu0 %431 }
  0xa9   :  { %2103 = vmatpush3.bf16.msra.mxu0 %v2259_v15 }
  0xaa   :  { %2104 = vmatprep.subr.bf16.mxu0 %v2291_v3 }
  0xac   :  { %2085 = vmatmul.mubr.msk.bf16.gmra.mxu0 %vm307_vm6, %v270_v53 }
  0xad   :  { %2088 = vmatprep.mubr.msk.bf16.mxu0 %vm2294_vm3, %v2291_v3  ;;  %2105 = vmatpush3.bf16.msra.mxu0 %v2262_v2 }
  0xae   :  { %2106 = vmatprep.subr.bf16.mxu0 %v2291_v3 }
  0xb1   :  { %2107 = vmatpush3.bf16.msra.mxu0 %v2265_v6 }
  0xb2   :  { %2128 = vmatprep.subr.bf16.mxu0 %v2291_v3 }
  0xb4   :  { %2089 = vmatmul.mubr.msk.bf16.gmra.mxu0 %vm307_vm6, %v269_v52 }
  0xb5   :  { %2108 = vmatprep.mubr.msk.bf16.mxu0 %vm2294_vm3, %v2291_v3 }
 0x154   :  { %v357_v10 = vpop.f32.mrf.mxu0 }
 0x155   :  { %v358_v11 = vadd.f32 %v2632_v9, %v357_v10 }
 0x156   :  { %v2074_v12 = vpop.f32.mrf.mxu0 }
 0x157   :  { %v395_v16 = vmax.f32 %v358_v11, 0.0 }
 0x158   :  { %v360_v21 = vpop.f32.mrf.mxu0 }
 0x159   :  { %v361_v17 = vadd.f32 %v2632_v9, %v360_v21  ;;  %v449_v24 = vmul.f32 %v2638_v22, %v395_v16 }
 0x15a   :  { %v2075_v18 = vpop.f32.mrf.mxu0 }
 0x15b   :  { %v396_v19 = vmax.f32 %v361_v17, 0.0  ;;  %v562_v35 = vrot.slane %v449_v24, 4  ;;  %v533_v38 = vrot.slane %v449_v24, 2  ;;  %v591_v51 = vpack.c.bf16 %v449_v24, %v2291_v3  ;;  %v2268_v18 = vld [vmem:[%s3038_s6 + $0x38] sm:$0xff]  }
 0x15c   :  { %v365_v23 = vpop.f32.mrf.mxu0 }
 0x15d   :  { %v450_v25 = vmul.f32 %v2636_v20, %v396_v19  ;;  %v366_v27 = vadd.f32 %v2632_v9, %v365_v23  ;;  %v677_v6 = vrot.slane %v591_v51, 3 }
 0x15e   :  { %v2078_v31 = vpop.f32.mrf.mxu0 }
 0x15f   :  { %v1863_v28 = vpack.c.bf16 %v450_v25, %v449_v24  ;;  %v563_v29 = vrot.slane %v450_v25, 4  ;;  %v397_v30 = vmax.f32 %v366_v27, 0.0  ;;  %v534_v32 = vrot.slane %v450_v25, 2 }
 0x160   :  { %v368_v34 = vpop.f32.mrf.mxu0 }
 0x161   :  { %1864 = vst [vmem:[%s3040_s8] sm:$0xff] %v1863_v28   ;;  %v451_v26 = vmul.f32 %v2643_v33, %v397_v30  ;;  %v369_v37 = vadd.f32 %v2632_v9, %v368_v34  ;;  %v535_v41 = vsel %vm131_vm2, %v533_v38, %v534_v32  ;;  %v564_v42 = vsel %vm561_vm7, %v562_v35, %v563_v29 }
 0x162   :  { %v2079_v39 = vpop.f32.mrf.mxu0  ;;  %v592_v48 = vpack.c.bf16 %v535_v41, %v533_v38  ;;  %v593_v49 = vpack.c.bf16 %v564_v42, %v562_v35 }
 0x163   :  { %v398_v40 = vmax.f32 %v369_v37, 0.0  ;;  %v565_v36 = vrot.slane %v451_v26, 4  ;;  %v536_v44 = vrot.slane %v451_v26, 2  ;;  %v594_v13 = vpack.c.bf16 %v451_v26, %v450_v25 }
 0x164   :  { %v373_v43 = vpop.f32.mrf.mxu0  ;;  %v680_v4 = vrot.slane %v592_v48, 3  ;;  %v683_v5 = vrot.slane %v593_v49, 3 }
 0x165   :  { %v2655_v45 = vmul.f32 %v2652_v50, %v398_v40  ;;  %v374_v46 = vadd.f32 %v2632_v9, %v373_v43  ;;  %v537_v58 = vsel %vm131_vm2, %v534_v32, %v536_v44  ;;  %v566_v59 = vsel %vm561_vm7, %v563_v29, %v565_v36  ;;  %v2689_v32 = vpop.permute.xlu1 %436 }
 0x166   :  { %v2082_v47 = vpop.f32.mrf.mxu0  ;;  %v678_v1 = vrot.slane %v594_v13, 3 }
 0x167   :  { %v1868_v52 = vpack.c.bf16 %v2655_v45, %v451_v26  ;;  %v567_v53 = vrot.slane %v2655_v45, 4  ;;  %v399_v54 = vmax.f32 %v374_v46, 0.0  ;;  %v538_v55 = vrot.slane %v2655_v45, 2 }
 0x168   :  { %v376_v57 = vpop.f32.mrf.mxu0  ;;  %v679_v25 = vsel %vm676_vm8, %v677_v6, %v678_v1 }
 0x169   :  { %1920 = vst [vmem:[%s3040_s8 + $0x8] sm:$0xff] %v1868_v52   ;;  %v453_v60 = vmul.f32 %v2662_v56, %v399_v54  ;;  %v377_v61 = vadd.f32 %v2632_v9, %v376_v57  ;;  %v539_v62 = vsel %vm131_vm2, %v536_v44, %v538_v55  ;;  %v568_v63 = vsel %vm561_vm7, %v565_v36, %v567_v53 }
 0x16a   :  { %v2083_v0 = vpop.f32.mrf.mxu0  ;;  %v595_v15 = vpack.c.bf16 %v539_v62, %v537_v58  ;;  %v596_v14 = vpack.c.bf16 %v568_v63, %v566_v59  ;;  %v2710_v63 = vpop.permute.xlu1 %446 }
 0x16b   :  { %v400_v2 = vmax.f32 %v377_v61, 0.0  ;;  %v540_v8 = vrot.slane %v453_v60, 2  ;;  %v569_v10 = vrot.slane %v453_v60, 4  ;;  %v597_v27 = vpack.c.bf16 %v453_v60, %v2655_v45  ;;  %v2702_v45 = vpop.permute.xlu0 %441 }
 0x16c   :  { %v381_v11 = vpop.f32.mrf.mxu0  ;;  %v681_v12 = vrot.slane %v595_v15, 3  ;;  %v684_v21 = vrot.slane %v596_v14, 3  ;;  %v579_v15 = vrot.slane %v2291_v3, 4 }
 0x16d   :  { %v2676_v16 = vmul.f32 %v2673_v7, %v400_v2  ;;  %v382_v17 = vadd.f32 %v2632_v9, %v381_v11  ;;  %v541_v35 = vsel %vm131_vm2, %v538_v55, %v540_v8  ;;  %v570_v26 = vsel %vm561_vm7, %v567_v53, %v569_v10 }
 0x16e   :  { %v2086_v19 = vpop.f32.mrf.mxu0  ;;  %v682_v23 = vsel %vm676_vm8, %v680_v4, %v681_v12  ;;  %v685_v24 = vsel %vm676_vm8, %v683_v5, %v684_v21  ;;  %v686_v43 = vrot.slane %v597_v27, 3 }
 0x16f   :  { %v1873_v31 = vpack.c.bf16 %v2676_v16, %v453_v60  ;;  %v542_v28 = vrot.slane %v2676_v16, 2  ;;  %v571_v29 = vrot.slane %v2676_v16, 4  ;;  %v401_v30 = vmax.f32 %v382_v17, 0.0  ;;  %895 = vmatprep.mubr.bf16.mxu1 %v682_v23  ;;  %2109 = vmatmul.mubr.bf16.vlgmr.msra.gmra.mxu0 %v685_v24 }
 0x170   :  { %v384_v34 = vpop.f32.mrf.mxu0  ;;  %896 = vmatmul.mubr.bf16.vlgmr.msra.gmra.mxu1 %v679_v25  ;;  %2112 = vmatprep.mubr.msk.bf16.mxu0 %vm2294_vm3, %v2291_v3  ;;  %v687_v57 = vsel %vm676_vm8, %v678_v1, %v686_v43 }
 0x171   :  { %1921 = vst [vmem:[%s3040_s8 + $0x10] sm:$0xff] %v1873_v31   ;;  %v455_v37 = vmul.f32 %v2689_v32, %v401_v30  ;;  %v385_v38 = vadd.f32 %v2632_v9, %v384_v34  ;;  %v543_v39 = vsel %vm131_vm2, %v540_v8, %v542_v28  ;;  %v572_v40 = vsel %vm561_vm7, %v569_v10, %v571_v29 }
 0x172   :  { %2002 = vmatpush3.bf16.msra.mxu1 %v2268_v18  ;;  %v2087_v41 = vpop.f32.mrf.mxu0  ;;  %v598_v42 = vpack.c.bf16 %v543_v39, %v541_v35  ;;  %v599_v36 = vpack.c.bf16 %v572_v40, %v570_v26  ;;  %v2744_v39 = vld [vmem:[%s3038_s6 + $0xb8] sm:$0xff]   ;;  %v2269_v40 = vld [vmem:[%s3038_s6 + $0x70] sm:$0xff]  }
 0x173   :  { %v402_v44 = vmax.f32 %v385_v38, 0.0  ;;  %v544_v46 = vrot.slane %v455_v37, 2  ;;  %v573_v51 = vrot.slane %v455_v37, 4  ;;  %v600_v58 = vpack.c.bf16 %v455_v37, %v2676_v16  ;;  %2129 = vmatpush3.bf16.msra.mxu0 %v2744_v39  ;;  %v2754_v41 = vld [vmem:[%s3038_s6 + $0xb0] sm:$0xff]   ;;  %2003 = vmatprep.subr.bf16.mxu1 %v2269_v40 }
 0x174   :  { %v389_v47 = vpop.f32.mrf.mxu0  ;;  %v688_v48 = vrot.slane %v598_v42, 3  ;;  %v690_v49 = vrot.slane %v599_v36, 3  ;;  %2130 = vmatprep.subr.bf16.mxu0 %v2291_v3  ;;  %v2270_v42 = vld [vmem:[%s3038_s6 + $0x30] sm:$0xff]   ;;  %v2272_v36 = vld [vmem:[%s3038_s6 + $0x68] sm:$0xff]  }
 0x175   :  { %v456_v13 = vmul.f32 %v2702_v45, %v402_v44  ;;  %v390_v52 = vadd.f32 %v2632_v9, %v389_v47  ;;  %v545_v9 = vsel %vm131_vm2, %v542_v28, %v544_v46  ;;  %v574_v2 = vsel %vm561_vm7, %v571_v29, %v573_v51  ;;  %v2273_v44 = vld [vmem:[%s3038_s6 + $0x28] sm:$0xff]   ;;  %v2780_v47 = vld [vmem:[%s3038_s6 + $0xa0] sm:$0xff]  }
 0x176   :  { %v2090_v53 = vpop.f32.mrf.mxu0  ;;  %v689_v54 = vsel %vm676_vm8, %v681_v12, %v688_v48  ;;  %v691_v55 = vsel %vm676_vm8, %v684_v21, %v690_v49  ;;  %v692_v12 = vrot.slane %v600_v58, 3  ;;  %2004 = vmatpush3.bf16.msra.mxu1 %v2270_v42  ;;  %v2286_v58 = vld [vmem:[%s3038_s6 + $0x8] sm:$0xff]  }
 0x177   :  { %v1878_v59 = vpack.c.bf16 %v456_v13, %v455_v37  ;;  %v546_v60 = vrot.slane %v456_v13, 2  ;;  %v575_v61 = vrot.slane %v456_v13, 4  ;;  %v403_v62 = vmax.f32 %v390_v52, 0.0  ;;  %903 = vmatprep.mubr.bf16.mxu1 %v689_v54  ;;  %2113 = vmatmul.mubr.bf16.gmra.mxu0 %v691_v55  ;;  %v2281_v52 = vld [vmem:[%s3038_s6 + $0x50] sm:$0xff]   ;;  %v2285_v55 = vld [vmem:[%s3038_s6 + $0x48] sm:$0xff]  }
 0x178   :  { %v392_v0 = vpop.f32.mrf.mxu0  ;;  %904 = vmatmul.mubr.bf16.gmra.mxu1 %v687_v57  ;;  %2116 = vmatprep.mubr.msk.bf16.mxu0 %vm2294_vm3, %v2291_v3  ;;  %v693_v28 = vsel %vm676_vm8, %v686_v43, %v692_v12  ;;  %v2767_v43 = vld [vmem:[%s3038_s6 + $0xa8] sm:$0xff]   ;;  %v2806_v53 = vld [vmem:[%s3038_s6 + $0x90] sm:$0xff]  }
 0x179   :  { %1922 = vst [vmem:[%s3040_s8 + $0x18] sm:$0xff] %v1878_v59   ;;  %v457_v14 = vmul.f32 %v2710_v63, %v403_v62  ;;  %v547_v1 = vsel %vm131_vm2, %v544_v46, %v546_v60  ;;  %v576_v4 = vsel %vm561_vm7, %v573_v51, %v575_v61  ;;  %2131 = vmatpush3.bf16.msra.mxu0 %v2754_v41  ;;  %v2275_v46 = vld [vmem:[%s3038_s6 + $0x60] sm:$0xff]   ;;  %v2793_v51 = vld [vmem:[%s3038_s6 + $0x98] sm:$0xff]   ;;  %v2283_v54 = vld [vmem:[%s3038_s6 + $0x10] sm:$0xff]  }
 0x17a   :  { %v2091_v5 = vpop.f32.mrf.mxu0  ;;  %v601_v6 = vpack.c.bf16 %v547_v1, %v545_v9  ;;  %v602_v8 = vpack.c.bf16 %v576_v4, %v574_v2  ;;  %2132 = vmatprep.subr.bf16.mxu0 %v2291_v3  ;;  %2005 = vmatprep.subr.bf16.mxu1 %v2272_v36  ;;  %v2819_v57 = vld [vmem:[%s3038_s6 + $0x88] sm:$0xff]   ;;  %v2288_v59 = vld [vmem:[%s3038_s6 + $0x40] sm:$0xff]  }
 0x17b   :  { %v1841_v10 = vpack.c.bf16 %v457_v14, %v457_v14  ;;  %v577_v11 = vrot.slane %v457_v14, 4  ;;  %v548_v21 = vrot.slane %v457_v14, 2  ;;  %v603_v29 = vpack.c.bf16 %v457_v14, %v456_v13  ;;  %2006 = vmatpush3.bf16.msra.mxu1 %v2273_v44  ;;  %v2279_v13 = vld [vmem:[%s3038_s6 + $0x18] sm:$0xff]  }
 0x17c   :  { %v694_v16 = vrot.slane %v601_v6, 3  ;;  %v696_v17 = vrot.slane %v602_v8, 3  ;;  %2007 = vmatprep.subr.bf16.mxu1 %v2275_v46 }
 0x17d   :  { %512 = vst [vmem:[%s3040_s8 + $0x20] sm:$0xf] %v1841_v10  ;;  %v549_v18 = vsel %vm131_vm2, %v546_v60, %v548_v21  ;;  %v578_v19 = vsel %vm561_vm7, %v575_v61, %v577_v11  ;;  %v580_v23 = vsel %vm561_vm7, %v577_v11, %v579_v15  ;;  %v698_v26 = vrot.slane %v603_v29, 3  ;;  %2133 = vmatpush3.bf16.msra.mxu0 %v2767_v43  ;;  %v2832_v60 = vld [vmem:[%s3038_s6 + $0x80] sm:$0xff]  }
 0x17e   :  { %v695_v24 = vsel %vm676_vm8, %v688_v48, %v694_v16  ;;  %v697_v25 = vsel %vm676_vm8, %v690_v49, %v696_v17  ;;  %v604_v27 = vpack.c.bf16 %v548_v21, %v549_v18  ;;  %v605_v31 = vpack.c.bf16 %v580_v23, %v578_v19  ;;  %2134 = vmatprep.subr.bf16.mxu0 %v2291_v3  ;;  %v2276_v48 = vld [vmem:[%s3038_s6 + $0x20] sm:$0xff]   ;;  %v2278_v49 = vld [vmem:[%s3038_s6 + $0x58] sm:$0xff]  }
 0x17f   :  { %911 = vmatprep.mubr.bf16.mxu1 %v695_v24  ;;  %2117 = vmatmul.mubr.bf16.gmra.mxu0 %v697_v25  ;;  %v699_v38 = vsel %vm676_vm8, %v692_v12, %v698_v26  ;;  %v2289_v61 = vld [vmem:[%s3038_s6] sm:$0xff]  }
 0x180   :  { %912 = vmatmul.mubr.bf16.gmra.mxu1 %v693_v28  ;;  %v700_v30 = vrot.slane %v604_v27, 3  ;;  %2120 = vmatprep.mubr.msk.bf16.mxu0 %vm2294_vm3, %v2291_v3  ;;  %v702_v35 = vrot.slane %v605_v31, 3  ;;  %v2842_v15 = vld [vmem:[%s3041_s5] ss:$0 sm:$0xff] }
 0x181   :  { %2135 = vmatpush3.bf16.msra.mxu0 %v2780_v47  ;;  %2008 = vmatpush3.bf16.msra.mxu1 %v2276_v48 }
 0x182   :  { %v701_v34 = vsel %vm676_vm8, %v694_v16, %v700_v30  ;;  %v703_v37 = vsel %vm676_vm8, %v696_v17, %v702_v35  ;;  %2136 = vmatprep.subr.bf16.mxu0 %v2291_v3  ;;  %2009 = vmatprep.subr.bf16.mxu1 %v2278_v49 }
 0x183   :  { %919 = vmatprep.mubr.bf16.mxu1 %v701_v34 }
 0x185   :  { %2137 = vmatpush3.bf16.msra.mxu0 %v2793_v51  ;;  %2010 = vmatpush3.bf16.msra.mxu1 %v2279_v13 }
 0x186   :  { %2138 = vmatprep.subr.bf16.mxu0 %v2291_v3  ;;  %2011 = vmatprep.subr.bf16.mxu1 %v2281_v52 }
 0x187   :  { %2121 = vmatmul.mubr.bf16.gmra.mxu0 %v703_v37 }
 0x188   :  { %920 = vmatmul.mubr.bf16.gmra.mxu1 %v699_v38  ;;  %2124 = vmatprep.mubr.msk.bf16.mxu0 %vm2294_vm3, %v2291_v3 }
 0x189   :  { %927 = vmatprep.mubr.bf16.mxu1 %v700_v30  ;;  %2139 = vmatpush3.bf16.msra.mxu0 %v2806_v53 }
 0x18a   :  { %2012 = vmatpush3.bf16.msra.mxu1 %v2283_v54  ;;  %2140 = vmatprep.subr.bf16.mxu0 %v2291_v3 }
 0x18b   :  { %2013 = vmatprep.subr.bf16.mxu1 %v2285_v55 }
 0x18d   :  { %2141 = vmatpush3.bf16.msra.mxu0 %v2819_v57 }
 0x18e   :  { %2014 = vmatpush3.bf16.msra.mxu1 %v2286_v58  ;;  %2142 = vmatprep.subr.bf16.mxu0 %v2291_v3 }
 0x18f   :  { %2125 = vmatmul.mubr.bf16.gmra.mxu0 %v702_v35  ;;  %2015 = vmatprep.subr.bf16.mxu1 %v2288_v59 }
 0x190   :  { %928 = vmatmul.mubr.bf16.gmra.mxu1 %v698_v26  ;;  %2144 = vmatprep.mubr.msk.bf16.mxu0 %vm2294_vm3, %v2291_v3 }
 0x191   :  { %2143 = vmatpush3.bf16.msra.mxu0 %v2832_v60 }
 0x192   :  { %2016 = vmatpush3.bf16.msra.mxu1 %v2289_v61 }
 0x193   :  { %2164 = vmatprep.subr.bf16.mxu1 %v2291_v3 }
 0x22f   :  { %v969_v62 = vpop.f32.mrf.mxu0 }
 0x230   :  { %v1958_v0 = vpop.f32.mrf.mxu1 }
 0x231   :  { %v2110_v9 = vpop.f32.mrf.mxu0 }
 0x232   :  { %v1959_v14 = vpop.f32.mrf.mxu1 }
 0x233   :  { %v1960_v1 = vadd.f32 %v1959_v14, %v1958_v0  ;;  %v972_v2 = vpop.f32.mrf.mxu0 }
 0x234   :  { %v1961_v4 = vpop.f32.mrf.mxu1 }
 0x235   :  { %v898_v5 = vadd.f32 %v1960_v1, %v2842_v15  ;;  %v2111_v6 = vpop.f32.mrf.mxu0 }
 0x236   :  { %v1962_v8 = vpop.f32.mrf.mxu1 }
 0x237   :  { %v970_v10 = vadd.f32 %v969_v62, %v898_v5  ;;  %v1963_v11 = vadd.f32 %v1962_v8, %v1961_v4  ;;  %v977_v12 = vpop.f32.mrf.mxu0 }
 0x238   :  { %v1964_v21 = vpop.f32.mrf.mxu1 }
 0x239   :  { %v1007_v16 = vmax.f32 %v970_v10, 0.0  ;;  %v901_v17 = vadd.f32 %v1963_v11, %v2842_v15  ;;  %v2114_v18 = vpop.f32.mrf.mxu0 }
 0x23a   :  { %v1965_v19 = vpop.f32.mrf.mxu1 }
 0x23b   :  { %v1016_v23 = vmul.f32 %v1007_v16, %v2638_v22  ;;  %v973_v24 = vadd.f32 %v972_v2, %v901_v17  ;;  %v1966_v25 = vadd.f32 %v1965_v19, %v1964_v21  ;;  %v980_v27 = vpop.f32.mrf.mxu0 }
 0x23c   :  { %v1967_v31 = vpop.f32.mrf.mxu1 }
 0x23d   :  { %v1842_v28 = vpack.c.bf16 %v1016_v23, %v1016_v23  ;;  %v1008_v29 = vmax.f32 %v973_v24, 0.0  ;;  %v906_v30 = vadd.f32 %v1966_v25, %v2842_v15  ;;  %v2115_v34 = vpop.f32.mrf.mxu0  ;;  %v1160_v26 = vpack.c.bf16 %v1016_v23, %v2291_v3 }
 0x23e   :  { %v1968_v35 = vpop.f32.mrf.mxu1  ;;  %v1102_v36 = vrot.slane %v1016_v23, 3  ;;  %v1131_v55 = vrot.slane %v1016_v23, 6 }
 0x23f   :  { %1781 = vst [vmem:[%s3040_s8 + $0x24] sm:$0xf] %v1842_v28  ;;  %v1017_v37 = vmul.f32 %v1008_v29, %v2636_v20  ;;  %v978_v38 = vadd.f32 %v977_v12, %v906_v30  ;;  %v1969_v22 = vadd.f32 %v1968_v35, %v1967_v31  ;;  %v985_v40 = vpop.f32.mrf.mxu0  ;;  %v1232_v44 = vshrl.u32 %v1160_v26, 16 }
 0x240   :  { %v1970_v42 = vpop.f32.mrf.mxu1  ;;  %v1235_v46 = vshll.u32 %v1160_v26, 16 }
 0x241   :  { %v1103_v48 = vrot.slane %v1017_v37, 3  ;;  %v1132_v49 = vrot.slane %v1017_v37, 6  ;;  %v1009_v13 = vmax.f32 %v978_v38, 0.0  ;;  %v909_v52 = vadd.f32 %v1969_v22, %v2842_v15  ;;  %v2118_v54 = vpop.f32.mrf.mxu0 }
 0x242   :  { %v1971_v58 = vpop.f32.mrf.mxu1  ;;  %v2854_v59 = vrot.slane %v1232_v44, 2  ;;  %v2856_v61 = vrot.slane %v1235_v46, 3 }
 0x243   :  { %v1018_v20 = vmul.f32 %v1009_v13, %v2643_v33  ;;  %v981_v62 = vadd.f32 %v980_v27, %v909_v52  ;;  %v1972_v0 = vadd.f32 %v1971_v58, %v1970_v42  ;;  %v988_v9 = vpop.f32.mrf.mxu0  ;;  %v1104_v14 = vsel %vm676_vm8, %v1102_v36, %v1103_v48 }
 0x244   :  { %v1973_v1 = vpop.f32.mrf.mxu1  ;;  %v1161_v2 = vpack.c.bf16 %v1104_v14, %v1102_v36  ;;  %v1133_v4 = vsel %vm1130_vm9, %v1131_v55, %v1132_v49  ;;  %v1238_v25 = vor.u32 %v2856_v61, %v2854_v59 }
 0x245   :  { %v2861_v5 = vpack.c.bf16 %v1018_v20, %v1017_v37  ;;  %v1105_v6 = vrot.slane %v1018_v20, 3  ;;  %v1134_v8 = vrot.slane %v1018_v20, 6  ;;  %v1010_v10 = vmax.f32 %v981_v62, 0.0  ;;  %v2119_v11 = vpop.f32.mrf.mxu0 }
 0x246   :  { %v914_v12 = vadd.f32 %v1972_v0, %v2842_v15  ;;  %v1974_v21 = vpop.f32.mrf.mxu1  ;;  %v1249_v16 = vshrl.u32 %v1161_v2, 16  ;;  %v1252_v33 = vshll.u32 %v1161_v2, 16  ;;  %v1162_v17 = vpack.c.bf16 %v1133_v4, %v1131_v55 }
 0x247   :  { %1923 = vst [vmem:[%s3040_s8 + $0x28] sm:$0xff] %v2861_v5   ;;  %v2869_v18 = vmul.f32 %v1010_v10, %v2652_v50  ;;  %v1975_v19 = vadd.f32 %v1974_v21, %v1973_v1  ;;  %v993_v23 = vpop.f32.mrf.mxu0  ;;  %v1106_v24 = vsel %vm676_vm8, %v1103_v48, %v1105_v6  ;;  %v1240_v36 = vshrl.u32 %v2861_v5, 16 }
 0x248   :  { %v986_v27 = vadd.f32 %v985_v40, %v914_v12  ;;  %v1976_v31 = vpop.f32.mrf.mxu1  ;;  %v2874_v28 = vrot.slane %v1249_v16, 2  ;;  %v2876_v29 = vrot.slane %v1252_v33, 3  ;;  %v1266_v30 = vshrl.u32 %v1162_v17, 16 }
 0x249   :  { %v1107_v34 = vrot.slane %v2869_v18, 3  ;;  %v1136_v35 = vrot.slane %v2869_v18, 6  ;;  %v917_v50 = vadd.f32 %v1975_v19, %v2842_v15  ;;  %v2122_v26 = vpop.f32.mrf.mxu0  ;;  %v1269_v37 = vshll.u32 %v1162_v17, 16 }
 0x24a   :  { %v1011_v38 = vmax.f32 %v986_v27, 0.0  ;;  %v1977_v22 = vpop.f32.mrf.mxu1  ;;  %v1255_v42 = vor.u32 %v2876_v29, %v2874_v28  ;;  %v1135_v40 = vsel %vm1130_vm9, %v1132_v49, %v1134_v8  ;;  %v1268_v20 = vrot.slane %v1266_v30, 2 }
 0x24b   :  { %v989_v44 = vadd.f32 %v988_v9, %v917_v50  ;;  %v1978_v46 = vadd.f32 %v1977_v22, %v1976_v31  ;;  %v996_v48 = vpop.f32.mrf.mxu0  ;;  %v1108_v13 = vsel %vm676_vm8, %v1105_v6, %v1107_v34  ;;  %v1137_v52 = vsel %vm1130_vm9, %v1134_v8, %v1136_v35 }
 0x24c   :  { %v2892_v54 = vmul.f32 %v1011_v38, %v2662_v56  ;;  %v1979_v55 = vpop.f32.mrf.mxu1  ;;  %v1164_v58 = vpack.c.bf16 %v1108_v13, %v1106_v24  ;;  %v1165_v49 = vpack.c.bf16 %v1137_v52, %v1135_v40  ;;  %v1271_v14 = vrot.slane %v1269_v37, 3 }
 0x24d   :  { %v1012_v62 = vmax.f32 %v989_v44, 0.0  ;;  %v922_v0 = vadd.f32 %v1978_v46, %v2842_v15  ;;  %v2123_v9 = vpop.f32.mrf.mxu0  ;;  %v1242_v1 = vrot.slane %v1240_v36, 2  ;;  %v1243_v8 = vshll.u32 %v2861_v5, 16 }
 0x24e   :  { %v2897_v2 = vpack.c.bf16 %v2892_v54, %v2869_v18  ;;  %v1109_v4 = vrot.slane %v2892_v54, 3  ;;  %v1980_v6 = vpop.f32.mrf.mxu1  ;;  %v1257_v56 = vshrl.u32 %v1164_v58, 16  ;;  %v1260_v16 = vshll.u32 %v1164_v58, 16 }
 0x24f   :  { %v2902_v10 = vmul.f32 %v1012_v62, %v2673_v7  ;;  %v994_v11 = vadd.f32 %v993_v23, %v922_v0  ;;  %v1981_v12 = vadd.f32 %v1980_v6, %v1979_v55  ;;  %v1001_v21 = vpop.f32.mrf.mxu0  ;;  %v1138_v33 = vrot.slane %v2892_v54, 6 }
 0x250   :  { %1924 = vst [vmem:[%s3040_s8 + $0x30] sm:$0xff] %v2897_v2   ;;  %v1982_v17 = vpop.f32.mrf.mxu1  ;;  %v1259_v19 = vrot.slane %v1257_v56, 2  ;;  %v1274_v24 = vshrl.u32 %v1165_v49, 16  ;;  %v1277_v27 = vshll.u32 %v1165_v49, 16  ;;  %v1272_v30 = vor.u32 %v1271_v14, %v1268_v20 }
 0x251   :  { %v1111_v5 = vrot.slane %v2902_v10, 3  ;;  %v1013_v31 = vmax.f32 %v994_v11, 0.0  ;;  %v925_v7 = vadd.f32 %v1981_v12, %v2842_v15  ;;  %v2126_v23 = vpop.f32.mrf.mxu0  ;;  %v1262_v26 = vrot.slane %v1260_v16, 3 }
 0x252   :  { %v1983_v50 = vpop.f32.mrf.mxu1  ;;  %v1276_v37 = vrot.slane %v1274_v24, 2  ;;  %v1279_v38 = vrot.slane %v1277_v27, 3  ;;  %v1245_v22 = vrot.slane %v1243_v8, 3  ;;  %v1140_v40 = vrot.slane %v2902_v10, 6 }
 0x253   :  { %v1022_v36 = vmul.f32 %v1013_v31, %v2689_v32  ;;  %v997_v44 = vadd.f32 %v996_v48, %v925_v7  ;;  %v1984_v46 = vadd.f32 %v1983_v50, %v1982_v17  ;;  %v1004_v13 = vpop.f32.mrf.mxu0  ;;  %v1263_v54 = vor.u32 %v1262_v26, %v1259_v19 }
 0x254   :  { %v1985_v52 = vpop.f32.mrf.mxu1  ;;  %v2913_v55 = vor.u32 %v1279_v38, %v1276_v37  ;;  %v1246_v58 = vor.u32 %v1245_v22, %v1242_v1  ;;  %v1112_v49 = vsel %vm676_vm8, %v1109_v4, %v1111_v5  ;;  %v1110_v32 = vsel %vm676_vm8, %v1107_v34, %v1109_v4 }
 0x255   :  { %v2917_v20 = vpack.c.bf16 %v1022_v36, %v2902_v10  ;;  %v1113_v62 = vrot.slane %v1022_v36, 3  ;;  %v1014_v0 = vmax.f32 %v997_v44, 0.0  ;;  %v2127_v9 = vpop.f32.mrf.mxu0  ;;  %v1142_v48 = vrot.slane %v1022_v36, 6 }
 0x256   :  { %v930_v14 = vadd.f32 %v1984_v46, %v2842_v15  ;;  %v1264_v1 = vsel %vm1230_vm10, %v1255_v42, %v1263_v54  ;;  %v1281_v6 = vsel %vm1230_vm10, %v1272_v30, %v2913_v55  ;;  %v1986_v56 = vpop.f32.mrf.mxu1  ;;  %v1247_v15 = vsel %vm1230_vm10, %v1238_v25, %v1246_v58 }
 0x257   :  { %1925 = vst [vmem:[%s3040_s8 + $0x38] sm:$0xff] %v2917_v20   ;;  %v2934_v8 = vmul.f32 %v1014_v0, %v2702_v45  ;;  %1554 = vmatprep.mubr.bf16.mxu1 %v1264_v1  ;;  %2145 = vmatmul.mubr.bf16.vlgmr.msra.gmra.mxu0 %v1281_v6  ;;  %v1167_v28 = vpack.c.bf16 %v1112_v49, %v1110_v32  ;;  %v1283_v29 = vshrl.u32 %v2897_v2, 16  ;;  %v1286_v4 = vshll.u32 %v2897_v2, 16 }
 0x258   :  { %v1002_v34 = vadd.f32 %v1001_v21, %v930_v14  ;;  %1555 = vmatmul.mubr.bf16.vlgmr.msra.gmra.mxu1 %v1247_v15  ;;  %2148 = vmatprep.mubr.msk.bf16.mxu0 %vm2294_vm3, %v2291_v3  ;;  %v1139_v45 = vsel %vm1130_vm9, %v1136_v35, %v1138_v33  ;;  %v1141_v42 = vsel %vm1130_vm9, %v1138_v33, %v1140_v40  ;;  %v1310_v23 = vshrl.u32 %v2917_v20, 16 }
 0x259   :  { %v1115_v59 = vrot.slane %v2934_v8, 3  ;;  %v1144_v61 = vrot.slane %v2934_v8, 6  ;;  %2172 = vmatpush3.bf16.msra.mxu1 %v2744_v39  ;;  %v1292_v25 = vshrl.u32 %v1167_v28, 16  ;;  %v1295_v10 = vshll.u32 %v1167_v28, 16 }
 0x25a   :  { %v1015_v11 = vmax.f32 %v1002_v34, 0.0  ;;  %2165 = vmatprep.subr.bf16.mxu1 %v2291_v3  ;;  %v1168_v12 = vpack.c.bf16 %v1141_v42, %v1139_v45  ;;  %v1285_v21 = vrot.slane %v1283_v29, 2  ;;  %v1288_v18 = vrot.slane %v1286_v4, 3 }
 0x25b   :  { %v1294_v16 = vrot.slane %v1292_v25, 2  ;;  %v1297_v35 = vrot.slane %v1295_v10, 3  ;;  %v1114_v33 = vsel %vm676_vm8, %v1111_v5, %v1113_v62  ;;  %v1116_v2 = vsel %vm676_vm8, %v1113_v62, %v1115_v59 }
 0x25c   :  { %v2955_v17 = vmul.f32 %v1015_v11, %v2710_v63  ;;  %v1301_v19 = vshrl.u32 %v1168_v12, 16  ;;  %v1304_v24 = vshll.u32 %v1168_v12, 16  ;;  %v1289_v39 = vor.u32 %v1288_v18, %v1285_v21 }
 0x25d   :  { %2173 = vmatpush3.bf16.msra.mxu1 %v2754_v41  ;;  %v1298_v27 = vor.u32 %v1297_v35, %v1294_v16  ;;  %v1170_v31 = vpack.c.bf16 %v1116_v2, %v1114_v33  ;;  %v1145_v7 = vsel %vm1130_vm9, %v1142_v48, %v1144_v61  ;;  %v1143_v50 = vsel %vm1130_vm9, %v1140_v40, %v1142_v48 }
 0x25e   :  { %v1898_v5 = vpack.c.bf16 %v2955_v17, %v2934_v8  ;;  %v1117_v30 = vrot.slane %v2955_v17, 3  ;;  %v1303_v63 = vrot.slane %v1301_v19, 2  ;;  %2166 = vmatprep.subr.bf16.mxu1 %v2291_v3  ;;  %v1306_v26 = vrot.slane %v1304_v24, 3 }
 0x25f   :  { %v1299_v41 = vsel %vm1230_vm10, %v1263_v54, %v1298_v27  ;;  %v1290_v37 = vsel %vm1230_vm10, %v1246_v58, %v1289_v39  ;;  %v1319_v38 = vshrl.u32 %v1170_v31, 16  ;;  %v1322_v22 = vshll.u32 %v1170_v31, 16 }
 0x260   :  { %1926 = vst [vmem:[%s3040_s8 + $0x40] sm:$0xff] %v1898_v5   ;;  %1562 = vmatprep.mubr.bf16.mxu1 %v1299_v41  ;;  %v1171_v36 = vpack.c.bf16 %v1145_v7, %v1143_v50  ;;  %v1312_v44 = vrot.slane %v1310_v23, 2  ;;  %v1313_v46 = vshll.u32 %v2917_v20, 16  ;;  %v1307_v13 = vor.u32 %v1306_v26, %v1303_v63 }
 0x261   :  { %1563 = vmatmul.mubr.bf16.gmra.mxu1 %v1290_v37  ;;  %v1321_v52 = vrot.slane %v1319_v38, 2  ;;  %v1118_v40 = vsel %vm676_vm8, %v1115_v59, %v1117_v30  ;;  %v1324_v54 = vrot.slane %v1322_v22, 3  ;;  %v1337_v32 = vshrl.u32 %v1898_v5, 16 }
 0x262   :  { %2174 = vmatpush3.bf16.msra.mxu1 %v2767_v43  ;;  %v1328_v58 = vshrl.u32 %v1171_v36, 16  ;;  %v1331_v49 = vshll.u32 %v1171_v36, 16  ;;  %v1315_v62 = vrot.slane %v1313_v46, 3  ;;  %v1308_v0 = vsel %vm1230_vm10, %v2913_v55, %v1307_v13 }
 0x263   :  { %2167 = vmatprep.subr.bf16.mxu1 %v2291_v3  ;;  %v1173_v9 = vpack.c.bf16 %v1117_v30, %v1118_v40  ;;  %v1340_v48 = vshll.u32 %v1898_v5, 16  ;;  %2149 = vmatmul.mubr.bf16.gmra.mxu0 %v1308_v0  ;;  %v1325_v20 = vor.u32 %v1324_v54, %v1321_v52  ;;  %v1339_v45 = vrot.slane %v1337_v32, 2 }
 0x264   :  { %v1330_v14 = vrot.slane %v1328_v58, 2  ;;  %v1333_v1 = vrot.slane %v1331_v49, 3  ;;  %v1316_v6 = vor.u32 %v1315_v62, %v1312_v44  ;;  %2152 = vmatprep.mubr.msk.bf16.mxu0 %vm2294_vm3, %v2291_v3  ;;  %v1146_v4 = vrot.slane %v2955_v17, 6 }
 0x265   :  { %v1346_v43 = vshrl.u32 %v1173_v9, 16  ;;  %v1349_v56 = vshll.u32 %v1173_v9, 16  ;;  %v1326_v15 = vsel %vm1230_vm10, %v1298_v27, %v1325_v20  ;;  %v1342_v42 = vrot.slane %v1340_v48, 3 }
 0x266   :  { %2175 = vmatpush3.bf16.msra.mxu1 %v2780_v47  ;;  %v1334_v55 = vor.u32 %v1333_v1, %v1330_v14  ;;  %1570 = vmatprep.mubr.bf16.mxu1 %v1326_v15  ;;  %v1317_v34 = vsel %vm1230_vm10, %v1289_v39, %v1316_v6  ;;  %v1148_v10 = vrot.slane %v2291_v3, 6  ;;  %v1147_v12 = vsel %vm1130_vm9, %v1144_v61, %v1146_v4 }
 0x267   :  { %v1348_v28 = vrot.slane %v1346_v43, 2  ;;  %v1351_v29 = vrot.slane %v1349_v56, 3  ;;  %2168 = vmatprep.subr.bf16.mxu1 %v2291_v3  ;;  %v1343_v11 = vor.u32 %v1342_v42, %v1339_v45 }
 0x268   :  { %v1335_v59 = vsel %vm1230_vm10, %v1307_v13, %v1334_v55  ;;  %v1149_v21 = vsel %vm1130_vm9, %v1146_v4, %v1148_v10 }
 0x269   :  { %1571 = vmatmul.mubr.bf16.gmra.mxu1 %v1317_v34  ;;  %v1352_v25 = vor.u32 %v1351_v29, %v1348_v28  ;;  %v1344_v18 = vsel %vm1230_vm10, %v1316_v6, %v1343_v11 }
 0x26a   :  { %2176 = vmatpush3.bf16.msra.mxu1 %v2793_v51  ;;  %v1174_v51 = vpack.c.bf16 %v1149_v21, %v1147_v12 }
 0x26b   :  { %v1353_v47 = vsel %vm1230_vm10, %v1325_v20, %v1352_v25  ;;  %2169 = vmatprep.subr.bf16.mxu1 %v2291_v3  ;;  %2153 = vmatmul.mubr.bf16.gmra.mxu0 %v1335_v59 }
 0x26c   :  { %1578 = vmatprep.mubr.bf16.mxu1 %v1353_v47  ;;  %v1355_v16 = vshrl.u32 %v1174_v51, 16  ;;  %v1358_v35 = vshll.u32 %v1174_v51, 16 }
 0x26e   :  { %2177 = vmatpush3.bf16.msra.mxu1 %v2806_v53  ;;  %v1357_v8 = vrot.slane %v1355_v16, 2  ;;  %v1360_v61 = vrot.slane %v1358_v35, 3 }
 0x26f   :  { %2170 = vmatprep.subr.bf16.mxu1 %v2291_v3 }
 0x270   :  { %v1361_v53 = vor.u32 %v1360_v61, %v1357_v8 }
 0x271   :  { %1579 = vmatmul.mubr.bf16.gmra.mxu1 %v1344_v18 }
 0x272   :  { %1586 = vmatprep.mubr.bf16.mxu1 %v1352_v25  ;;  %2178 = vmatpush3.bf16.msra.mxu1 %v2819_v57  ;;  %v1362_v33 = vsel %vm1230_vm10, %v1334_v55, %v1361_v53 }
 0x273   :  { %2171 = vmatprep.subr.bf16.mxu1 %v2291_v3 }
 0x276   :  { %2179 = vmatpush3.bf16.msra.mxu1 %v2832_v60  ;;  %v3008_v60 = vld [vmem:[%s3042_s7] ss:$0 sm:$0xff] }
 0x279   :  { %1587 = vmatmul.mubr.bf16.gmra.mxu1 %v1343_v11 }
 0x27a   :  { %2156 = vmatprep.mubr.msk.bf16.mxu1 %vm2294_vm3, %v2291_v3 }
 0x281   :  { %2157 = vmatmul.mubr.bf16.vlgmr.msra.gmra.mxu1 %v1362_v33 }
 0x282   :  { %2160 = vmatprep.mubr.msk.bf16.mxu1 %vm2294_vm3, %v2291_v3 }
 0x289   :  { %2161 = vmatmul.mubr.bf16.gmra.mxu1 %v1361_v53 }
 0x317   :  { %v1628_v57 = vpop.f32.mrf.mxu0 }
 0x318   :  { %v2017_v2 = vpop.f32.mrf.mxu1 }
 0x319   :  { %v2146_v17 = vpop.f32.mrf.mxu0 }
 0x31a   :  { %v2018_v19 = vpop.f32.mrf.mxu1 }
 0x31b   :  { %v2019_v24 = vadd.f32 %v2018_v19, %v2017_v2  ;;  %v1631_v39 = vpop.f32.mrf.mxu0 }
 0x31c   :  { %v2020_v27 = vpop.f32.mrf.mxu1 }
 0x31d   :  { %v1557_v31 = vadd.f32 %v2019_v24, %v3008_v60  ;;  %v2147_v7 = vpop.f32.mrf.mxu0 }
 0x31e   :  { %v2021_v23 = vpop.f32.mrf.mxu1 }
 0x31f   :  { %v2022_v5 = vadd.f32 %v2021_v23, %v2020_v27  ;;  %v1629_v30 = vadd.f32 %v1628_v57, %v1557_v31 }
 0x321   :  { %v1560_v3 = vadd.f32 %v2022_v5, %v3008_v60  ;;  %v2023_v63 = vpop.f32.mrf.mxu1  ;;  %v1666_v38 = vmax.f32 %v1629_v30, 0.0 }
 0x323   :  { %v1632_v50 = vadd.f32 %v1631_v39, %v1560_v3  ;;  %v2024_v41 = vpop.f32.mrf.mxu1  ;;  %v1636_v26 = vpop.f32.mrf.mxu0 }
 0x324   :  { %v2025_v37 = vadd.f32 %v2024_v41, %v2023_v63 }
 0x325   :  { %v1667_v22 = vmax.f32 %v1632_v50, 0.0  ;;  %v2026_v36 = vpop.f32.mrf.mxu1  ;;  %v2150_v44 = vpop.f32.mrf.mxu0 }
 0x326   :  { %v1565_v46 = vadd.f32 %v2025_v37, %v3008_v60 }
 0x327   :  { %v1903_v13 = vpack.c.bf16 %v1667_v22, %v1666_v38  ;;  %v2027_v52 = vpop.f32.mrf.mxu1  ;;  %v1639_v40 = vpop.f32.mrf.mxu0 }
 0x328   :  { %v2028_v54 = vadd.f32 %v2027_v52, %v2026_v36  ;;  %v1637_v49 = vadd.f32 %v1636_v26, %v1565_v46 }
 0x329   :  { %1927 = vst [vmem:[%s3040_s8 + $0x48] sm:$0xff] %v1903_v13   ;;  %v2029_v58 = vpop.f32.mrf.mxu1  ;;  %v2151_v62 = vpop.f32.mrf.mxu0 }
 0x32a   :  { %v1568_v0 = vadd.f32 %v2028_v54, %v3008_v60  ;;  %v1668_v1 = vmax.f32 %v1637_v49, 0.0 }
 0x32b   :  { %v2030_v9 = vpop.f32.mrf.mxu1  ;;  %v1644_v48 = vpop.f32.mrf.mxu0 }
 0x32c   :  { %v1640_v32 = vadd.f32 %v1639_v40, %v1568_v0  ;;  %v2031_v20 = vadd.f32 %v2030_v9, %v2029_v58 }
 0x32d   :  { %v2032_v14 = vpop.f32.mrf.mxu1  ;;  %v2154_v43 = vpop.f32.mrf.mxu0 }
 0x32e   :  { %v1669_v6 = vmax.f32 %v1640_v32, 0.0  ;;  %v1573_v56 = vadd.f32 %v2031_v20, %v3008_v60 }
 0x32f   :  { %v2033_v15 = vpop.f32.mrf.mxu1  ;;  %v1647_v28 = vpop.f32.mrf.mxu0 }
 0x330   :  { %v1908_v55 = vpack.c.bf16 %v1669_v6, %v1668_v1  ;;  %v2034_v29 = vadd.f32 %v2033_v15, %v2032_v14  ;;  %v1645_v45 = vadd.f32 %v1644_v48, %v1573_v56 }
 0x331   :  { %v2035_v34 = vpop.f32.mrf.mxu1  ;;  %v2155_v42 = vpop.f32.mrf.mxu0 }
 0x332   :  { %1928 = vst [vmem:[%s3040_s8 + $0x50] sm:$0xff] %v1908_v55   ;;  %v1576_v4 = vadd.f32 %v2034_v29, %v3008_v60  ;;  %v1670_v47 = vmax.f32 %v1645_v45, 0.0 }
 0x333   :  { %v2036_v59 = vpop.f32.mrf.mxu1 }
 0x334   :  { %v1648_v25 = vadd.f32 %v1647_v28, %v1576_v4  ;;  %v2037_v35 = vadd.f32 %v2036_v59, %v2035_v34 }
 0x335   :  { %v2038_v10 = vpop.f32.mrf.mxu1 }
 0x336   :  { %v1671_v11 = vmax.f32 %v1648_v25, 0.0  ;;  %v1581_v33 = vadd.f32 %v2037_v35, %v3008_v60 }
 0x337   :  { %v2039_v12 = vpop.f32.mrf.mxu1 }
 0x338   :  { %v1913_v21 = vpack.c.bf16 %v1671_v11, %v1670_v47  ;;  %v2040_v61 = vadd.f32 %v2039_v12, %v2038_v10 }
 0x339   :  { %v2041_v18 = vpop.f32.mrf.mxu1 }
 0x33a   :  { %1929 = vst [vmem:[%s3040_s8 + $0x58] sm:$0xff] %v1913_v21   ;;  %v1584_v19 = vadd.f32 %v2040_v61, %v3008_v60 }
 0x33b   :  { %v2042_v51 = vpop.f32.mrf.mxu1 }
 0x33c   :  { %v2043_v2 = vadd.f32 %v2042_v51, %v2041_v18 }
 0x33d   :  { %v2044_v16 = vpop.f32.mrf.mxu1 }
 0x33e   :  { %v1589_v23 = vadd.f32 %v2043_v2, %v3008_v60 }
 0x33f   :  { %v2045_v8 = vpop.f32.mrf.mxu1 }
 0x341   :  { %v1652_v53 = vpop.f32.mrf.mxu1 }
 0x342   :  { %v1653_v17 = vadd.f32 %v1652_v53, %v1581_v33 }
 0x343   :  { %v2158_v57 = vpop.f32.mrf.mxu1 }
 0x344   :  { %v1672_v31 = vmax.f32 %v1653_v17, 0.0 }
 0x345   :  { %v1655_v24 = vpop.f32.mrf.mxu1 }
 0x346   :  { %v1656_v39 = vadd.f32 %v1655_v24, %v1584_v19 }
 0x347   :  { %v2159_v27 = vpop.f32.mrf.mxu1 }
 0x348   :  { %v1673_v7 = vmax.f32 %v1656_v39, 0.0 }
 0x349   :  { %v1660_v5 = vpop.f32.mrf.mxu1 }
 0x34a   :  { %v1918_v30 = vpack.c.bf16 %v1673_v7, %v1672_v31  ;;  %v1661_v3 = vadd.f32 %v1660_v5, %v1589_v23 }
 0x34b   :  { %v2162_v63 = vpop.f32.mrf.mxu1 }
 0x34c   :  { %1930 = vst [vmem:[%s3040_s8 + $0x60] sm:$0xff] %v1918_v30   ;;  %v1674_v50 = vmax.f32 %v1661_v3, 0.0 }
 0x34d   :  { %v1663_v41 = vpop.f32.mrf.mxu1 }
 0x34e   :  { %v1859_v26 = vpack.c.bf16 %v1674_v50, %v1674_v50 }
 0x34f   :  { %v2163_v37 = vpop.f32.mrf.mxu1 }
 0x350   :  { %1832 = vst [vmem:[%s3040_s8 + $0x68] sm:$0xf] %v1859_v26 }

// kernel: fim_forward.4
= control target key start
LH: loop header
LB: loop body
LE: loop exit
PB: predicated region body
PF: predicated region fallthrough
CT: control target
= control target key end

     0   :  { %vm44_vm0 = vcmask 261120   ;;  %v2974_v3 = vmov 0.0   ;;  %vm76_vm1 = vcmask 257024   ;;  %vm107_vm2 = vcmask 1046528   ;;  %s2975_s16 = smov 32   ;;  %s2976_s17 = smov 64   ;;  %s3989_s0 = inlined_call_operand.vmem [shape: f32[1,108,32], index: 0, kind: input, shape index: {}]   ;;  %s3990_s2 = inlined_call_operand.vmem [shape: bf16[96,128], index: 2, kind: input, shape index: {}]   ;;  %s3991_s1 = inlined_call_operand.vmem [shape: f32[108,1], index: 1, kind: input, shape index: {}]   ;;  %s3992_s4 = inlined_call_operand.vmem [shape: bf16[384,128], index: 4, kind: input, shape index: {}]   ;;  %s3993_s6 = inlined_call_operand.vmem [shape: bf16[384,128], index: 6, kind: input, shape index: {}]   ;;  %s3994_s3 = inlined_call_operand.vmem [shape: f32[1,128], index: 3, kind: input, shape index: {}]   ;;  %s3995_s8 = inlined_call_operand.vmem [shape: bf16[3,1,108,128], index: 8, kind: output, shape index: {}]   ;;  %s3996_s5 = inlined_call_operand.vmem [shape: f32[1,128], index: 5, kind: input, shape index: {}]   ;;  %s3997_s7 = inlined_call_operand.vmem [shape: f32[1,128], index: 7, kind: input, shape index: {}]  }
   0x1   :  { %v49_v0 = vld [vmem:[%s3989_s0] sm:$0xff]  ;;  %v50_v1 = vld [vmem:[%s3989_s0 + $0x8] sm:$0xff]  ;;  %v51_v2 = vld [vmem:[%s3989_s0 + $0x10] sm:$0xff]  ;;  %46 = vst.msk [vmem:[#allocation2 + $0x74] sm:$0xff] %vm44_vm0, %v2974_v3  ;;  %2701 = vmatprep.subr.bf16.mxu0 %v2974_v3  ;;  %2829 = vmatprep.subr.bf16.mxu1 %v2974_v3  ;;  %vm180_vm3 = vcmask 1045504   ;;  %vm2977_vm4 = vmmov 0  }
   0x2   :  { %45 = vst.msk [vmem:[#allocation2] sm:$0xff] %vm44_vm0, %v2974_v3  ;;  %47 = vst [vmem:[#allocation3] sm:$0xff] %v2974_v3  ;;  %v52_v4 = vld [vmem:[%s3989_s0 + $0x18] sm:$0xff]  ;;  %v53_v5 = vld [vmem:[%s3989_s0 + $0x20] sm:$0xff]  ;;  %2713 = vmatprep.mubr.msk.bf16.mxu0 %vm2977_vm4, %v2974_v3  ;;  %2729 = vmatprep.mubr.msk.bf16.mxu1 %vm2977_vm4, %v2974_v3  ;;  %vm268_vm5 = vcmask 523264   ;;  %vm419_vm7 = vcmask 785408  }
   0x3   :  { %48 = vst [vmem:[#allocation3 + $0x74] sm:$0xff] %v2974_v3  ;;  %63 = vst.msk [vmem:[#allocation2 + $0x8] sm:$0xff] %vm44_vm0, %v49_v0  ;;  %v54_v6 = vld [vmem:[%s3989_s0 + $0x28] sm:$0xff]  ;;  %v55_v7 = vld [vmem:[%s3989_s0 + $0x30] sm:$0xff]  ;;  %vm311_vm6 = vsmask.f32 4352 }
   0x4   :  { %64 = vst.msk [vmem:[#allocation2 + $0x10] sm:$0xff] %vm44_vm0, %v50_v1  ;;  %65 = vst.msk [vmem:[#allocation2 + $0x18] sm:$0xff] %vm44_vm0, %v51_v2  ;;  %v56_v8 = vld [vmem:[%s3989_s0 + $0x38] sm:$0xff]  ;;  %v57_v9 = vld [vmem:[%s3989_s0 + $0x40] sm:$0xff]  ;;  %vm783_vm8 = vcmask 1043456   ;;  %vm929_vm9 = vcmask 1044480  }
   0x5   :  { %66 = vst.msk [vmem:[#allocation2 + $0x20] sm:$0xff] %vm44_vm0, %v52_v4  ;;  %67 = vst.msk [vmem:[#allocation2 + $0x28] sm:$0xff] %vm44_vm0, %v53_v5  ;;  %v58_v10 = vld [vmem:[%s3989_s0 + $0x48] sm:$0xff]  ;;  %v59_v11 = vld [vmem:[%s3989_s0 + $0x50] sm:$0xff]  ;;  %vm1503_vm10 = vcmask 1041408  }
   0x6   :  { %68 = vst.msk [vmem:[#allocation2 + $0x30] sm:$0xff] %vm44_vm0, %v54_v6  ;;  %69 = vst.msk [vmem:[#allocation2 + $0x38] sm:$0xff] %vm44_vm0, %v55_v7  ;;  %v60_v12 = vld [vmem:[%s3989_s0 + $0x58] sm:$0xff]  ;;  %v61_v13 = vld [vmem:[%s3989_s0 + $0x60] sm:$0xff]  ;;  %vm1625_vm11 = vsmask.f32 5376 }
   0x7   :  { %70 = vst.msk [vmem:[#allocation2 + $0x40] sm:$0xff] %vm44_vm0, %v56_v8  ;;  %71 = vst.msk [vmem:[#allocation2 + $0x48] sm:$0xff] %vm44_vm0, %v57_v9  ;;  %v62_v14 = vld [vmem:[%s3989_s0 + $0x68] sm:$0xf]  ;;  %v2919_v16 = vld [vmem:[%s3990_s2 + $0x20] sm:$0xff]  }
   0x8   :  { %72 = vst.msk [vmem:[#allocation2 + $0x50] sm:$0xff] %vm44_vm0, %v58_v10  ;;  %73 = vst.msk [vmem:[#allocation2 + $0x58] sm:$0xff] %vm44_vm0, %v59_v11  ;;  %v2918_v15 = vld [vmem:[%s3990_s2 + $0x28] sm:$0xff]   ;;  %v2920_v35 = vld [vmem:[%s3990_s2 + $0x18] sm:$0xff]  }
   0x9   :  { %74 = vst.msk [vmem:[#allocation2 + $0x60] sm:$0xff] %vm44_vm0, %v60_v12  ;;  %75 = vst.msk [vmem:[#allocation2 + $0x68] sm:$0xff] %vm44_vm0, %v61_v13  ;;  %2702 = vmatpush3.bf16.msra.mxu0 %v2918_v15  ;;  %2835 = vmatpush3.bf16.msra.mxu1 %v2918_v15  ;;  %v2921_v55 = vld [vmem:[%s3990_s2 + $0x10] sm:$0xff]   ;;  %v2922_v8 = vld [vmem:[%s3990_s2 + $0x8] sm:$0xff]  }
   0xa   :  { %77 = vst.msk [vmem:[#allocation2 + $0x70] sm:$0xf] %vm76_vm1, %v62_v14  ;;  %v3093_v17 = vld [vmem:[#allocation2 + $0x8] sm:$0xff]  ;;  %2703 = vmatprep.subr.bf16.mxu0 %v2974_v3  ;;  %2830 = vmatprep.subr.bf16.mxu1 %v2974_v3 }
   0xb   :  { %v3095_v18 = vld [vmem:[#allocation2 + $0x10] sm:$0xff]  ;;  %v3097_v19 = vld [vmem:[#allocation2 + $0x18] sm:$0xff]  ;;  %v108_v20 = vrot.slane %v3093_v17, 1  ;;  %v181_v22 = vrot.slane %v3093_v17, 2 }
   0xc   :  { %v109_v21 = vrot.slane %v3095_v18, 1  ;;  %v182_v23 = vrot.slane %v3095_v18, 2  ;;  %v3105_v24 = vld [vmem:[#allocation2 + $0x20] sm:$0xff]  ;;  %v3107_v25 = vld [vmem:[#allocation2 + $0x28] sm:$0xff]  ;;  %v111_v26 = vrot.slane %v3097_v19, 1  ;;  %v184_v28 = vrot.slane %v3097_v19, 2 }
   0xd   :  { %v113_v27 = vrot.slane %v3105_v24, 1  ;;  %v186_v29 = vrot.slane %v3105_v24, 2  ;;  %v3113_v30 = vld [vmem:[#allocation2 + $0x30] sm:$0xff]  ;;  %v115_v33 = vrot.slane %v3107_v25, 1  ;;  %2704 = vmatpush3.bf16.msra.mxu0 %v2919_v16  ;;  %2836 = vmatpush3.bf16.msra.mxu1 %v2919_v16  ;;  %v3124_v40 = vld [vmem:[#allocation2 + $0x38] sm:$0xff]  ;;  %v188_v48 = vrot.slane %v3107_v25, 2 }
   0xe   :  { %v110_v31 = vsel %vm107_vm2, %v108_v20, %v109_v21  ;;  %v183_v32 = vsel %vm180_vm3, %v181_v22, %v182_v23  ;;  %v117_v34 = vrot.slane %v3113_v30, 1  ;;  %v112_v38 = vsel %vm107_vm2, %v109_v21, %v111_v26  ;;  %v3126_v41 = vld [vmem:[#allocation2 + $0x40] sm:$0xff]  ;;  %2705 = vmatprep.subr.bf16.mxu0 %v2974_v3  ;;  %2831 = vmatprep.subr.bf16.mxu1 %v2974_v3  ;;  %v3138_v50 = vld [vmem:[#allocation2 + $0x48] sm:$0xff] }
   0xf   :  { %v2846_v36 = vpack.i.bf16 %v110_v31, %v108_v20  ;;  %v2856_v37 = vpack.i.bf16 %v183_v32, %v181_v22  ;;  %v114_v39 = vsel %vm107_vm2, %v111_v26, %v113_v27  ;;  %v185_v43 = vsel %vm180_vm3, %v182_v23, %v184_v28  ;;  %v3140_v51 = vld [vmem:[#allocation2 + $0x50] sm:$0xff]  ;;  %v3159_v1 = vld [vmem:[#allocation2 + $0x58] sm:$0xff]  ;;  %v2923_v23 = vld [vmem:[%s3990_s2] sm:$0xff]  }
  0x10   :  { %v2851_v42 = vpack.i.bf16 %v114_v39, %v112_v38  ;;  %v187_v44 = vsel %vm180_vm3, %v184_v28, %v186_v29  ;;  %v116_v45 = vsel %vm107_vm2, %v113_v27, %v115_v33  ;;  %v118_v47 = vsel %vm107_vm2, %v115_v33, %v117_v34  ;;  %v3165_v7 = vld [vmem:[#allocation2 + $0x60] sm:$0xff]  ;;  %v3182_v22 = vld [vmem:[#allocation2 + $0x68] sm:$0xff] }
  0x11   :  { %2847 = vrot.lane.b32.xlu0 %v2846_v36, %s2975_s16  ;;  %2857 = vrot.lane.b32.xlu1 %v2856_v37, %s2976_s17  ;;  %v2861_v46 = vpack.i.bf16 %v187_v44, %v185_v43  ;;  %v190_v49 = vrot.slane %v3113_v30, 2  ;;  %v119_v52 = vrot.slane %v3124_v40, 1  ;;  %v121_v53 = vrot.slane %v3126_v41, 1  ;;  %v3187_v26 = vld [vmem:[#allocation2 + $0x70] sm:$0xff] }
  0x12   :  { %v192_v54 = vrot.slane %v3124_v40, 2  ;;  %2706 = vmatpush3.bf16.msra.mxu0 %v2920_v35  ;;  %2837 = vmatpush3.bf16.msra.mxu1 %v2920_v35  ;;  %v189_v56 = vsel %vm180_vm3, %v186_v29, %v188_v48  ;;  %v194_v58 = vrot.slane %v3126_v41, 2  ;;  %v2866_v59 = vpack.i.bf16 %v118_v47, %v116_v45 }
  0x13   :  { %v191_v57 = vsel %vm180_vm3, %v188_v48, %v190_v49  ;;  %2707 = vmatprep.subr.bf16.mxu0 %v2974_v3  ;;  %2832 = vmatprep.subr.bf16.mxu1 %v2974_v3  ;;  %v123_v60 = vrot.slane %v3138_v50, 1  ;;  %v120_v62 = vsel %vm107_vm2, %v117_v34, %v119_v52  ;;  %v122_v63 = vsel %vm107_vm2, %v119_v52, %v121_v53  ;;  %v30_v52 = vld [vmem:[%s3991_s1] sm:$0xff] }
  0x14   :  { %v2871_v61 = vpack.i.bf16 %v191_v57, %v189_v56  ;;  %v125_v0 = vrot.slane %v3140_v51, 1  ;;  %v193_v2 = vsel %vm180_vm3, %v190_v49, %v192_v54  ;;  %v195_v4 = vsel %vm180_vm3, %v192_v54, %v194_v58  ;;  %v31_v49 = vld [vmem:[%s3991_s1 + $0x8] sm:$0xff]  ;;  %v33_v54 = vld [vmem:[%s3991_s1 + $0x18] sm:$0xff]  ;;  %v36_v57 = vld [vmem:[%s3991_s1 + $0x30] sm:$0xff] }
  0x15   :  { %2852 = vrot.lane.b32.xlu0 %v2851_v42, %s2975_s16  ;;  %2862 = vrot.lane.b32.xlu1 %v2861_v46, %s2976_s17  ;;  %v196_v5 = vrot.slane %v3138_v50, 2  ;;  %v198_v6 = vrot.slane %v3140_v51, 2  ;;  %v2876_v9 = vpack.i.bf16 %v122_v63, %v120_v62  ;;  %v124_v10 = vsel %vm107_vm2, %v121_v53, %v123_v60  ;;  %v32_v53 = vld [vmem:[%s3991_s1 + $0x10] sm:$0xff]  ;;  %v35_v56 = vld [vmem:[%s3991_s1 + $0x28] sm:$0xff] }
  0x16   :  { %2708 = vmatpush3.bf16.msra.mxu0 %v2921_v55  ;;  %2838 = vmatpush3.bf16.msra.mxu1 %v2921_v55  ;;  %v127_v11 = vrot.slane %v3159_v1, 1  ;;  %v2881_v12 = vpack.i.bf16 %v195_v4, %v193_v2  ;;  %v126_v13 = vsel %vm107_vm2, %v123_v60, %v125_v0  ;;  %v129_v14 = vrot.slane %v3165_v7, 1  ;;  %v34_v55 = vld [vmem:[%s3991_s1 + $0x20] sm:$0xff]  ;;  %v39_v60 = vld [vmem:[%s3991_s1 + $0x48] sm:$0xff]  ;;  %v41_v62 = vld [vmem:[%s3991_s1 + $0x58] sm:$0xff] }
  0x17   :  { %2709 = vmatprep.subr.bf16.mxu0 %v2974_v3  ;;  %2833 = vmatprep.subr.bf16.mxu1 %v2974_v3  ;;  %v200_v15 = vrot.slane %v3159_v1, 2  ;;  %v197_v16 = vsel %vm180_vm3, %v194_v58, %v196_v5  ;;  %v199_v20 = vsel %vm180_vm3, %v196_v5, %v198_v6  ;;  %v202_v21 = vrot.slane %v3165_v7, 2  ;;  %v37_v58 = vld [vmem:[%s3991_s1 + $0x38] sm:$0xff]  ;;  %v42_v63 = vld [vmem:[%s3991_s1 + $0x60] sm:$0xff] }
  0x18   :  { %v2886_v27 = vpack.i.bf16 %v126_v13, %v124_v10  ;;  %v128_v28 = vsel %vm107_vm2, %v125_v0, %v127_v11  ;;  %v2891_v29 = vpack.i.bf16 %v199_v20, %v197_v16  ;;  %v130_v31 = vsel %vm107_vm2, %v127_v11, %v129_v14  ;;  %v43_v0 = vld [vmem:[%s3991_s1 + $0x68] sm:$0xf]  ;;  %v78_v2 = vld [vmem:[#allocation2] sm:$0xff] }
  0x19   :  { %2867 = vrot.lane.b32.xlu0 %v2866_v59, %s2975_s16  ;;  %2872 = vrot.lane.b32.xlu1 %v2871_v61, %s2976_s17  ;;  %v201_v32 = vsel %vm180_vm3, %v198_v6, %v200_v15  ;;  %v131_v33 = vrot.slane %v3182_v22, 1  ;;  %v203_v34 = vsel %vm180_vm3, %v200_v15, %v202_v21  ;;  %v133_v35 = vrot.slane %v3187_v26, 1  ;;  %v38_v59 = vld [vmem:[%s3991_s1 + $0x40] sm:$0xff]  ;;  %v40_v61 = vld [vmem:[%s3991_s1 + $0x50] sm:$0xff] }
  0x1a   :  { %2710 = vmatpush3.bf16.msra.mxu0 %v2922_v8  ;;  %2839 = vmatpush3.bf16.msra.mxu1 %v2922_v8  ;;  %v204_v36 = vrot.slane %v3182_v22, 2  ;;  %v206_v37 = vrot.slane %v3187_v26, 2  ;;  %v2896_v38 = vpack.i.bf16 %v130_v31, %v128_v28  ;;  %v2901_v39 = vpack.i.bf16 %v203_v34, %v201_v32 }
  0x1b   :  { %2711 = vmatprep.subr.bf16.mxu0 %v2974_v3  ;;  %2834 = vmatprep.subr.bf16.mxu1 %v2974_v3  ;;  %v132_v42 = vsel %vm107_vm2, %v129_v14, %v131_v33  ;;  %v134_v43 = vsel %vm107_vm2, %v131_v33, %v133_v35  ;;  %v2978_v48 = vmov 0  }
  0x1c   :  { %v205_v44 = vsel %vm180_vm3, %v202_v21, %v204_v36  ;;  %v207_v45 = vsel %vm180_vm3, %v204_v36, %v206_v37  ;;  %v2906_v46 = vpack.i.bf16 %v134_v43, %v132_v42  ;;  %2917 = vset.pattern.permute.xlu1 %v2978_v48  ;;  %2916 = vset.pattern.permute.xlu0 %v2978_v48 }
  0x1d   :  { %2877 = vrot.lane.b32.xlu0 %v2876_v9, %s2975_s16  ;;  %2882 = vrot.lane.b32.xlu1 %v2881_v12, %s2976_s17  ;;  %v2911_v47 = vpack.i.bf16 %v207_v45, %v205_v44 }
  0x1e   :  { %2712 = vmatpush3.bf16.msra.mxu0 %v2923_v23  ;;  %2840 = vmatpush3.bf16.msra.mxu1 %v2923_v23 }
  0x1f   :  { %2741 = vmatprep.subr.bf16.mxu0 %v2974_v3 }
  0x21   :  { %2887 = vrot.lane.b32.xlu0 %v2886_v27, %s2975_s16  ;;  %2892 = vrot.lane.b32.xlu1 %v2891_v29, %s2976_s17 }
  0x25   :  { %2897 = vrot.lane.b32.xlu0 %v2896_v38, %s2975_s16  ;;  %2902 = vrot.lane.b32.xlu1 %v2901_v39, %s2976_s17 }
  0x29   :  { %2907 = vrot.lane.b32.xlu0 %v2906_v46, %s2975_s16  ;;  %2912 = vrot.lane.b32.xlu1 %v2911_v47, %s2976_s17 }
  0x2d   :  { %163 = vrot.lane.b32.xlu0 %v133_v35, %s2975_s16  ;;  %236 = vrot.lane.b32.xlu1 %v206_v37, %s2976_s17 }
  0x31   :  { %551 = vperm.xlu1 %2917, %v31_v49   ;;  %546 = vperm.xlu0 %2916, %v30_v52  }
  0x35   :  { %556 = vperm.xlu1 %2917, %v32_v53   ;;  %561 = vperm.xlu0 %2916, %v33_v54  }
  0x39   :  { %566 = vperm.xlu1 %2917, %v34_v55   ;;  %571 = vperm.xlu0 %2916, %v35_v56  }
  0x3d   :  { %576 = vperm.xlu1 %2917, %v36_v57   ;;  %581 = vperm.xlu0 %2916, %v37_v58  }
  0x41   :  { %586 = vperm.xlu1 %2917, %v38_v59   ;;  %591 = vperm.xlu0 %2916, %v39_v60  }
  0x45   :  { %596 = vperm.xlu1 %2917, %v40_v61   ;;  %601 = vperm.xlu0 %2916, %v41_v62  }
  0x49   :  { %606 = vperm.xlu1 %2917, %v42_v63   ;;  %611 = vperm.xlu0 %2916, %v43_v0  }
  0x83   :  { %v2848_v4 = vpop.permute.xlu0 %2847  ;;  %v2858_v5 = vpop.permute.xlu1 %2857 }
  0x84   :  { %v2850_v6 = vunpack.i.h.bf16 %v2848_v4  ;;  %v2849_v8 = vunpack.i.l.bf16 %v2848_v4  ;;  %v2860_v9 = vunpack.i.h.bf16 %v2858_v5  ;;  %v2859_v10 = vunpack.i.l.bf16 %v2858_v5 }
  0x86   :  { %v254_v11 = vsel %vm44_vm0, %v3093_v17, %v2850_v6  ;;  %v253_v12 = vsel %vm44_vm0, %v78_v2, %v2849_v8 }
  0x87   :  { %v269_v13 = vsel %vm268_vm5, %v253_v12, %v2859_v10  ;;  %v270_v14 = vsel %vm268_vm5, %v254_v11, %v2860_v9  ;;  %v2853_v15 = vpop.permute.xlu0 %2852  ;;  %v2863_v16 = vpop.permute.xlu1 %2862 }
  0x88   :  { %v284_v20 = vpack.c.bf16 %v270_v14, %v269_v13  ;;  %v2855_v21 = vunpack.i.h.bf16 %v2853_v15  ;;  %v2854_v23 = vunpack.i.l.bf16 %v2853_v15  ;;  %v2865_v27 = vunpack.i.h.bf16 %v2863_v16 }
  0x89   :  { %v2864_v28 = vunpack.i.l.bf16 %v2863_v16 }
  0x8a   :  { %v313_v29 = vshrl.u32 %v284_v20, 16  ;;  %v316_v31 = vshll.u32 %v284_v20, 16  ;;  %v256_v32 = vsel %vm44_vm0, %v3097_v19, %v2855_v21  ;;  %v255_v17 = vsel %vm44_vm0, %v3095_v18, %v2854_v23 }
  0x8b   :  { %v271_v33 = vsel %vm268_vm5, %v255_v17, %v2864_v28  ;;  %v272_v34 = vsel %vm268_vm5, %v256_v32, %v2865_v27  ;;  %v2868_v35 = vpop.permute.xlu0 %2867  ;;  %v2873_v36 = vpop.permute.xlu1 %2872 }
  0x8c   :  { %v285_v37 = vpack.c.bf16 %v272_v34, %v271_v33  ;;  %v2870_v38 = vunpack.i.h.bf16 %v2868_v35  ;;  %v315_v39 = vrot.slane %v313_v29, 3  ;;  %v2869_v42 = vunpack.i.l.bf16 %v2868_v35 }
  0x8d   :  { %v2875_v43 = vunpack.i.h.bf16 %v2873_v36  ;;  %v2874_v44 = vunpack.i.l.bf16 %v2873_v36  ;;  %v318_v45 = vrot.slane %v316_v31, 4 }
  0x8e   :  { %v321_v46 = vshrl.u32 %v285_v37, 16  ;;  %v324_v47 = vshll.u32 %v285_v37, 16  ;;  %v258_v19 = vsel %vm44_vm0, %v3107_v25, %v2870_v38  ;;  %v257_v18 = vsel %vm44_vm0, %v3105_v24, %v2869_v42 }
  0x8f   :  { %v274_v48 = vsel %vm268_vm5, %v258_v19, %v2875_v43  ;;  %v2878_v49 = vpop.permute.xlu0 %2877  ;;  %v2883_v52 = vpop.permute.xlu1 %2882  ;;  %v273_v55 = vsel %vm268_vm5, %v257_v18, %v2874_v44  ;;  %v319_v61 = vor.u32 %v318_v45, %v315_v39 }
  0x90   :  { %v323_v53 = vrot.slane %v321_v46, 3  ;;  %v326_v54 = vrot.slane %v324_v47, 4  ;;  %v2880_v56 = vunpack.i.h.bf16 %v2878_v49  ;;  %v286_v57 = vpack.c.bf16 %v274_v48, %v273_v55 }
  0x91   :  { %v2879_v58 = vunpack.i.l.bf16 %v2878_v49  ;;  %v2885_v59 = vunpack.i.h.bf16 %v2883_v52  ;;  %v2884_v60 = vunpack.i.l.bf16 %v2883_v52 }
  0x92   :  { %v260_v25 = vsel %vm44_vm0, %v3124_v40, %v2880_v56  ;;  %v327_v62 = vor.u32 %v326_v54, %v323_v53  ;;  %v330_v24 = vshrl.u32 %v286_v57, 16  ;;  %v333_v63 = vshll.u32 %v286_v57, 16 }
  0x93   :  { %v259_v0 = vsel %vm44_vm0, %v3113_v30, %v2879_v58  ;;  %v276_v2 = vsel %vm268_vm5, %v260_v25, %v2885_v59  ;;  %v2888_v4 = vpop.permute.xlu0 %2887  ;;  %v2893_v5 = vpop.permute.xlu1 %2892 }
  0x94   :  { %v275_v6 = vsel %vm268_vm5, %v259_v0, %v2884_v60  ;;  %v2890_v8 = vunpack.i.h.bf16 %v2888_v4  ;;  %v2889_v9 = vunpack.i.l.bf16 %v2888_v4  ;;  %v2895_v10 = vunpack.i.h.bf16 %v2893_v5 }
  0x95   :  { %v332_v11 = vrot.slane %v330_v24, 3  ;;  %v335_v12 = vrot.slane %v333_v63, 4  ;;  %v287_v40 = vpack.c.bf16 %v276_v2, %v275_v6  ;;  %v2894_v13 = vunpack.i.l.bf16 %v2893_v5 }
  0x96   :  { %v262_v14 = vsel %vm44_vm0, %v3138_v50, %v2890_v8  ;;  %v261_v15 = vsel %vm44_vm0, %v3126_v41, %v2889_v9  ;;  %v328_v30 = vsel %vm311_vm6, %v319_v61, %v327_v62 }
  0x97   :  { %v339_v16 = vshrl.u32 %v287_v40, 16  ;;  %v277_v20 = vsel %vm268_vm5, %v261_v15, %v2894_v13  ;;  %v278_v21 = vsel %vm268_vm5, %v262_v14, %v2895_v10  ;;  %2714 = vmatmul.mubr.msk.bf16.vlgmr.msra.gmra.mxu0 %vm419_vm7, %v328_v30  ;;  %v2898_v23 = vpop.permute.xlu0 %2897  ;;  %v2903_v27 = vpop.permute.xlu1 %2902  ;;  %v342_v50 = vshll.u32 %v287_v40, 16  ;;  %v2924_v30 = vld [vmem:[%s3992_s4 + $0x78] sm:$0xff]  }
  0x98   :  { %v288_v28 = vpack.c.bf16 %v278_v21, %v277_v20  ;;  %v2900_v29 = vunpack.i.h.bf16 %v2898_v23  ;;  %v2899_v31 = vunpack.i.l.bf16 %v2898_v23  ;;  %v2905_v32 = vunpack.i.h.bf16 %v2903_v27  ;;  %2717 = vmatprep.mubr.msk.bf16.mxu0 %vm2977_vm4, %v2974_v3  ;;  %2555 = vmatprep.subr.bf16.mxu1 %v2924_v30  ;;  %v2926_v20 = vld [vmem:[%s3992_s4 + $0x38] sm:$0xff]   ;;  %v2927_v21 = vld [vmem:[%s3992_s4 + $0x70] sm:$0xff]  }
  0x99   :  { %v2904_v41 = vunpack.i.l.bf16 %v2903_v27  ;;  %v336_v17 = vor.u32 %v335_v12, %v332_v11  ;;  %v341_v37 = vrot.slane %v339_v16, 3  ;;  %v344_v19 = vrot.slane %v342_v50, 4  ;;  %v2925_v16 = vld [vmem:[%s3992_s4 + $0xb8] sm:$0xff]   ;;  %v2928_v23 = vld [vmem:[%s3992_s4 + $0xb0] sm:$0xff]   ;;  %v2934_v50 = vld [vmem:[%s3992_s4 + $0xa0] sm:$0xff]  }
  0x9a   :  { %v348_v33 = vshrl.u32 %v288_v28, 16  ;;  %v351_v34 = vshll.u32 %v288_v28, 16  ;;  %v264_v35 = vsel %vm44_vm0, %v3159_v1, %v2900_v29  ;;  %v263_v36 = vsel %vm44_vm0, %v3140_v51, %v2899_v31  ;;  %2742 = vmatpush3.bf16.msra.mxu0 %v2925_v16  ;;  %v2929_v27 = vld [vmem:[%s3992_s4 + $0x30] sm:$0xff]   ;;  %v2930_v28 = vld [vmem:[%s3992_s4 + $0x68] sm:$0xff]  }
  0x9b   :  { %v279_v38 = vsel %vm268_vm5, %v263_v36, %v2904_v41  ;;  %v280_v39 = vsel %vm268_vm5, %v264_v35, %v2905_v32  ;;  %v2908_v42 = vpop.permute.xlu0 %2907  ;;  %v2913_v43 = vpop.permute.xlu1 %2912  ;;  %v337_v53 = vsel %vm311_vm6, %v327_v62, %v336_v17  ;;  %v345_v24 = vor.u32 %v344_v19, %v341_v37  ;;  %2743 = vmatprep.subr.bf16.mxu0 %v2974_v3  ;;  %v2931_v29 = vld [vmem:[%s3992_s4 + $0xa8] sm:$0xff]   ;;  %v2933_v32 = vld [vmem:[%s3992_s4 + $0x60] sm:$0xff]   ;;  %v2939_v35 = vld [vmem:[%s3992_s4 + $0x50] sm:$0xff]  }
  0x9c   :  { %v350_v44 = vrot.slane %v348_v33, 3  ;;  %v353_v45 = vrot.slane %v351_v34, 4  ;;  %v289_v46 = vpack.c.bf16 %v280_v39, %v279_v38  ;;  %v2910_v47 = vunpack.i.h.bf16 %v2908_v42  ;;  %v2932_v31 = vld [vmem:[%s3992_s4 + $0x28] sm:$0xff]   ;;  %v2935_v41 = vld [vmem:[%s3992_s4 + $0x20] sm:$0xff]   ;;  %v2937_v33 = vld [vmem:[%s3992_s4 + $0x98] sm:$0xff]  }
  0x9d   :  { %v2909_v18 = vunpack.i.l.bf16 %v2908_v42  ;;  %v2915_v48 = vunpack.i.h.bf16 %v2913_v43  ;;  %v2914_v49 = vunpack.i.l.bf16 %v2913_v43  ;;  %v346_v8 = vsel %vm311_vm6, %v336_v17, %v345_v24  ;;  %v2936_v17 = vld [vmem:[%s3992_s4 + $0x58] sm:$0xff]   ;;  %v2940_v36 = vld [vmem:[%s3992_s4 + $0x90] sm:$0xff]   ;;  %v2942_v38 = vld [vmem:[%s3992_s4 + $0x48] sm:$0xff]  }
  0x9e   :  { %v357_v52 = vshrl.u32 %v289_v46, 16  ;;  %v360_v1 = vshll.u32 %v289_v46, 16  ;;  %v266_v51 = vsel %vm44_vm0, %v3182_v22, %v2910_v47  ;;  %v354_v56 = vor.u32 %v353_v45, %v350_v44  ;;  %2744 = vmatpush3.bf16.msra.mxu0 %v2928_v23  ;;  %v2938_v34 = vld [vmem:[%s3992_s4 + $0x18] sm:$0xff]   ;;  %v2941_v37 = vld [vmem:[%s3992_s4 + $0x10] sm:$0xff]   ;;  %v2943_v39 = vld [vmem:[%s3992_s4 + $0x88] sm:$0xff]  }
  0x9f   :  { %2718 = vmatmul.mubr.msk.bf16.gmra.mxu0 %vm419_vm7, %v337_v53  ;;  %v265_v54 = vsel %vm44_vm0, %v3165_v7, %v2909_v18  ;;  %v282_v55 = vsel %vm268_vm5, %v266_v51, %v2915_v48  ;;  %v164_v57 = vpop.permute.xlu0 %163  ;;  %v237_v58 = vpop.permute.xlu1 %236  ;;  %2745 = vmatprep.subr.bf16.mxu0 %v2974_v3  ;;  %v2944_v42 = vld [vmem:[%s3992_s4 + $0x8] sm:$0xff]   ;;  %v2945_v43 = vld [vmem:[%s3992_s4 + $0x40] sm:$0xff]   ;;  %v2948_v46 = vld [vmem:[%s3993_s6 + $0x78] sm:$0xff]  }
  0xa0   :  { %v359_v59 = vrot.slane %v357_v52, 3  ;;  %v362_v60 = vrot.slane %v360_v1, 4  ;;  %v281_v25 = vsel %vm268_vm5, %v265_v54, %v2914_v49  ;;  %2721 = vmatprep.mubr.msk.bf16.mxu0 %vm2977_vm4, %v2974_v3  ;;  %v267_v22 = vsel %vm44_vm0, %v3187_v26, %v164_v57  ;;  %v2946_v44 = vld [vmem:[%s3992_s4 + $0x80] sm:$0xff]  }
  0xa1   :  { %v290_v61 = vpack.c.bf16 %v282_v55, %v281_v25  ;;  %v283_v62 = vsel %vm268_vm5, %v267_v22, %v237_v58  ;;  %v355_v14 = vsel %vm311_vm6, %v345_v24, %v354_v56  ;;  %v2947_v45 = vld [vmem:[%s3992_s4] sm:$0xff]  }
  0xa2   :  { %v363_v7 = vor.u32 %v362_v60, %v359_v59  ;;  %v291_v63 = vpack.c.bf16 %v283_v62, %v283_v62  ;;  %2746 = vmatpush3.bf16.msra.mxu0 %v2931_v29  ;;  %v3420_v18 = vld [vmem:[%s3994_s3] ss:$0 sm:$0xff] }
  0xa3   :  { %v366_v0 = vshrl.u32 %v290_v61, 16  ;;  %v369_v2 = vshll.u32 %v290_v61, 16  ;;  %2747 = vmatprep.subr.bf16.mxu0 %v2974_v3 }
  0xa4   :  { %v364_v4 = vsel %vm311_vm6, %v354_v56, %v363_v7  ;;  %v375_v9 = vshrl.u32 %v291_v63, 16  ;;  %v378_v10 = vshll.u32 %v291_v63, 16 }
  0xa5   :  { %v368_v5 = vrot.slane %v366_v0, 3  ;;  %v371_v6 = vrot.slane %v369_v2, 4  ;;  %2730 = vmatmul.mubr.msk.bf16.vlgmr.msra.gmra.mxu1 %vm419_vm7, %v364_v4 }
  0xa6   :  { %2733 = vmatprep.mubr.msk.bf16.mxu1 %vm2977_vm4, %v2974_v3  ;;  %v377_v11 = vrot.slane %v375_v9, 3  ;;  %v380_v12 = vrot.slane %v378_v10, 4  ;;  %2556 = vmatpush3.bf16.msra.mxu1 %v2926_v20 }
  0xa7   :  { %2722 = vmatmul.mubr.msk.bf16.gmra.mxu0 %vm419_vm7, %v346_v8  ;;  %v372_v26 = vor.u32 %v371_v6, %v368_v5  ;;  %2557 = vmatprep.subr.bf16.mxu1 %v2927_v21 }
  0xa8   :  { %2725 = vmatprep.mubr.msk.bf16.mxu0 %vm2977_vm4, %v2974_v3  ;;  %v381_v13 = vor.u32 %v380_v12, %v377_v11  ;;  %2748 = vmatpush3.bf16.msra.mxu0 %v2934_v50 }
  0xa9   :  { %v373_v40 = vsel %vm311_vm6, %v363_v7, %v372_v26  ;;  %2749 = vmatprep.subr.bf16.mxu0 %v2974_v3 }
  0xaa   :  { %v382_v15 = vsel %vm311_vm6, %v372_v26, %v381_v13  ;;  %2558 = vmatpush3.bf16.msra.mxu1 %v2929_v27  ;;  %v3441_v26 = vld [vmem:[#allocation3] sm:$0xff] }
  0xab   :  { %2559 = vmatprep.subr.bf16.mxu1 %v2930_v28 }
  0xac   :  { %2750 = vmatpush3.bf16.msra.mxu0 %v2937_v33  ;;  %v3413_v47 = vpop.permute.xlu1 %551  ;;  %v3415_v19 = vpop.permute.xlu0 %546 }
  0xad   :  { %2734 = vmatmul.mubr.msk.bf16.gmra.mxu1 %vm419_vm7, %v373_v40  ;;  %2751 = vmatprep.subr.bf16.mxu0 %v2974_v3 }
  0xae   :  { %2737 = vmatprep.mubr.msk.bf16.mxu1 %vm2977_vm4, %v2974_v3  ;;  %2560 = vmatpush3.bf16.msra.mxu1 %v2932_v31 }
  0xaf   :  { %2726 = vmatmul.mubr.msk.bf16.gmra.mxu0 %vm419_vm7, %v355_v14  ;;  %2561 = vmatprep.subr.bf16.mxu1 %v2933_v32 }
  0xb0   :  { %2757 = vmatprep.mubr.msk.bf16.mxu0 %vm2977_vm4, %v2974_v3  ;;  %2752 = vmatpush3.bf16.msra.mxu0 %v2940_v36  ;;  %v3423_v1 = vpop.permute.xlu1 %556 }
  0xb1   :  { %2753 = vmatprep.subr.bf16.mxu0 %v2974_v3 }
  0xb2   :  { %2562 = vmatpush3.bf16.msra.mxu1 %v2935_v41 }
  0xb3   :  { %2563 = vmatprep.subr.bf16.mxu1 %v2936_v17 }
  0xb4   :  { %2754 = vmatpush3.bf16.msra.mxu0 %v2943_v39  ;;  %v3429_v59 = vpop.permute.xlu1 %566 }
  0xb5   :  { %2738 = vmatmul.mubr.msk.bf16.gmra.mxu1 %vm419_vm7, %v382_v15  ;;  %2755 = vmatprep.subr.bf16.mxu0 %v2974_v3 }
  0xb6   :  { %2564 = vmatpush3.bf16.msra.mxu1 %v2938_v34 }
  0xb7   :  { %2565 = vmatprep.subr.bf16.mxu1 %v2939_v35 }
  0xb8   :  { %2756 = vmatpush3.bf16.msra.mxu0 %v2946_v44  ;;  %v3444_v12 = vpop.permute.xlu1 %576 }
  0xb9   :  { %2785 = vmatprep.subr.bf16.mxu0 %v2974_v3  ;;  %v3425_v3 = vpop.permute.xlu0 %561 }
  0xba   :  { %2566 = vmatpush3.bf16.msra.mxu1 %v2941_v37 }
  0xbb   :  { %2567 = vmatprep.subr.bf16.mxu1 %v2942_v38 }
  0xbc   :  { %v3463_v44 = vpop.permute.xlu1 %586 }
  0xbd   :  { %v3431_v60 = vpop.permute.xlu0 %571 }
  0xbe   :  { %2568 = vmatpush3.bf16.msra.mxu1 %v2944_v42 }
  0xbf   :  { %2569 = vmatprep.subr.bf16.mxu1 %v2945_v43 }
  0xc1   :  { %v3446_v40 = vpop.permute.xlu0 %581 }
  0xc2   :  { %2570 = vmatpush3.bf16.msra.mxu1 %v2947_v45 }
  0xc3   :  { %2628 = vmatprep.subr.bf16.mxu1 %v2948_v46 }
  0xc5   :  { %v3465_v45 = vpop.permute.xlu0 %591 }
 0x157   :  { %v475_v48 = vpop.f32.mrf.mxu0 }
 0x158   :  { %v476_v49 = vadd.f32 %v3420_v18, %v475_v48 }
 0x159   :  { %v2715_v52 = vpop.f32.mrf.mxu0 }
 0x15a   :  { %v530_v53 = vmax.f32 %v476_v49, 0.0 }
 0x15b   :  { %v478_v51 = vpop.f32.mrf.mxu0 }
 0x15c   :  { %v479_v54 = vadd.f32 %v3420_v18, %v478_v51  ;;  %v614_v56 = vmul.f32 %v3415_v19, %v530_v53 }
 0x15d   :  { %v2716_v55 = vpop.f32.mrf.mxu0 }
 0x15e   :  { %v531_v57 = vmax.f32 %v479_v54, 0.0  ;;  %v741_v7 = vrot.slane %v614_v56, 2  ;;  %v784_v10 = vrot.slane %v614_v56, 4  ;;  %v826_v11 = vpack.c.bf16 %v614_v56, %v3441_v26 }
 0x15f   :  { %v483_v58 = vpop.f32.mrf.mxu0 }
 0x160   :  { %v615_v25 = vmul.f32 %v3413_v47, %v531_v57  ;;  %v484_v22 = vadd.f32 %v3420_v18, %v483_v58  ;;  %v930_v41 = vrot.slane %v826_v11, 3 }
 0x161   :  { %v2719_v61 = vpop.f32.mrf.mxu0 }
 0x162   :  { %v2438_v62 = vpack.c.bf16 %v615_v25, %v614_v56  ;;  %v532_v24 = vmax.f32 %v484_v22, 0.0  ;;  %v742_v63 = vrot.slane %v615_v25, 2  ;;  %v785_v2 = vrot.slane %v615_v25, 4 }
 0x163   :  { %v486_v0 = vpop.f32.mrf.mxu0 }
 0x164   :  { %2439 = vst [vmem:[%s3995_s8] sm:$0xff] %v2438_v62   ;;  %v616_v4 = vmul.f32 %v3423_v1, %v532_v24  ;;  %v487_v5 = vadd.f32 %v3420_v18, %v486_v0  ;;  %v743_v6 = vsel %vm180_vm3, %v741_v7, %v742_v63  ;;  %v786_v20 = vsel %vm783_vm8, %v784_v10, %v785_v2 }
 0x165   :  { %v2720_v8 = vpop.f32.mrf.mxu0  ;;  %v507_v9 = vpop.f32.mrf.mxu1  ;;  %v3449_v16 = vpack.c.bf16 %v743_v6, %v741_v7  ;;  %v828_v35 = vpack.c.bf16 %v786_v20, %v784_v10 }
 0x166   :  { %v533_v13 = vmax.f32 %v487_v5, 0.0  ;;  %v508_v14 = vadd.f32 %v3420_v18, %v507_v9  ;;  %v829_v21 = vpack.c.bf16 %v616_v4, %v615_v25  ;;  %v744_v28 = vrot.slane %v616_v4, 2 }
 0x167   :  { %v491_v15 = vpop.f32.mrf.mxu0  ;;  %v2731_v30 = vpop.f32.mrf.mxu1  ;;  %v787_v50 = vrot.slane %v616_v4, 4  ;;  %v933_v39 = vrot.slane %v3449_v16, 3 }
 0x168   :  { %v3453_v23 = vmul.f32 %v3425_v3, %v533_v13  ;;  %v492_v27 = vadd.f32 %v3420_v18, %v491_v15  ;;  %v538_v29 = vmax.f32 %v508_v14, 0.0  ;;  %v3461_v43 = vrot.slane %v829_v21, 3  ;;  %v3496_v30 = vpop.permute.xlu1 %596 }
 0x169   :  { %v2723_v31 = vpop.f32.mrf.mxu0  ;;  %v510_v32 = vpop.f32.mrf.mxu1  ;;  %v745_v52 = vsel %vm180_vm3, %v742_v63, %v744_v28  ;;  %v788_v56 = vsel %vm783_vm8, %v785_v2, %v787_v50  ;;  %v936_v63 = vrot.slane %v828_v35, 3 }
 0x16a   :  { %v2443_v17 = vpack.c.bf16 %v3453_v23, %v616_v4  ;;  %v534_v33 = vmax.f32 %v492_v27, 0.0  ;;  %v511_v34 = vadd.f32 %v3420_v18, %v510_v32  ;;  %v746_v38 = vrot.slane %v3453_v23, 2 }
 0x16b   :  { %v494_v36 = vpop.f32.mrf.mxu0  ;;  %v2732_v37 = vpop.f32.mrf.mxu1  ;;  %v789_v42 = vrot.slane %v3453_v23, 4  ;;  %v3474_v53 = vmul.f32 %v3463_v44, %v538_v29  ;;  %v932_v0 = vsel %vm929_vm9, %v930_v41, %v3461_v43 }
 0x16c   :  { %2525 = vst [vmem:[%s3995_s8 + $0x8] sm:$0xff] %v2443_v17   ;;  %v618_v46 = vmul.f32 %v3429_v59, %v534_v33  ;;  %v495_v48 = vadd.f32 %v3420_v18, %v494_v36  ;;  %v539_v49 = vmax.f32 %v511_v34, 0.0  ;;  %v747_v55 = vsel %vm180_vm3, %v744_v28, %v746_v38  ;;  %v2949_v28 = vld [vmem:[%s3993_s6 + $0x38] sm:$0xff]   ;;  %v2950_v33 = vld [vmem:[%s3993_s6 + $0x70] sm:$0xff]   ;;  %v3519_v34 = vpop.permute.xlu0 %601 }
 0x16d   :  { %v2724_v51 = vpop.f32.mrf.mxu0  ;;  %v515_v54 = vpop.f32.mrf.mxu1  ;;  %v790_v57 = vsel %vm783_vm8, %v787_v50, %v789_v42  ;;  %v830_v61 = vpack.c.bf16 %v747_v55, %v745_v52 }
 0x16e   :  { %v535_v58 = vmax.f32 %v495_v48, 0.0  ;;  %v3480_v25 = vmul.f32 %v3465_v45, %v539_v49  ;;  %v516_v22 = vadd.f32 %v3420_v18, %v515_v54  ;;  %v831_v7 = vpack.c.bf16 %v790_v57, %v788_v56  ;;  %v2952_v57 = vld [vmem:[%s3993_s6 + $0x30] sm:$0xff]  }
 0x16f   :  { %v499_v62 = vpop.f32.mrf.mxu0  ;;  %v2735_v24 = vpop.f32.mrf.mxu1  ;;  %v748_v4 = vrot.slane %v618_v46, 2  ;;  %v791_v8 = vrot.slane %v618_v46, 4  ;;  %v3491_v13 = vrot.slane %v830_v61, 3  ;;  %v832_v15 = vpack.c.bf16 %v618_v46, %v3453_v23  ;;  %v2951_v23 = vld [vmem:[%s3993_s6 + $0xb8] sm:$0xff]  }
 0x170   :  { %v3486_v5 = vmul.f32 %v3431_v60, %v535_v58  ;;  %v2458_v2 = vpack.c.bf16 %v3480_v25, %v3474_v53  ;;  %v500_v6 = vadd.f32 %v3420_v18, %v499_v62  ;;  %v540_v9 = vmax.f32 %v516_v22, 0.0 }
 0x171   :  { %v2727_v10 = vpop.f32.mrf.mxu0  ;;  %v518_v11 = vpop.f32.mrf.mxu1  ;;  %v3493_v14 = vrot.slane %v831_v7, 3  ;;  %v749_v27 = vsel %vm180_vm3, %v746_v38, %v748_v4  ;;  %v935_v32 = vsel %vm929_vm9, %v933_v39, %v3491_v13  ;;  %v792_v38 = vsel %vm783_vm8, %v789_v42, %v791_v8 }
 0x172   :  { %v2448_v16 = vpack.c.bf16 %v3486_v5, %v618_v46  ;;  %2528 = vst [vmem:[%s3995_s8 + $0x20] sm:$0xff] %v2458_v2   ;;  %v536_v20 = vmax.f32 %v500_v6, 0.0  ;;  %v519_v21 = vadd.f32 %v3420_v18, %v518_v11  ;;  %v750_v41 = vrot.slane %v3486_v5, 2  ;;  %1172 = vmatprep.mubr.bf16.mxu1 %v935_v32  ;;  %v3554_v2 = vpop.permute.xlu1 %606  ;;  %v3585_v32 = vpop.permute.xlu0 %611 }
 0x173   :  { %v502_v29 = vpop.f32.mrf.mxu0  ;;  %v2736_v31 = vpop.f32.mrf.mxu1  ;;  %v938_v50 = vsel %vm929_vm9, %v936_v63, %v3493_v14  ;;  %v793_v17 = vrot.slane %v3486_v5, 4  ;;  %v3530_v39 = vmul.f32 %v3496_v30, %v540_v9  ;;  %1173 = vmatmul.mubr.bf16.vlgmr.msra.gmra.mxu1 %v932_v0  ;;  %v3536_v51 = vrot.slane %v832_v15, 3 }
 0x174   :  { %2526 = vst [vmem:[%s3995_s8 + $0x10] sm:$0xff] %v2448_v16   ;;  %v3525_v35 = vmul.f32 %v3444_v12, %v536_v20  ;;  %v503_v36 = vadd.f32 %v3420_v18, %v502_v29  ;;  %v541_v37 = vmax.f32 %v519_v21, 0.0  ;;  %2758 = vmatmul.mubr.bf16.vlgmr.msra.gmra.mxu0 %v938_v50  ;;  %v751_v49 = vsel %vm180_vm3, %v748_v4, %v750_v41 }
 0x175   :  { %v2728_v46 = vpop.f32.mrf.mxu0  ;;  %v523_v48 = vpop.f32.mrf.mxu1  ;;  %2761 = vmatprep.mubr.msk.bf16.mxu0 %vm2977_vm4, %v3441_v26  ;;  %v794_v52 = vsel %vm783_vm8, %v791_v8, %v793_v17  ;;  %v833_v56 = vpack.c.bf16 %v751_v49, %v749_v27  ;;  %2629 = vmatpush3.bf16.msra.mxu1 %v2949_v28  ;;  %v756_v24 = vrot.slane %v3474_v53, 2  ;;  %v940_v9 = vsel %vm929_vm9, %v3461_v43, %v3536_v51 }
 0x176   :  { %v537_v54 = vmax.f32 %v503_v36, 0.0  ;;  %v3539_v55 = vmul.f32 %v3519_v34, %v541_v37  ;;  %v524_v42 = vadd.f32 %v3420_v18, %v523_v48  ;;  %2786 = vmatpush3.bf16.msra.mxu0 %v2951_v23  ;;  %v834_v22 = vpack.c.bf16 %v794_v52, %v792_v38  ;;  %2630 = vmatprep.subr.bf16.mxu1 %v2950_v33 }
 0x177   :  { %v2739_v58 = vpop.f32.mrf.mxu1  ;;  %v752_v61 = vrot.slane %v3525_v35, 2  ;;  %v795_v62 = vrot.slane %v3525_v35, 4  ;;  %2787 = vmatprep.subr.bf16.mxu0 %v3441_v26  ;;  %v941_v4 = vrot.slane %v833_v56, 3  ;;  %v758_v10 = vrot.slane %v3480_v25, 2 }
 0x178   :  { %v3550_v7 = vmul.f32 %v3446_v40, %v537_v54  ;;  %v2463_v63 = vpack.c.bf16 %v3539_v55, %v3530_v39  ;;  %v542_v0 = vmax.f32 %v524_v42, 0.0  ;;  %v943_v8 = vrot.slane %v834_v22, 3 }
 0x179   :  { %v526_v6 = vpop.f32.mrf.mxu1  ;;  %v799_v11 = vrot.slane %v3474_v53, 4  ;;  %v942_v21 = vsel %vm929_vm9, %v3491_v13, %v941_v4  ;;  %2631 = vmatpush3.bf16.msra.mxu1 %v2952_v57  ;;  %v835_v29 = vpack.c.bf16 %v3525_v35, %v3486_v5  ;;  %v753_v31 = vsel %vm180_vm3, %v750_v41, %v752_v61 }
 0x17a   :  { %v2453_v15 = vpack.c.bf16 %v3550_v7, %v3525_v35  ;;  %2529 = vst [vmem:[%s3995_s8 + $0x28] sm:$0xff] %v2463_v63   ;;  %v3567_v16 = vmul.f32 %v3554_v2, %v542_v0  ;;  %v527_v20 = vadd.f32 %v3420_v18, %v526_v6  ;;  %1180 = vmatprep.mubr.bf16.mxu1 %v942_v21  ;;  %v754_v28 = vrot.slane %v3550_v7, 2 }
 0x17b   :  { %v2740_v43 = vpop.f32.mrf.mxu1  ;;  %v944_v27 = vsel %vm929_vm9, %v3493_v14, %v943_v8  ;;  %v797_v23 = vrot.slane %v3550_v7, 4  ;;  %v796_v14 = vsel %vm783_vm8, %v793_v17, %v795_v62  ;;  %1181 = vmatmul.mubr.bf16.gmra.mxu1 %v940_v9  ;;  %v759_v33 = vsel %vm180_vm3, %v756_v24, %v758_v10 }
 0x17c   :  { %2527 = vst [vmem:[%s3995_s8 + $0x18] sm:$0xff] %v2453_v15   ;;  %v2405_v18 = vpack.c.bf16 %v3567_v16, %v3567_v16  ;;  %v543_v13 = vmax.f32 %v527_v20, 0.0  ;;  %2762 = vmatmul.mubr.bf16.gmra.mxu0 %v944_v27  ;;  %v755_v5 = vsel %vm180_vm3, %v752_v61, %v754_v28  ;;  %v801_v35 = vrot.slane %v3480_v25, 4 }
 0x17d   :  { %2765 = vmatprep.mubr.msk.bf16.mxu0 %vm2977_vm4, %v3441_v26  ;;  %v798_v50 = vsel %vm783_vm8, %v795_v62, %v797_v23  ;;  %v836_v17 = vpack.c.bf16 %v755_v5, %v753_v31  ;;  %v757_v37 = vsel %vm180_vm3, %v754_v28, %v756_v24  ;;  %v945_v38 = vrot.slane %v835_v29, 3 }
 0x17e   :  { %710 = vst [vmem:[%s3995_s8 + $0x30] sm:$0xf] %v2405_v18  ;;  %v627_v41 = vmul.f32 %v3585_v32, %v543_v13  ;;  %v837_v36 = vpack.c.bf16 %v798_v50, %v796_v14  ;;  %v839_v46 = vpack.c.bf16 %v759_v33, %v757_v37  ;;  %v760_v48 = vrot.slane %v3530_v39, 2 }
 0x17f   :  { %v947_v52 = vrot.slane %v836_v17, 3  ;;  %v800_v42 = vsel %vm783_vm8, %v797_v23, %v799_v11  ;;  %v762_v57 = vrot.slane %v3539_v55, 2  ;;  %v802_v61 = vsel %vm783_vm8, %v799_v11, %v801_v35 }
 0x180   :  { %641 = vst [vmem:[#allocation3 + $0x70] sm:$0xf] %v627_v41  ;;  %v2406_v49 = vpack.c.bf16 %v627_v41, %v627_v41  ;;  %v949_v54 = vrot.slane %v837_v36, 3  ;;  %v953_v56 = vrot.slane %v839_v46, 3  ;;  %v840_v62 = vpack.c.bf16 %v802_v61, %v800_v42 }
 0x181   :  { %v948_v58 = vsel %vm929_vm9, %v941_v4, %v947_v52  ;;  %v763_v24 = vsel %vm180_vm3, %v760_v48, %v762_v57  ;;  %v946_v63 = vsel %vm929_vm9, %v3536_v51, %v945_v38  ;;  %v838_v0 = vpack.c.bf16 %v3474_v53, %v3550_v7 }
 0x182   :  { %711 = vst [vmem:[%s3995_s8 + $0x34] sm:$0x3] %v2406_v49  ;;  %v950_v22 = vsel %vm929_vm9, %v943_v8, %v949_v54  ;;  %1188 = vmatprep.mubr.bf16.mxu1 %v948_v58  ;;  %v761_v6 = vsel %vm180_vm3, %v758_v10, %v760_v48  ;;  %v805_v9 = vrot.slane %v3539_v55, 4  ;;  %v954_v4 = vsel %vm929_vm9, %v947_v52, %v953_v56 }
 0x183   :  { %1189 = vmatmul.mubr.bf16.gmra.mxu1 %v946_v63  ;;  %v842_v8 = vpack.c.bf16 %v763_v24, %v761_v6  ;;  %v803_v11 = vrot.slane %v3530_v39, 4  ;;  %v955_v15 = vrot.slane %v840_v62, 3  ;;  %v951_v51 = vrot.slane %v838_v0, 3  ;;  %v2953_v24 = vld [vmem:[%s3993_s6 + $0x68] sm:$0xff]   ;;  %v2954_v63 = vld [vmem:[%s3993_s6 + $0xb0] sm:$0xff]   ;;  %v2956_v6 = vld [vmem:[%s3993_s6 + $0x60] sm:$0xff]  }
 0x184   :  { %2766 = vmatmul.mubr.bf16.gmra.mxu0 %v950_v22  ;;  %1196 = vmatprep.mubr.bf16.mxu1 %v954_v4  ;;  %v764_v53 = vrot.slane %v3567_v16, 2  ;;  %v841_v5 = vpack.c.bf16 %v3530_v39, %v3480_v25  ;;  %v807_v50 = vrot.slane %v3567_v16, 4  ;;  %v844_v48 = vpack.c.bf16 %v3567_v16, %v3539_v55  ;;  %v2955_v0 = vld [vmem:[%s3993_s6 + $0x28] sm:$0xff]   ;;  %v2958_v4 = vld [vmem:[%s3993_s6 + $0x20] sm:$0xff]  }
 0x185   :  { %2769 = vmatprep.mubr.msk.bf16.mxu0 %vm2977_vm4, %v3441_v26  ;;  %v806_v21 = vsel %vm783_vm8, %v803_v11, %v805_v9  ;;  %v959_v10 = vrot.slane %v842_v8, 3  ;;  %v804_v43 = vsel %vm783_vm8, %v801_v35, %v803_v11  ;;  %v956_v28 = vsel %vm929_vm9, %v949_v54, %v955_v15  ;;  %2632 = vmatprep.subr.bf16.mxu1 %v2953_v24  ;;  %v2959_v8 = vld [vmem:[%s3993_s6 + $0x58] sm:$0xff]   ;;  %v2960_v11 = vld [vmem:[%s3993_s6 + $0xa0] sm:$0xff]  }
 0x186   :  { %v843_v23 = vpack.c.bf16 %v806_v21, %v804_v43  ;;  %v952_v29 = vsel %vm929_vm9, %v945_v38, %v951_v51  ;;  %v765_v18 = vsel %vm180_vm3, %v762_v57, %v764_v53  ;;  %v957_v17 = vrot.slane %v841_v5, 3  ;;  %2788 = vmatpush3.bf16.msra.mxu0 %v2954_v63  ;;  %2633 = vmatpush3.bf16.msra.mxu1 %v2955_v0  ;;  %v2964_v21 = vld [vmem:[%s3993_s6 + $0x10] sm:$0xff]   ;;  %v2967_v43 = vld [vmem:[%s3993_s6 + $0x8] sm:$0xff]  }
 0x187   :  { %v726_v20 = vld [vmem:[#allocation3 + $0x70] sm:$0xff]  ;;  %v960_v31 = vsel %vm929_vm9, %v953_v56, %v959_v10  ;;  %v808_v36 = vsel %vm783_vm8, %v805_v9, %v807_v50  ;;  %v963_v52 = vrot.slane %v844_v48, 3  ;;  %2789 = vmatprep.subr.bf16.mxu0 %v3441_v26  ;;  %v2957_v9 = vld [vmem:[%s3993_s6 + $0xa8] sm:$0xff]   ;;  %2634 = vmatprep.subr.bf16.mxu1 %v2956_v6 }
 0x188   :  { %v766_v7 = vrot.slane %v726_v20, 2  ;;  %v809_v13 = vrot.slane %v726_v20, 4  ;;  %v961_v33 = vrot.slane %v843_v23, 3  ;;  %v958_v46 = vsel %vm929_vm9, %v951_v51, %v957_v17  ;;  %v2962_v51 = vld [vmem:[%s3993_s6 + $0x50] sm:$0xff]   ;;  %v2970_v23 = vld [vmem:[%s3993_s6] sm:$0xff]  }
 0x189   :  { %v964_v57 = vsel %vm929_vm9, %v957_v17, %v963_v52  ;;  %v847_v58 = vpack.c.bf16 %v726_v20, %v726_v20  ;;  %v2963_v20 = vld [vmem:[%s3993_s6 + $0x98] sm:$0xff]  }
 0x18a   :  { %v767_v27 = vsel %vm180_vm3, %v764_v53, %v766_v7  ;;  %v810_v35 = vsel %vm783_vm8, %v807_v50, %v809_v13  ;;  %v962_v37 = vsel %vm929_vm9, %v955_v15, %v961_v33  ;;  %v848_v39 = vpack.c.bf16 %v766_v7, %v766_v7  ;;  %2790 = vmatpush3.bf16.msra.mxu0 %v2957_v9  ;;  %v2961_v15 = vld [vmem:[%s3993_s6 + $0x18] sm:$0xff]   ;;  %v2966_v53 = vld [vmem:[%s3993_s6 + $0x90] sm:$0xff]   ;;  %v2965_v7 = vld [vmem:[%s3993_s6 + $0x48] sm:$0xff]  }
 0x18b   :  { %1197 = vmatmul.mubr.bf16.gmra.mxu1 %v952_v29  ;;  %v845_v14 = vpack.c.bf16 %v767_v27, %v765_v18  ;;  %v846_v38 = vpack.c.bf16 %v810_v35, %v808_v36  ;;  %v849_v56 = vpack.c.bf16 %v809_v13, %v809_v13  ;;  %v969_v22 = vrot.slane %v847_v58, 3  ;;  %2791 = vmatprep.subr.bf16.mxu0 %v3441_v26  ;;  %v2968_v27 = vld [vmem:[%s3993_s6 + $0x40] sm:$0xff]  }
 0x18c   :  { %2770 = vmatmul.mubr.bf16.gmra.mxu0 %v956_v28  ;;  %1204 = vmatprep.mubr.bf16.mxu1 %v960_v31  ;;  %v971_v54 = vrot.slane %v848_v39, 3  ;;  %v2971_v28 = vld [vmem:[%s3993_s6 + $0x80] sm:$0xff]  }
 0x18d   :  { %2773 = vmatprep.mubr.msk.bf16.mxu0 %vm2977_vm4, %v3441_v26  ;;  %v965_v41 = vrot.slane %v845_v14, 3  ;;  %v967_v49 = vrot.slane %v846_v38, 3  ;;  %v973_v16 = vrot.slane %v849_v56, 3  ;;  %v970_v62 = vsel %vm929_vm9, %v963_v52, %v969_v22  ;;  %2635 = vmatpush3.bf16.msra.mxu1 %v2958_v4  ;;  %v3715_v31 = vld [vmem:[%s3996_s5] ss:$0 sm:$0xff] }
 0x18e   :  { %2636 = vmatprep.subr.bf16.mxu1 %v2959_v8  ;;  %2792 = vmatpush3.bf16.msra.mxu0 %v2960_v11 }
 0x18f   :  { %v966_v25 = vsel %vm929_vm9, %v959_v10, %v965_v41  ;;  %v968_v42 = vsel %vm929_vm9, %v961_v33, %v967_v49  ;;  %v972_v55 = vsel %vm929_vm9, %v965_v41, %v971_v54  ;;  %v974_v61 = vsel %vm929_vm9, %v967_v49, %v973_v16  ;;  %2793 = vmatprep.subr.bf16.mxu0 %v3441_v26  ;;  %v2969_v10 = vld [vmem:[%s3993_s6 + $0x88] sm:$0xff]  }
 0x191   :  { %2637 = vmatpush3.bf16.msra.mxu1 %v2961_v15 }
 0x192   :  { %2794 = vmatpush3.bf16.msra.mxu0 %v2963_v20  ;;  %2638 = vmatprep.subr.bf16.mxu1 %v2962_v51 }
 0x193   :  { %1205 = vmatmul.mubr.bf16.gmra.mxu1 %v958_v46  ;;  %2795 = vmatprep.subr.bf16.mxu0 %v3441_v26 }
 0x194   :  { %2774 = vmatmul.mubr.bf16.gmra.mxu0 %v962_v37  ;;  %1212 = vmatprep.mubr.bf16.mxu1 %v966_v25 }
 0x195   :  { %2777 = vmatprep.mubr.msk.bf16.mxu0 %vm2977_vm4, %v3441_v26  ;;  %2639 = vmatpush3.bf16.msra.mxu1 %v2964_v21 }
 0x196   :  { %2796 = vmatpush3.bf16.msra.mxu0 %v2966_v53  ;;  %2640 = vmatprep.subr.bf16.mxu1 %v2965_v7 }
 0x197   :  { %2797 = vmatprep.subr.bf16.mxu0 %v3441_v26 }
 0x199   :  { %2641 = vmatpush3.bf16.msra.mxu1 %v2967_v43 }
 0x19a   :  { %2798 = vmatpush3.bf16.msra.mxu0 %v2969_v10  ;;  %2642 = vmatprep.subr.bf16.mxu1 %v2968_v27 }
 0x19b   :  { %1213 = vmatmul.mubr.bf16.gmra.mxu1 %v964_v57  ;;  %2799 = vmatprep.subr.bf16.mxu0 %v3441_v26 }
 0x19c   :  { %2778 = vmatmul.mubr.bf16.gmra.mxu0 %v968_v42  ;;  %1220 = vmatprep.mubr.bf16.mxu1 %v972_v55 }
 0x19d   :  { %2781 = vmatprep.mubr.msk.bf16.mxu0 %vm2977_vm4, %v3441_v26  ;;  %2643 = vmatpush3.bf16.msra.mxu1 %v2970_v23 }
 0x19e   :  { %2800 = vmatpush3.bf16.msra.mxu0 %v2971_v28 }
 0x1a3   :  { %1221 = vmatmul.mubr.bf16.gmra.mxu1 %v970_v62 }
 0x1a4   :  { %2782 = vmatmul.mubr.bf16.gmra.mxu0 %v974_v61 }
 0x1a5   :  { %2801 = vmatprep.mubr.msk.bf16.mxu0 %vm2977_vm4, %v3441_v26 }
 0x233   :  { %v2571_v18 = vpop.f32.mrf.mxu1 }
 0x234   :  { %v1263_v29 = vpop.f32.mrf.mxu0 }
 0x235   :  { %v2572_v14 = vpop.f32.mrf.mxu1 }
 0x236   :  { %v2759_v13 = vpop.f32.mrf.mxu0  ;;  %v2573_v5 = vadd.f32 %v2572_v14, %v2571_v18 }
 0x237   :  { %v2574_v33 = vpop.f32.mrf.mxu1 }
 0x238   :  { %v1266_v50 = vpop.f32.mrf.mxu0  ;;  %v1175_v35 = vadd.f32 %v2573_v5, %v3715_v31 }
 0x239   :  { %v2575_v17 = vpop.f32.mrf.mxu1 }
 0x23a   :  { %v2760_v41 = vpop.f32.mrf.mxu0  ;;  %v1264_v36 = vadd.f32 %v1263_v29, %v1175_v35  ;;  %v2576_v37 = vadd.f32 %v2575_v17, %v2574_v33 }
 0x23b   :  { %v2577_v46 = vpop.f32.mrf.mxu1 }
 0x23c   :  { %v1271_v38 = vpop.f32.mrf.mxu0  ;;  %v1318_v48 = vmax.f32 %v1264_v36, 0.0  ;;  %v1178_v25 = vadd.f32 %v2576_v37, %v3715_v31 }
 0x23d   :  { %v2578_v49 = vpop.f32.mrf.mxu1 }
 0x23e   :  { %v2763_v39 = vpop.f32.mrf.mxu0  ;;  %v1332_v52 = vmul.f32 %v1318_v48, %v3415_v19  ;;  %v1267_v54 = vadd.f32 %v1266_v50, %v1178_v25  ;;  %v2579_v42 = vadd.f32 %v2578_v49, %v2577_v46 }
 0x23f   :  { %v2580_v57 = vpop.f32.mrf.mxu1 }
 0x240   :  { %v1274_v56 = vpop.f32.mrf.mxu0  ;;  %v1319_v58 = vmax.f32 %v1267_v54, 0.0  ;;  %v1183_v55 = vadd.f32 %v2579_v42, %v3715_v31  ;;  %v1546_v61 = vpack.c.bf16 %v1332_v52, %v3441_v26  ;;  %v1461_v9 = vrot.slane %v1332_v52, 3 }
 0x241   :  { %v2581_v22 = vpop.f32.mrf.mxu1  ;;  %v1504_v53 = vrot.slane %v1332_v52, 6 }
 0x242   :  { %v2764_v16 = vpop.f32.mrf.mxu0  ;;  %v1333_v62 = vmul.f32 %v1319_v58, %v3413_v47  ;;  %v1272_v24 = vadd.f32 %v1271_v38, %v1183_v55  ;;  %v2582_v63 = vadd.f32 %v2581_v22, %v2580_v57  ;;  %v1627_v19 = vshrl.u32 %v1546_v61, 16 }
 0x243   :  { %v2583_v6 = vpop.f32.mrf.mxu1  ;;  %v1630_v4 = vshll.u32 %v1546_v61, 16 }
 0x244   :  { %v1279_v0 = vpop.f32.mrf.mxu0  ;;  %v2468_v8 = vpack.c.bf16 %v1333_v62, %v1332_v52  ;;  %v1320_v11 = vmax.f32 %v1272_v24, 0.0  ;;  %v1186_v15 = vadd.f32 %v2582_v63, %v3715_v31  ;;  %v1462_v51 = vrot.slane %v1333_v62, 3 }
 0x245   :  { %v2584_v21 = vpop.f32.mrf.mxu1  ;;  %v1505_v7 = vrot.slane %v1333_v62, 6  ;;  %v3724_v10 = vrot.slane %v1627_v19, 2  ;;  %v3726_v47 = vrot.slane %v1630_v4, 3 }
 0x246   :  { %v2767_v20 = vpop.f32.mrf.mxu0  ;;  %2530 = vst [vmem:[%s3995_s8 + $0x38] sm:$0xff] %v2468_v8   ;;  %v1334_v43 = vmul.f32 %v1320_v11, %v3423_v1  ;;  %v1275_v27 = vadd.f32 %v1274_v56, %v1186_v15  ;;  %v2585_v28 = vadd.f32 %v2584_v21, %v2583_v6  ;;  %v1463_v29 = vsel %vm929_vm9, %v1461_v9, %v1462_v51 }
 0x247   :  { %v2586_v18 = vpop.f32.mrf.mxu1  ;;  %v1547_v13 = vpack.c.bf16 %v1463_v29, %v1461_v9  ;;  %v1506_v14 = vsel %vm1503_vm10, %v1504_v53, %v1505_v7  ;;  %v1633_v5 = vor.u32 %v3726_v47, %v3724_v10 }
 0x248   :  { %v1282_v23 = vpop.f32.mrf.mxu0  ;;  %v1321_v50 = vmax.f32 %v1275_v27, 0.0  ;;  %v1191_v33 = vadd.f32 %v2585_v28, %v3715_v31  ;;  %v1464_v41 = vrot.slane %v1334_v43, 3  ;;  %v1507_v17 = vrot.slane %v1334_v43, 6 }
 0x249   :  { %v2587_v36 = vpop.f32.mrf.mxu1  ;;  %v1644_v1 = vshrl.u32 %v1547_v13, 16  ;;  %v1647_v37 = vshll.u32 %v1547_v13, 16  ;;  %v1548_v38 = vpack.c.bf16 %v1506_v14, %v1504_v53  ;;  %v1549_v46 = vpack.c.bf16 %v1334_v43, %v1333_v62 }
 0x24a   :  { %v2768_v35 = vpop.f32.mrf.mxu0  ;;  %v3738_v48 = vmul.f32 %v1321_v50, %v3425_v3  ;;  %v1280_v25 = vadd.f32 %v1279_v0, %v1191_v33  ;;  %v2588_v39 = vadd.f32 %v2587_v36, %v2586_v18  ;;  %v1465_v52 = vsel %vm929_vm9, %v1462_v51, %v1464_v41 }
 0x24b   :  { %v2589_v54 = vpop.f32.mrf.mxu1  ;;  %v3741_v42 = vrot.slane %v1644_v1, 2  ;;  %v3743_v56 = vrot.slane %v1647_v37, 3  ;;  %v1508_v57 = vsel %vm1503_vm10, %v1505_v7, %v1507_v17  ;;  %v1661_v58 = vshrl.u32 %v1548_v38, 16 }
 0x24c   :  { %v1287_v49 = vpop.f32.mrf.mxu0  ;;  %v2473_v55 = vpack.c.bf16 %v3738_v48, %v1334_v43  ;;  %v1322_v16 = vmax.f32 %v1280_v25, 0.0  ;;  %v1194_v22 = vadd.f32 %v2588_v39, %v3715_v31  ;;  %v1466_v61 = vrot.slane %v3738_v48, 3 }
 0x24d   :  { %v2590_v62 = vpop.f32.mrf.mxu1  ;;  %v1650_v24 = vor.u32 %v3743_v56, %v3741_v42  ;;  %v1509_v63 = vrot.slane %v3738_v48, 6  ;;  %v3752_v0 = vrot.slane %v1661_v58, 2  ;;  %v1664_v6 = vshll.u32 %v1548_v38, 16 }
 0x24e   :  { %v2771_v3 = vpop.f32.mrf.mxu0  ;;  %2531 = vst [vmem:[%s3995_s8 + $0x40] sm:$0xff] %v2473_v55   ;;  %v3758_v9 = vmul.f32 %v1322_v16, %v3429_v59  ;;  %v1283_v19 = vadd.f32 %v1282_v23, %v1194_v22  ;;  %v2591_v4 = vadd.f32 %v2590_v62, %v2589_v54  ;;  %v1467_v11 = vsel %vm929_vm9, %v1464_v41, %v1466_v61 }
 0x24f   :  { %v2592_v15 = vpop.f32.mrf.mxu1  ;;  %v1550_v20 = vpack.c.bf16 %v1467_v11, %v1465_v52  ;;  %v1510_v51 = vsel %vm1503_vm10, %v1507_v17, %v1509_v63  ;;  %v1666_v21 = vrot.slane %v1664_v6, 3  ;;  %v1635_v53 = vshrl.u32 %v1549_v46, 16 }
 0x250   :  { %v1290_v8 = vpop.f32.mrf.mxu0  ;;  %v1323_v7 = vmax.f32 %v1283_v19, 0.0  ;;  %v1199_v43 = vadd.f32 %v2591_v4, %v3715_v31  ;;  %v1551_v28 = vpack.c.bf16 %v1510_v51, %v1508_v57  ;;  %v1638_v59 = vshll.u32 %v1549_v46, 16 }
 0x251   :  { %v2593_v29 = vpop.f32.mrf.mxu1  ;;  %v1652_v23 = vshrl.u32 %v1550_v20, 16  ;;  %v1655_v18 = vshll.u32 %v1550_v20, 16  ;;  %v1667_v13 = vor.u32 %v1666_v21, %v3752_v0  ;;  %v1637_v14 = vrot.slane %v1635_v53, 2 }
 0x252   :  { %v2772_v27 = vpop.f32.mrf.mxu0  ;;  %v3767_v50 = vmul.f32 %v1323_v7, %v3431_v60  ;;  %v1288_v33 = vadd.f32 %v1287_v49, %v1199_v43  ;;  %v2594_v35 = vadd.f32 %v2593_v29, %v2592_v15  ;;  %v1669_v17 = vshrl.u32 %v1551_v28, 16 }
 0x253   :  { %v2595_v36 = vpop.f32.mrf.mxu1  ;;  %v1654_v1 = vrot.slane %v1652_v23, 2  ;;  %v1657_v37 = vrot.slane %v1655_v18, 3  ;;  %v1672_v38 = vshll.u32 %v1551_v28, 16  ;;  %v1640_v25 = vrot.slane %v1638_v59, 3 }
 0x254   :  { %v1295_v41 = vpop.f32.mrf.mxu0  ;;  %v2478_v46 = vpack.c.bf16 %v3767_v50, %v3758_v9  ;;  %v1324_v39 = vmax.f32 %v1288_v33, 0.0  ;;  %v1202_v52 = vadd.f32 %v2594_v35, %v3715_v31  ;;  %v1671_v42 = vrot.slane %v1669_v17, 2 }
 0x255   :  { %v2596_v56 = vpop.f32.mrf.mxu1  ;;  %v3772_v60 = vor.u32 %v1657_v37, %v1654_v1  ;;  %v1674_v49 = vrot.slane %v1672_v38, 3  ;;  %v3774_v57 = vor.u32 %v1640_v25, %v1637_v14  ;;  %v1468_v58 = vrot.slane %v3758_v9, 3 }
 0x256   :  { %v2775_v54 = vpop.f32.mrf.mxu0  ;;  %2532 = vst [vmem:[%s3995_s8 + $0x48] sm:$0xff] %v2478_v46   ;;  %v3781_v55 = vmul.f32 %v1324_v39, %v3444_v12  ;;  %v1291_v16 = vadd.f32 %v1290_v8, %v1202_v52  ;;  %v2597_v22 = vadd.f32 %v2596_v56, %v2595_v36  ;;  %v1470_v62 = vrot.slane %v3767_v50, 3 }
 0x257   :  { %v2598_v0 = vpop.f32.mrf.mxu1  ;;  %v1659_v6 = vsel %vm1625_vm11, %v1650_v24, %v3772_v60  ;;  %v3786_v19 = vor.u32 %v1674_v49, %v1671_v42  ;;  %v1642_v4 = vsel %vm1625_vm11, %v1633_v5, %v3774_v57  ;;  %v1469_v12 = vsel %vm929_vm9, %v1466_v61, %v1468_v58 }
 0x258   :  { %v1298_v3 = vpop.f32.mrf.mxu0  ;;  %v1325_v11 = vmax.f32 %v1291_v16, 0.0  ;;  %v1207_v8 = vadd.f32 %v2597_v22, %v3715_v31  ;;  %2024 = vmatprep.mubr.bf16.mxu1 %v1659_v6  ;;  %v1471_v20 = vsel %vm929_vm9, %v1468_v58, %v1470_v62  ;;  %v1511_v51 = vrot.slane %v3758_v9, 6 }
 0x259   :  { %v2599_v24 = vpop.f32.mrf.mxu1  ;;  %v1676_v21 = vsel %vm1625_vm11, %v1667_v13, %v3786_v19  ;;  %2025 = vmatmul.mubr.bf16.vlgmr.msra.gmra.mxu1 %v1642_v4  ;;  %v1553_v53 = vpack.c.bf16 %v1471_v20, %v1469_v12  ;;  %v1513_v10 = vrot.slane %v3767_v50, 6  ;;  %v1552_v47 = vpack.c.bf16 %v3758_v9, %v3738_v48 }
 0x25a   :  { %v2776_v15 = vpop.f32.mrf.mxu0  ;;  %v3803_v5 = vmul.f32 %v1325_v11, %v3446_v40  ;;  %v1296_v61 = vadd.f32 %v1295_v41, %v1207_v8  ;;  %v2600_v7 = vadd.f32 %v2599_v24, %v2598_v0  ;;  %2802 = vmatmul.mubr.bf16.vlgmr.msra.gmra.mxu0 %v1676_v21  ;;  %v1512_v27 = vsel %vm1503_vm10, %v1509_v63, %v1511_v51 }
 0x25b   :  { %v2601_v28 = vpop.f32.mrf.mxu1  ;;  %2805 = vmatprep.mubr.msk.bf16.mxu0 %vm2977_vm4, %v3441_v26  ;;  %v1687_v59 = vshrl.u32 %v1553_v53, 16  ;;  %v1690_v29 = vshll.u32 %v1553_v53, 16  ;;  %v1514_v9 = vsel %vm1503_vm10, %v1511_v51, %v1513_v10  ;;  %v1678_v40 = vshrl.u32 %v1552_v47, 16 }
 0x25c   :  { %v1303_v43 = vpop.f32.mrf.mxu0  ;;  %v2483_v23 = vpack.c.bf16 %v3803_v5, %v3781_v55  ;;  %v1326_v18 = vmax.f32 %v1296_v61, 0.0  ;;  %v1210_v13 = vadd.f32 %v2600_v7, %v3715_v31  ;;  %v1554_v14 = vpack.c.bf16 %v1514_v9, %v1512_v27 }
 0x25d   :  { %v2602_v63 = vpop.f32.mrf.mxu1  ;;  %v1689_v33 = vrot.slane %v1687_v59, 2  ;;  %v1692_v35 = vrot.slane %v1690_v29, 3  ;;  %v1680_v41 = vrot.slane %v1678_v40, 2  ;;  %v1681_v26 = vshll.u32 %v1552_v47, 16 }
 0x25e   :  { %v2779_v48 = vpop.f32.mrf.mxu0  ;;  %2533 = vst [vmem:[%s3995_s8 + $0x50] sm:$0xff] %v2483_v23   ;;  %v3820_v17 = vmul.f32 %v1326_v18, %v3463_v44  ;;  %v1299_v36 = vadd.f32 %v1298_v3, %v1210_v13  ;;  %v2603_v1 = vadd.f32 %v2602_v63, %v2601_v28  ;;  %v1696_v38 = vshrl.u32 %v1554_v14, 16  ;;  %v3859_v18 = vld [vmem:[#allocation3] sm:$0xff] }
 0x25f   :  { %v2604_v25 = vpop.f32.mrf.mxu1  ;;  %v3822_v46 = vor.u32 %v1692_v35, %v1689_v33  ;;  %v1699_v39 = vshll.u32 %v1554_v14, 16  ;;  %v1683_v52 = vrot.slane %v1681_v26, 3  ;;  %v1472_v54 = vrot.slane %v3781_v55, 3 }
 0x260   :  { %v1306_v37 = vpop.f32.mrf.mxu0  ;;  %v1327_v42 = vmax.f32 %v1299_v36, 0.0  ;;  %v1215_v56 = vadd.f32 %v2603_v1, %v3715_v31  ;;  %v1698_v58 = vrot.slane %v1696_v38, 2  ;;  %v1474_v16 = vrot.slane %v3803_v5, 3 }
 0x261   :  { %v2605_v44 = vpop.f32.mrf.mxu1  ;;  %v1694_v22 = vsel %vm1625_vm11, %v3772_v60, %v3822_v46  ;;  %v1701_v3 = vrot.slane %v1699_v39, 3  ;;  %v3830_v0 = vor.u32 %v1683_v52, %v1680_v41  ;;  %v1473_v6 = vsel %vm929_vm9, %v1470_v62, %v1472_v54 }
 0x262   :  { %v2780_v49 = vpop.f32.mrf.mxu0  ;;  %v3834_v4 = vmul.f32 %v1327_v42, %v3465_v45  ;;  %v1304_v12 = vadd.f32 %v1303_v43, %v1215_v56  ;;  %v2606_v11 = vadd.f32 %v2605_v44, %v2604_v25  ;;  %2032 = vmatprep.mubr.bf16.mxu1 %v1694_v22  ;;  %v1475_v15 = vsel %vm929_vm9, %v1472_v54, %v1474_v16 }
 0x263   :  { %v2607_v20 = vpop.f32.mrf.mxu1  ;;  %v1702_v51 = vor.u32 %v1701_v3, %v1698_v58  ;;  %v1685_v60 = vsel %vm1625_vm11, %v3774_v57, %v3830_v0  ;;  %v1556_v24 = vpack.c.bf16 %v1475_v15, %v1473_v6  ;;  %v1515_v62 = vrot.slane %v3781_v55, 6 }
 0x264   :  { %v1311_v8 = vpop.f32.mrf.mxu0  ;;  %v2488_v45 = vpack.c.bf16 %v3834_v4, %v3820_v17  ;;  %v1328_v21 = vmax.f32 %v1304_v12, 0.0  ;;  %v1218_v53 = vadd.f32 %v2606_v11, %v3715_v31  ;;  %2033 = vmatmul.mubr.bf16.gmra.mxu1 %v1685_v60  ;;  %v1517_v61 = vrot.slane %v3803_v5, 6 }
 0x265   :  { %v2608_v7 = vpop.f32.mrf.mxu1  ;;  %v1703_v43 = vsel %vm1625_vm11, %v3786_v19, %v1702_v51  ;;  %v1714_v27 = vshrl.u32 %v1556_v24, 16  ;;  %v1717_v28 = vshll.u32 %v1556_v24, 16  ;;  %v1516_v57 = vsel %vm1503_vm10, %v1513_v10, %v1515_v62 }
 0x266   :  { %v2783_v47 = vpop.f32.mrf.mxu0  ;;  %2534 = vst [vmem:[%s3995_s8 + $0x58] sm:$0xff] %v2488_v45   ;;  %v3856_v59 = vmul.f32 %v1328_v21, %v3496_v30  ;;  %v1307_v29 = vadd.f32 %v1306_v37, %v1218_v53  ;;  %v2609_v9 = vadd.f32 %v2608_v7, %v2607_v20  ;;  %2806 = vmatmul.mubr.bf16.gmra.mxu0 %v1703_v43  ;;  %v1476_v35 = vrot.slane %v3820_v17, 3 }
 0x267   :  { %v1518_v23 = vsel %vm1503_vm10, %v1515_v62, %v1517_v61  ;;  %v2610_v19 = vpop.f32.mrf.mxu1  ;;  %2809 = vmatprep.mubr.msk.bf16.mxu0 %vm2977_vm4, %v3859_v18  ;;  %v1716_v10 = vrot.slane %v1714_v27, 2  ;;  %v1719_v13 = vrot.slane %v1717_v28, 3  ;;  %v1555_v14 = vpack.c.bf16 %v3781_v55, %v3767_v50 }
 0x268   :  { %v1314_v40 = vpop.f32.mrf.mxu0  ;;  %v1557_v48 = vpack.c.bf16 %v1518_v23, %v1516_v57  ;;  %v1329_v30 = vmax.f32 %v1307_v29, 0.0  ;;  %v1223_v63 = vadd.f32 %v2609_v9, %v3715_v31  ;;  %v1478_v41 = vrot.slane %v3834_v4, 3 }
 0x269   :  { %v2611_v26 = vpop.f32.mrf.mxu1  ;;  %v3868_v36 = vor.u32 %v1719_v13, %v1716_v10  ;;  %v1705_v38 = vshrl.u32 %v1555_v14, 16  ;;  %v1708_v50 = vshll.u32 %v1555_v14, 16  ;;  %v1477_v3 = vsel %vm929_vm9, %v1474_v16, %v1476_v35 }
 0x26a   :  { %v2784_v33 = vpop.f32.mrf.mxu0  ;;  %v1723_v1 = vshrl.u32 %v1557_v48, 16  ;;  %v1726_v37 = vshll.u32 %v1557_v48, 16  ;;  %v3871_v25 = vmul.f32 %v1329_v30, %v3519_v34  ;;  %v1312_v39 = vadd.f32 %v1311_v8, %v1223_v63 }
 0x26b   :  { %v2612_v52 = vadd.f32 %v2611_v26, %v2610_v19  ;;  %v1721_v55 = vsel %vm1625_vm11, %v3822_v46, %v3868_v36  ;;  %v1707_v56 = vrot.slane %v1705_v38, 2  ;;  %v1710_v22 = vrot.slane %v1708_v50, 3 }
 0x26c   :  { %v1725_v54 = vrot.slane %v1723_v1, 2  ;;  %v1728_v42 = vrot.slane %v1726_v37, 3  ;;  %v2493_v49 = vpack.c.bf16 %v3871_v25, %v3856_v59  ;;  %v1330_v58 = vmax.f32 %v1312_v39, 0.0  ;;  %2040 = vmatprep.mubr.bf16.mxu1 %v1721_v55 }
 0x26d   :  { %v1226_v44 = vadd.f32 %v2612_v52, %v3715_v31  ;;  %v1479_v6 = vsel %vm929_vm9, %v1476_v35, %v1478_v41  ;;  %v1519_v46 = vrot.slane %v3820_v17, 6  ;;  %v1711_v31 = vor.u32 %v1710_v22, %v1707_v56 }
 0x26e   :  { %v1729_v34 = vor.u32 %v1728_v42, %v1725_v54  ;;  %2535 = vst [vmem:[%s3995_s8 + $0x60] sm:$0xff] %v2493_v49   ;;  %v3888_v12 = vmul.f32 %v1330_v58, %v3554_v2  ;;  %v1559_v8 = vpack.c.bf16 %v1479_v6, %v1477_v3  ;;  %v1521_v16 = vrot.slane %v3834_v4, 6 }
 0x26f   :  { %v1315_v11 = vadd.f32 %v1314_v40, %v1226_v44  ;;  %v1520_v20 = vsel %vm1503_vm10, %v1517_v61, %v1519_v46  ;;  %v1558_v60 = vpack.c.bf16 %v3820_v17, %v3803_v5  ;;  %v1712_v2 = vsel %vm1625_vm11, %v3830_v0, %v1711_v31 }
 0x270   :  { %v1730_v15 = vsel %vm1625_vm11, %v1702_v51, %v1729_v34  ;;  %v2419_v24 = vpack.c.bf16 %v3888_v12, %v3888_v12  ;;  %v1741_v45 = vshrl.u32 %v1559_v8, 16  ;;  %2041 = vmatmul.mubr.bf16.gmra.mxu1 %v1712_v2  ;;  %v1744_v51 = vshll.u32 %v1559_v8, 16 }
 0x271   :  { %v1331_v62 = vmax.f32 %v1315_v11, 0.0  ;;  %2810 = vmatmul.mubr.bf16.gmra.mxu0 %v1730_v15  ;;  %v1522_v21 = vsel %vm1503_vm10, %v1519_v46, %v1521_v16  ;;  %v1732_v53 = vshrl.u32 %v1558_v60, 16  ;;  %v1735_v47 = vshll.u32 %v1558_v60, 16 }
 0x272   :  { %2813 = vmatprep.mubr.msk.bf16.mxu0 %vm2977_vm4, %v3859_v18  ;;  %2338 = vst [vmem:[%s3995_s8 + $0x68] sm:$0xf] %v2419_v24  ;;  %v1743_v17 = vrot.slane %v1741_v45, 2  ;;  %v1560_v61 = vpack.c.bf16 %v1522_v21, %v1520_v20  ;;  %v1480_v0 = vrot.slane %v3856_v59, 3  ;;  %v1746_v7 = vrot.slane %v1744_v51, 3 }
 0x273   :  { %v1345_v5 = vmul.f32 %v1331_v62, %v3585_v32  ;;  %v1734_v43 = vrot.slane %v1732_v53, 2  ;;  %v1737_v27 = vrot.slane %v1735_v47, 3  ;;  %v1482_v28 = vrot.slane %v3871_v25, 3 }
 0x274   :  { %v1750_v29 = vshrl.u32 %v1560_v61, 16  ;;  %v1753_v9 = vshll.u32 %v1560_v61, 16  ;;  %v1481_v40 = vsel %vm929_vm9, %v1478_v41, %v1480_v0  ;;  %v1747_v23 = vor.u32 %v1746_v7, %v1743_v17 }
 0x275   :  { %1359 = vst [vmem:[#allocation3 + $0x70] sm:$0xf] %v1345_v5  ;;  %v2420_v57 = vpack.c.bf16 %v1345_v5, %v1345_v5  ;;  %v1738_v19 = vor.u32 %v1737_v27, %v1734_v43  ;;  %v1483_v10 = vsel %vm929_vm9, %v1480_v0, %v1482_v28  ;;  %v1523_v32 = vrot.slane %v3856_v59, 6 }
 0x276   :  { %v1752_v13 = vrot.slane %v1750_v29, 2  ;;  %v1755_v48 = vrot.slane %v1753_v9, 3  ;;  %v1562_v14 = vpack.c.bf16 %v1483_v10, %v1481_v40  ;;  %v1525_v30 = vrot.slane %v3871_v25, 6 }
 0x277   :  { %2339 = vst [vmem:[%s3995_s8 + $0x6c] sm:$0x3] %v2420_v57  ;;  %v1748_v63 = vsel %vm1625_vm11, %v3868_v36, %v1747_v23  ;;  %v1739_v33 = vsel %vm1625_vm11, %v1711_v31, %v1738_v19  ;;  %v1524_v35 = vsel %vm1503_vm10, %v1521_v16, %v1523_v32  ;;  %v1561_v41 = vpack.c.bf16 %v3856_v59, %v3834_v4 }
 0x278   :  { %2048 = vmatprep.mubr.bf16.mxu1 %v1748_v63  ;;  %v1756_v26 = vor.u32 %v1755_v48, %v1752_v13  ;;  %v1768_v1 = vshrl.u32 %v1562_v14, 16  ;;  %v1771_v37 = vshll.u32 %v1562_v14, 16  ;;  %v1526_v38 = vsel %vm1503_vm10, %v1523_v32, %v1525_v30 }
 0x279   :  { %2049 = vmatmul.mubr.bf16.gmra.mxu1 %v1739_v33  ;;  %v1563_v39 = vpack.c.bf16 %v1526_v38, %v1524_v35  ;;  %v1759_v52 = vshrl.u32 %v1561_v41, 16  ;;  %v1762_v50 = vshll.u32 %v1561_v41, 16  ;;  %v1484_v55 = vrot.slane %v3888_v12, 3  ;;  %v3949_v38 = vld [vmem:[%s3997_s7] ss:$0 sm:$0xff] }
 0x27a   :  { %v1757_v36 = vsel %vm1625_vm11, %v1729_v34, %v1756_v26  ;;  %v1770_v54 = vrot.slane %v1768_v1, 2  ;;  %v1773_v42 = vrot.slane %v1771_v37, 3  ;;  %v1527_v56 = vrot.slane %v3888_v12, 6 }
 0x27b   :  { %2814 = vmatmul.mubr.bf16.gmra.mxu0 %v1757_v36  ;;  %v1777_v4 = vshrl.u32 %v1563_v39, 16  ;;  %v1780_v59 = vshll.u32 %v1563_v39, 16  ;;  %v1761_v49 = vrot.slane %v1759_v52, 2  ;;  %v1764_v58 = vrot.slane %v1762_v50, 3 }
 0x27c   :  { %v1445_v44 = vld [vmem:[#allocation3 + $0x70] sm:$0xff]  ;;  %2817 = vmatprep.mubr.msk.bf16.mxu0 %vm2977_vm4, %v3859_v18  ;;  %v1774_v22 = vor.u32 %v1773_v42, %v1770_v54  ;;  %v1485_v3 = vsel %vm929_vm9, %v1482_v28, %v1484_v55  ;;  %v1528_v20 = vsel %vm1503_vm10, %v1525_v30, %v1527_v56  ;;  %v1564_v16 = vpack.c.bf16 %v3888_v12, %v3871_v25 }
 0x27d   :  { %v1486_v6 = vrot.slane %v1445_v44, 3  ;;  %v1779_v46 = vrot.slane %v1777_v4, 2  ;;  %v1782_v11 = vrot.slane %v1780_v59, 3  ;;  %v1765_v34 = vor.u32 %v1764_v58, %v1761_v49 }
 0x27e   :  { %v1529_v31 = vrot.slane %v1445_v44, 6  ;;  %v1775_v8 = vsel %vm1625_vm11, %v1747_v23, %v1774_v22  ;;  %v1786_v21 = vshrl.u32 %v1564_v16, 16  ;;  %v1789_v53 = vshll.u32 %v1564_v16, 16 }
 0x27f   :  { %v1487_v15 = vsel %vm929_vm9, %v1484_v55, %v1486_v6  ;;  %2056 = vmatprep.mubr.bf16.mxu1 %v1775_v8  ;;  %v1783_v60 = vor.u32 %v1782_v11, %v1779_v46  ;;  %v1568_v2 = vpack.c.bf16 %v1486_v6, %v1486_v6  ;;  %v1766_v45 = vsel %vm1625_vm11, %v1738_v19, %v1765_v34 }
 0x280   :  { %v1565_v24 = vpack.c.bf16 %v1487_v15, %v1485_v3  ;;  %v1530_v62 = vsel %vm1503_vm10, %v1527_v56, %v1529_v31  ;;  %v1788_v7 = vrot.slane %v1786_v21, 2  ;;  %v1791_v25 = vrot.slane %v1789_v53, 3 }
 0x281   :  { %v1566_v51 = vpack.c.bf16 %v1530_v62, %v1528_v20  ;;  %v1784_v47 = vsel %vm1625_vm11, %v1756_v26, %v1783_v60  ;;  %2057 = vmatmul.mubr.bf16.gmra.mxu1 %v1766_v45  ;;  %v1818_v27 = vshll.u32 %v1568_v2, 16  ;;  %v1567_v9 = vpack.c.bf16 %v1445_v44, %v1445_v44 }
 0x282   :  { %v1795_v5 = vshrl.u32 %v1565_v24, 16  ;;  %v1798_v17 = vshll.u32 %v1565_v24, 16  ;;  %v1792_v29 = vor.u32 %v1791_v25, %v1788_v7  ;;  %v1569_v48 = vpack.c.bf16 %v1529_v31, %v1529_v31 }
 0x283   :  { %v1804_v61 = vshrl.u32 %v1566_v51, 16  ;;  %v1807_v0 = vshll.u32 %v1566_v51, 16  ;;  %2818 = vmatmul.mubr.bf16.gmra.mxu0 %v1784_v47  ;;  %v1820_v10 = vrot.slane %v1818_v27, 3  ;;  %v1813_v14 = vshll.u32 %v1567_v9, 16 }
 0x284   :  { %v1797_v12 = vrot.slane %v1795_v5, 2  ;;  %v1800_v43 = vrot.slane %v1798_v17, 3  ;;  %2821 = vmatprep.mubr.msk.bf16.mxu0 %vm2977_vm4, %v3859_v18  ;;  %v1793_v13 = vsel %vm1625_vm11, %v1765_v34, %v1792_v29  ;;  %v1823_v63 = vshll.u32 %v1569_v48, 16 }
 0x285   :  { %v1806_v28 = vrot.slane %v1804_v61, 2  ;;  %v1809_v57 = vrot.slane %v1807_v0, 3  ;;  %v1815_v33 = vrot.slane %v1813_v14, 3 }
 0x286   :  { %v1801_v40 = vor.u32 %v1800_v43, %v1797_v12  ;;  %v1825_v35 = vrot.slane %v1823_v63, 3 }
 0x287   :  { %v1810_v23 = vor.u32 %v1809_v57, %v1806_v28  ;;  %v1816_v41 = vsel %vm1625_vm11, %v1792_v29, %v1815_v33 }
 0x288   :  { %v1802_v19 = vsel %vm1625_vm11, %v1774_v22, %v1801_v40  ;;  %v1821_v30 = vsel %vm1625_vm11, %v1801_v40, %v1820_v10 }
 0x289   :  { %2064 = vmatprep.mubr.bf16.mxu1 %v1802_v19  ;;  %v1811_v32 = vsel %vm1625_vm11, %v1783_v60, %v1810_v23  ;;  %v1826_v26 = vsel %vm1625_vm11, %v1810_v23, %v1825_v35 }
 0x28a   :  { %2065 = vmatmul.mubr.bf16.gmra.mxu1 %v1793_v13 }
 0x28b   :  { %2072 = vmatprep.mubr.bf16.mxu1 %v1821_v30  ;;  %2822 = vmatmul.mubr.bf16.gmra.mxu0 %v1811_v32 }
 0x28c   :  { %2825 = vmatprep.mubr.msk.bf16.mxu0 %vm2977_vm4, %v3859_v18 }
 0x292   :  { %2073 = vmatmul.mubr.bf16.gmra.mxu1 %v1816_v41 }
 0x293   :  { %2826 = vmatmul.mubr.bf16.gmra.mxu0 %v1826_v26 }
 0x319   :  { %v2644_v1 = vpop.f32.mrf.mxu1 }
 0x31a   :  { %v2115_v37 = vpop.f32.mrf.mxu0 }
 0x31b   :  { %v2645_v39 = vpop.f32.mrf.mxu1 }
 0x31c   :  { %v2803_v52 = vpop.f32.mrf.mxu0  ;;  %v2646_v50 = vadd.f32 %v2645_v39, %v2644_v1 }
 0x31d   :  { %v2647_v18 = vpop.f32.mrf.mxu1 }
 0x31e   :  { %v2027_v55 = vadd.f32 %v2646_v50, %v3949_v38  ;;  %v2118_v36 = vpop.f32.mrf.mxu0 }
 0x31f   :  { %v2648_v54 = vpop.f32.mrf.mxu1 }
 0x320   :  { %v2804_v42 = vpop.f32.mrf.mxu0  ;;  %v2649_v56 = vadd.f32 %v2648_v54, %v2647_v18  ;;  %v2116_v4 = vadd.f32 %v2115_v37, %v2027_v55 }
 0x322   :  { %v2030_v59 = vadd.f32 %v2649_v56, %v3949_v38  ;;  %v2170_v44 = vmax.f32 %v2116_v4, 0.0 }
 0x324   :  { %v2119_v49 = vadd.f32 %v2118_v36, %v2030_v59  ;;  %v2650_v58 = vpop.f32.mrf.mxu1 }
 0x326   :  { %v2171_v22 = vmax.f32 %v2119_v49, 0.0  ;;  %v2123_v3 = vpop.f32.mrf.mxu0  ;;  %v2651_v6 = vpop.f32.mrf.mxu1 }
 0x327   :  { %v2652_v46 = vadd.f32 %v2651_v6, %v2650_v58 }
 0x328   :  { %v2498_v11 = vpack.c.bf16 %v2171_v22, %v2170_v44  ;;  %v2807_v34 = vpop.f32.mrf.mxu0  ;;  %v2653_v31 = vpop.f32.mrf.mxu1 }
 0x329   :  { %v2035_v8 = vadd.f32 %v2652_v46, %v3949_v38 }
 0x32a   :  { %2536 = vst [vmem:[%s3995_s8 + $0x70] sm:$0xff] %v2498_v11   ;;  %v2126_v15 = vpop.f32.mrf.mxu0  ;;  %v2654_v20 = vpop.f32.mrf.mxu1 }
 0x32b   :  { %v2655_v16 = vadd.f32 %v2654_v20, %v2653_v31  ;;  %v2124_v24 = vadd.f32 %v2123_v3, %v2035_v8 }
 0x32c   :  { %v2808_v60 = vpop.f32.mrf.mxu0 }
 0x32d   :  { %v2038_v62 = vadd.f32 %v2655_v16, %v3949_v38  ;;  %v2172_v51 = vmax.f32 %v2124_v24, 0.0 }
 0x32f   :  { %v2127_v2 = vadd.f32 %v2126_v15, %v2038_v62 }
 0x330   :  { %v2656_v53 = vpop.f32.mrf.mxu1 }
 0x331   :  { %v2131_v45 = vpop.f32.mrf.mxu0  ;;  %v2173_v21 = vmax.f32 %v2127_v2, 0.0 }
 0x332   :  { %v2657_v17 = vpop.f32.mrf.mxu1 }
 0x333   :  { %v2811_v47 = vpop.f32.mrf.mxu0  ;;  %v2503_v5 = vpack.c.bf16 %v2173_v21, %v2172_v51  ;;  %v2658_v61 = vadd.f32 %v2657_v17, %v2656_v53 }
 0x334   :  { %v2659_v7 = vpop.f32.mrf.mxu1 }
 0x335   :  { %v2134_v0 = vpop.f32.mrf.mxu0  ;;  %2537 = vst [vmem:[%s3995_s8 + $0x78] sm:$0xff] %v2503_v5   ;;  %v2043_v25 = vadd.f32 %v2658_v61, %v3949_v38 }
 0x336   :  { %v2660_v43 = vpop.f32.mrf.mxu1 }
 0x337   :  { %v2812_v12 = vpop.f32.mrf.mxu0  ;;  %v2661_v27 = vadd.f32 %v2660_v43, %v2659_v7  ;;  %v2132_v57 = vadd.f32 %v2131_v45, %v2043_v25 }
 0x339   :  { %v2662_v28 = vpop.f32.mrf.mxu1  ;;  %v2046_v29 = vadd.f32 %v2661_v27, %v3949_v38  ;;  %v2174_v13 = vmax.f32 %v2132_v57, 0.0 }
 0x33b   :  { %v2139_v9 = vpop.f32.mrf.mxu0  ;;  %v2663_v40 = vpop.f32.mrf.mxu1  ;;  %v2135_v23 = vadd.f32 %v2134_v0, %v2046_v29 }
 0x33c   :  { %v2664_v19 = vadd.f32 %v2663_v40, %v2662_v28 }
 0x33d   :  { %v2815_v10 = vpop.f32.mrf.mxu0  ;;  %v2665_v32 = vpop.f32.mrf.mxu1  ;;  %v2175_v48 = vmax.f32 %v2135_v23, 0.0 }
 0x33e   :  { %v2051_v14 = vadd.f32 %v2664_v19, %v3949_v38 }
 0x33f   :  { %v2142_v30 = vpop.f32.mrf.mxu0  ;;  %v2666_v63 = vpop.f32.mrf.mxu1  ;;  %v2508_v33 = vpack.c.bf16 %v2175_v48, %v2174_v13 }
 0x340   :  { %v2667_v35 = vadd.f32 %v2666_v63, %v2665_v32  ;;  %v2140_v1 = vadd.f32 %v2139_v9, %v2051_v14 }
 0x341   :  { %v2816_v41 = vpop.f32.mrf.mxu0  ;;  %v2668_v26 = vpop.f32.mrf.mxu1  ;;  %2538 = vst [vmem:[%s3995_s8 + $0x80] sm:$0xff] %v2508_v33  }
 0x342   :  { %v2054_v37 = vadd.f32 %v2667_v35, %v3949_v38  ;;  %v2176_v54 = vmax.f32 %v2140_v1, 0.0 }
 0x343   :  { %v2147_v39 = vpop.f32.mrf.mxu0  ;;  %v2669_v52 = vpop.f32.mrf.mxu1 }
 0x344   :  { %v2143_v50 = vadd.f32 %v2142_v30, %v2054_v37  ;;  %v2670_v18 = vadd.f32 %v2669_v52, %v2668_v26 }
 0x345   :  { %v2819_v55 = vpop.f32.mrf.mxu0  ;;  %v2671_v36 = vpop.f32.mrf.mxu1 }
 0x346   :  { %v2177_v42 = vmax.f32 %v2143_v50, 0.0  ;;  %v2059_v56 = vadd.f32 %v2670_v18, %v3949_v38 }
 0x347   :  { %v2150_v4 = vpop.f32.mrf.mxu0  ;;  %v2672_v59 = vpop.f32.mrf.mxu1 }
 0x348   :  { %v2513_v49 = vpack.c.bf16 %v2177_v42, %v2176_v54  ;;  %v2673_v58 = vadd.f32 %v2672_v59, %v2671_v36  ;;  %v2148_v3 = vadd.f32 %v2147_v39, %v2059_v56 }
 0x349   :  { %v2820_v44 = vpop.f32.mrf.mxu0 }
 0x34a   :  { %v2674_v22 = vpop.f32.mrf.mxu1  ;;  %2539 = vst [vmem:[%s3995_s8 + $0x88] sm:$0xff] %v2513_v49   ;;  %v2062_v6 = vadd.f32 %v2673_v58, %v3949_v38  ;;  %v2178_v20 = vmax.f32 %v2148_v3, 0.0 }
 0x34b   :  { %v2155_v46 = vpop.f32.mrf.mxu0 }
 0x34c   :  { %v2675_v11 = vpop.f32.mrf.mxu1  ;;  %v2151_v34 = vadd.f32 %v2150_v4, %v2062_v6 }
 0x34d   :  { %v2676_v31 = vadd.f32 %v2675_v11, %v2674_v22  ;;  %v2823_v8 = vpop.f32.mrf.mxu0 }
 0x34e   :  { %v2677_v15 = vpop.f32.mrf.mxu1  ;;  %v2179_v16 = vmax.f32 %v2151_v34, 0.0 }
 0x34f   :  { %v2067_v60 = vadd.f32 %v2676_v31, %v3949_v38  ;;  %v2158_v24 = vpop.f32.mrf.mxu0 }
 0x350   :  { %v2678_v62 = vpop.f32.mrf.mxu1  ;;  %v2518_v2 = vpack.c.bf16 %v2179_v16, %v2178_v20 }
 0x351   :  { %v2679_v45 = vadd.f32 %v2678_v62, %v2677_v15  ;;  %v2824_v51 = vpop.f32.mrf.mxu0  ;;  %v2156_v53 = vadd.f32 %v2155_v46, %v2067_v60 }
 0x352   :  { %v2680_v21 = vpop.f32.mrf.mxu1  ;;  %2540 = vst [vmem:[%s3995_s8 + $0x90] sm:$0xff] %v2518_v2  }
 0x353   :  { %v2070_v47 = vadd.f32 %v2679_v45, %v3949_v38  ;;  %v2163_v5 = vpop.f32.mrf.mxu0  ;;  %v2180_v12 = vmax.f32 %v2156_v53, 0.0 }
 0x354   :  { %v2681_v17 = vpop.f32.mrf.mxu1 }
 0x355   :  { %v2159_v61 = vadd.f32 %v2158_v24, %v2070_v47  ;;  %v2682_v0 = vadd.f32 %v2681_v17, %v2680_v21  ;;  %v2827_v7 = vpop.f32.mrf.mxu0 }
 0x356   :  { %v2683_v25 = vpop.f32.mrf.mxu1 }
 0x357   :  { %v2181_v43 = vmax.f32 %v2159_v61, 0.0  ;;  %v2075_v27 = vadd.f32 %v2682_v0, %v3949_v38  ;;  %v2166_v28 = vpop.f32.mrf.mxu0 }
 0x358   :  { %v2684_v57 = vpop.f32.mrf.mxu1 }
 0x359   :  { %v2523_v29 = vpack.c.bf16 %v2181_v43, %v2180_v12  ;;  %v2164_v9 = vadd.f32 %v2163_v5, %v2075_v27  ;;  %v2685_v40 = vadd.f32 %v2684_v57, %v2683_v25  ;;  %v2828_v23 = vpop.f32.mrf.mxu0 }
 0x35b   :  { %2541 = vst [vmem:[%s3995_s8 + $0x98] sm:$0xff] %v2523_v29   ;;  %v2182_v19 = vmax.f32 %v2164_v9, 0.0  ;;  %v2078_v10 = vadd.f32 %v2685_v40, %v3949_v38 }
 0x35d   :  { %v2433_v32 = vpack.c.bf16 %v2182_v19, %v2182_v19  ;;  %v2167_v13 = vadd.f32 %v2166_v28, %v2078_v10 }
 0x35f   :  { %2391 = vst [vmem:[%s3995_s8 + $0xa0] sm:$0xf] %v2433_v32  ;;  %v2183_v48 = vmax.f32 %v2167_v13, 0.0 }
 0x361   :  { %v2434_v14 = vpack.c.bf16 %v2183_v48, %v2183_v48 }
 0x363   :  { %2392 = vst [vmem:[%s3995_s8 + $0xa4] sm:$0x3] %v2434_v14 }

// kernel: fim_forward.5
= control target key start
LH: loop header
LB: loop body
LE: loop exit
PB: predicated region body
PF: predicated region fallthrough
CT: control target
= control target key end

     0   :  { %s7467_s18 = smov 0   ;;  %s7469_s19 = smov 0   ;;  %s10679_s0 = inlined_call_operand.vmem [shape: bf16[3,4,18,128], index: 0, kind: input, shape index: {}]   ;;  %s10680_s1 = inlined_call_operand.vmem [shape: bf16[9,2,18,128], index: 1, kind: input, shape index: {}]   ;;  %s10681_s2 = inlined_call_operand.vmem [shape: bf16[9,128,256], index: 2, kind: input, shape index: {}]   ;;  %s10682_s3 = inlined_call_operand.vmem [shape: f32[1,256], index: 3, kind: input, shape index: {}]   ;;  %s10683_s4 = inlined_call_operand.vmem [shape: f32[48,192], index: 4, kind: input, shape index: {}]   ;;  %s10684_s5 = inlined_call_operand.vmem [shape: f32[2,1,2], index: 5, kind: output, shape index: {}]  }
   0x1   :  { %s7471_s20 = smov 0  }
   0x2 LB: > { %s6210_s21 = sadd.s32 4294967295, %s7425_s20   ;;  %s7484_s22 = sadd.s32 1, %s7425_s20   ;;  %s7425_s20 = sphi %s7471_s20, %s10954_s20   ;;  %s7421_s19 = sphi %s7469_s19, %s10953_s19   ;;  %s7417_s18 = sphi %s7467_s18, %s10952_s18  }
   0x3   : > { %s19_s23 = ssub.s32 %s7425_s20, %s7484_s22  ;;  %s22_s24 = sadd.s32 1, %s7421_s19 }
   0x4   : > { %p20_p0 = scmp.eq.s32.totalorder %s19_s23, 0  ;;  %p29_p1 = scmp.ne.s32.totalorder %s7421_s19, %s7417_s18 }
   0x5   : > { %p30_p2 = scmp.eq.s32.totalorder %s7425_s20, 0  ;;  %p6213_p4 = scmp.ge.s32.totalorder %s7425_s20, 2 }
   0x6   : > { %s7493_s25 = scalar_select %p20_p0, %s7421_s19, %s22_s24  }
   0x7   : > { %p7495_p3 = por %p30_p2, %p29_p1  ;;  %179 = sbr.rel (%p6213_p4) target bundleno = 36 (0x24), region = 28 }
   0xc   : > { %182 = sbr.rel (!%p7495_p3) target bundleno = 22 (0x16), region = 32  ;;  %s184_s27 = sand.u32 (%p7495_p3), 1, %s7421_s19  }
   0xd   : > { %s6868_s28 = smul.u32 (%p7495_p3), 24, %s7425_s20 }
   0xe   : > { %s6867_s29 = smul.u32 (%p7495_p3), 72, %s184_s27 }
   0xf   : > { %s190_s7 = scalar_lea.vmem (%p7495_p3), %s10679_s0, %s6868_s28 }
  0x10   : > { %v207_v0 = vld [vmem:[%s190_s7] sm:$0xff] (%p7495_p3)   ;;  %v211_v1 = vld [vmem:[%s190_s7 + $0x8] sm:$0xff] (%p7495_p3)   ;;  %v215_v2 = vld [vmem:[%s190_s7 + $0x10] sm:$0xff] (%p7495_p3)   ;;  %s186_s8 = scalar_lea.vmem (%p7495_p3), [#allocation4], %s6867_s29 }
  0x11   : > { %208 = vst [vmem:[%s186_s8] sm:$0xff] %v207_v0   ;;  %212 = vst [vmem:[%s186_s8 + $0x8] sm:$0xff] %v211_v1   ;;  %v219_v3 = vld [vmem:[%s190_s7 + $0x30] sm:$0xff]   ;;  %v223_v4 = vld [vmem:[%s190_s7 + $0x38] sm:$0xff]  }
  0x12   : > { %216 = vst [vmem:[%s186_s8 + $0x10] sm:$0xff] %v215_v2   ;;  %v227_v5 = vld [vmem:[%s190_s7 + $0x40] sm:$0xff]   ;;  %220 = vst [vmem:[%s186_s8 + $0x18] sm:$0xff] %v219_v3   ;;  %v235_v7 = vld [vmem:[%s190_s7 + $0x68] sm:$0xff]  }
  0x13   : > { %224 = vst [vmem:[%s186_s8 + $0x20] sm:$0xff] %v223_v4   ;;  %228 = vst [vmem:[%s186_s8 + $0x28] sm:$0xff] %v227_v5   ;;  %v231_v6 = vld [vmem:[%s190_s7 + $0x60] sm:$0xff]   ;;  %v239_v8 = vld [vmem:[%s190_s7 + $0x70] sm:$0xff]  }
  0x14   : > { %232 = vst [vmem:[%s186_s8 + $0x30] sm:$0xff] %v231_v6   ;;  %236 = vst [vmem:[%s186_s8 + $0x38] sm:$0xff] %v235_v7  }
  0x15   : > { %240 = vst [vmem:[%s186_s8 + $0x40] sm:$0xff] %v239_v8  }
  0x16 PF: > { %302 = sbr.rel (!%p7495_p3) target bundleno = 36 (0x24), region = 73  ;;  %s304_s9 = sand.u32 (%p7495_p3), 1, %s7421_s19  }
  0x17   : > { %s6870_s10 = smul.u32 (%p7495_p3), 12, %s7425_s20 }
  0x18   : > { %s6869_s11 = smul.u32 (%p7495_p3), 108, %s304_s9 }
  0x19   : > { %s7514_s14 = scalar_lea.vmem (%p7495_p3), %s10680_s1, %s6870_s10 }
  0x1a   : > { %v326_v9 = vld [vmem:[%s7514_s14] sm:$0xff] (%p7495_p3)   ;;  %v330_v10 = vld [vmem:[%s7514_s14 + $0x8] sm:$0xf] (%p7495_p3)  ;;  %v332_v11 = vld [vmem:[%s7514_s14 + $0x18] sm:$0xff] (%p7495_p3)   ;;  %s7519_s15 = scalar_lea.vmem (%p7495_p3), [#allocation5], %s6869_s11 }
  0x1b   : > { %327 = vst [vmem:[%s7519_s15] sm:$0xff] %v326_v9   ;;  %331 = vst [vmem:[%s7519_s15 + $0x8] sm:$0xf] %v330_v10  ;;  %v336_v12 = vld [vmem:[%s7514_s14 + $0x20] sm:$0xf]  ;;  %v338_v13 = vld [vmem:[%s7514_s14 + $0x30] sm:$0xff]  }
  0x1c   : > { %333 = vst [vmem:[%s7519_s15 + $0xc] sm:$0xff] %v332_v11   ;;  %v342_v14 = vld [vmem:[%s7514_s14 + $0x38] sm:$0xf]  ;;  %337 = vst [vmem:[%s7519_s15 + $0x14] sm:$0xf] %v336_v12  ;;  %v344_v15 = vld [vmem:[%s7514_s14 + $0x48] sm:$0xff]  }
  0x1d   : > { %339 = vst [vmem:[%s7519_s15 + $0x18] sm:$0xff] %v338_v13   ;;  %343 = vst [vmem:[%s7519_s15 + $0x20] sm:$0xf] %v342_v14  ;;  %v348_v16 = vld [vmem:[%s7514_s14 + $0x50] sm:$0xf]  ;;  %v350_v17 = vld [vmem:[%s7514_s14 + $0x60] sm:$0xff]  }
  0x1e   : > { %345 = vst [vmem:[%s7519_s15 + $0x24] sm:$0xff] %v344_v15   ;;  %349 = vst [vmem:[%s7519_s15 + $0x2c] sm:$0xf] %v348_v16  ;;  %v354_v18 = vld [vmem:[%s7514_s14 + $0x68] sm:$0xf]  ;;  %v356_v19 = vld [vmem:[%s7514_s14 + $0x78] sm:$0xff]  }
  0x1f   : > { %351 = vst [vmem:[%s7519_s15 + $0x30] sm:$0xff] %v350_v17   ;;  %v360_v20 = vld [vmem:[%s7514_s14 + $0x80] sm:$0xf]  ;;  %355 = vst [vmem:[%s7519_s15 + $0x38] sm:$0xf] %v354_v18  ;;  %v362_v21 = vld [vmem:[%s7514_s14 + $0x90] sm:$0xff]  }
  0x20   : > { %357 = vst [vmem:[%s7519_s15 + $0x3c] sm:$0xff] %v356_v19   ;;  %361 = vst [vmem:[%s7519_s15 + $0x44] sm:$0xf] %v360_v20  ;;  %v366_v22 = vld [vmem:[%s7514_s14 + $0x98] sm:$0xf]  ;;  %v368_v23 = vld [vmem:[%s7514_s14 + $0xa8] sm:$0xff]  }
  0x21   : > { %363 = vst [vmem:[%s7519_s15 + $0x48] sm:$0xff] %v362_v21   ;;  %367 = vst [vmem:[%s7519_s15 + $0x50] sm:$0xf] %v366_v22  ;;  %v372_v24 = vld [vmem:[%s7514_s14 + $0xb0] sm:$0xf]  ;;  %v374_v25 = vld [vmem:[%s7514_s14 + $0xc0] sm:$0xff]  }
  0x22   : > { %369 = vst [vmem:[%s7519_s15 + $0x54] sm:$0xff] %v368_v23   ;;  %v378_v26 = vld [vmem:[%s7514_s14 + $0xc8] sm:$0xf]  ;;  %373 = vst [vmem:[%s7519_s15 + $0x5c] sm:$0xf] %v372_v24 }
  0x23   : > { %375 = vst [vmem:[%s7519_s15 + $0x60] sm:$0xff] %v374_v25   ;;  %379 = vst [vmem:[%s7519_s15 + $0x68] sm:$0xf] %v378_v26 }
  0x24 PF: > { %p6218_p5 = scmp.ge.s32.totalorder %s7425_s20, 1  ;;  %p456_p6 = scmp.lt.s32.totalorder %s7425_s20, 3 }
  0x26   : > { %p457_p7 = pnand %p6218_p5, %p456_p6 }
  0x28   : > { %460 = sbr.rel (%p457_p7) target bundleno = 1379 (0x563), region = 114 }
  0x2d   : > { %s463_s16 = sand.u32 1, %s7417_s18   ;;  %vm616_vm0 = vcmask 1043456   ;;  %vm559_vm1 = vcmask 1045504   ;;  %s7428_s26 = smov 12   ;;  %vm969_vm2 = vcmask 195584   ;;  %vm966_vm3 = vcmask 97280  }
  0x2e   : > { %s6872_s17 = smul.u32 108, %s463_s16  ;;  %s7430_s6 = smov 116   ;;  %vm972_vm4 = vcmask 293888   ;;  %vm7434_vm6 = vmmov 1   ;;  %vm3145_vm8 = vcmask 1039360   ;;  %vm3245_vm9 = vcmask 1031168  }
  0x2f   : > { %s7557_s23 = smul.u32 72, %s463_s16  ;;  %s7432_s15 = smov 24   ;;  %vm7864_vm5 = vmpackc.low %vm616_vm0, %vm972_vm4  ;;  %vm3323_vm10 = vcmask 1046528   ;;  %vm3524_vm11 = vcmask 523264   ;;  %vm6135_vm12 = vcmask 7168   ;;  %vm6137_vm13 = vcmask 8192  }
  0x30   : > { %s7559_s24 = scalar_lea.vmem [#allocation5], %s6872_s17  ;;  %s7433_s30 = smov 104   ;;  %vm8415_vm7 = vmpackc.low %vm616_vm0, %vm7434_vm6 }
  0x31   : > { %v6905_v27 = vld [vmem:[%s7559_s24 + $0x18] sm:$0xfe]   ;;  %v6907_v33 = vld [vmem:[%s7559_s24 + $0xc] sm:$0xfe]   ;;  %v6909_v44 = vld [vmem:[%s7559_s24] sm:$0xfe]  }
  0x32   : > { %v6906_v28 = vld [vmem:[%s7559_s24 + $0x3c] sm:$0xfe]   ;;  %v604_v29 = vshrl.u32 %v6905_v27, 16  ;;  %v607_v30 = vshll.u32 %v6905_v27, 16  ;;  %v6908_v36 = vld [vmem:[%s7559_s24 + $0x30] sm:$0xfe]  }
  0x33   : > { %v746_v31 = vshrl.u32 %v6906_v28, 16  ;;  %v749_v32 = vshll.u32 %v6906_v28, 16  ;;  %v591_v39 = vshrl.u32 %v6907_v33, 16  ;;  %v594_v40 = vshll.u32 %v6907_v33, 16  ;;  %v6910_v52 = vld [vmem:[%s7559_s24 + $0x24] sm:$0xfe]  }
  0x34   : > { %v606_v34 = vrot.slane %v604_v29, 5  ;;  %v609_v35 = vrot.slane %v607_v30, 6  ;;  %v733_v42 = vshrl.u32 %v6908_v36, 16  ;;  %v736_v43 = vshll.u32 %v6908_v36, 16  ;;  %s7568_s18 = scalar_lea.vmem [#allocation4], %s7557_s23  ;;  %s7435_s11 = smov 127  }
  0x35   : > { %v748_v37 = vrot.slane %v746_v31, 5  ;;  %v751_v38 = vrot.slane %v749_v32, 6  ;;  %v593_v46 = vrot.slane %v591_v39, 3  ;;  %v596_v47 = vrot.slane %v594_v40, 4  ;;  %v6911_v63 = vld [vmem:[%s7568_s18] sm:$0xfe]  }
  0x36   : > { %v610_v41 = vor.u32 %v609_v35, %v606_v34  ;;  %v735_v48 = vrot.slane %v733_v42, 3  ;;  %v738_v49 = vrot.slane %v736_v43, 4  ;;  %v578_v50 = vshrl.u32 %v6909_v44, 16  ;;  %v6912_v1 = vld [vmem:[%s7568_s18 + $0xc] sm:$0xfe]   ;;  %s7436_s12 = smov 126  }
  0x37   : > { %v752_v45 = vor.u32 %v751_v38, %v748_v37  ;;  %v581_v51 = vshll.u32 %v6909_v44, 16  ;;  %v597_v53 = vor.u32 %v596_v47, %v593_v46  ;;  %v720_v57 = vshrl.u32 %v6910_v52, 16  ;;  %v6913_v8 = vld [vmem:[%s7568_s18 + $0x18] sm:$0xfe]   ;;  %v6914_v11 = vld [vmem:[%s7568_s18 + $0x24] sm:$0xfe]  }
  0x38   : > { %6821 = vmatprep.subr.bf16.mxu0 %v610_v41  ;;  %v739_v54 = vor.u32 %v738_v49, %v735_v48  ;;  %v580_v55 = vrot.slane %v578_v50, 1  ;;  %v723_v59 = vshll.u32 %v6910_v52, 16  ;;  %v538_v2 = vshrl.u32 %v6911_v63, 16  ;;  %v6915_v12 = vld [vmem:[%s7559_s24 + $0x60] sm:$0xfe]   ;;  %p500_p8 = scmp.lt.s32.totalorder %s6210_s21, 1 }
  0x39   : > { %6831 = vmatprep.subr.bf16.mxu1 %v752_v45  ;;  %6822 = vmatpush3.bf16.xpose.msra.mxu0 %v610_v41  ;;  %v583_v56 = vrot.slane %v581_v51, 2  ;;  %v618_v58 = vsel %vm616_vm0, %v597_v53, %v610_v41  ;;  %v722_v62 = vrot.slane %v720_v57, 1  ;;  %v541_v3 = vshll.u32 %v6911_v63, 16  ;;  %v6916_v25 = vld [vmem:[%s7559_s24 + $0x54] sm:$0xfe]  }
  0x3a   : > { %6832 = vmatpush3.bf16.xpose.msra.mxu1 %v752_v45  ;;  %6823 = vmatprep.subr.bf16.mxu0 %v618_v58  ;;  %v759_v60 = vsel %vm616_vm0, %v739_v54, %v752_v45  ;;  %v725_v0 = vrot.slane %v723_v59, 2  ;;  %v551_v6 = vshrl.u32 %v6912_v1, 16  ;;  %v554_v7 = vshll.u32 %v6912_v1, 16  ;;  %v6917_v36 = vld [vmem:[%s7559_s24 + $0x48] sm:$0xfe]   ;;  %s10956_s21 = smov (!%p500_p8, %s6210_s21), 1 }
  0x3b   : > { %v584_v61 = vor.u32 %v583_v56, %v580_v55  ;;  %6833 = vmatprep.subr.bf16.mxu1 %v759_v60  ;;  %v540_v9 = vrot.slane %v538_v2, 1  ;;  %v543_v10 = vrot.slane %v541_v3, 2  ;;  %v680_v16 = vshrl.u32 %v6913_v8, 16  ;;  %v6918_v41 = vld [vmem:[%s7568_s18 + $0x30] sm:$0xfe]  }
  0x3c   : > { %v726_v5 = vor.u32 %v725_v0, %v722_v62  ;;  %v553_v14 = vrot.slane %v551_v6, 3  ;;  %v556_v15 = vrot.slane %v554_v7, 4  ;;  %v683_v18 = vshll.u32 %v6913_v8, 16  ;;  %v6919_v42 = vld [vmem:[%s7568_s18 + $0x3c] sm:$0xfe]  }
  0x3d   : > { %v614_v4 = vsel %vm559_vm1, %v584_v61, %v597_v53  ;;  %v544_v17 = vor.u32 %v543_v10, %v540_v9  ;;  %v693_v19 = vshrl.u32 %v6914_v11, 16  ;;  %v696_v20 = vshll.u32 %v6914_v11, 16  ;;  %v6920_v62 = vld [vmem:[%s10681_s2 + $0xf0] ss:$8 sps:$4 sm:$0xff]   ;;  %v6922_v63 = vld [vmem:[%s10681_s2 + $0xf4] ss:$8 sps:$4 sm:$0xff]  }
  0x3e   : > { %v756_v13 = vsel %vm559_vm1, %v726_v5, %v739_v54  ;;  %v557_v21 = vor.u32 %v556_v15, %v553_v14  ;;  %v682_v22 = vrot.slane %v680_v16, 1  ;;  %v887_v23 = vshrl.u32 %v6915_v12, 16  ;;  %v6923_v0 = vld [vmem:[%s10681_s2 + $0x70] ss:$8 sps:$4 sm:$0xff]   ;;  %v6925_v1 = vld [vmem:[%s10681_s2 + $0x74] ss:$8 sps:$4 sm:$0xff]  }
  0x3f   : > { %v890_v24 = vshll.u32 %v6915_v12, 16  ;;  %v685_v26 = vrot.slane %v683_v18, 2  ;;  %v695_v27 = vrot.slane %v693_v19, 3  ;;  %v698_v28 = vrot.slane %v696_v20, 4  ;;  %v6928_v2 = vld [vmem:[%s10681_s2 + $0xe4] ss:$8 sps:$4 sm:$0xff]  }
  0x40   : > { %v562_v29 = vsel %vm559_vm1, %v544_v17, %v557_v21  ;;  %v889_v30 = vrot.slane %v887_v23, 5  ;;  %v874_v32 = vshrl.u32 %v6916_v25, 16  ;;  %v877_v35 = vshll.u32 %v6916_v25, 16  ;;  %v6931_v3 = vld [vmem:[%s10681_s2 + $0x64] ss:$8 sps:$4 sm:$0xff]  }
  0x41   : > { %6824 = vmatpush3.bf16.xpose.msra.mxu0 %v618_v58  ;;  %v892_v31 = vrot.slane %v890_v24, 6  ;;  %6827 = vmatprep.mubr.bf16.mxu0 %v562_v29  ;;  %v686_v33 = vor.u32 %v685_v26, %v682_v22  ;;  %v699_v34 = vor.u32 %v698_v28, %v695_v27  ;;  %v861_v44 = vshrl.u32 %v6917_v36, 16  ;;  %v6929_v5 = vld [vmem:[%s10681_s2 + $0x60] ss:$8 sps:$4 sm:$0xff]   ;;  %v6934_v6 = vld [vmem:[%s10681_s2 + $0xd4] ss:$8 sps:$4 sm:$0xff]  }
  0x42   : > { %6834 = vmatpush3.bf16.xpose.msra.mxu1 %v759_v60  ;;  %6825 = vmatprep.subr.bf16.mxu0 %v614_v4  ;;  %v876_v38 = vrot.slane %v874_v32, 3  ;;  %v879_v40 = vrot.slane %v877_v35, 4  ;;  %v864_v45 = vshll.u32 %v6917_v36, 16  ;;  %v821_v46 = vshrl.u32 %v6918_v41, 16  ;;  %v6932_v7 = vld [vmem:[%s10681_s2 + $0xd0] ss:$8 sps:$4 sm:$0xff]  }
  0x43   : > { %6835 = vmatprep.subr.bf16.mxu1 %v756_v13  ;;  %v893_v37 = vor.u32 %v892_v31, %v889_v30  ;;  %v703_v39 = vsel %vm559_vm1, %v686_v33, %v699_v34  ;;  %v824_v47 = vshll.u32 %v6918_v41, 16  ;;  %v834_v48 = vshrl.u32 %v6919_v42, 16  ;;  %v6937_v8 = vld [vmem:[%s10681_s2 + $0x54] ss:$8 sps:$4 sm:$0xff]   ;;  %v6935_v9 = vld [vmem:[%s10681_s2 + $0x50] ss:$8 sps:$4 sm:$0xff]  }
  0x44   : > { %6837 = vmatprep.mubr.bf16.mxu1 %v703_v39  ;;  %v880_v43 = vor.u32 %v879_v40, %v876_v38  ;;  %v837_v49 = vshll.u32 %v6919_v42, 16  ;;  %v823_v50 = vrot.slane %v821_v46, 1  ;;  %v863_v54 = vrot.slane %v861_v44, 1  ;;  %v6940_v10 = vld [vmem:[%s10681_s2 + $0xc4] ss:$8 sps:$4 sm:$0xff]  }
  0x45   : > { %v826_v51 = vrot.slane %v824_v47, 2  ;;  %v836_v52 = vrot.slane %v834_v48, 3  ;;  %v866_v56 = vrot.slane %v864_v45, 2  ;;  %v6943_v11 = vld [vmem:[%s10681_s2 + $0x44] ss:$8 sps:$4 sm:$0xff]   ;;  %v7427_v35 = vmov 0.0  }
  0x46   : > { %v839_v53 = vrot.slane %v837_v49, 4  ;;  %v900_v55 = vsel %vm616_vm0, %v880_v43, %v893_v37  ;;  %v6938_v12 = vld [vmem:[%s10681_s2 + $0xc0] ss:$8 sps:$4 sm:$0xff]   ;;  %v6946_v14 = vld [vmem:[%s10681_s2 + $0xb4] ss:$8 sps:$4 sm:$0xff]   ;;  %505 = vst [vmem:[#allocation2 + $0x8] sm:$0xff] %v7427_v35 }
  0x47   : > { %v827_v57 = vor.u32 %v826_v51, %v823_v50  ;;  %v867_v60 = vor.u32 %v866_v56, %v863_v54  ;;  %v6949_v15 = vld [vmem:[%s10681_s2 + $0x34] ss:$8 sps:$4 sm:$0xff]   ;;  %v6944_v16 = vld [vmem:[%s10681_s2 + $0xb0] ss:$8 sps:$4 sm:$0xff]   ;;  %v6955_v22 = vld [vmem:[%s10681_s2 + $0x24] ss:$8 sps:$4 sm:$0xff]  }
  0x48   : > { %v840_v58 = vor.u32 %v839_v53, %v836_v52  ;;  %v6947_v17 = vld [vmem:[%s10681_s2 + $0x30] ss:$8 sps:$4 sm:$0xff]   ;;  %v6950_v24 = vld [vmem:[%s10681_s2 + $0xa0] ss:$8 sps:$4 sm:$0xff]   ;;  %v6958_v27 = vld [vmem:[%s10681_s2 + $0x94] ss:$8 sps:$4 sm:$0xff]  }
  0x49   : > { %6826 = vmatpush3.bf16.xpose.msra.mxu0 %v614_v4  ;;  %v897_v61 = vsel %vm559_vm1, %v867_v60, %v880_v43  ;;  %v6926_v4 = vld [vmem:[%s10681_s2 + $0xe0] ss:$8 sps:$4 sm:$0xff]   ;;  %v6961_v28 = vld [vmem:[%s10681_s2 + $0x14] ss:$8 sps:$4 sm:$0xff]   ;;  %v6956_v30 = vld [vmem:[%s10681_s2 + $0x90] ss:$8 sps:$4 sm:$0xff]  }
  0x4a   : > { %6836 = vmatpush3.bf16.xpose.msra.mxu1 %v756_v13  ;;  %6841 = vmatprep.subr.bf16.mxu0 %v893_v37  ;;  %v844_v59 = vsel %vm559_vm1, %v827_v57, %v840_v58  ;;  %v6941_v13 = vld [vmem:[%s10681_s2 + $0x40] ss:$8 sps:$4 sm:$0xff]   ;;  %v6959_v31 = vld [vmem:[%s10681_s2 + $0x10] ss:$8 sps:$4 sm:$0xff]   ;;  %v6964_v32 = vld [vmem:[%s10681_s2 + $0x84] ss:$8 sps:$4 sm:$0xff]  }
  0x4b   : > { %1204 = vmatprep.subr.bf16.mxu1 %v6922_v63  ;;  %v6953_v25 = vld [vmem:[%s10681_s2 + $0x20] ss:$8 sps:$4 sm:$0xff]   ;;  %v6967_v33 = vld [vmem:[%s10681_s2 + $0x4] ss:$8 sps:$4 sm:$0xff]   ;;  %506 = vst [vmem:[#allocation2 + $0x10] sm:$0xff] %v7427_v35  ;;  %504 = vst [vmem:[#allocation2] sm:$0xff] %v7427_v35 }
  0x4c   : > { %507 = vst [vmem:[#allocation2 + $0x48] sm:$0xff] %v7427_v35  ;;  %508 = vst [vmem:[#allocation2 + $0x50] sm:$0xff] %v7427_v35  ;;  %v6962_v36 = vld [vmem:[%s10681_s2 + $0x80] ss:$8 sps:$4 sm:$0xff]   ;;  %v10690_v41 = vmov 0   ;;  %v7431_v43 = vmov 0.0|0.0  }
  0x4d   : > { %509 = vst [vmem:[#allocation2 + $0x58] sm:$0xff] %v7427_v35  ;;  %510 = vst [vmem:[#allocation2 + $0x60] sm:$0xff] %v7427_v35  ;;  %v6968_v44 = vld [vmem:[%s10681_s2 + $0x170] ss:$8 sps:$4 sm:$0xff]   ;;  %v6970_v45 = vld [vmem:[%s10681_s2 + $0x174] ss:$8 sps:$4 sm:$0xff]  }
  0x4e   : > { %511 = vst [vmem:[#allocation2 + $0x68] sm:$0xff] %v7427_v35  ;;  %512 = vst [vmem:[#allocation2 + $0x70] sm:$0xff] %v7427_v35  ;;  %v6971_v46 = vld [vmem:[%s10681_s2 + $0x270] ss:$8 sps:$4 sm:$0xff]   ;;  %v6973_v47 = vld [vmem:[%s10681_s2 + $0x274] ss:$8 sps:$4 sm:$0xff]  }
  0x4f   : > { %513 = vst [vmem:[#allocation2 + $0x78] sm:$0xf] %v7427_v35  ;;  %v6974_v51 = vld [vmem:[%s10681_s2 + $0x160] ss:$8 sps:$4 sm:$0xff]   ;;  %v6976_v52 = vld [vmem:[%s10681_s2 + $0x164] ss:$8 sps:$4 sm:$0xff]  }
  0x50   : > { %6828 = vmatmul.mubr.bf16.vlgmr.msra.gmra.mxu0 %v557_v21  ;;  %v6952_v21 = vld [vmem:[%s10681_s2 + $0xa4] ss:$8 sps:$4 sm:$0xff]   ;;  %v6977_v54 = vld [vmem:[%s10681_s2 + $0x260] ss:$8 sps:$4 sm:$0xff]   ;;  %v6980_v56 = vld [vmem:[%s10681_s2 + $0x150] ss:$8 sps:$4 sm:$0xff]  }
  0x51   : > { %6838 = vmatmul.mubr.bf16.vlgmr.msra.gmra.mxu1 %v699_v34  ;;  %6842 = vmatpush3.bf16.xpose.msra.mxu0 %v893_v37  ;;  %v6965_v37 = vld [vmem:[%s10681_s2] ss:$8 sps:$4 sm:$0xff]   ;;  %v6982_v57 = vld [vmem:[%s10681_s2 + $0x154] ss:$8 sps:$4 sm:$0xff]   ;;  %v6991_v63 = vld [vmem:[%s10681_s2 + $0x244] ss:$8 sps:$4 sm:$0xff]  }
  0x52   : > { %6843 = vmatprep.subr.bf16.mxu0 %v900_v55  ;;  %6847 = vmatprep.mubr.bf16.mxu0 %v844_v59  ;;  %v1022_v38 = vld [vmem:[#allocation2 + $0x7] sm:$0xff]  ;;  %v1023_v39 = vld [vmem:[#allocation2 + $0xf] sm:$0xff] }
  0x53   : > { %1205 = vmatpush1.bf16.msra.mxu1 %v6920_v62  ;;  %1236 = vmatprep.mubr.bf16.mxu1 %v10690_v41  ;;  %v1037_v42 = vpack.c.bf16 %v1023_v39, %v1022_v38  ;;  %v6985_v59 = vld [vmem:[%s10681_s2 + $0x254] ss:$8 sps:$4 sm:$0xff]   ;;  %v6986_v60 = vld [vmem:[%s10681_s2 + $0x140] ss:$8 sps:$4 sm:$0xff]  }
  0x54   : > { %1206 = vmatprep.subr.bf16.mxu1 %v6928_v2  ;;  %v6989_v62 = vld [vmem:[%s10681_s2 + $0x240] ss:$8 sps:$4 sm:$0xff]   ;;  %v7000_v2 = vld [vmem:[%s10681_s2 + $0x124] ss:$8 sps:$4 sm:$0xff]  }
  0x57   : > { %1207 = vmatpush1.bf16.msra.mxu1 %v6926_v4  ;;  %v6997_v4 = vld [vmem:[%s10681_s2 + $0x234] ss:$8 sps:$4 sm:$0xff]  }
  0x58   : > { %1208 = vmatprep.subr.bf16.mxu1 %v6934_v6  ;;  %v7003_v6 = vld [vmem:[%s10681_s2 + $0x224] ss:$8 sps:$4 sm:$0xff]  }
  0x59   : > { %6844 = vmatpush3.bf16.xpose.msra.mxu0 %v900_v55  ;;  %v6979_v55 = vld [vmem:[%s10681_s2 + $0x264] ss:$8 sps:$4 sm:$0xff]  }
  0x5a   : > { %6845 = vmatprep.subr.bf16.mxu0 %v897_v61 }
  0x5b   : > { %1209 = vmatpush1.bf16.msra.mxu1 %v6932_v7  ;;  %v7001_v7 = vld [vmem:[%s10681_s2 + $0x220] ss:$8 sps:$4 sm:$0xff]  }
  0x5c   : > { %1210 = vmatprep.subr.bf16.mxu1 %v6940_v10  ;;  %v7009_v10 = vld [vmem:[%s10681_s2 + $0x214] ss:$8 sps:$4 sm:$0xff]  }
  0x5f   : > { %1211 = vmatpush1.bf16.msra.mxu1 %v6938_v12  ;;  %v7012_v12 = vld [vmem:[%s10681_s2 + $0x104] ss:$8 sps:$4 sm:$0xff]  }
  0x60   : > { %1212 = vmatprep.subr.bf16.mxu1 %v6946_v14  ;;  %v7013_v14 = vld [vmem:[%s10681_s2 + $0x200] ss:$8 sps:$4 sm:$0xff]  }
  0x61   : > { %6846 = vmatpush3.bf16.xpose.msra.mxu0 %v897_v61  ;;  %v6988_v61 = vld [vmem:[%s10681_s2 + $0x144] ss:$8 sps:$4 sm:$0xff]  }
  0x62   : > { %1375 = vmatprep.subr.bf16.mxu0 %v6925_v1  ;;  %v6992_v1 = vld [vmem:[%s10681_s2 + $0x130] ss:$8 sps:$4 sm:$0xff]  }
  0x63   : > { %1213 = vmatpush1.bf16.msra.mxu1 %v6944_v16  ;;  %v7018_v16 = vld [vmem:[%s10681_s2 + $0x1f4] ss:$8 sps:$4 sm:$0xff]  }
  0x64   : > { %1214 = vmatprep.subr.bf16.mxu1 %v6952_v21 }
  0x67   : > { %1215 = vmatpush1.bf16.msra.mxu1 %v6950_v24 }
  0x68   : > { %6848 = vmatmul.mubr.bf16.vlgmr.msra.gmra.mxu0 %v840_v58  ;;  %1216 = vmatprep.subr.bf16.mxu1 %v6958_v27  ;;  %v6983_v58 = vld [vmem:[%s10681_s2 + $0x250] ss:$8 sps:$4 sm:$0xff]  }
  0x69   : > { %1376 = vmatpush1.bf16.msra.mxu0 %v6923_v0  ;;  %1407 = vmatprep.mubr.bf16.mxu0 %v10690_v41  ;;  %v6994_v0 = vld [vmem:[%s10681_s2 + $0x134] ss:$8 sps:$4 sm:$0xff]  }
  0x6a   : > { %1377 = vmatprep.subr.bf16.mxu0 %v6931_v3  ;;  %v6995_v3 = vld [vmem:[%s10681_s2 + $0x230] ss:$8 sps:$4 sm:$0xff]  }
  0x6b   : > { %1217 = vmatpush1.bf16.msra.mxu1 %v6956_v30 }
  0x6c   : > { %1218 = vmatprep.subr.bf16.mxu1 %v6964_v32 }
  0x6d   : > { %1378 = vmatpush1.bf16.msra.mxu0 %v6929_v5  ;;  %v6998_v5 = vld [vmem:[%s10681_s2 + $0x120] ss:$8 sps:$4 sm:$0xff]  }
  0x6e   : > { %1379 = vmatprep.subr.bf16.mxu0 %v6937_v8  ;;  %v7006_v8 = vld [vmem:[%s10681_s2 + $0x114] ss:$8 sps:$4 sm:$0xff]  }
  0x6f   : > { %1219 = vmatpush1.bf16.msra.mxu1 %v6962_v36 }
  0x70   : > { %1563 = vmatprep.subr.bf16.mxu1 %v6970_v45 }
  0x71   : > { %1380 = vmatpush1.bf16.msra.mxu0 %v6935_v9  ;;  %v7004_v9 = vld [vmem:[%s10681_s2 + $0x110] ss:$8 sps:$4 sm:$0xff]  }
  0x72   : > { %1381 = vmatprep.subr.bf16.mxu0 %v6943_v11  ;;  %1237 = vmatmul.mubr.bf16.vlgmr.msra.gmra.mxu1 %v7431_v43  ;;  %v7007_v11 = vld [vmem:[%s10681_s2 + $0x210] ss:$8 sps:$4 sm:$0xff]  }
  0x73   : > { %1246 = vmatprep.mubr.bf16.mxu1 %v10690_v41  ;;  %1564 = vmatpush1.bf16.msra.mxu1 %v6968_v44 }
  0x74   : > { %1565 = vmatprep.subr.bf16.mxu1 %v6976_v52 }
  0x75   : > { %1382 = vmatpush1.bf16.msra.mxu0 %v6941_v13  ;;  %v7010_v13 = vld [vmem:[%s10681_s2 + $0x100] ss:$8 sps:$4 sm:$0xff]  }
  0x76   : > { %1383 = vmatprep.subr.bf16.mxu0 %v6949_v15  ;;  %v7015_v15 = vld [vmem:[%s10681_s2 + $0x204] ss:$8 sps:$4 sm:$0xff]  }
  0x77   : > { %1566 = vmatpush1.bf16.msra.mxu1 %v6974_v51 }
  0x78   : > { %1567 = vmatprep.subr.bf16.mxu1 %v6982_v57 }
  0x79   : > { %1384 = vmatpush1.bf16.msra.mxu0 %v6947_v17  ;;  %v7021_v17 = vld [vmem:[%s10681_s2 + $0x2f4] ss:$8 sps:$4 sm:$0xff]  }
  0x7a   : > { %1385 = vmatprep.subr.bf16.mxu0 %v6955_v22 }
  0x7b   : > { %1568 = vmatpush1.bf16.msra.mxu1 %v6980_v56 }
  0x7c   : > { %1569 = vmatprep.subr.bf16.mxu1 %v6988_v61 }
  0x7d   : > { %1386 = vmatpush1.bf16.msra.mxu0 %v6953_v25 }
  0x7e   : > { %1387 = vmatprep.subr.bf16.mxu0 %v6961_v28 }
  0x7f   : > { %1570 = vmatpush1.bf16.msra.mxu1 %v6986_v60 }
  0x80   : > { %1571 = vmatprep.subr.bf16.mxu1 %v6994_v0 }
  0x81   : > { %1388 = vmatpush1.bf16.msra.mxu0 %v6959_v31 }
  0x82   : > { %1389 = vmatprep.subr.bf16.mxu0 %v6967_v33 }
  0x83   : > { %1572 = vmatpush1.bf16.msra.mxu1 %v6992_v1 }
  0x84   : > { %1573 = vmatprep.subr.bf16.mxu1 %v7000_v2 }
  0x85   : > { %1390 = vmatpush1.bf16.msra.mxu0 %v6965_v37 }
  0x86   : > { %1812 = vmatprep.subr.bf16.mxu0 %v6973_v47 }
  0x87   : > { %1574 = vmatpush1.bf16.msra.mxu1 %v6998_v5 }
  0x88   : > { %1408 = vmatmul.mubr.bf16.vlgmr.msra.gmra.mxu0 %v1037_v42  ;;  %1575 = vmatprep.subr.bf16.mxu1 %v7006_v8 }
  0x89   : > { %1417 = vmatprep.mubr.bf16.mxu0 %v10690_v41  ;;  %1813 = vmatpush1.bf16.msra.mxu0 %v6971_v46 }
  0x8a   : > { %1814 = vmatprep.subr.bf16.mxu0 %v6979_v55 }
  0x8b   : > { %1576 = vmatpush1.bf16.msra.mxu1 %v7004_v9 }
  0x8c   : > { %1577 = vmatprep.subr.bf16.mxu1 %v7012_v12 }
  0x8d   : > { %1815 = vmatpush1.bf16.msra.mxu0 %v6977_v54 }
  0x8e   : > { %1816 = vmatprep.subr.bf16.mxu0 %v6985_v59 }
  0x8f   : > { %1578 = vmatpush1.bf16.msra.mxu1 %v7010_v13 }
  0x90   : > { %1983 = vmatprep.subr.bf16.mxu1 %v7018_v16 }
  0x91   : > { %1817 = vmatpush1.bf16.msra.mxu0 %v6983_v58 }
  0x92   : > { %1818 = vmatprep.subr.bf16.mxu0 %v6991_v63 }
  0x95   : > { %1819 = vmatpush1.bf16.msra.mxu0 %v6989_v62 }
  0x96   : > { %1820 = vmatprep.subr.bf16.mxu0 %v6997_v4 }
  0x99   : > { %1821 = vmatpush1.bf16.msra.mxu0 %v6995_v3 }
  0x9a   : > { %1822 = vmatprep.subr.bf16.mxu0 %v7003_v6 }
  0x9d   : > { %1823 = vmatpush1.bf16.msra.mxu0 %v7001_v7 }
  0x9e   : > { %1824 = vmatprep.subr.bf16.mxu0 %v7009_v10 }
  0xa1   : > { %1825 = vmatpush1.bf16.msra.mxu0 %v7007_v11 }
  0xa2   : > { %1826 = vmatprep.subr.bf16.mxu0 %v7015_v15 }
  0xa5   : > { %1827 = vmatpush1.bf16.msra.mxu0 %v7013_v14 }
  0xa6   : > { %2171 = vmatprep.subr.bf16.mxu0 %v7021_v17 }
 0x110   : > { %v7648_v18 = vpop.f32.mrf.mxu0 }
 0x111   : > { %v7650_v19 = vpop.f32.mrf.mxu1 }
 0x112   : > { %v7652_v20 = vpop.f32.mrf.mxu0 }
 0x113   : > { %v7660_v23 = vpop.f32.mrf.mxu1 }
 0x114   : > { %v6830_v26 = vpop.f32.mrf.mxu0 }
 0x115   : > { %v6840_v29 = vpop.f32.mrf.mxu1 }
 0x116   : > { %v7698_v40 = vpop.f32.mrf.mxu0 }
 0x117   : > { %v7686_v34 = vpop.f32.mrf.mxu1 }
 0x118   : > { %954 = vrot.lane.b32.xlu0 %v7686_v34, %s7428_s26 }
 0x11c   : > { %952 = vrot.lane.b32.xlu0 %v7660_v23, %s7428_s26 }
 0x120   : > { %982 = vrot.lane.b32.xlu0 %v7698_v40, %s7430_s6 }
 0x128   : > { %v7719_v48 = vpop.f32.mrf.mxu0 }
 0x12a   : > { %v7721_v49 = vpop.f32.mrf.mxu0 }
 0x12b   : > { %960 = vrot.lane.b32.xlu1 %v7721_v49, %s7432_s15 }
 0x12c   : > { %v6850_v50 = vpop.f32.mrf.mxu0 }
 0x12e   : > { %v7731_v53 = vpop.f32.mrf.mxu0 }
 0x12f   : > { %988 = vrot.lane.b32.xlu0 %v7731_v53, %s7428_s26  ;;  %962 = vrot.lane.b32.xlu1 %v7731_v53, %s7432_s15 }
 0x133   : > { %1003 = vrot.lane.b32.xlu0 %v7698_v40, %s7433_s30  ;;  %980 = vrot.lane.b32.xlu1 %v7652_v20, %s7430_s6 }
 0x137   : > { %1001 = vrot.lane.b32.xlu0 %v7652_v20, %s7433_s30  ;;  %986 = vrot.lane.b32.xlu1 %v7721_v49, %s7428_s26 }
 0x13b   : > { %3561 = vrot.lane.b32.xlu0 %v7650_v19, %s7428_s26  ;;  %1009 = vrot.lane.b32.xlu1 %v7686_v34, %s7430_s6 }
 0x13f   : > { %3582 = vrot.lane.b32.xlu0 %v7648_v18, %s7430_s6  ;;  %1007 = vrot.lane.b32.xlu1 %v7660_v23, %s7430_s6 }
 0x143   : > { %3601 = vrot.lane.b32.xlu0 %v7648_v18, %s7433_s30  ;;  %3565 = vrot.lane.b32.xlu1 %v7719_v48, %s7432_s15 }
 0x147   : > { %3585 = vrot.lane.b32.xlu1 %v7719_v48, %s7428_s26 }
 0x14b   : > { %3604 = vrot.lane.b32.xlu1 %v7650_v19, %s7430_s6  ;;  %s502_s6 = scalar_lea.vmem %s10684_s5, %s10956_s21 }
 0x18a   : > { %v955_v21 = vpop.permute.xlu0 %954 }
 0x18b   : > { %v968_v29 = vsel %vm966_vm3, %v7698_v40, %v955_v21  ;;  %v7138_v40 = vld [vmem:[%s10681_s2 + $0x434] ss:$8 sps:$4 sm:$0xff]  }
 0x18e   : > { %v953_v22 = vpop.permute.xlu0 %952 }
 0x18f   : > { %v967_v24 = vsel %vm966_vm3, %v7652_v20, %v953_v22 }
 0x192   : > { %v983_v25 = vpop.permute.xlu0 %982 }
 0x193   : > { %v993_v30 = vsel %vm966_vm3, %v983_v25, %v7686_v34 }
 0x19d   : > { %v961_v26 = vpop.permute.xlu1 %960 }
 0x19e   : > { %v970_v27 = vsel %vm969_vm2, %v967_v24, %v961_v26 }
 0x19f   : > { %v973_v28 = vsel %vm972_vm4, %v970_v27, 0.0 }
 0x1a0   : > { %976 = vst [vmem:[#allocation2 + $0x18] sm:$0xff] %v973_v28 }
 0x1a1   : > { %v989_v31 = vpop.permute.xlu0 %988  ;;  %v963_v32 = vpop.permute.xlu1 %962 }
 0x1a2   : > { %v995_v33 = vsel %vm969_vm2, %v993_v30, %v989_v31  ;;  %v971_v35 = vsel %vm969_vm2, %v968_v29, %v963_v32 }
 0x1a3   : > { %v7856_v20 = vsel %vm972_vm4, %v995_v33, 0.0  ;;  %v974_v36 = vsel %vm972_vm4, %v971_v35, 0.0 }
 0x1a4   : > { %v998_v37 = vsel %vm616_vm0, %v7856_v20, 0.0  ;;  %v975_v38 = vsel %vm616_vm0, %v974_v36, 0.0  ;;  %v7868_v42 = vpack.c.bf16 %v974_v36, %v970_v27 }
 0x1a5   : > { %1000 = vst [vmem:[#allocation2 + $0x30] sm:$0xff] %v998_v37  ;;  %977 = vst [vmem:[#allocation2 + $0x20] sm:$0xff] %v975_v38  ;;  %v1004_v39 = vpop.permute.xlu0 %1003  ;;  %v981_v34 = vpop.permute.xlu1 %980  ;;  %v1031_v38 = vld [vmem:[#allocation2 + $0x4f] sm:$0xff] }
 0x1a6   : > { %7357 = vmatmul.mubr.msk.bf16.gmra.mxu1 %vm7864_vm5, %v7868_v42  ;;  %v992_v44 = vsel %vm966_vm3, %v981_v34, %v7660_v23 }
 0x1a7   : > { %1256 = vmatprep.mubr.bf16.mxu1 %v10690_v41  ;;  %v1024_v51 = vld [vmem:[#allocation2 + $0x17] sm:$0xff] }
 0x1a8   : > { %v1069_v14 = vld [vmem:[#allocation2 + $0x11] sm:$0xff] }
 0x1a9   : > { %v987_v45 = vpop.permute.xlu1 %986  ;;  %v1002_v46 = vpop.permute.xlu0 %1001 }
 0x1aa   : > { %v994_v47 = vsel %vm969_vm2, %v992_v44, %v987_v45 }
 0x1ab   : > { %v996_v50 = vsel %vm972_vm4, %v994_v47, 0.0  ;;  %v7885_v23 = vpack.c.bf16 %v7856_v20, %v994_v47  ;;  %v1033_v47 = vld [vmem:[#allocation2 + $0x5f] sm:$0xff] }
 0x1ac   : > { %999 = vst [vmem:[#allocation2 + $0x28] sm:$0xff] %v996_v50  ;;  %v1025_v52 = vld [vmem:[#allocation2 + $0x1f] sm:$0xff]  ;;  %v1068_v50 = vld [vmem:[#allocation2 + $0x9] sm:$0xff] }
 0x1ad   : > { %v1010_v54 = vpop.permute.xlu1 %1009  ;;  %v7878_v55 = vpack.c.bf16 %v1025_v52, %v1024_v51  ;;  %v3562_v58 = vpop.permute.xlu0 %3561  ;;  %v1070_v15 = vld [vmem:[#allocation2 + $0x19] sm:$0xff] }
 0x1ae   : > { %v1014_v56 = vsel %vm966_vm3, %v1004_v39, %v1010_v54  ;;  %7360 = vmatmul.mubr.msk.bf16.gmra.mxu1 %vm7864_vm5, %v7885_v23  ;;  %v3568_v3 = vsel %vm966_vm3, %v7648_v18, %v3562_v58  ;;  %v7016_v52 = vld [vmem:[%s10681_s2 + $0x1f0] ss:$8 sps:$4 sm:$0xff]   ;;  %v1083_v54 = vpack.c.bf16 %v1069_v14, %v1068_v50  ;;  %v7030_v58 = vld [vmem:[%s10681_s2 + $0x1d4] ss:$8 sps:$4 sm:$0xff]   ;;  %v1079_v50 = vld [vmem:[#allocation2 + $0x61] sm:$0xff] }
 0x1af   : > { %v1016_v57 = vsel %vm969_vm2, %v1014_v56, %v7731_v53  ;;  %1418 = vmatmul.mubr.bf16.gmra.mxu0 %v7878_v55  ;;  %1266 = vmatprep.mubr.bf16.mxu1 %v10690_v41  ;;  %v7024_v56 = vld [vmem:[%s10681_s2 + $0x1e4] ss:$8 sps:$4 sm:$0xff]  }
 0x1b0   : > { %v1018_v59 = vsel %vm972_vm4, %v1016_v57, 0.0  ;;  %1427 = vmatprep.mubr.bf16.mxu0 %v10690_v41  ;;  %v7022_v57 = vld [vmem:[%s10681_s2 + $0x1e0] ss:$8 sps:$4 sm:$0xff]  }
 0x1b1   : > { %v1019_v60 = vsel %vm616_vm0, %v1018_v59, 0.0  ;;  %v1008_v61 = vpop.permute.xlu1 %1007  ;;  %v3583_v5 = vpop.permute.xlu0 %3582 }
 0x1b2   : > { %1021 = vst [vmem:[#allocation2 + $0x40] sm:$0xff] %v1019_v60  ;;  %v1013_v53 = vsel %vm966_vm3, %v1002_v46, %v1008_v61  ;;  %v3588_v18 = vsel %vm966_vm3, %v3583_v5, %v7650_v19  ;;  %v3593_v19 = vrot.slane %v7856_v20, 4  ;;  %v3612_v20 = vrot.slane %v1018_v59, 4  ;;  %v1032_v46 = vld [vmem:[#allocation2 + $0x57] sm:$0xff]  ;;  %v7027_v60 = vld [vmem:[%s10681_s2 + $0x2e4] ss:$8 sps:$4 sm:$0xff]  }
 0x1b3   : > { %v1015_v62 = vsel %vm969_vm2, %v1013_v53, %v7721_v49  ;;  %v1026_v63 = vld [vmem:[#allocation2 + $0x27] sm:$0xff]  ;;  %v1027_v0 = vld [vmem:[#allocation2 + $0x2f] sm:$0xff]  ;;  %v3573_v49 = vrot.slane %v974_v36, 4  ;;  %v7964_v51 = vpack.c.bf16 %v1033_v47, %v1032_v46  ;;  %v1078_v47 = vld [vmem:[#allocation2 + $0x59] sm:$0xff] }
 0x1b4   : > { %v1017_v1 = vsel %vm972_vm4, %v1015_v62, 0.0  ;;  %v7898_v2 = vpack.c.bf16 %v1027_v0, %v1026_v63  ;;  %v7905_v8 = vpack.c.bf16 %v1018_v59, %v1015_v62  ;;  %v1071_v16 = vld [vmem:[#allocation2 + $0x21] sm:$0xff]  ;;  %v1072_v31 = vld [vmem:[#allocation2 + $0x29] sm:$0xff]  ;;  %v7033_v0 = vld [vmem:[%s10681_s2 + $0x2d4] ss:$8 sps:$4 sm:$0xff]  }
 0x1b5   : > { %1020 = vst [vmem:[#allocation2 + $0x38] sm:$0xff] %v1017_v1  ;;  %v3566_v4 = vpop.permute.xlu1 %3565  ;;  %v3602_v25 = vpop.permute.xlu0 %3601  ;;  %v7019_v59 = vld [vmem:[%s10681_s2 + $0x2f0] ss:$8 sps:$4 sm:$0xff]   ;;  %v7987_v61 = vpack.c.bf16 %v1071_v16, %v1070_v15  ;;  %v7036_v62 = vld [vmem:[%s10681_s2 + $0x1c4] ss:$8 sps:$4 sm:$0xff]  }
 0x1b6   : > { %v3569_v6 = vsel %vm969_vm2, %v3568_v3, %v3566_v4  ;;  %7363 = vmatmul.mubr.msk.bf16.gmra.mxu1 %vm7864_vm5, %v7905_v8  ;;  %v7028_v53 = vld [vmem:[%s10681_s2 + $0x1d0] ss:$8 sps:$4 sm:$0xff]   ;;  %v7025_v63 = vld [vmem:[%s10681_s2 + $0x2e0] ss:$8 sps:$4 sm:$0xff]   ;;  %v7039_v5 = vld [vmem:[%s10681_s2 + $0x2c4] ss:$8 sps:$4 sm:$0xff]  }
 0x1b7   : > { %v3570_v7 = vsel %vm972_vm4, %v3569_v6, 0.0  ;;  %1428 = vmatmul.mubr.bf16.gmra.mxu0 %v7898_v2  ;;  %1276 = vmatprep.mubr.bf16.mxu1 %v10690_v41  ;;  %v7034_v1 = vld [vmem:[%s10681_s2 + $0x1c0] ss:$8 sps:$4 sm:$0xff]   ;;  %v7031_v3 = vld [vmem:[%s10681_s2 + $0x2d0] ss:$8 sps:$4 sm:$0xff]  }
 0x1b8   : > { %v7910_v9 = vrot.slane %v3570_v7, 4  ;;  %1437 = vmatprep.mubr.bf16.mxu0 %v10690_v41  ;;  %v7040_v6 = vld [vmem:[%s10681_s2 + $0x1b0] ss:$8 sps:$4 sm:$0xff]   ;;  %v7048_v7 = vld [vmem:[%s10681_s2 + $0x1a4] ss:$8 sps:$4 sm:$0xff]  }
 0x1b9   : > { %v3586_v10 = vpop.permute.xlu1 %3585  ;;  %v1030_v37 = vld [vmem:[#allocation2 + $0x47] sm:$0xff]  ;;  %v7066_v46 = vld [vmem:[%s10681_s2 + $0x3f4] ss:$8 sps:$4 sm:$0xff]  }
 0x1ba   : > { %v7918_v11 = vsel %vm616_vm0, %v3573_v49, %v7910_v9  ;;  %v3578_v12 = vsel %vm616_vm0, %v7910_v9, 0.0  ;;  %v3589_v13 = vsel %vm969_vm2, %v3588_v18, %v3586_v10  ;;  %v7955_v44 = vld [vmem:[#allocation2 + $0x41] sm:$0xff]  ;;  %v7958_v45 = vpack.c.bf16 %v1031_v38, %v1030_v37  ;;  %v1238_v18 = vpop.f32.mrf.mxu1  ;;  %v7045_v10 = vld [vmem:[%s10681_s2 + $0x2b4] ss:$8 sps:$4 sm:$0xff]  }
 0x1bb   : > { %v3590_v17 = vsel %vm972_vm4, %v3589_v13, 0.0  ;;  %3579 = vst [vmem:[#allocation2 + $0x18] sm:$0xff] %v7918_v11  ;;  %3580 = vst [vmem:[#allocation2 + $0x20] sm:$0xff] %v3578_v12  ;;  %v7037_v49 = vld [vmem:[%s10681_s2 + $0x2c0] ss:$8 sps:$4 sm:$0xff]   ;;  %v1409_v12 = vpop.f32.mrf.mxu0 }
 0x1bc   : > { %v7926_v21 = vrot.slane %v3590_v17, 4  ;;  %v1028_v22 = vld [vmem:[#allocation2 + $0x37] sm:$0xff]  ;;  %v1029_v24 = vld [vmem:[#allocation2 + $0x3f] sm:$0xff]  ;;  %v8042_v14 = vadd.f32 %v1409_v12, %v1238_v18  ;;  %v1240_v15 = vpop.f32.mrf.mxu1 }
 0x1bd   : > { %v3605_v26 = vpop.permute.xlu1 %3604  ;;  %v7928_v27 = vpack.c.bf16 %v1029_v24, %v1028_v22  ;;  %v1073_v32 = vld [vmem:[#allocation2 + $0x31] sm:$0xff]  ;;  %v7953_v34 = vld [vmem:[#allocation2 + $0x39] sm:$0xff]  ;;  %v1411_v16 = vpop.f32.mrf.mxu0  ;;  %v7051_v24 = vld [vmem:[%s10681_s2 + $0x2a4] ss:$8 sps:$4 sm:$0xff]  }
 0x1be   : > { %v7932_v28 = vsel %vm616_vm0, %v3593_v19, %v7926_v21  ;;  %v3598_v29 = vsel %vm616_vm0, %v7926_v21, 0.0  ;;  %v3607_v30 = vsel %vm966_vm3, %v3602_v25, %v3605_v26  ;;  %1277 = vmatmul.mubr.bf16.gmra.mxu1 %v7431_v43  ;;  %v8016_v4 = vpack.c.bf16 %v1073_v32, %v1072_v31  ;;  %v7046_v13 = vld [vmem:[%s10681_s2 + $0x1a0] ss:$8 sps:$4 sm:$0xff]   ;;  %v7043_v17 = vld [vmem:[%s10681_s2 + $0x2b0] ss:$8 sps:$4 sm:$0xff]   ;;  %v1242_v25 = vpop.f32.mrf.mxu1 }
 0x1bf   : > { %v3608_v33 = vsel %vm969_vm2, %v3607_v30, %v7719_v48  ;;  %1438 = vmatmul.mubr.bf16.gmra.mxu0 %v7928_v27  ;;  %3599 = vst [vmem:[#allocation2 + $0x28] sm:$0xff] %v7932_v28  ;;  %3600 = vst [vmem:[#allocation2 + $0x30] sm:$0xff] %v3598_v29  ;;  %1286 = vmatprep.mubr.bf16.mxu1 %v10690_v41  ;;  %v8047_v19 = vadd.f32 %v1411_v16, %v1240_v15  ;;  %v1413_v26 = vpop.f32.mrf.mxu0  ;;  %v7054_v29 = vld [vmem:[%s10681_s2 + $0x194] ss:$8 sps:$4 sm:$0xff]   ;;  %v1076_v31 = vld [vmem:[#allocation2 + $0x49] sm:$0xff] }
 0x1c0   : > { %v3609_v35 = vsel %vm972_vm4, %v3608_v33, 0.0  ;;  %1447 = vmatprep.mubr.bf16.mxu0 %v10690_v41  ;;  %v8051_v22 = vpack.c.bf16 %v7955_v44, %v7953_v34  ;;  %v8059_v30 = vadd.f32 %v1413_v26, %v1242_v25  ;;  %v7052_v32 = vld [vmem:[%s10681_s2 + $0x190] ss:$8 sps:$4 sm:$0xff]   ;;  %v7049_v33 = vld [vmem:[%s10681_s2 + $0x2a0] ss:$8 sps:$4 sm:$0xff]  }
 0x1c1   : > { %v7945_v36 = vrot.slane %v3609_v35, 4  ;;  %v1077_v35 = vld [vmem:[#allocation2 + $0x51] sm:$0xff]  ;;  %v7058_v34 = vld [vmem:[%s10681_s2 + $0x180] ss:$8 sps:$4 sm:$0xff]   ;;  %v7063_v44 = vld [vmem:[%s10681_s2 + $0x284] ss:$8 sps:$4 sm:$0xff]  }
 0x1c2   : > { %v7057_v37 = vld [vmem:[%s10681_s2 + $0x294] ss:$8 sps:$4 sm:$0xff]   ;;  %v8079_v38 = vpack.c.bf16 %v1077_v35, %v1076_v31  ;;  %v7091_v12 = vld [vmem:[%s10681_s2 + $0x330] ss:$8 sps:$4 sm:$0xff]   ;;  %v7111_v31 = vld [vmem:[%s10681_s2 + $0x304] ss:$8 sps:$4 sm:$0xff]  }
 0x1c3   : > { %v7949_v48 = vsel %vm616_vm0, %v3612_v20, %v7945_v36  ;;  %v3617_v39 = vsel %vm616_vm0, %v7945_v36, 0.0  ;;  %v7060_v20 = vld [vmem:[%s10681_s2 + $0x184] ss:$8 sps:$4 sm:$0xff]   ;;  %v7093_v18 = vld [vmem:[%s10681_s2 + $0x334] ss:$8 sps:$4 sm:$0xff]  }
 0x1c4   : > { %3618 = vst [vmem:[#allocation2 + $0x38] sm:$0xff] %v7949_v48  ;;  %3619 = vst [vmem:[#allocation2 + $0x40] sm:$0xff] %v3617_v39  ;;  %v7055_v39 = vld [vmem:[%s10681_s2 + $0x290] ss:$8 sps:$4 sm:$0xff]   ;;  %v7102_v15 = vld [vmem:[%s10681_s2 + $0x394] ss:$8 sps:$4 sm:$0xff]  }
 0x1c5   : > { %v7100_v16 = vld [vmem:[%s10681_s2 + $0x390] ss:$8 sps:$4 sm:$0xff]   ;;  %v7105_v25 = vld [vmem:[%s10681_s2 + $0x314] ss:$8 sps:$4 sm:$0xff]  }
 0x1c6   : > { %1287 = vmatmul.mubr.bf16.gmra.mxu1 %v7431_v43  ;;  %v7103_v26 = vld [vmem:[%s10681_s2 + $0x310] ss:$8 sps:$4 sm:$0xff]  }
 0x1c7   : > { %1448 = vmatmul.mubr.bf16.gmra.mxu0 %v7958_v45  ;;  %1595 = vmatprep.mubr.bf16.mxu1 %v10690_v41  ;;  %v1035_v35 = vld [vmem:[#allocation2 + $0x6f] sm:$0xff] }
 0x1c8   : > { %1457 = vmatprep.mubr.bf16.mxu0 %v10690_v41 }
 0x1ce   : > { %1596 = vmatmul.mubr.bf16.vlgmr.msra.gmra.mxu1 %v1083_v54  ;;  %v7069_v54 = vld [vmem:[%s10681_s2 + $0x374] ss:$8 sps:$4 sm:$0xff]  }
 0x1cf   : > { %1458 = vmatmul.mubr.bf16.gmra.mxu0 %v7964_v51  ;;  %1984 = vmatpush1.bf16.msra.mxu1 %v7016_v52  ;;  %v7061_v52 = vld [vmem:[%s10681_s2 + $0x280] ss:$8 sps:$4 sm:$0xff]  }
 0x1d0   : > { %1844 = vmatprep.mubr.bf16.mxu0 %v10690_v41  ;;  %1985 = vmatprep.subr.bf16.mxu1 %v7024_v56  ;;  %v8103_v56 = vpack.c.bf16 %v1079_v50, %v1078_v47  ;;  %v7112_v47 = vld [vmem:[%s10681_s2 + $0x470] ss:$8 sps:$4 sm:$0xff]   ;;  %v7120_v50 = vld [vmem:[%s10681_s2 + $0x464] ss:$8 sps:$4 sm:$0xff]  }
 0x1d1   : > { %1605 = vmatprep.mubr.bf16.mxu1 %v10690_v41 }
 0x1d3   : > { %1986 = vmatpush1.bf16.msra.mxu1 %v7022_v57  ;;  %v7064_v57 = vld [vmem:[%s10681_s2 + $0x3f0] ss:$8 sps:$4 sm:$0xff]  }
 0x1d4   : > { %1987 = vmatprep.subr.bf16.mxu1 %v7030_v58  ;;  %v7072_v58 = vld [vmem:[%s10681_s2 + $0x3e4] ss:$8 sps:$4 sm:$0xff]  }
 0x1d6   : > { %1606 = vmatmul.mubr.bf16.gmra.mxu1 %v7987_v61 }
 0x1d7   : > { %7366 = vmatmul.mubr.msk.bf16.vlgmr.msra.gmra.mxu0 %vm7864_vm5, %v7868_v42  ;;  %1988 = vmatpush1.bf16.msra.mxu1 %v7028_v53  ;;  %v7042_v42 = vld [vmem:[%s10681_s2 + $0x1b4] ss:$8 sps:$4 sm:$0xff]   ;;  %v7067_v53 = vld [vmem:[%s10681_s2 + $0x370] ss:$8 sps:$4 sm:$0xff]  }
 0x1d8   : > { %2172 = vmatpush1.bf16.msra.mxu0 %v7019_v59  ;;  %1854 = vmatprep.mubr.bf16.mxu0 %v10690_v41  ;;  %v7070_v59 = vld [vmem:[%s10681_s2 + $0x3e0] ss:$8 sps:$4 sm:$0xff]  }
 0x1d9   : > { %2173 = vmatprep.subr.bf16.mxu0 %v7027_v60  ;;  %1615 = vmatprep.mubr.bf16.mxu1 %v10690_v41  ;;  %v7078_v60 = vld [vmem:[%s10681_s2 + $0x3d4] ss:$8 sps:$4 sm:$0xff]  }
 0x1da   : > { %1989 = vmatprep.subr.bf16.mxu1 %v7036_v62  ;;  %v7076_v62 = vld [vmem:[%s10681_s2 + $0x3d0] ss:$8 sps:$4 sm:$0xff]  }
 0x1db   : > { %1990 = vmatpush1.bf16.msra.mxu1 %v7034_v1  ;;  %v7081_v1 = vld [vmem:[%s10681_s2 + $0x354] ss:$8 sps:$4 sm:$0xff]  }
 0x1dc   : > { %2174 = vmatpush1.bf16.msra.mxu0 %v7025_v63  ;;  %1991 = vmatprep.subr.bf16.mxu1 %v7042_v42  ;;  %v7084_v63 = vld [vmem:[%s10681_s2 + $0x3c4] ss:$8 sps:$4 sm:$0xff]   ;;  %v7082_v42 = vld [vmem:[%s10681_s2 + $0x3c0] ss:$8 sps:$4 sm:$0xff]  }
 0x1dd   : > { %2175 = vmatprep.subr.bf16.mxu0 %v7033_v0  ;;  %v7073_v0 = vld [vmem:[%s10681_s2 + $0x360] ss:$8 sps:$4 sm:$0xff]  }
 0x1de   : > { %1616 = vmatmul.mubr.bf16.gmra.mxu1 %v8016_v4 }
 0x1df   : > { %7369 = vmatmul.mubr.msk.bf16.gmra.mxu0 %vm7864_vm5, %v7885_v23  ;;  %1625 = vmatprep.mubr.bf16.mxu1 %v10690_v41 }
 0x1e0   : > { %2176 = vmatpush1.bf16.msra.mxu0 %v7031_v3  ;;  %1864 = vmatprep.mubr.bf16.mxu0 %v10690_v41  ;;  %v7079_v3 = vld [vmem:[%s10681_s2 + $0x350] ss:$8 sps:$4 sm:$0xff]  }
 0x1e1   : > { %2177 = vmatprep.subr.bf16.mxu0 %v7039_v5  ;;  %1992 = vmatpush1.bf16.msra.mxu1 %v7040_v6  ;;  %v7087_v5 = vld [vmem:[%s10681_s2 + $0x344] ss:$8 sps:$4 sm:$0xff]   ;;  %v7088_v6 = vld [vmem:[%s10681_s2 + $0x3b0] ss:$8 sps:$4 sm:$0xff]  }
 0x1e2   : > { %1993 = vmatprep.subr.bf16.mxu1 %v7048_v7  ;;  %v7096_v7 = vld [vmem:[%s10681_s2 + $0x3a4] ss:$8 sps:$4 sm:$0xff]  }
 0x1e4   : > { %2178 = vmatpush1.bf16.msra.mxu0 %v7037_v49  ;;  %v7085_v49 = vld [vmem:[%s10681_s2 + $0x340] ss:$8 sps:$4 sm:$0xff]  }
 0x1e5   : > { %2179 = vmatprep.subr.bf16.mxu0 %v7045_v10  ;;  %1994 = vmatpush1.bf16.msra.mxu1 %v7046_v13  ;;  %v7094_v10 = vld [vmem:[%s10681_s2 + $0x3a0] ss:$8 sps:$4 sm:$0xff]   ;;  %v7099_v13 = vld [vmem:[%s10681_s2 + $0x324] ss:$8 sps:$4 sm:$0xff]  }
 0x1e6   : > { %1626 = vmatmul.mubr.bf16.gmra.mxu1 %v8051_v22  ;;  %1995 = vmatprep.subr.bf16.mxu1 %v7054_v29  ;;  %v7106_v29 = vld [vmem:[%s10681_s2 + $0x380] ss:$8 sps:$4 sm:$0xff]  }
 0x1e7   : > { %7372 = vmatmul.mubr.msk.bf16.gmra.mxu0 %vm7864_vm5, %v7905_v8  ;;  %1635 = vmatprep.mubr.bf16.mxu1 %v10690_v41 }
 0x1e8   : > { %1874 = vmatprep.mubr.bf16.mxu0 %v10690_v41  ;;  %2180 = vmatpush1.bf16.msra.mxu0 %v7043_v17  ;;  %v7097_v17 = vld [vmem:[%s10681_s2 + $0x320] ss:$8 sps:$4 sm:$0xff]  }
 0x1e9   : > { %2181 = vmatprep.subr.bf16.mxu0 %v7051_v24  ;;  %1996 = vmatpush1.bf16.msra.mxu1 %v7052_v32  ;;  %v7108_v24 = vld [vmem:[%s10681_s2 + $0x384] ss:$8 sps:$4 sm:$0xff]   ;;  %v7114_v32 = vld [vmem:[%s10681_s2 + $0x474] ss:$8 sps:$4 sm:$0xff]  }
 0x1ea   : > { %1997 = vmatprep.subr.bf16.mxu1 %v7060_v20  ;;  %v7109_v20 = vld [vmem:[%s10681_s2 + $0x300] ss:$8 sps:$4 sm:$0xff]  }
 0x1ec   : > { %2182 = vmatpush1.bf16.msra.mxu0 %v7049_v33  ;;  %v1034_v33 = vld [vmem:[#allocation2 + $0x67] sm:$0xff] }
 0x1ed   : > { %2183 = vmatprep.subr.bf16.mxu0 %v7057_v37  ;;  %1998 = vmatpush1.bf16.msra.mxu1 %v7058_v34  ;;  %v7117_v37 = vld [vmem:[%s10681_s2 + $0xf4] ss:$8 sps:$4 sm:$0xff]   ;;  %v1080_v34 = vld [vmem:[#allocation2 + $0x69] sm:$0xff] }
 0x1ee   : > { %1636 = vmatmul.mubr.bf16.gmra.mxu1 %v8079_v38  ;;  %2464 = vmatprep.subr.bf16.mxu1 %v7066_v46 }
 0x1ef   : > { %1875 = vmatmul.mubr.bf16.gmra.mxu0 %v7431_v43  ;;  %1645 = vmatprep.mubr.bf16.mxu1 %v10690_v41 }
 0x1f0   : > { %1884 = vmatprep.mubr.bf16.mxu0 %v10690_v41  ;;  %2184 = vmatpush1.bf16.msra.mxu0 %v7055_v39  ;;  %v8225_v39 = vpack.c.bf16 %v1035_v35, %v1034_v33  ;;  %v7171_v35 = vld [vmem:[%s10681_s2 + $0x164] ss:$8 sps:$4 sm:$0xff]  }
 0x1f1   : > { %2185 = vmatprep.subr.bf16.mxu0 %v7063_v44  ;;  %v1081_v44 = vld [vmem:[#allocation2 + $0x71] sm:$0xff] }
 0x1f2   : > { %v8231_v46 = vpack.c.bf16 %v1081_v44, %v1080_v34  ;;  %v7169_v34 = vld [vmem:[%s10681_s2 + $0x160] ss:$8 sps:$4 sm:$0xff]  }
 0x1f4   : > { %2186 = vmatpush1.bf16.msra.mxu0 %v7061_v52  ;;  %v7118_v52 = vld [vmem:[%s10681_s2 + $0x460] ss:$8 sps:$4 sm:$0xff]  }
 0x1f5   : > { %2635 = vmatprep.subr.bf16.mxu0 %v7069_v54  ;;  %v7126_v54 = vld [vmem:[%s10681_s2 + $0x454] ss:$8 sps:$4 sm:$0xff]  }
 0x1f6   : > { %1646 = vmatmul.mubr.bf16.gmra.mxu1 %v8103_v56 }
 0x1f7   : > { %1885 = vmatmul.mubr.bf16.gmra.mxu0 %v7431_v43  ;;  %2015 = vmatprep.mubr.bf16.mxu1 %v10690_v41 }
 0x1f8   : > { %1894 = vmatprep.mubr.bf16.mxu0 %v10690_v41 }
 0x1fe   : > { %2016 = vmatmul.mubr.bf16.vlgmr.msra.gmra.mxu1 %v7878_v55  ;;  %v7075_v55 = vld [vmem:[%s10681_s2 + $0x364] ss:$8 sps:$4 sm:$0xff]  }
 0x1ff   : > { %1895 = vmatmul.mubr.bf16.gmra.mxu0 %v7431_v43  ;;  %2465 = vmatpush1.bf16.msra.mxu1 %v7064_v57  ;;  %v7115_v57 = vld [vmem:[%s10681_s2 + $0xf0] ss:$8 sps:$4 sm:$0xff]  }
 0x200   : > { %2203 = vmatprep.mubr.bf16.mxu0 %v10690_v41  ;;  %2466 = vmatprep.subr.bf16.mxu1 %v7072_v58  ;;  %v7124_v58 = vld [vmem:[%s10681_s2 + $0x450] ss:$8 sps:$4 sm:$0xff]  }
 0x201   : > { %2025 = vmatprep.mubr.bf16.mxu1 %v10690_v41 }
 0x203   : > { %2467 = vmatpush1.bf16.msra.mxu1 %v7070_v59  ;;  %v7132_v59 = vld [vmem:[%s10681_s2 + $0x444] ss:$8 sps:$4 sm:$0xff]  }
 0x204   : > { %2468 = vmatprep.subr.bf16.mxu1 %v7078_v60  ;;  %v7121_v60 = vld [vmem:[%s10681_s2 + $0xe0] ss:$8 sps:$4 sm:$0xff]  }
 0x206   : > { %2026 = vmatmul.mubr.bf16.gmra.mxu1 %v7898_v2 }
 0x207   : > { %2204 = vmatmul.mubr.bf16.vlgmr.msra.gmra.mxu0 %v7987_v61  ;;  %2469 = vmatpush1.bf16.msra.mxu1 %v7076_v62  ;;  %v7090_v61 = vld [vmem:[%s10681_s2 + $0x3b4] ss:$8 sps:$4 sm:$0xff]   ;;  %v7136_v62 = vld [vmem:[%s10681_s2 + $0x430] ss:$8 sps:$4 sm:$0xff]  }
 0x208   : > { %2636 = vmatpush1.bf16.msra.mxu0 %v7067_v53  ;;  %2213 = vmatprep.mubr.bf16.mxu0 %v10690_v41  ;;  %v7129_v53 = vld [vmem:[%s10681_s2 + $0xd4] ss:$8 sps:$4 sm:$0xff]  }
 0x209   : > { %2637 = vmatprep.subr.bf16.mxu0 %v7075_v55  ;;  %2035 = vmatprep.mubr.bf16.mxu1 %v10690_v41  ;;  %v7135_v55 = vld [vmem:[%s10681_s2 + $0xc4] ss:$8 sps:$4 sm:$0xff]  }
 0x20a   : > { %2470 = vmatprep.subr.bf16.mxu1 %v7084_v63  ;;  %v7144_v63 = vld [vmem:[%s10681_s2 + $0x424] ss:$8 sps:$4 sm:$0xff]  }
 0x20b   : > { %2471 = vmatpush1.bf16.msra.mxu1 %v7082_v42  ;;  %v7139_v42 = vld [vmem:[%s10681_s2 + $0xb0] ss:$8 sps:$4 sm:$0xff]  }
 0x20c   : > { %2638 = vmatpush1.bf16.msra.mxu0 %v7073_v0  ;;  %2472 = vmatprep.subr.bf16.mxu1 %v7090_v61  ;;  %v7133_v0 = vld [vmem:[%s10681_s2 + $0xc0] ss:$8 sps:$4 sm:$0xff]   ;;  %v7147_v61 = vld [vmem:[%s10681_s2 + $0xa4] ss:$8 sps:$4 sm:$0xff]  }
 0x20d   : > { %2639 = vmatprep.subr.bf16.mxu0 %v7081_v1  ;;  %v7142_v1 = vld [vmem:[%s10681_s2 + $0x420] ss:$8 sps:$4 sm:$0xff]  }
 0x20e   : > { %2036 = vmatmul.mubr.bf16.gmra.mxu1 %v7928_v27 }
 0x20f   : > { %2214 = vmatmul.mubr.bf16.gmra.mxu0 %v8016_v4  ;;  %2045 = vmatprep.mubr.bf16.mxu1 %v10690_v41 }
 0x210   : > { %2640 = vmatpush1.bf16.msra.mxu0 %v7079_v3  ;;  %2223 = vmatprep.mubr.bf16.mxu0 %v10690_v41  ;;  %v7150_v3 = vld [vmem:[%s10681_s2 + $0x414] ss:$8 sps:$4 sm:$0xff]  }
 0x211   : > { %2641 = vmatprep.subr.bf16.mxu0 %v7087_v5  ;;  %2473 = vmatpush1.bf16.msra.mxu1 %v7088_v6  ;;  %v7148_v5 = vld [vmem:[%s10681_s2 + $0x410] ss:$8 sps:$4 sm:$0xff]   ;;  %v7145_v6 = vld [vmem:[%s10681_s2 + $0xa0] ss:$8 sps:$4 sm:$0xff]  }
 0x212   : > { %2474 = vmatprep.subr.bf16.mxu1 %v7096_v7  ;;  %v7156_v7 = vld [vmem:[%s10681_s2 + $0x404] ss:$8 sps:$4 sm:$0xff]  }
 0x214   : > { %2642 = vmatpush1.bf16.msra.mxu0 %v7085_v49  ;;  %v7151_v49 = vld [vmem:[%s10681_s2 + $0x90] ss:$8 sps:$4 sm:$0xff]  }
 0x215   : > { %2643 = vmatprep.subr.bf16.mxu0 %v7093_v18  ;;  %2475 = vmatpush1.bf16.msra.mxu1 %v7094_v10  ;;  %v7154_v18 = vld [vmem:[%s10681_s2 + $0x400] ss:$8 sps:$4 sm:$0xff]   ;;  %v7159_v10 = vld [vmem:[%s10681_s2 + $0x84] ss:$8 sps:$4 sm:$0xff]  }
 0x216   : > { %2046 = vmatmul.mubr.bf16.gmra.mxu1 %v7958_v45  ;;  %2476 = vmatprep.subr.bf16.mxu1 %v7102_v15  ;;  %v7157_v15 = vld [vmem:[%s10681_s2 + $0x80] ss:$8 sps:$4 sm:$0xff]  }
 0x217   : > { %2224 = vmatmul.mubr.bf16.gmra.mxu0 %v8051_v22  ;;  %2055 = vmatprep.mubr.bf16.mxu1 %v10690_v41 }
 0x218   : > { %2233 = vmatprep.mubr.bf16.mxu0 %v10690_v41  ;;  %2644 = vmatpush1.bf16.msra.mxu0 %v7091_v12  ;;  %v7162_v12 = vld [vmem:[%s10681_s2 + $0x74] ss:$8 sps:$4 sm:$0xff]  }
 0x219   : > { %2645 = vmatprep.subr.bf16.mxu0 %v7099_v13  ;;  %2477 = vmatpush1.bf16.msra.mxu1 %v7100_v16  ;;  %v1059_v13 = vld [vmem:[#allocation2 + $0x78] sm:$0x3]  ;;  %v7165_v16 = vld [vmem:[%s10681_s2 + $0x174] ss:$8 sps:$4 sm:$0xff]  }
 0x21a   : > { %2478 = vmatprep.subr.bf16.mxu1 %v7108_v24  ;;  %v7160_v24 = vld [vmem:[%s10681_s2 + $0x70] ss:$8 sps:$4 sm:$0xff]  }
 0x21c   : > { %2646 = vmatpush1.bf16.msra.mxu0 %v7097_v17 }
 0x21d   : > { %2647 = vmatprep.subr.bf16.mxu0 %v7105_v25  ;;  %2479 = vmatpush1.bf16.msra.mxu1 %v7106_v29  ;;  %v7168_v25 = vld [vmem:[%s10681_s2 + $0x64] ss:$8 sps:$4 sm:$0xff]   ;;  %v7174_v29 = vld [vmem:[%s10681_s2 + $0x54] ss:$8 sps:$4 sm:$0xff]  }
 0x21e   : > { %2056 = vmatmul.mubr.bf16.gmra.mxu1 %v7964_v51  ;;  %2823 = vmatprep.subr.bf16.mxu1 %v7114_v32  ;;  %v7352_v32 = vld [vmem:[#allocation2 + $0x8] sm:$0xff] }
 0x21f   : > { %2234 = vmatmul.mubr.bf16.gmra.mxu0 %v8079_v38  ;;  %2065 = vmatprep.mubr.bf16.mxu1 %v10690_v41  ;;  %v8373_v33 = vpack.c.bf16 %v7352_v32, %v7352_v32  ;;  %v7202_v32 = vld [vmem:[%s10681_s2] ss:$8 sps:$4 sm:$0xff]  }
 0x220   : > { %2243 = vmatprep.mubr.bf16.mxu0 %v10690_v41  ;;  %2648 = vmatpush1.bf16.msra.mxu0 %v7103_v26  ;;  %v7166_v26 = vld [vmem:[%s10681_s2 + $0x60] ss:$8 sps:$4 sm:$0xff]  }
 0x221   : > { %2649 = vmatprep.subr.bf16.mxu0 %v7111_v31  ;;  %v8371_v31 = vpop.f32.mrf.mxu1 }
 0x224   : > { %2650 = vmatpush1.bf16.msra.mxu0 %v7109_v20  ;;  %v7172_v20 = vld [vmem:[%s10681_s2 + $0x50] ss:$8 sps:$4 sm:$0xff]  }
 0x225   : > { %3801 = vmatprep.subr.bf16.mxu0 %v7117_v37  ;;  %v7180_v37 = vld [vmem:[%s10681_s2 + $0x44] ss:$8 sps:$4 sm:$0xff]  }
 0x226   : > { %2066 = vmatmul.mubr.bf16.gmra.mxu1 %v8225_v39 }
 0x227   : > { %2244 = vmatmul.mubr.bf16.gmra.mxu0 %v8103_v56  ;;  %2496 = vmatprep.mubr.bf16.mxu1 %v10690_v41 }
 0x228   : > { %2253 = vmatprep.mubr.bf16.mxu0 %v10690_v41 }
 0x22e   : > { %7375 = vmatmul.mubr.msk.bf16.vlgmr.msra.gmra.mxu1 %vm7864_vm5, %v7885_v23  ;;  %v7123_v23 = vld [vmem:[%s10681_s2 + $0xe4] ss:$8 sps:$4 sm:$0xff]  }
 0x22f   : > { %2254 = vmatmul.mubr.bf16.gmra.mxu0 %v8231_v46  ;;  %2824 = vmatpush1.bf16.msra.mxu1 %v7112_v47  ;;  %v7177_v47 = vld [vmem:[%s10681_s2 + $0x154] ss:$8 sps:$4 sm:$0xff]  }
 0x230   : > { %2667 = vmatprep.mubr.bf16.mxu0 %v10690_v41  ;;  %2825 = vmatprep.subr.bf16.mxu1 %v7120_v50  ;;  %v7178_v50 = vld [vmem:[%s10681_s2 + $0x40] ss:$8 sps:$4 sm:$0xff]  }
 0x231   : > { %2506 = vmatprep.mubr.bf16.mxu1 %v10690_v41 }
 0x233   : > { %2826 = vmatpush1.bf16.msra.mxu1 %v7118_v52 }
 0x234   : > { %2827 = vmatprep.subr.bf16.mxu1 %v7126_v54  ;;  %v7175_v54 = vld [vmem:[%s10681_s2 + $0x150] ss:$8 sps:$4 sm:$0xff]  }
 0x236   : > { %7378 = vmatmul.mubr.msk.bf16.gmra.mxu1 %vm7864_vm5, %v7905_v8  ;;  %v7127_v8 = vld [vmem:[%s10681_s2 + $0xd0] ss:$8 sps:$4 sm:$0xff]  }
 0x237   : > { %2668 = vmatmul.mubr.bf16.vlgmr.msra.gmra.mxu0 %v7898_v2  ;;  %2828 = vmatpush1.bf16.msra.mxu1 %v7124_v58  ;;  %v7130_v2 = vld [vmem:[%s10681_s2 + $0x440] ss:$8 sps:$4 sm:$0xff]   ;;  %v7183_v58 = vld [vmem:[%s10681_s2 + $0x144] ss:$8 sps:$4 sm:$0xff]  }
 0x238   : > { %3802 = vmatpush1.bf16.msra.mxu0 %v7115_v57  ;;  %2677 = vmatprep.mubr.bf16.mxu0 %v10690_v41  ;;  %v8406_v57 = vpop.f32.mrf.mxu0 }
 0x239   : > { %3803 = vmatprep.subr.bf16.mxu0 %v7123_v23  ;;  %2516 = vmatprep.mubr.bf16.mxu1 %v10690_v41 }
 0x23a   : > { %2829 = vmatprep.subr.bf16.mxu1 %v7132_v59  ;;  %v7184_v59 = vld [vmem:[%s10681_s2 + $0x30] ss:$8 sps:$4 sm:$0xff]  }
 0x23b   : > { %2830 = vmatpush1.bf16.msra.mxu1 %v7130_v2  ;;  %v8421_v2 = vpack.c.bf16 %v7910_v9, %v7918_v11  ;;  %v7181_v9 = vld [vmem:[%s10681_s2 + $0x140] ss:$8 sps:$4 sm:$0xff]  }
 0x23c   : > { %3804 = vmatpush1.bf16.msra.mxu0 %v7121_v60  ;;  %2831 = vmatprep.subr.bf16.mxu1 %v7138_v40 }
 0x23d   : > { %3805 = vmatprep.subr.bf16.mxu0 %v7129_v53 }
 0x23e   : > { %2517 = vmatmul.mubr.bf16.gmra.mxu1 %v7431_v43 }
 0x23f   : > { %2678 = vmatmul.mubr.bf16.gmra.mxu0 %v7928_v27  ;;  %2526 = vmatprep.mubr.bf16.mxu1 %v10690_v41  ;;  %v7141_v27 = vld [vmem:[%s10681_s2 + $0xb4] ss:$8 sps:$4 sm:$0xff]  }
 0x240   : > { %3806 = vmatpush1.bf16.msra.mxu0 %v7127_v8  ;;  %2687 = vmatprep.mubr.bf16.mxu0 %v10690_v41  ;;  %v7192_v8 = vld [vmem:[%s10681_s2 + $0x24] ss:$8 sps:$4 sm:$0xff]  }
 0x241   : > { %3807 = vmatprep.subr.bf16.mxu0 %v7135_v55  ;;  %2832 = vmatpush1.bf16.msra.mxu1 %v7136_v62 }
 0x242   : > { %2833 = vmatprep.subr.bf16.mxu1 %v7144_v63 }
 0x244   : > { %3808 = vmatpush1.bf16.msra.mxu0 %v7133_v0  ;;  %v7190_v0 = vld [vmem:[%s10681_s2 + $0x20] ss:$8 sps:$4 sm:$0xff]  }
 0x245   : > { %3809 = vmatprep.subr.bf16.mxu0 %v7141_v27  ;;  %2834 = vmatpush1.bf16.msra.mxu1 %v7142_v1 }
 0x246   : > { %2527 = vmatmul.mubr.bf16.gmra.mxu1 %v7431_v43  ;;  %2835 = vmatprep.subr.bf16.mxu1 %v7150_v3 }
 0x247   : > { %2688 = vmatmul.mubr.bf16.gmra.mxu0 %v7958_v45  ;;  %2536 = vmatprep.mubr.bf16.mxu1 %v10690_v41  ;;  %v7153_v45 = vld [vmem:[%s10681_s2 + $0x94] ss:$8 sps:$4 sm:$0xff]  }
 0x248   : > { %2697 = vmatprep.mubr.bf16.mxu0 %v10690_v41  ;;  %3810 = vmatpush1.bf16.msra.mxu0 %v7139_v42 }
 0x249   : > { %3811 = vmatprep.subr.bf16.mxu0 %v7147_v61  ;;  %2836 = vmatpush1.bf16.msra.mxu1 %v7148_v5  ;;  %v7187_v61 = vld [vmem:[%s10681_s2 + $0x130] ss:$8 sps:$4 sm:$0xff]  }
 0x24a   : > { %2837 = vmatprep.subr.bf16.mxu1 %v7156_v7 }
 0x24c   : > { %3812 = vmatpush1.bf16.msra.mxu0 %v7145_v6  ;;  %v7195_v6 = vld [vmem:[%s10681_s2 + $0x124] ss:$8 sps:$4 sm:$0xff]  }
 0x24d   : > { %3813 = vmatprep.subr.bf16.mxu0 %v7153_v45  ;;  %2838 = vmatpush1.bf16.msra.mxu1 %v7154_v18  ;;  %v7198_v45 = vld [vmem:[%s10681_s2 + $0x14] ss:$8 sps:$4 sm:$0xff]   ;;  %v8460_v18 = vpack.c.bf16 %v7926_v21, %v7932_v28  ;;  %v7193_v21 = vld [vmem:[%s10681_s2 + $0x120] ss:$8 sps:$4 sm:$0xff]   ;;  %v7204_v28 = vld [vmem:[%s10681_s2 + $0x4] ss:$8 sps:$4 sm:$0xff]  }
 0x24e   : > { %2537 = vmatmul.mubr.bf16.gmra.mxu1 %v7431_v43  ;;  %3972 = vmatprep.subr.bf16.mxu1 %v7162_v12  ;;  %v1036_v43 = vld [vmem:[#allocation2 + $0x77] sm:$0x3] }
 0x24f   : > { %2698 = vmatmul.mubr.bf16.gmra.mxu0 %v7964_v51  ;;  %2546 = vmatprep.mubr.bf16.mxu1 %v10690_v41  ;;  %v1067_v51 = vpack.c.bf16 %v1059_v13, %v1059_v13  ;;  %v1044_v17 = vpack.c.bf16 %v1036_v43, %v1036_v43  ;;  %10764 = vst [vmem:[#allocation6_spill] sm:$0xff] %v8460_v18  ;;  %v7196_v12 = vld [vmem:[%s10681_s2 + $0x10] ss:$8 sps:$4 sm:$0xff]  }
 0x250   : > { %2707 = vmatprep.mubr.bf16.mxu0 %v10690_v41  ;;  %3814 = vmatpush1.bf16.msra.mxu0 %v7151_v49 }
 0x251   : > { %3815 = vmatprep.subr.bf16.mxu0 %v7159_v10 }
 0x254   : > { %3816 = vmatpush1.bf16.msra.mxu0 %v7157_v15 }
 0x255   : > { %4159 = vmatprep.subr.bf16.mxu0 %v7165_v16 }
 0x256   : > { %2547 = vmatmul.mubr.bf16.gmra.mxu1 %v1067_v51 }
 0x257   : > { %2708 = vmatmul.mubr.bf16.gmra.mxu0 %v8225_v39  ;;  %2855 = vmatprep.mubr.bf16.mxu1 %v10690_v41 }
 0x258   : > { %2717 = vmatprep.mubr.bf16.mxu0 %v10690_v41 }
 0x25e   : > { %2856 = vmatmul.mubr.bf16.vlgmr.msra.gmra.mxu1 %v8016_v4  ;;  %v7163_v4 = vld [vmem:[%s10681_s2 + $0x170] ss:$8 sps:$4 sm:$0xff]  }
 0x25f   : > { %2718 = vmatmul.mubr.bf16.gmra.mxu0 %v1044_v17  ;;  %3973 = vmatpush1.bf16.msra.mxu1 %v7160_v24 }
 0x260   : > { %3833 = vmatprep.mubr.bf16.mxu0 %v10690_v41  ;;  %3974 = vmatprep.subr.bf16.mxu1 %v7168_v25  ;;  %v7199_v25 = vld [vmem:[%s10681_s2 + $0x110] ss:$8 sps:$4 sm:$0xff]  }
 0x261   : > { %2865 = vmatprep.mubr.bf16.mxu1 %v10690_v41 }
 0x263   : > { %3975 = vmatpush1.bf16.msra.mxu1 %v7166_v26 }
 0x264   : > { %3976 = vmatprep.subr.bf16.mxu1 %v7174_v29 }
 0x266   : > { %v1248_v39 = vpop.f32.mrf.mxu1  ;;  %2866 = vmatmul.mubr.bf16.gmra.mxu1 %v8051_v22  ;;  %v7186_v22 = vld [vmem:[%s10681_s2 + $0x34] ss:$8 sps:$4 sm:$0xff]  }
 0x267   : > { %3834 = vmatmul.mubr.bf16.vlgmr.msra.gmra.mxu0 %v8373_v33  ;;  %3977 = vmatpush1.bf16.msra.mxu1 %v7172_v20  ;;  %v7210_v20 = vld [vmem:[%s10681_s2 + $0x274] ss:$8 sps:$4 sm:$0xff]  }
 0x268   : > { %4160 = vmatpush1.bf16.msra.mxu0 %v7163_v4  ;;  %3843 = vmatprep.mubr.bf16.mxu0 %v10690_v41  ;;  %v1250_v44 = vpop.f32.mrf.mxu1 }
 0x269   : > { %4161 = vmatprep.subr.bf16.mxu0 %v7171_v35  ;;  %2875 = vmatprep.mubr.bf16.mxu1 %v10690_v41  ;;  %v7207_v35 = vld [vmem:[%s10681_s2 + $0x104] ss:$8 sps:$4 sm:$0xff]  }
 0x26a   : > { %3978 = vmatprep.subr.bf16.mxu1 %v7180_v37  ;;  %v1252_v52 = vpop.f32.mrf.mxu1 }
 0x26b   : > { %3979 = vmatpush1.bf16.msra.mxu1 %v7178_v50  ;;  %v7205_v50 = vld [vmem:[%s10681_s2 + $0x100] ss:$8 sps:$4 sm:$0xff]  }
 0x26c   : > { %4162 = vmatpush1.bf16.msra.mxu0 %v7169_v34  ;;  %v1254_v23 = vpop.f32.mrf.mxu1  ;;  %3980 = vmatprep.subr.bf16.mxu1 %v7186_v22 }
 0x26d   : > { %4163 = vmatprep.subr.bf16.mxu0 %v7177_v47  ;;  %v1082_v47 = vld [vmem:[#allocation2 + $0x79] sm:$0x3] }
 0x26e   : > { %v1258_v40 = vpop.f32.mrf.mxu1  ;;  %2876 = vmatmul.mubr.bf16.gmra.mxu1 %v8079_v38  ;;  %v7189_v38 = vld [vmem:[%s10681_s2 + $0x134] ss:$8 sps:$4 sm:$0xff]  }
 0x26f   : > { %v1419_v60 = vpop.f32.mrf.mxu0  ;;  %7381 = vmatmul.mubr.msk.bf16.gmra.mxu0 %vm8415_vm7, %v8421_v2  ;;  %2885 = vmatprep.mubr.bf16.mxu1 %v10690_v41 }
 0x270   : > { %v8430_v55 = vadd.f32 %v1419_v60, %v1248_v39  ;;  %4164 = vmatpush1.bf16.msra.mxu0 %v7175_v54  ;;  %3853 = vmatprep.mubr.bf16.mxu0 %v10690_v41  ;;  %v1260_v62 = vpop.f32.mrf.mxu1  ;;  %v8502_v39 = vpack.c.bf16 %v7945_v36, %v7949_v48  ;;  %v7213_v48 = vld [vmem:[%s10681_s2 + $0x1f4] ss:$8 sps:$4 sm:$0xff]  }
 0x271   : > { %v1421_v11 = vpop.f32.mrf.mxu0  ;;  %4165 = vmatprep.subr.bf16.mxu0 %v7183_v58  ;;  %3981 = vmatpush1.bf16.msra.mxu1 %v7184_v59 }
 0x272   : > { %v8440_v63 = vadd.f32 %v1421_v11, %v1250_v44  ;;  %v1262_v1 = vpop.f32.mrf.mxu1  ;;  %3982 = vmatprep.subr.bf16.mxu1 %v7192_v8 }
 0x273   : > { %v1423_v27 = vpop.f32.mrf.mxu0 }
 0x274   : > { %v8445_v42 = vadd.f32 %v1423_v27, %v1252_v52  ;;  %4166 = vmatpush1.bf16.msra.mxu0 %v7181_v9  ;;  %v1264_v5 = vpop.f32.mrf.mxu1 }
 0x275   : > { %v1425_v3 = vpop.f32.mrf.mxu0  ;;  %4167 = vmatprep.subr.bf16.mxu0 %v7189_v38  ;;  %3983 = vmatpush1.bf16.msra.mxu1 %v7190_v0  ;;  %v3621_v38 = vld [vmem:[#allocation2 + $0xf] sm:$0xff] }
 0x276   : > { %v8453_v7 = vadd.f32 %v1425_v3, %v1254_v23  ;;  %v1268_v10 = vpop.f32.mrf.mxu1  ;;  %2886 = vmatmul.mubr.bf16.gmra.mxu1 %v8103_v56  ;;  %v7201_v56 = vld [vmem:[%s10681_s2 + $0x114] ss:$8 sps:$4 sm:$0xff]   ;;  %3984 = vmatprep.subr.bf16.mxu1 %v7198_v45  ;;  %v1090_v23 = vpack.c.bf16 %v1082_v47, %v1082_v47  ;;  %v7208_v45 = vld [vmem:[%s10681_s2 + $0x270] ss:$8 sps:$4 sm:$0xff]  }
 0x277   : > { %v1429_v49 = vpop.f32.mrf.mxu0  ;;  %7384 = vmatmul.mubr.msk.bf16.gmra.mxu0 %vm8415_vm7, %v8460_v18  ;;  %2895 = vmatprep.mubr.bf16.mxu1 %v10690_v41 }
 0x278   : > { %v8469_v13 = vadd.f32 %v1429_v49, %v1258_v40  ;;  %3863 = vmatprep.mubr.bf16.mxu0 %v10690_v41  ;;  %4168 = vmatpush1.bf16.msra.mxu0 %v7187_v61  ;;  %v1270_v16 = vpop.f32.mrf.mxu1 }
 0x279   : > { %v1431_v15 = vpop.f32.mrf.mxu0  ;;  %4169 = vmatprep.subr.bf16.mxu0 %v7195_v6  ;;  %3985 = vmatpush1.bf16.msra.mxu1 %v7196_v12  ;;  %v7216_v12 = vld [vmem:[%s10681_s2 + $0x264] ss:$8 sps:$4 sm:$0xff]  }
 0x27a   : > { %v8482_v51 = vadd.f32 %v1431_v15, %v1260_v62  ;;  %v1272_v17 = vpop.f32.mrf.mxu1  ;;  %3986 = vmatprep.subr.bf16.mxu1 %v7204_v28  ;;  %v3620_v62 = vld [vmem:[#allocation2 + $0x7] sm:$0xff] }
 0x27b   : > { %v1433_v43 = vpop.f32.mrf.mxu0 }
 0x27c   : > { %v8484_v24 = vadd.f32 %v1433_v43, %v1262_v1  ;;  %4170 = vmatpush1.bf16.msra.mxu0 %v7193_v21  ;;  %v1274_v29 = vpop.f32.mrf.mxu1 }
 0x27d   : > { %v1435_v26 = vpop.f32.mrf.mxu0  ;;  %4171 = vmatprep.subr.bf16.mxu0 %v7201_v56  ;;  %3987 = vmatpush1.bf16.msra.mxu1 %v7202_v32  ;;  %v7214_v56 = vld [vmem:[%s10681_s2 + $0x260] ss:$8 sps:$4 sm:$0xff]   ;;  %v3622_v32 = vld [vmem:[#allocation2 + $0x17] sm:$0xff] }
 0x27e   : > { %v8492_v4 = vadd.f32 %v1435_v26, %v1264_v5  ;;  %v1278_v34 = vpop.f32.mrf.mxu1  ;;  %2896 = vmatmul.mubr.bf16.gmra.mxu1 %v8231_v46  ;;  %4406 = vmatprep.subr.bf16.mxu1 %v7210_v20  ;;  %v3635_v5 = vpack.c.bf16 %v3621_v38, %v3620_v62  ;;  %v7222_v26 = vld [vmem:[%s10681_s2 + $0x254] ss:$8 sps:$4 sm:$0xff]   ;;  %v3669_v62 = vld [vmem:[#allocation2 + $0x21] sm:$0xff] }
 0x27f   : > { %v1439_v37 = vpop.f32.mrf.mxu0  ;;  %7387 = vmatmul.mubr.msk.bf16.gmra.mxu0 %vm8415_vm7, %v8502_v39  ;;  %2905 = vmatprep.mubr.bf16.mxu1 %v10690_v41 }
 0x280   : > { %v8508_v44 = vadd.f32 %v1439_v37, %v1268_v10  ;;  %3873 = vmatprep.mubr.bf16.mxu0 %v10690_v41  ;;  %4172 = vmatpush1.bf16.msra.mxu0 %v7199_v25  ;;  %v1280_v36 = vpop.f32.mrf.mxu1 }
 0x281   : > { %v1441_v22 = vpop.f32.mrf.mxu0  ;;  %4173 = vmatprep.subr.bf16.mxu0 %v7207_v35  ;;  %v3623_v35 = vld [vmem:[#allocation2 + $0x1f] sm:$0xff] }
 0x282   : > { %v8518_v46 = vadd.f32 %v1441_v22, %v1270_v16  ;;  %v1282_v54 = vpop.f32.mrf.mxu1 }
 0x283   : > { %v1443_v52 = vpop.f32.mrf.mxu0 }
 0x284   : > { %v8520_v58 = vadd.f32 %v1443_v52, %v1272_v17  ;;  %4174 = vmatpush1.bf16.msra.mxu0 %v7205_v50  ;;  %v1284_v60 = vpop.f32.mrf.mxu1  ;;  %v3666_v17 = vld [vmem:[#allocation2 + $0x9] sm:$0xff] }
 0x285   : > { %v1445_v59 = vpop.f32.mrf.mxu0  ;;  %4577 = vmatprep.subr.bf16.mxu0 %v7213_v48  ;;  %v8575_v48 = vpack.c.bf16 %v3623_v35, %v3622_v32  ;;  %v7220_v52 = vld [vmem:[%s10681_s2 + $0x250] ss:$8 sps:$4 sm:$0xff]  }
 0x286   : > { %v8522_v40 = vadd.f32 %v1445_v59, %v1274_v29  ;;  %v8525_v9 = vpop.f32.mrf.mxu1  ;;  %2906 = vmatmul.mubr.bf16.gmra.mxu1 %v1090_v23  ;;  %v3667_v29 = vld [vmem:[#allocation2 + $0x11] sm:$0xff]  ;;  %v7217_v59 = vld [vmem:[%s10681_s2 + $0x1e0] ss:$8 sps:$4 sm:$0xff]  }
 0x287   : > { %v1449_v8 = vpop.f32.mrf.mxu0  ;;  %3874 = vmatmul.mubr.bf16.gmra.mxu0 %v8373_v33  ;;  %4004 = vmatprep.mubr.bf16.mxu1 %v10690_v41  ;;  %v3681_v22 = vpack.c.bf16 %v3667_v29, %v3666_v17  ;;  %v7231_v29 = vld [vmem:[%s10681_s2 + $0x1c4] ss:$8 sps:$4 sm:$0xff]   ;;  %v7232_v32 = vld [vmem:[%s10681_s2 + $0x230] ss:$8 sps:$4 sm:$0xff]  }
 0x288   : > { %v8527_v11 = vadd.f32 %v1449_v8, %v1278_v34  ;;  %3883 = vmatprep.mubr.bf16.mxu0 %v10690_v41  ;;  %v8531_v27 = vpop.f32.mrf.mxu1  ;;  %v7211_v34 = vld [vmem:[%s10681_s2 + $0x1f0] ss:$8 sps:$4 sm:$0xff]  }
 0x289   : > { %v1451_v0 = vpop.f32.mrf.mxu0 }
 0x28a   : > { %v8533_v1 = vadd.f32 %v1451_v0, %v1280_v36  ;;  %v1292_v3 = vpop.f32.mrf.mxu1  ;;  %v7225_v0 = vld [vmem:[%s10681_s2 + $0x1d4] ss:$8 sps:$4 sm:$0xff]  }
 0x28b   : > { %v1453_v61 = vpop.f32.mrf.mxu0 }
 0x28c   : > { %v8535_v6 = vadd.f32 %v1453_v61, %v1282_v54  ;;  %v1293_v10 = vpop.f32.mrf.mxu1  ;;  %v7226_v61 = vld [vmem:[%s10681_s2 + $0x240] ss:$8 sps:$4 sm:$0xff]  }
 0x28d   : > { %v1455_v49 = vpop.f32.mrf.mxu0 }
 0x28e   : > { %v8543_v21 = vadd.f32 %v1455_v49, %v1284_v60  ;;  %v1597_v15 = vpop.f32.mrf.mxu1  ;;  %4005 = vmatmul.mubr.bf16.vlgmr.msra.gmra.mxu1 %v3635_v5  ;;  %v3625_v5 = vld [vmem:[#allocation2 + $0x2f] sm:$0xff] }
 0x28f   : > { %v8545_v28 = vpop.f32.mrf.mxu0  ;;  %3884 = vmatmul.mubr.bf16.gmra.mxu0 %v8373_v33  ;;  %v8550_v16 = vadd.f32 %v1597_v15, %v8042_v14  ;;  %4407 = vmatpush1.bf16.msra.mxu1 %v7208_v45  ;;  %v7234_v45 = vld [vmem:[%s10681_s2 + $0x234] ss:$8 sps:$4 sm:$0xff]  }
 0x290   : > { %4191 = vmatprep.mubr.bf16.mxu0 %v10690_v41  ;;  %v1599_v25 = vpop.f32.mrf.mxu1  ;;  %4408 = vmatprep.subr.bf16.mxu1 %v7216_v12  ;;  %v3668_v12 = vld [vmem:[#allocation2 + $0x19] sm:$0xff] }
 0x291   : > { %v8555_v43 = vpop.f32.mrf.mxu0  ;;  %4014 = vmatprep.mubr.bf16.mxu1 %v10690_v41  ;;  %v8562_v14 = vadd.f32 %v1599_v25, %v8047_v19  ;;  %v7219_v19 = vld [vmem:[%s10681_s2 + $0x1e4] ss:$8 sps:$4 sm:$0xff]   ;;  %v8618_v17 = vpack.c.bf16 %v3669_v62, %v3668_v12 }
 0x292   : > { %v1601_v37 = vpop.f32.mrf.mxu1  ;;  %v7243_v12 = vld [vmem:[%s10681_s2 + $0x1a4] ss:$8 sps:$4 sm:$0xff]  }
 0x293   : > { %v1463_v20 = vpop.f32.mrf.mxu0  ;;  %v8568_v47 = vadd.f32 %v1601_v37, %v8059_v30  ;;  %4409 = vmatpush1.bf16.msra.mxu1 %v7214_v56  ;;  %v7228_v30 = vld [vmem:[%s10681_s2 + $0x244] ss:$8 sps:$4 sm:$0xff]   ;;  %10765 = vst [vmem:[#allocation7_spill] sm:$0xff] %v8618_v17 }
 0x294   : > { %v8570_v36 = vpop.f32.mrf.mxu1  ;;  %4410 = vmatprep.subr.bf16.mxu1 %v7222_v26  ;;  %v7240_v37 = vld [vmem:[%s10681_s2 + $0x224] ss:$8 sps:$4 sm:$0xff]  }
 0x295   : > { %v1464_v50 = vpop.f32.mrf.mxu0 }
 0x296   : > { %v1607_v23 = vpop.f32.mrf.mxu1  ;;  %4015 = vmatmul.mubr.bf16.gmra.mxu1 %v8575_v48 }
 0x297   : > { %v8583_v54 = vpop.f32.mrf.mxu0  ;;  %4192 = vmatmul.mubr.bf16.vlgmr.msra.gmra.mxu0 %v3681_v22  ;;  %v8591_v60 = vadd.f32 %v1607_v23, %v8430_v55  ;;  %4411 = vmatpush1.bf16.msra.mxu1 %v7220_v52  ;;  %v3624_v55 = vld [vmem:[#allocation2 + $0x27] sm:$0xff]  ;;  %v3671_v22 = vld [vmem:[#allocation2 + $0x31] sm:$0xff]  ;;  %v3627_v23 = vld [vmem:[#allocation2 + $0x3f] sm:$0xff] }
 0x298   : > { %4578 = vmatpush1.bf16.msra.mxu0 %v7211_v34  ;;  %4201 = vmatprep.mubr.bf16.mxu0 %v10690_v41  ;;  %v1609_v38 = vpop.f32.mrf.mxu1  ;;  %v8620_v26 = vpack.c.bf16 %v3625_v5, %v3624_v55  ;;  %v7229_v34 = vld [vmem:[%s10681_s2 + $0x1c0] ss:$8 sps:$4 sm:$0xff]   ;;  %v7237_v52 = vld [vmem:[%s10681_s2 + $0x1b4] ss:$8 sps:$4 sm:$0xff]  }
 0x299   : > { %v8593_v8 = vpop.f32.mrf.mxu0  ;;  %4579 = vmatprep.subr.bf16.mxu0 %v7219_v19  ;;  %v8602_v3 = vadd.f32 %v1609_v38, %v8440_v63  ;;  %4024 = vmatprep.mubr.bf16.mxu1 %v10690_v41  ;;  %v7223_v63 = vld [vmem:[%s10681_s2 + $0x1d0] ss:$8 sps:$4 sm:$0xff]  }
 0x29a   : > { %4412 = vmatprep.subr.bf16.mxu1 %v7228_v30  ;;  %v1611_v10 = vpop.f32.mrf.mxu1 }
 0x29b   : > { %v8608_v49 = vpop.f32.mrf.mxu0  ;;  %v8611_v15 = vadd.f32 %v1611_v10, %v8445_v42  ;;  %4413 = vmatpush1.bf16.msra.mxu1 %v7226_v61 }
 0x29c   : > { %4580 = vmatpush1.bf16.msra.mxu0 %v7217_v59  ;;  %v1613_v25 = vpop.f32.mrf.mxu1  ;;  %4414 = vmatprep.subr.bf16.mxu1 %v7234_v45  ;;  %v7238_v59 = vld [vmem:[%s10681_s2 + $0x220] ss:$8 sps:$4 sm:$0xff]  }
 0x29d   : > { %v8616_v56 = vpop.f32.mrf.mxu0  ;;  %4581 = vmatprep.subr.bf16.mxu0 %v7225_v0  ;;  %v8626_v42 = vadd.f32 %v1613_v25, %v8453_v7  ;;  %v3670_v0 = vld [vmem:[#allocation2 + $0x29] sm:$0xff] }
 0x29e   : > { %v1617_v20 = vpop.f32.mrf.mxu1  ;;  %4025 = vmatmul.mubr.bf16.gmra.mxu1 %v8620_v26  ;;  %v8667_v5 = vpack.c.bf16 %v3671_v22, %v3670_v0 }
 0x29f   : > { %v8631_v35 = vpop.f32.mrf.mxu0  ;;  %4202 = vmatmul.mubr.bf16.gmra.mxu0 %v8618_v17  ;;  %v8640_v7 = vadd.f32 %v1617_v20, %v8469_v13  ;;  %4034 = vmatprep.mubr.bf16.mxu1 %v10690_v41  ;;  %v3626_v13 = vld [vmem:[#allocation2 + $0x37] sm:$0xff]  ;;  %v7241_v20 = vld [vmem:[%s10681_s2 + $0x1a0] ss:$8 sps:$4 sm:$0xff]  }
 0x2a0   : > { %4582 = vmatpush1.bf16.msra.mxu0 %v7223_v63  ;;  %4211 = vmatprep.mubr.bf16.mxu0 %v10690_v41  ;;  %v1619_v19 = vpop.f32.mrf.mxu1  ;;  %10766 = vst [vmem:[#allocation8_spill] sm:$0xff] %v8667_v5  ;;  %v8669_v10 = vpack.c.bf16 %v3627_v23, %v3626_v13  ;;  %v7246_v63 = vld [vmem:[%s10681_s2 + $0x214] ss:$8 sps:$4 sm:$0xff]   ;;  %v3673_v13 = vld [vmem:[#allocation2 + $0x41] sm:$0xff] }
 0x2a1   : > { %v8645_v50 = vpop.f32.mrf.mxu0  ;;  %4583 = vmatprep.subr.bf16.mxu0 %v7231_v29  ;;  %v8652_v30 = vadd.f32 %v1619_v19, %v8482_v51  ;;  %4415 = vmatpush1.bf16.msra.mxu1 %v7232_v32  ;;  %v7235_v51 = vld [vmem:[%s10681_s2 + $0x1b0] ss:$8 sps:$4 sm:$0xff]  }
 0x2a2   : > { %v1621_v38 = vpop.f32.mrf.mxu1  ;;  %4416 = vmatprep.subr.bf16.mxu1 %v7240_v37  ;;  %v7244_v32 = vld [vmem:[%s10681_s2 + $0x210] ss:$8 sps:$4 sm:$0xff]   ;;  %v7252_v37 = vld [vmem:[%s10681_s2 + $0x204] ss:$8 sps:$4 sm:$0xff]  }
 0x2a3   : > { %v8657_v62 = vpop.f32.mrf.mxu0  ;;  %v8660_v61 = vadd.f32 %v1621_v38, %v8484_v24  ;;  %v3629_v19 = vld [vmem:[#allocation2 + $0x4f] sm:$0xff] }
 0x2a4   : > { %4584 = vmatpush1.bf16.msra.mxu0 %v7229_v34  ;;  %v1623_v45 = vpop.f32.mrf.mxu1 }
 0x2a5   : > { %v8665_v55 = vpop.f32.mrf.mxu0  ;;  %4585 = vmatprep.subr.bf16.mxu0 %v7237_v52  ;;  %v8675_v24 = vadd.f32 %v1623_v45, %v8492_v4  ;;  %4417 = vmatpush1.bf16.msra.mxu1 %v7238_v59  ;;  %v3672_v52 = vld [vmem:[#allocation2 + $0x39] sm:$0xff]  ;;  %v3628_v59 = vld [vmem:[#allocation2 + $0x47] sm:$0xff] }
 0x2a6   : > { %v1627_v29 = vpop.f32.mrf.mxu1  ;;  %4035 = vmatmul.mubr.bf16.gmra.mxu1 %v8669_v10  ;;  %4418 = vmatprep.subr.bf16.mxu1 %v7246_v63  ;;  %v7247_v45 = vld [vmem:[%s10681_s2 + $0x190] ss:$8 sps:$4 sm:$0xff]   ;;  %v7250_v63 = vld [vmem:[%s10681_s2 + $0x200] ss:$8 sps:$4 sm:$0xff]  }
 0x2a7   : > { %v8680_v25 = vpop.f32.mrf.mxu0  ;;  %4212 = vmatmul.mubr.bf16.gmra.mxu0 %v8667_v5  ;;  %v8689_v4 = vadd.f32 %v1627_v29, %v8508_v44  ;;  %4044 = vmatprep.mubr.bf16.mxu1 %v10690_v41  ;;  %v7249_v44 = vld [vmem:[%s10681_s2 + $0x194] ss:$8 sps:$4 sm:$0xff]   ;;  %v8716_v29 = vpack.c.bf16 %v3673_v13, %v3672_v52 }
 0x2a8   : > { %4221 = vmatprep.mubr.bf16.mxu0 %v10690_v41  ;;  %4586 = vmatpush1.bf16.msra.mxu0 %v7235_v51  ;;  %v1629_v22 = vpop.f32.mrf.mxu1  ;;  %v3675_v52 = vld [vmem:[#allocation2 + $0x51] sm:$0xff] }
 0x2a9   : > { %v8697_v34 = vpop.f32.mrf.mxu0  ;;  %4587 = vmatprep.subr.bf16.mxu0 %v7243_v12  ;;  %v8704_v23 = vadd.f32 %v1629_v22, %v8518_v46  ;;  %4419 = vmatpush1.bf16.msra.mxu1 %v7244_v32  ;;  %10767 = vst [vmem:[#allocation9_spill] sm:$0xff] %v8716_v29  ;;  %v8718_v22 = vpack.c.bf16 %v3629_v19, %v3628_v59  ;;  %v7255_v32 = vld [vmem:[%s10681_s2 + $0x184] ss:$8 sps:$4 sm:$0xff]   ;;  %v3630_v13 = vld [vmem:[#allocation2 + $0x57] sm:$0xff] }
 0x2aa   : > { %v1631_v0 = vpop.f32.mrf.mxu1  ;;  %4420 = vmatprep.subr.bf16.mxu1 %v7252_v37  ;;  %v3631_v59 = vld [vmem:[#allocation2 + $0x5f] sm:$0xff] }
 0x2ab   : > { %v8706_v38 = vpop.f32.mrf.mxu0  ;;  %v8709_v51 = vadd.f32 %v1631_v0, %v8520_v58  ;;  %v7253_v0 = vld [vmem:[%s10681_s2 + $0x180] ss:$8 sps:$4 sm:$0xff]   ;;  %v7261_v5 = vld [vmem:[%s10681_s2 + $0x3f4] ss:$8 sps:$4 sm:$0xff]  }
 0x2ac   : > { %4588 = vmatpush1.bf16.msra.mxu0 %v7241_v20  ;;  %v1633_v46 = vpop.f32.mrf.mxu1  ;;  %v7258_v20 = vld [vmem:[%s10681_s2 + $0x2f4] ss:$8 sps:$4 sm:$0xff]  }
 0x2ad   : > { %v8714_v12 = vpop.f32.mrf.mxu0  ;;  %4589 = vmatprep.subr.bf16.mxu0 %v7249_v44  ;;  %v8724_v58 = vadd.f32 %v1633_v46, %v8522_v40  ;;  %v3674_v44 = vld [vmem:[#allocation2 + $0x49] sm:$0xff]  ;;  %4421 = vmatpush1.bf16.msra.mxu1 %v7250_v63 }
 0x2ae   : > { %v1637_v19 = vpop.f32.mrf.mxu1  ;;  %4045 = vmatmul.mubr.bf16.gmra.mxu1 %v8718_v22  ;;  %4764 = vmatprep.subr.bf16.mxu1 %v7258_v20 }
 0x2af   : > { %10768 = vst [vmem:[#allocation10_spill] sm:$0xff] %v8724_v58  ;;  %v8732_v37 = vpop.f32.mrf.mxu0  ;;  %4222 = vmatmul.mubr.bf16.gmra.mxu0 %v8716_v29  ;;  %v8738_v40 = vadd.f32 %v1637_v19, %v8527_v11  ;;  %4054 = vmatprep.mubr.bf16.mxu1 %v10690_v41  ;;  %v8754_v19 = vpack.c.bf16 %v3675_v52, %v3674_v44  ;;  %v3677_v52 = vld [vmem:[#allocation2 + $0x61] sm:$0xff] }
 0x2b0   : > { %4231 = vmatprep.mubr.bf16.mxu0 %v10690_v41  ;;  %4590 = vmatpush1.bf16.msra.mxu0 %v7247_v45  ;;  %v1639_v29 = vpop.f32.mrf.mxu1 }
 0x2b1   : > { %10769 = vst [vmem:[#allocation11_spill] sm:$0xff] %v8738_v40  ;;  %v8743_v46 = vpop.f32.mrf.mxu0  ;;  %v8750_v11 = vadd.f32 %v1639_v29, %v8533_v1  ;;  %4591 = vmatprep.subr.bf16.mxu0 %v7255_v32  ;;  %10770 = vst [vmem:[#allocation12_spill] sm:$0xff] %v8754_v19  ;;  %v8756_v40 = vpack.c.bf16 %v3631_v59, %v3630_v13  ;;  %v1460_v1 = vadd.f32 %v8545_v28, %v8525_v9 }
 0x2b2   : > { %v1641_v17 = vpop.f32.mrf.mxu1 }
 0x2b3   : > { %v8752_v45 = vpop.f32.mrf.mxu0  ;;  %10771 = vst [vmem:[#allocation13_spill] sm:$0xff] %v8756_v40  ;;  %v8759_v58 = vadd.f32 %v1641_v17, %v8535_v6  ;;  %v1462_v6 = vadd.f32 %v8555_v43, %v8531_v27  ;;  %v10772_v17 = vmov 0   ;;  %v7256_v27 = vld [vmem:[%s10681_s2 + $0x2f0] ss:$8 sps:$4 sm:$0xff]  }
 0x2b4   : > { %4592 = vmatpush1.bf16.msra.mxu0 %v7253_v0  ;;  %v1643_v41 = vpop.f32.mrf.mxu1 }
 0x2b5   : > { %v8761_v63 = vpop.f32.mrf.mxu0  ;;  %5055 = vmatprep.subr.bf16.mxu0 %v7261_v5  ;;  %v8766_v29 = vadd.f32 %v1643_v41, %v8543_v21  ;;  %v3676_v5 = vld [vmem:[#allocation2 + $0x59] sm:$0xff] }
 0x2b6   : > { %v1647_v20 = vpop.f32.mrf.mxu1  ;;  %4055 = vmatmul.mubr.bf16.gmra.mxu1 %v8756_v40  ;;  %v8780_v13 = vpack.c.bf16 %v3677_v52, %v3676_v5  ;;  %v7262_v5 = vld [vmem:[%s10681_s2 + $0x2e0] ss:$8 sps:$4 sm:$0xff]  }
 0x2b7   : > { %v8768_v32 = vpop.f32.mrf.mxu0  ;;  %4232 = vmatmul.mubr.bf16.gmra.mxu0 %v8754_v19  ;;  %v1674_v44 = vadd.f32 %v1647_v20, %v1460_v1  ;;  %4438 = vmatprep.mubr.bf16.mxu1 %v10772_v17  ;;  %v7264_v1 = vld [vmem:[%s10681_s2 + $0x2e4] ss:$8 sps:$4 sm:$0xff]   ;;  %v7268_v19 = vld [vmem:[%s10681_s2 + $0x2d0] ss:$8 sps:$4 sm:$0xff]  }
 0x2b8   : > { %4241 = vmatprep.mubr.bf16.mxu0 %v10772_v17  ;;  %v1649_v41 = vpop.f32.mrf.mxu1  ;;  %10773 = vst [vmem:[#allocation14_spill] sm:$0xff] %v8780_v13 }
 0x2b9   : > { %v8776_v9 = vpop.f32.mrf.mxu0  ;;  %1696 = vst [vmem:[#allocation3 + $0x18] sm:$0x3] %v1674_v44  ;;  %v1675_v21 = vadd.f32 %v1649_v41, %v1462_v6 }
 0x2ba   : > { %v1651_v59 = vpop.f32.mrf.mxu1 }
 0x2bb   : > { %v8778_v28 = vpop.f32.mrf.mxu0  ;;  %1697 = vst [vmem:[#allocation3] sm:$0x3] %v1675_v21  ;;  %v7270_v21 = vld [vmem:[%s10681_s2 + $0x2d4] ss:$8 sps:$4 sm:$0xff]  }
 0x2bc   : > { %v1652_v0 = vpop.f32.mrf.mxu1 }
 0x2bd   : > { %v8785_v43 = vpop.f32.mrf.mxu0 }
 0x2be   : > { %v2017_v6 = vpop.f32.mrf.mxu1  ;;  %7390 = vmatmul.mubr.msk.bf16.vlgmr.msra.gmra.mxu1 %vm8415_vm7, %v8421_v2 }
 0x2bf   : > { %v8790_v20 = vpop.f32.mrf.mxu0  ;;  %4242 = vmatmul.mubr.bf16.gmra.mxu0 %v8780_v13  ;;  %v2018_v44 = vadd.f32 %v2017_v6, %v8583_v54  ;;  %4765 = vmatpush1.bf16.msra.mxu1 %v7256_v27  ;;  %v7259_v54 = vld [vmem:[%s10681_s2 + $0x3f0] ss:$8 sps:$4 sm:$0xff]  }
 0x2c0   : > { %4609 = vmatprep.mubr.bf16.mxu0 %v10772_v17  ;;  %v2019_v41 = vpop.f32.mrf.mxu1  ;;  %4766 = vmatprep.subr.bf16.mxu1 %v7264_v1  ;;  %v7267_v1 = vld [vmem:[%s10681_s2 + $0x3e4] ss:$8 sps:$4 sm:$0xff]  }
 0x2c1   : > { %v8801_v52 = vpop.f32.mrf.mxu0  ;;  %4448 = vmatprep.mubr.bf16.mxu1 %v10772_v17  ;;  %v2020_v2 = vadd.f32 %v2019_v41, %v8593_v8  ;;  %v7276_v41 = vld [vmem:[%s10681_s2 + $0x2c4] ss:$8 sps:$4 sm:$0xff]  }
 0x2c2   : > { %v2021_v0 = vpop.f32.mrf.mxu1 }
 0x2c3   : > { %v1900_v59 = vpop.f32.mrf.mxu0  ;;  %v2022_v27 = vadd.f32 %v2021_v0, %v8608_v49  ;;  %4767 = vmatpush1.bf16.msra.mxu1 %v7262_v5 }
 0x2c4   : > { %v2023_v13 = vpop.f32.mrf.mxu1  ;;  %4768 = vmatprep.subr.bf16.mxu1 %v7270_v21 }
 0x2c5   : > { %v1901_v6 = vpop.f32.mrf.mxu0  ;;  %v2024_v8 = vadd.f32 %v2023_v13, %v8616_v56  ;;  %v7265_v56 = vld [vmem:[%s10681_s2 + $0x3e0] ss:$8 sps:$4 sm:$0xff]  }
 0x2c6   : > { %v2027_v49 = vpop.f32.mrf.mxu1  ;;  %7393 = vmatmul.mubr.msk.bf16.gmra.mxu1 %vm8415_vm7, %v8460_v18 }
 0x2c7   : > { %v2205_v59 = vpop.f32.mrf.mxu0  ;;  %4610 = vmatmul.mubr.bf16.vlgmr.msra.gmra.mxu0 %v8575_v48  ;;  %v2028_v13 = vadd.f32 %v2027_v49, %v8631_v35  ;;  %4769 = vmatpush1.bf16.msra.mxu1 %v7268_v19  ;;  %v7273_v48 = vld [vmem:[%s10681_s2 + $0x3d4] ss:$8 sps:$4 sm:$0xff]   ;;  %v1416_v49 = vadd.f32 %v8406_v57, %v8371_v31 }
 0x2c8   : > { %v2262_v5 = vadd.f32 %v2205_v59, %v2018_v44  ;;  %5056 = vmatpush1.bf16.msra.mxu0 %v7259_v54  ;;  %4619 = vmatprep.mubr.bf16.mxu0 %v10772_v17  ;;  %v2029_v0 = vpop.f32.mrf.mxu1  ;;  %v7274_v44 = vld [vmem:[%s10681_s2 + $0x2c0] ss:$8 sps:$4 sm:$0xff]   ;;  %v7282_v35 = vld [vmem:[%s10681_s2 + $0x2b4] ss:$8 sps:$4 sm:$0xff]  }
 0x2c9   : > { %v2207_v21 = vpop.f32.mrf.mxu0  ;;  %5057 = vmatprep.subr.bf16.mxu0 %v7267_v1  ;;  %v2030_v59 = vadd.f32 %v2029_v0, %v8645_v50  ;;  %4458 = vmatprep.mubr.bf16.mxu1 %v10772_v17  ;;  %v7271_v50 = vld [vmem:[%s10681_s2 + $0x3d0] ss:$8 sps:$4 sm:$0xff]   ;;  %v1657_v31 = vadd.f32 %v8570_v36, %v1416_v49 }
 0x2ca   : > { %v8838_v54 = vadd.f32 %v2262_v5, %v8550_v16  ;;  %v2263_v6 = vadd.f32 %v2207_v21, %v2020_v2  ;;  %4770 = vmatprep.subr.bf16.mxu1 %v7276_v41  ;;  %v2031_v1 = vpop.f32.mrf.mxu1  ;;  %v7279_v21 = vld [vmem:[%s10681_s2 + $0x3c4] ss:$8 sps:$4 sm:$0xff]  }
 0x2cb   : > { %v2209_v19 = vpop.f32.mrf.mxu0  ;;  %v2032_v2 = vadd.f32 %v2031_v1, %v8657_v62  ;;  %4771 = vmatpush1.bf16.msra.mxu1 %v7274_v44 }
 0x2cc   : > { %v8848_v18 = vadd.f32 %v2263_v6, %v8562_v14  ;;  %v2264_v16 = vadd.f32 %v2209_v19, %v2022_v27  ;;  %5058 = vmatpush1.bf16.msra.mxu0 %v7265_v56  ;;  %v2033_v5 = vpop.f32.mrf.mxu1  ;;  %v7280_v27 = vld [vmem:[%s10681_s2 + $0x2b0] ss:$8 sps:$4 sm:$0xff]   ;;  %4772 = vmatprep.subr.bf16.mxu1 %v7282_v35  ;;  %v7285_v35 = vld [vmem:[%s10681_s2 + $0x3b4] ss:$8 sps:$4 sm:$0xff]  }
 0x2cd   : > { %v2211_v41 = vpop.f32.mrf.mxu0  ;;  %5059 = vmatprep.subr.bf16.mxu0 %v7273_v48  ;;  %v2034_v62 = vadd.f32 %v2033_v5, %v8665_v55  ;;  %v7277_v48 = vld [vmem:[%s10681_s2 + $0x3c0] ss:$8 sps:$4 sm:$0xff]  }
 0x2ce   : > { %v8859_v57 = vadd.f32 %v2264_v16, %v8568_v47  ;;  %v2265_v14 = vadd.f32 %v2211_v41, %v2024_v8  ;;  %v2037_v0 = vpop.f32.mrf.mxu1  ;;  %7396 = vmatmul.mubr.msk.bf16.gmra.mxu1 %vm8415_vm7, %v8502_v39  ;;  %v7288_v47 = vld [vmem:[%s10681_s2 + $0x2a4] ss:$8 sps:$4 sm:$0xff]  }
 0x2cf   : > { %v2215_v56 = vpop.f32.mrf.mxu0  ;;  %4620 = vmatmul.mubr.bf16.gmra.mxu0 %v8620_v26  ;;  %v2038_v8 = vadd.f32 %v2037_v0, %v8680_v25  ;;  %4468 = vmatprep.mubr.bf16.mxu1 %v10772_v17  ;;  %v7286_v25 = vld [vmem:[%s10681_s2 + $0x2a0] ss:$8 sps:$4 sm:$0xff]  }
 0x2d0   : > { %v8872_v36 = vadd.f32 %v2265_v14, %v1657_v31  ;;  %v2266_v55 = vadd.f32 %v2215_v56, %v2028_v13  ;;  %5060 = vmatpush1.bf16.msra.mxu0 %v7271_v50  ;;  %4629 = vmatprep.mubr.bf16.mxu0 %v10772_v17  ;;  %v2039_v6 = vpop.f32.mrf.mxu1  ;;  %v7292_v56 = vld [vmem:[%s10681_s2 + $0x290] ss:$8 sps:$4 sm:$0xff]   ;;  %v7289_v0 = vld [vmem:[%s10681_s2 + $0x3a0] ss:$8 sps:$4 sm:$0xff]  }
 0x2d1   : > { %v2217_v44 = vpop.f32.mrf.mxu0  ;;  %5061 = vmatprep.subr.bf16.mxu0 %v7279_v21  ;;  %v2040_v1 = vadd.f32 %v2039_v6, %v8697_v34  ;;  %4773 = vmatpush1.bf16.msra.mxu1 %v7280_v27  ;;  %v7291_v21 = vld [vmem:[%s10681_s2 + $0x3a4] ss:$8 sps:$4 sm:$0xff]  }
 0x2d2   : > { %v8884_v13 = vadd.f32 %v2266_v55, %v8591_v60  ;;  %v2267_v19 = vadd.f32 %v2217_v44, %v2030_v59  ;;  %v2041_v16 = vpop.f32.mrf.mxu1  ;;  %4774 = vmatprep.subr.bf16.mxu1 %v7288_v47  ;;  %v7283_v60 = vld [vmem:[%s10681_s2 + $0x3b0] ss:$8 sps:$4 sm:$0xff]   ;;  %v7300_v47 = vld [vmem:[%s10681_s2 + $0x284] ss:$8 sps:$4 sm:$0xff]  }
 0x2d3   : > { %v2219_v49 = vpop.f32.mrf.mxu0  ;;  %v2042_v5 = vadd.f32 %v2041_v16, %v8706_v38  ;;  %v7294_v38 = vld [vmem:[%s10681_s2 + $0x294] ss:$8 sps:$4 sm:$0xff]   ;;  %v7295_v16 = vld [vmem:[%s10681_s2 + $0x390] ss:$8 sps:$4 sm:$0xff]  }
 0x2d4   : > { %v8891_v50 = vadd.f32 %v2267_v19, %v8602_v3  ;;  %v2268_v41 = vadd.f32 %v2219_v49, %v2032_v2  ;;  %5062 = vmatpush1.bf16.msra.mxu0 %v7277_v48  ;;  %v2043_v59 = vpop.f32.mrf.mxu1 }
 0x2d5   : > { %v2221_v34 = vpop.f32.mrf.mxu0  ;;  %5063 = vmatprep.subr.bf16.mxu0 %v7285_v35  ;;  %v2044_v2 = vadd.f32 %v2043_v59, %v8714_v12  ;;  %4775 = vmatpush1.bf16.msra.mxu1 %v7286_v25 }
 0x2d6   : > { %v8901_v31 = vadd.f32 %v2268_v41, %v8611_v15  ;;  %v2269_v3 = vadd.f32 %v2221_v34, %v2034_v62  ;;  %v2047_v27 = vpop.f32.mrf.mxu1  ;;  %4469 = vmatmul.mubr.bf16.gmra.mxu1 %v8373_v33  ;;  %4776 = vmatprep.subr.bf16.mxu1 %v7294_v38 }
 0x2d7   : > { %v2225_v14 = vpop.f32.mrf.mxu0  ;;  %4630 = vmatmul.mubr.bf16.gmra.mxu0 %v8669_v10  ;;  %v2048_v12 = vadd.f32 %v2047_v27, %v8732_v37  ;;  %4478 = vmatprep.mubr.bf16.mxu1 %v10772_v17 }
 0x2d8   : > { %10774 = vst [vmem:[#allocation15_spill] sm:$0xff] %v8901_v31  ;;  %v8913_v15 = vadd.f32 %v2269_v3, %v8626_v42  ;;  %v2270_v62 = vadd.f32 %v2225_v14, %v2038_v8  ;;  %4639 = vmatprep.mubr.bf16.mxu0 %v10772_v17  ;;  %5064 = vmatpush1.bf16.msra.mxu0 %v7283_v60  ;;  %v2049_v48 = vpop.f32.mrf.mxu1  ;;  %v7297_v42 = vld [vmem:[%s10681_s2 + $0x394] ss:$8 sps:$4 sm:$0xff]   ;;  %v7301_v3 = vld [vmem:[%s10681_s2 + $0x380] ss:$8 sps:$4 sm:$0xff]  }
 0x2d9   : > { %v2227_v55 = vpop.f32.mrf.mxu0  ;;  %5065 = vmatprep.subr.bf16.mxu0 %v7291_v21  ;;  %v2050_v44 = vadd.f32 %v2049_v48, %v8743_v46  ;;  %4777 = vmatpush1.bf16.msra.mxu1 %v7292_v56  ;;  %v7298_v46 = vld [vmem:[%s10681_s2 + $0x280] ss:$8 sps:$4 sm:$0xff]   ;;  %v7306_v60 = vld [vmem:[%s10681_s2 + $0x374] ss:$8 sps:$4 sm:$0xff]  }
 0x2da   : > { %10775 = vst [vmem:[#allocation16_spill] sm:$0xff] %v8913_v15  ;;  %v8928_v37 = vadd.f32 %v2270_v62, %v8640_v7  ;;  %v2271_v8 = vadd.f32 %v2227_v55, %v2040_v1  ;;  %v2051_v35 = vpop.f32.mrf.mxu1  ;;  %4778 = vmatprep.subr.bf16.mxu1 %v7300_v47 }
 0x2db   : > { %v2229_v6 = vpop.f32.mrf.mxu0  ;;  %v2052_v49 = vadd.f32 %v2051_v35, %v8752_v45  ;;  %v7303_v45 = vld [vmem:[%s10681_s2 + $0x384] ss:$8 sps:$4 sm:$0xff]  }
 0x2dc   : > { %10776 = vst [vmem:[#allocation17_spill] sm:$0xff] %v8928_v37  ;;  %v8932_v19 = vadd.f32 %v2271_v8, %v8652_v30  ;;  %v2272_v25 = vadd.f32 %v2229_v6, %v2042_v5  ;;  %5066 = vmatpush1.bf16.msra.mxu0 %v7289_v0  ;;  %v2053_v1 = vpop.f32.mrf.mxu1  ;;  %v3632_v35 = vld [vmem:[#allocation2 + $0x67] sm:$0xff] }
 0x2dd   : > { %v2231_v7 = vpop.f32.mrf.mxu0  ;;  %5067 = vmatprep.subr.bf16.mxu0 %v7297_v42  ;;  %v2054_v5 = vadd.f32 %v2053_v1, %v8761_v63  ;;  %4779 = vmatpush1.bf16.msra.mxu1 %v7298_v46 }
 0x2de   : > { %10777 = vst [vmem:[#allocation18_spill] sm:$0xff] %v8932_v19  ;;  %v8942_v41 = vadd.f32 %v2272_v25, %v8660_v61  ;;  %v2273_v30 = vadd.f32 %v2231_v7, %v2044_v2  ;;  %v2057_v59 = vpop.f32.mrf.mxu1  ;;  %4479 = vmatmul.mubr.bf16.gmra.mxu1 %v8373_v33  ;;  %5226 = vmatprep.subr.bf16.mxu1 %v7306_v60  ;;  %v3633_v25 = vld [vmem:[#allocation2 + $0x6f] sm:$0xff] }
 0x2df   : > { %v2235_v34 = vpop.f32.mrf.mxu0  ;;  %4640 = vmatmul.mubr.bf16.gmra.mxu0 %v8718_v22  ;;  %v2058_v63 = vadd.f32 %v2057_v59, %v8768_v32  ;;  %4488 = vmatprep.mubr.bf16.mxu1 %v10772_v17  ;;  %v8990_v46 = vpack.c.bf16 %v3633_v25, %v3632_v35  ;;  %v7304_v60 = vld [vmem:[%s10681_s2 + $0x370] ss:$8 sps:$4 sm:$0xff]   ;;  %v9035_v35 = vld [vmem:[%s10681_s2 + $0x464] ss:$8 sps:$4 sm:$0xff]   ;;  %v9181_v19 = vld [vmem:[%s10681_s2 + $0x414] ss:$8 sps:$4 sm:$0xff]  }
 0x2e0   : > { %10778 = vst [vmem:[#allocation19_spill] sm:$0xff] %v8942_v41  ;;  %v8954_v61 = vadd.f32 %v2273_v30, %v8675_v24  ;;  %v2274_v21 = vadd.f32 %v2235_v34, %v2048_v12  ;;  %4649 = vmatprep.mubr.bf16.mxu0 %v10772_v17  ;;  %5068 = vmatpush1.bf16.msra.mxu0 %v7295_v16  ;;  %v2059_v38 = vpop.f32.mrf.mxu1  ;;  %v8965_v24 = vld [vmem:[%s10681_s2 + $0x474] ss:$8 sps:$4 sm:$0xff]   ;;  %v10785_v16 = vld [vmem:[#allocation11_spill] sm:$0xff]  ;;  %v7316_v25 = vld [vmem:[%s10681_s2 + $0x350] ss:$8 sps:$4 sm:$0xff]  }
 0x2e1   : > { %v2237_v2 = vpop.f32.mrf.mxu0  ;;  %v2060_v32 = vadd.f32 %v2059_v38, %v8776_v9  ;;  %5069 = vmatprep.subr.bf16.mxu0 %v7303_v45  ;;  %10787 = vst [vmem:[#allocation24_spill] sm:$0xff] %v8990_v46  ;;  %10801 = vst [vmem:[#allocation29_spill] sm:$0xff] %v9181_v19 }
 0x2e2   : > { %10779 = vst [vmem:[#allocation20_spill] sm:$0xff] %v8954_v61  ;;  %v8968_v14 = vadd.f32 %v2274_v21, %v8689_v4  ;;  %v2275_v27 = vadd.f32 %v2237_v2, %v2050_v44  ;;  %v2061_v62 = vpop.f32.mrf.mxu1  ;;  %v7312_v21 = vld [vmem:[%s10681_s2 + $0x364] ss:$8 sps:$4 sm:$0xff]   ;;  %v9211_v61 = vld [vmem:[%s10681_s2 + $0x400] ss:$8 sps:$4 sm:$0xff]  }
 0x2e3   : > { %v2239_v56 = vpop.f32.mrf.mxu0  ;;  %v2062_v47 = vadd.f32 %v2061_v62, %v8778_v28  ;;  %10805 = vst [vmem:[#allocation32_spill] sm:$0xff] %v9211_v61 }
 0x2e4   : > { %10780 = vst [vmem:[#allocation21_spill] sm:$0xff] %v8968_v14  ;;  %v8972_v12 = vadd.f32 %v2275_v27, %v8704_v23  ;;  %v2276_v0 = vadd.f32 %v2239_v56, %v2052_v49  ;;  %5070 = vmatpush1.bf16.msra.mxu0 %v7301_v3  ;;  %v2063_v48 = vpop.f32.mrf.mxu1  ;;  %v10783_v23 = vld [vmem:[#allocation10_spill] sm:$0xff]  ;;  %v10790_v27 = vld [vmem:[#allocation7_spill] sm:$0xff] }
 0x2e5   : > { %v2241_v55 = vpop.f32.mrf.mxu0  ;;  %5413 = vmatprep.subr.bf16.mxu0 %v8965_v24  ;;  %v2064_v9 = vadd.f32 %v2063_v48, %v8785_v43  ;;  %v2305_v48 = vld [vmem:[#allocation3] sm:$0x3] }
 0x2e6   : > { %10781 = vst [vmem:[#allocation22_spill] sm:$0xff] %v8972_v12  ;;  %v8977_v4 = vadd.f32 %v2276_v0, %v8709_v51  ;;  %v2277_v42 = vadd.f32 %v2241_v55, %v2054_v5  ;;  %v2067_v44 = vpop.f32.mrf.mxu1  ;;  %4489 = vmatmul.mubr.bf16.gmra.mxu1 %v8373_v33 }
 0x2e7   : > { %v2245_v8 = vpop.f32.mrf.mxu0  ;;  %4650 = vmatmul.mubr.bf16.gmra.mxu0 %v8756_v40  ;;  %4796 = vmatprep.mubr.bf16.mxu1 %v10772_v17  ;;  %v2068_v2 = vadd.f32 %v2067_v44, %v8790_v20  ;;  %v2304_v20 = vld [vmem:[#allocation3 + $0x18] sm:$0x3] }
 0x2e8   : > { %10782 = vst [vmem:[#allocation23_spill] sm:$0xff] %v8977_v4  ;;  %v8983_v6 = vadd.f32 %v2277_v42, %v10783_v23  ;;  %v2278_v28 = vadd.f32 %v2245_v8, %v2058_v63  ;;  %4659 = vmatprep.mubr.bf16.mxu0 %v10772_v17  ;;  %v2069_v49 = vpop.f32.mrf.mxu1  ;;  %v9028_v44 = vld [vmem:[%s10681_s2 + $0x470] ss:$8 sps:$4 sm:$0xff]  }
 0x2e9   : > { %v2247_v51 = vpop.f32.mrf.mxu0  ;;  %v2070_v62 = vadd.f32 %v2069_v49, %v8801_v52  ;;  %v9189_v4 = vld [vmem:[%s10681_s2 + $0x410] ss:$8 sps:$4 sm:$0xff]  }
 0x2ea   : > { %10784 = vst [vmem:[#allocation10_spill] sm:$0xff] %v8983_v6  ;;  %v8988_v43 = vadd.f32 %v2278_v28, %v10785_v16  ;;  %v2279_v7 = vadd.f32 %v2247_v51, %v2060_v32  ;;  %v2071_v30 = vpop.f32.mrf.mxu1  ;;  %v7324_v51 = vld [vmem:[%s10681_s2 + $0x344] ss:$8 sps:$4 sm:$0xff]   ;;  %v10792_v16 = vld [vmem:[#allocation6_spill] sm:$0xff]  ;;  %10802 = vst [vmem:[#allocation30_spill] sm:$0xff] %v9189_v4 }
 0x2eb   : > { %v2249_v1 = vpop.f32.mrf.mxu0  ;;  %v9056_v30 = vld [vmem:[%s10681_s2 + $0x460] ss:$8 sps:$4 sm:$0xff]  }
 0x2ec   : > { %10786 = vst [vmem:[#allocation11_spill] sm:$0xff] %v8988_v43  ;;  %v8993_v5 = vadd.f32 %v2279_v7, %v8750_v11  ;;  %v2280_v45 = vadd.f32 %v2249_v1, %v2062_v47  ;;  %v2072_v59 = vpop.f32.mrf.mxu1  ;;  %v10793_v1 = vld [vmem:[#allocation8_spill] sm:$0xff] }
 0x2ed   : > { %v2251_v34 = vpop.f32.mrf.mxu0  ;;  %v7322_v59 = vld [vmem:[%s10681_s2 + $0x340] ss:$8 sps:$4 sm:$0xff]  }
 0x2ee   : > { %10788 = vst [vmem:[#allocation25_spill] sm:$0xff] %v8993_v5  ;;  %v9002_v63 = vadd.f32 %v2280_v45, %v8759_v58  ;;  %v2281_v3 = vadd.f32 %v2251_v34, %v2064_v9  ;;  %v9006_v11 = vpop.f32.mrf.mxu1  ;;  %4797 = vmatmul.mubr.bf16.vlgmr.msra.gmra.mxu1 %v10790_v27  ;;  %v7310_v58 = vld [vmem:[%s10681_s2 + $0x360] ss:$8 sps:$4 sm:$0xff]   ;;  %v9066_v34 = vld [vmem:[%s10681_s2 + $0x454] ss:$8 sps:$4 sm:$0xff]  }
 0x2ef   : > { %v2255_v38 = vpop.f32.mrf.mxu0  ;;  %4660 = vmatmul.mubr.bf16.gmra.mxu0 %v8990_v46  ;;  %5227 = vmatpush1.bf16.msra.mxu1 %v7304_v60  ;;  %v7348_v5 = vld [vmem:[%s10681_s2 + $0x304] ss:$8 sps:$4 sm:$0xff]  }
 0x2f0   : > { %10789 = vst [vmem:[#allocation26_spill] sm:$0xff] %v9002_v63  ;;  %v9010_v32 = vadd.f32 %v2281_v3, %v8766_v29  ;;  %v2282_v56 = vadd.f32 %v2255_v38, %v2068_v2  ;;  %5087 = vmatprep.mubr.bf16.mxu0 %v10772_v17  ;;  %v9017_v47 = vpop.f32.mrf.mxu1  ;;  %5228 = vmatprep.subr.bf16.mxu1 %v7312_v21  ;;  %v7318_v29 = vld [vmem:[%s10681_s2 + $0x354] ss:$8 sps:$4 sm:$0xff]   ;;  %v9083_v38 = vld [vmem:[%s10681_s2 + $0x450] ss:$8 sps:$4 sm:$0xff]  }
 0x2f1   : > { %v2257_v0 = vpop.f32.mrf.mxu0  ;;  %4806 = vmatprep.mubr.bf16.mxu1 %v10772_v17  ;;  %v7330_v21 = vld [vmem:[%s10681_s2 + $0x334] ss:$8 sps:$4 sm:$0xff]   ;;  %v7340_v63 = vld [vmem:[%s10681_s2 + $0x310] ss:$8 sps:$4 sm:$0xff]  }
 0x2f2   : > { %10791 = vst [vmem:[#allocation7_spill] sm:$0xff] %v9010_v32  ;;  %v2326_v55 = vadd.f32 %v2304_v20, %v2282_v56  ;;  %v2283_v52 = vadd.f32 %v2257_v0, %v2070_v62  ;;  %v9023_v9 = vpop.f32.mrf.mxu1  ;;  %v9093_v62 = vld [vmem:[%s10681_s2 + $0x444] ss:$8 sps:$4 sm:$0xff]  }
 0x2f3   : > { %v2259_v42 = vpop.f32.mrf.mxu0  ;;  %5229 = vmatpush1.bf16.msra.mxu1 %v7310_v58  ;;  %v7328_v58 = vld [vmem:[%s10681_s2 + $0x330] ss:$8 sps:$4 sm:$0xff]   ;;  %v10798_v32 = vld [vmem:[#allocation12_spill] sm:$0xff] }
 0x2f4   : > { %2348 = vst [vmem:[#allocation3 + $0x18] sm:$0x3] %v2326_v55  ;;  %v2327_v8 = vadd.f32 %v2305_v48, %v2283_v52  ;;  %v9030_v28 = vpop.f32.mrf.mxu1  ;;  %5230 = vmatprep.subr.bf16.mxu1 %v7318_v29  ;;  %v10795_v29 = vld [vmem:[#allocation9_spill] sm:$0xff]  ;;  %v7336_v55 = vld [vmem:[%s10681_s2 + $0x324] ss:$8 sps:$4 sm:$0xff]  }
 0x2f5   : > { %v2260_v23 = vpop.f32.mrf.mxu0  ;;  %v9114_v52 = vld [vmem:[%s10681_s2 + $0x440] ss:$8 sps:$4 sm:$0xff]  }
 0x2f6   : > { %2349 = vst [vmem:[#allocation3] sm:$0x3] %v2327_v8  ;;  %v9048_v7 = vpop.f32.mrf.mxu1  ;;  %4807 = vmatmul.mubr.bf16.gmra.mxu1 %v10793_v1  ;;  %v7334_v42 = vld [vmem:[%s10681_s2 + $0x320] ss:$8 sps:$4 sm:$0xff]  }
 0x2f7   : > { %v9043_v49 = vpop.f32.mrf.mxu0  ;;  %7399 = vmatmul.mubr.msk.bf16.vlgmr.msra.gmra.mxu0 %vm8415_vm7, %v10792_v16  ;;  %5231 = vmatpush1.bf16.msra.mxu1 %v7316_v25  ;;  %v9138_v25 = vld [vmem:[%s10681_s2 + $0x430] ss:$8 sps:$4 sm:$0xff]  }
 0x2f8   : > { %5414 = vmatpush1.bf16.msra.mxu0 %v9028_v44  ;;  %5097 = vmatprep.mubr.bf16.mxu0 %v10772_v17  ;;  %v9061_v60 = vpop.f32.mrf.mxu1 }
 0x2f9   : > { %v9058_v45 = vpop.f32.mrf.mxu0  ;;  %5415 = vmatprep.subr.bf16.mxu0 %v9035_v35  ;;  %4816 = vmatprep.mubr.bf16.mxu1 %v10772_v17 }
 0x2fa   : > { %5232 = vmatprep.subr.bf16.mxu1 %v7324_v51  ;;  %v9077_v2 = vpop.f32.mrf.mxu1 }
 0x2fb   : > { %v9075_v3 = vpop.f32.mrf.mxu0  ;;  %5233 = vmatpush1.bf16.msra.mxu1 %v7322_v59  ;;  %v9148_v59 = vld [vmem:[%s10681_s2 + $0x424] ss:$8 sps:$4 sm:$0xff]  }
 0x2fc   : > { %5416 = vmatpush1.bf16.msra.mxu0 %v9056_v30  ;;  %v9088_v56 = vpop.f32.mrf.mxu1  ;;  %5234 = vmatprep.subr.bf16.mxu1 %v7330_v21  ;;  %v7342_v21 = vld [vmem:[%s10681_s2 + $0x314] ss:$8 sps:$4 sm:$0xff]  }
 0x2fd   : > { %v9085_v27 = vpop.f32.mrf.mxu0  ;;  %5417 = vmatprep.subr.bf16.mxu0 %v9066_v34 }
 0x2fe   : > { %v9103_v0 = vpop.f32.mrf.mxu1  ;;  %4817 = vmatmul.mubr.bf16.gmra.mxu1 %v10795_v29 }
 0x2ff   : > { %v9098_v20 = vpop.f32.mrf.mxu0  ;;  %7402 = vmatmul.mubr.msk.bf16.gmra.mxu0 %vm8415_vm7, %v8502_v39  ;;  %10794 = vst [vmem:[#allocation6_spill] sm:$0xff] %v9103_v0  ;;  %4826 = vmatprep.mubr.bf16.mxu1 %v10772_v17  ;;  %v9125_v39 = vld [vmem:[%s10681_s2 + $0x434] ss:$8 sps:$4 sm:$0xff]  }
 0x300   : > { %5418 = vmatpush1.bf16.msra.mxu0 %v9083_v38  ;;  %5107 = vmatprep.mubr.bf16.mxu0 %v10772_v17  ;;  %v9118_v53 = vpop.f32.mrf.mxu1  ;;  %v3679_v0 = vld [vmem:[#allocation2 + $0x71] sm:$0xff] }
 0x301   : > { %v9116_v48 = vpop.f32.mrf.mxu0  ;;  %10796 = vst [vmem:[#allocation8_spill] sm:$0xff] %v9118_v53  ;;  %5419 = vmatprep.subr.bf16.mxu0 %v9093_v62  ;;  %5235 = vmatpush1.bf16.msra.mxu1 %v7328_v58 }
 0x302   : > { %v9132_v23 = vpop.f32.mrf.mxu1  ;;  %5236 = vmatprep.subr.bf16.mxu1 %v7336_v55 }
 0x303   : > { %v9130_v8 = vpop.f32.mrf.mxu0 }
 0x304   : > { %5420 = vmatpush1.bf16.msra.mxu0 %v9114_v52  ;;  %v9142_v16 = vpop.f32.mrf.mxu1 }
 0x305   : > { %v9140_v51 = vpop.f32.mrf.mxu0  ;;  %5421 = vmatprep.subr.bf16.mxu0 %v9125_v39  ;;  %5237 = vmatpush1.bf16.msra.mxu1 %v7334_v42  ;;  %v9167_v42 = vld [vmem:[%s10681_s2 + $0x420] ss:$8 sps:$4 sm:$0xff]  }
 0x306   : > { %v9156_v55 = vpop.f32.mrf.mxu1  ;;  %4827 = vmatmul.mubr.bf16.gmra.mxu1 %v10798_v32  ;;  %5238 = vmatprep.subr.bf16.mxu1 %v7342_v21  ;;  %v7346_v21 = vld [vmem:[%s10681_s2 + $0x300] ss:$8 sps:$4 sm:$0xff]  }
 0x307   : > { %v9153_v58 = vpop.f32.mrf.mxu0  ;;  %5108 = vmatmul.mubr.bf16.gmra.mxu0 %v8373_v33  ;;  %4836 = vmatprep.mubr.bf16.mxu1 %v10772_v17 }
 0x308   : > { %10797 = vst [vmem:[#allocation9_spill] sm:$0xff] %v9153_v58  ;;  %5117 = vmatprep.mubr.bf16.mxu0 %v10772_v17  ;;  %5422 = vmatpush1.bf16.msra.mxu0 %v9138_v25  ;;  %v9174_v6 = vpop.f32.mrf.mxu1  ;;  %v3678_v58 = vld [vmem:[#allocation2 + $0x69] sm:$0xff] }
 0x309   : > { %v9172_v43 = vpop.f32.mrf.mxu0  ;;  %10800 = vst [vmem:[#allocation28_spill] sm:$0xff] %v9174_v6  ;;  %5423 = vmatprep.subr.bf16.mxu0 %v9148_v59  ;;  %5239 = vmatpush1.bf16.msra.mxu1 %v7340_v63  ;;  %v9200_v63 = vld [vmem:[%s10681_s2 + $0x404] ss:$8 sps:$4 sm:$0xff]   ;;  %v3025_v6 = vlaneseq }
 0x30a   : > { %10799 = vst [vmem:[#allocation27_spill] sm:$0xff] %v9172_v43  ;;  %v2532_v37 = vpop.f32.mrf.mxu1  ;;  %5240 = vmatprep.subr.bf16.mxu1 %v7348_v5  ;;  %v10804_v5 = vld [vmem:[#allocation14_spill] sm:$0xff] }
 0x30b   : > { %v9183_v46 = vpop.f32.mrf.mxu0 }
 0x30c   : > { %5424 = vmatpush1.bf16.msra.mxu0 %v9167_v42  ;;  %v2534_v14 = vpop.f32.mrf.mxu1 }
 0x30d   : > { %v9191_v12 = vpop.f32.mrf.mxu0  ;;  %5425 = vmatprep.subr.bf16.mxu0 %v9181_v19  ;;  %5241 = vmatpush1.bf16.msra.mxu1 %v7346_v21 }
 0x30e   : > { %v2538_v53 = vpop.f32.mrf.mxu1  ;;  %4837 = vmatmul.mubr.bf16.gmra.mxu1 %v10804_v5  ;;  %6851 = vmatprep.subr.bf16.mxu1 %v8965_v24 }
 0x30f   : > { %v9202_v43 = vpop.f32.mrf.mxu0  ;;  %5118 = vmatmul.mubr.bf16.gmra.mxu0 %v8373_v33  ;;  %4846 = vmatprep.mubr.bf16.mxu1 %v10772_v17 }
 0x310   : > { %10803 = vst [vmem:[#allocation31_spill] sm:$0xff] %v9202_v43  ;;  %5127 = vmatprep.mubr.bf16.mxu0 %v10772_v17  ;;  %5426 = vmatpush1.bf16.msra.mxu0 %v9189_v4  ;;  %v2540_v40 = vpop.f32.mrf.mxu1  ;;  %v9218_v4 = vpack.c.bf16 %v3679_v0, %v3678_v58  ;;  %v3026_v0 = vshrl.u32 %v3025_v6, 7  ;;  %v2670_v6 = vadd.f32 %v9043_v49, %v9006_v11 }
 0x311   : > { %v9213_v15 = vpop.f32.mrf.mxu0  ;;  %5427 = vmatprep.subr.bf16.mxu0 %v9200_v63 }
 0x312   : > { %10806 = vst [vmem:[#allocation33_spill] sm:$0xff] %v9213_v15  ;;  %v2542_v32 = vpop.f32.mrf.mxu1  ;;  %10807 = vst [vmem:[#allocation34_spill] sm:$0xff] %v9218_v4 }
 0x313   : > { %v2703_v5 = vpop.f32.mrf.mxu0 }
 0x314   : > { %v9220_v31 = vadd.f32 %v2703_v5, %v2532_v37  ;;  %5428 = vmatpush1.bf16.msra.mxu0 %v9211_v61  ;;  %v2544_v41 = vpop.f32.mrf.mxu1  ;;  %v3657_v37 = vld [vmem:[#allocation2 + $0x78] sm:$0x3] }
 0x315   : > { %v2705_v19 = vpop.f32.mrf.mxu0 }
 0x316   : > { %v9223_v15 = vadd.f32 %v2705_v19, %v2534_v14  ;;  %v9226_v21 = vpop.f32.mrf.mxu1  ;;  %4847 = vmatmul.mubr.bf16.gmra.mxu1 %v9218_v4 }
 0x317   : > { %v2709_v43 = vpop.f32.mrf.mxu0  ;;  %5128 = vmatmul.mubr.bf16.gmra.mxu0 %v8373_v33  ;;  %10809 = vst [vmem:[#allocation36_spill] sm:$0xff] %v9226_v21  ;;  %5258 = vmatprep.mubr.bf16.mxu1 %v10772_v17  ;;  %v3027_v21 = vsub.s32 0, %v3026_v0 }
 0x318   : > { %10808 = vst [vmem:[#allocation35_spill] sm:$0xff] %v9223_v15  ;;  %v9229_v24 = vadd.f32 %v2709_v43, %v2538_v53  ;;  %5137 = vmatprep.mubr.bf16.mxu0 %v10772_v17  ;;  %v9233_v5 = vpop.f32.mrf.mxu1  ;;  %v3665_v15 = vpack.c.bf16 %v3657_v37, %v3657_v37  ;;  %v514_v53 = vld [vmem:[%s10682_s3] sm:$0x3] }
 0x319   : > { %v2711_v58 = vpop.f32.mrf.mxu0  ;;  %10811 = vst [vmem:[#allocation38_spill] sm:$0xff] %v9233_v5  ;;  %v3031_v5 = vsub.s32 1, %v3026_v0 }
 0x31a   : > { %10810 = vst [vmem:[#allocation37_spill] sm:$0xff] %v9229_v24  ;;  %v9235_v19 = vadd.f32 %v2711_v58, %v2540_v40  ;;  %v2552_v33 = vpop.f32.mrf.mxu1 }
 0x31b   : > { %v2713_v14 = vpop.f32.mrf.mxu0  ;;  %v9261_v49 = vrot.slane %v514_v53, %v3031_v5 }
 0x31c   : > { %v9237_v61 = vadd.f32 %v2713_v14, %v2542_v32  ;;  %v2553_v43 = vpop.f32.mrf.mxu1  ;;  %v2672_v32 = vadd.f32 %v9058_v45, %v9017_v47  ;;  %v9253_v14 = vrot.slane %v514_v53, %v3027_v21  ;;  %v2676_v21 = vadd.f32 %v9085_v27, %v9030_v28 }
 0x31d   : > { %v2715_v4 = vpop.f32.mrf.mxu0  ;;  %10813 = vst [vmem:[#allocation40_spill] sm:$0xff] %v9261_v49 }
 0x31e   : > { %v9244_v24 = vadd.f32 %v2715_v4, %v2544_v41  ;;  %v2857_v37 = vpop.f32.mrf.mxu1  ;;  %5259 = vmatmul.mubr.bf16.vlgmr.msra.gmra.mxu1 %v8620_v26  ;;  %10812 = vst [vmem:[#allocation39_spill] sm:$0xff] %v9253_v14 }
 0x31f   : > { %v9246_v40 = vpop.f32.mrf.mxu0  ;;  %5138 = vmatmul.mubr.bf16.gmra.mxu0 %v3665_v15  ;;  %v2914_v58 = vadd.f32 %v2857_v37, %v2670_v6  ;;  %5268 = vmatprep.mubr.bf16.mxu1 %v10772_v17  ;;  %v2674_v15 = vadd.f32 %v9075_v3, %v9023_v9 }
 0x320   : > { %5445 = vmatprep.mubr.bf16.mxu0 %v10772_v17  ;;  %v2859_v41 = vpop.f32.mrf.mxu1  ;;  %6859 = vmatpush1.bf16.msra.mxu1 %v9028_v44 }
 0x321   : > { %v9255_v11 = vpop.f32.mrf.mxu0  ;;  %v2958_v26 = vadd.f32 %v2914_v58, %v8838_v54  ;;  %v2915_v4 = vadd.f32 %v2859_v41, %v2672_v32  ;;  %6852 = vmatprep.subr.bf16.mxu1 %v9035_v35 }
 0x322   : > { %v2861_v45 = vpop.f32.mrf.mxu1 }
 0x323   : > { %v2723_v47 = vpop.f32.mrf.mxu0  ;;  %v2959_v0 = vadd.f32 %v2915_v4, %v8848_v18  ;;  %v2916_v33 = vadd.f32 %v2861_v45, %v2674_v15  ;;  %v3035_v44 = vadd.f32 %v9253_v14, %v2958_v26  ;;  %v10815_v45 = vld [vmem:[#allocation19_spill] sm:$0xff] }
 0x324   : > { %v2863_v6 = vpop.f32.mrf.mxu1  ;;  %6860 = vmatpush1.bf16.msra.mxu1 %v9056_v30 }
 0x325   : > { %v2724_v43 = vpop.f32.mrf.mxu0  ;;  %v2917_v54 = vadd.f32 %v2863_v6, %v2676_v21  ;;  %v9269_v9 = vmax.f32 %v3035_v44, 0.0  ;;  %v3036_v3 = vadd.f32 %v9261_v49, %v2959_v0  ;;  %6853 = vmatprep.subr.bf16.mxu1 %v9066_v34  ;;  %v2960_v18 = vadd.f32 %v2916_v33, %v8859_v57  ;;  %v10818_v33 = vld [vmem:[#allocation33_spill] sm:$0xff] }
 0x326   : > { %v2867_v28 = vpop.f32.mrf.mxu1  ;;  %5269 = vmatmul.mubr.bf16.gmra.mxu1 %v8669_v10  ;;  %v2680_v34 = vadd.f32 %v9098_v20, %v9048_v7  ;;  %v2682_v10 = vadd.f32 %v9116_v48, %v9061_v60  ;;  %v10819_v43 = vld [vmem:[#allocation15_spill] sm:$0xff] }
 0x327   : > { %v9273_v35 = vpop.f32.mrf.mxu0  ;;  %5446 = vmatmul.mubr.bf16.vlgmr.msra.gmra.mxu0 %v10793_v1  ;;  %v2961_v27 = vadd.f32 %v2917_v54, %v8872_v36  ;;  %5278 = vmatprep.mubr.bf16.mxu1 %v10772_v17  ;;  %v9281_v30 = vmax.f32 %v3036_v3, 0.0  ;;  %v3037_v1 = vadd.f32 %v9253_v14, %v2960_v18 }
 0x328   : > { %5455 = vmatprep.mubr.bf16.mxu0 %v10772_v17  ;;  %v2869_v53 = vpop.f32.mrf.mxu1  ;;  %3101 = vrot.lane.b32.xlu0 %v9269_v9, %s7435_s11  ;;  %v2918_v36 = vadd.f32 %v2867_v28, %v2680_v34  ;;  %v10822_v28 = vld [vmem:[#allocation16_spill] sm:$0xff] }
 0x329   : > { %v9285_v5 = vpop.f32.mrf.mxu0  ;;  %6861 = vmatpush1.bf16.msra.mxu1 %v9083_v38  ;;  %3103 = vrot.lane.b32.xlu1 %v9281_v30, %s7435_s11  ;;  %v2919_v20 = vadd.f32 %v2869_v53, %v2682_v10  ;;  %v3038_v37 = vadd.f32 %v9261_v49, %v2961_v27  ;;  %v9312_v58 = vmax.f32 %v3037_v1, 0.0  ;;  %v10823_v34 = vld [vmem:[#allocation20_spill] sm:$0xff]  ;;  %v10825_v1 = vld [vmem:[#allocation9_spill] sm:$0xff] }
 0x32a   : > { %6854 = vmatprep.subr.bf16.mxu1 %v9093_v62  ;;  %v2871_v7 = vpop.f32.mrf.mxu1  ;;  %v2962_v60 = vadd.f32 %v2918_v36, %v8884_v13  ;;  %v2684_v13 = vadd.f32 %v9130_v8, %v9077_v2 }
 0x32b   : > { %v9295_v57 = vpop.f32.mrf.mxu0  ;;  %v2963_v41 = vadd.f32 %v2919_v20, %v8891_v50  ;;  %v2694_v50 = vadd.f32 %v9183_v46, %v9132_v23  ;;  %v10814_v23 = vld [vmem:[#allocation31_spill] sm:$0xff] }
 0x32c   : > { %v2873_v38 = vpop.f32.mrf.mxu1  ;;  %3201 = vrot.lane.b32.xlu0 %v9269_v9, %s7436_s12  ;;  %v2920_v2 = vadd.f32 %v2871_v7, %v2684_v13  ;;  %v3039_v26 = vadd.f32 %v9253_v14, %v2962_v60  ;;  %v10824_v7 = vld [vmem:[#allocation6_spill] sm:$0xff]  ;;  %v10828_v13 = vld [vmem:[#allocation27_spill] sm:$0xff] }
 0x32d   : > { %v9299_v32 = vpop.f32.mrf.mxu0  ;;  %6862 = vmatpush1.bf16.msra.mxu1 %v9114_v52  ;;  %3203 = vrot.lane.b32.xlu1 %v9281_v30, %s7436_s12  ;;  %v9317_v52 = vmax.f32 %v3038_v37, 0.0  ;;  %v2690_v20 = vadd.f32 %v10825_v1, %v10824_v7  ;;  %v10826_v60 = vld [vmem:[#allocation30_spill] sm:$0xff]  ;;  %v10839_v7 = vld [vmem:[#allocation37_spill] sm:$0xff] }
 0x32e   : > { %6855 = vmatprep.subr.bf16.mxu1 %v9125_v39  ;;  %v2877_v48 = vpop.f32.mrf.mxu1  ;;  %5279 = vmatmul.mubr.bf16.gmra.mxu1 %v8718_v22  ;;  %v2686_v22 = vadd.f32 %v9140_v51, %v9088_v56  ;;  %v3040_v56 = vadd.f32 %v9261_v49, %v2963_v41  ;;  %v2964_v6 = vadd.f32 %v2920_v2, %v10819_v43  ;;  %v9359_v18 = vmax.f32 %v3039_v26, 0.0  ;;  %v10827_v41 = vld [vmem:[#allocation8_spill] sm:$0xff] }
 0x32f   : > { %v9308_v62 = vpop.f32.mrf.mxu0  ;;  %5456 = vmatmul.mubr.bf16.gmra.mxu0 %v10795_v29  ;;  %5288 = vmatprep.mubr.bf16.mxu1 %v10772_v17  ;;  %v2922_v26 = vadd.f32 %v2877_v48, %v2690_v20  ;;  %v10832_v48 = vld [vmem:[#allocation23_spill] sm:$0xff]  ;;  %v3634_v20 = vld [vmem:[#allocation2 + $0x77] sm:$0x3] }
 0x330   : > { %5465 = vmatprep.mubr.bf16.mxu0 %v10772_v17  ;;  %v2879_v15 = vpop.f32.mrf.mxu1  ;;  %3105 = vrot.lane.b32.xlu0 %v9312_v58, %s7435_s11  ;;  %v2921_v4 = vadd.f32 %v2873_v38, %v2686_v22  ;;  %v9367_v36 = vmax.f32 %v3040_v56, 0.0  ;;  %v2692_v22 = vadd.f32 %v10828_v13, %v10827_v41  ;;  %v10840_v13 = vld [vmem:[#allocation11_spill] sm:$0xff] }
 0x331   : > { %v9321_v39 = vpop.f32.mrf.mxu0  ;;  %6863 = vmatpush1.bf16.msra.mxu1 %v9138_v25  ;;  %3107 = vrot.lane.b32.xlu1 %v9317_v52, %s7435_s11  ;;  %v2696_v25 = vadd.f32 %v9191_v12, %v9142_v16  ;;  %v10816_v12 = vld [vmem:[#allocation29_spill] sm:$0xff]  ;;  %v10817_v16 = vld [vmem:[#allocation28_spill] sm:$0xff] }
 0x332   : > { %6856 = vmatprep.subr.bf16.mxu1 %v9148_v59  ;;  %v2881_v8 = vpop.f32.mrf.mxu1  ;;  %v2700_v59 = vadd.f32 %v10814_v23, %v9156_v55  ;;  %v2702_v44 = vadd.f32 %v10818_v33, %v10817_v16  ;;  %v10821_v55 = vld [vmem:[#allocation13_spill] sm:$0xff]  ;;  %v2965_v27 = vadd.f32 %v2921_v4, %v10822_v28  ;;  %v2923_v56 = vadd.f32 %v2879_v15, %v2692_v22  ;;  %v10833_v33 = vld [vmem:[#allocation35_spill] sm:$0xff]  ;;  %v10837_v28 = vld [vmem:[#allocation18_spill] sm:$0xff] }
 0x333   : > { %v9333_v29 = vpop.f32.mrf.mxu0  ;;  %v2924_v47 = vadd.f32 %v2881_v8, %v2694_v50  ;;  %v10829_v50 = vld [vmem:[#allocation21_spill] sm:$0xff] }
 0x334   : > { %v2883_v46 = vpop.f32.mrf.mxu1  ;;  %3205 = vrot.lane.b32.xlu0 %v9312_v58, %s7436_s12 }
 0x335   : > { %v9339_v51 = vpop.f32.mrf.mxu0  ;;  %6864 = vmatpush1.bf16.msra.mxu1 %v9167_v42  ;;  %v9347_v21 = vadd.f32 %v2924_v47, %v10815_v45  ;;  %v2925_v0 = vadd.f32 %v2883_v46, %v2696_v25  ;;  %3207 = vrot.lane.b32.xlu1 %v9317_v52, %s7436_s12  ;;  %v10820_v42 = vld [vmem:[#allocation12_spill] sm:$0xff]  ;;  %v3041_v47 = vadd.f32 %v9253_v14, %v2964_v6  ;;  %v10830_v46 = vld [vmem:[#allocation22_spill] sm:$0xff] }
 0x336   : > { %6857 = vmatprep.subr.bf16.mxu1 %v10816_v12  ;;  %v2887_v3 = vpop.f32.mrf.mxu1  ;;  %5289 = vmatmul.mubr.bf16.gmra.mxu1 %v10821_v55  ;;  %v3042_v45 = vadd.f32 %v9261_v49, %v2965_v27  ;;  %v10835_v6 = vld [vmem:[#allocation14_spill] sm:$0xff]  ;;  %v2967_v27 = vadd.f32 %v2923_v56, %v10837_v28  ;;  %v10841_v56 = vld [vmem:[#allocation25_spill] sm:$0xff] }
 0x337   : > { %v9355_v54 = vpop.f32.mrf.mxu0  ;;  %5466 = vmatmul.mubr.bf16.gmra.mxu0 %v10820_v42  ;;  %v9363_v53 = vadd.f32 %v2925_v0, %v10823_v34  ;;  %v2926_v10 = vadd.f32 %v2887_v3, %v2700_v59  ;;  %5298 = vmatprep.mubr.bf16.mxu1 %v10772_v17  ;;  %v10836_v3 = vld [vmem:[#allocation24_spill] sm:$0xff]  ;;  %v9408_v55 = vmax.f32 %v3041_v47, 0.0  ;;  %v10838_v34 = vld [vmem:[#allocation10_spill] sm:$0xff] }
 0x338   : > { %5475 = vmatprep.mubr.bf16.mxu0 %v10772_v17  ;;  %v2889_v38 = vpop.f32.mrf.mxu1  ;;  %3109 = vrot.lane.b32.xlu0 %v9359_v18, %s7435_s11 }
 0x339   : > { %v9371_v37 = vpop.f32.mrf.mxu0  ;;  %6865 = vmatpush1.bf16.msra.mxu1 %v10826_v60  ;;  %v9379_v2 = vadd.f32 %v2926_v10, %v10829_v50  ;;  %v2927_v8 = vadd.f32 %v2889_v38, %v2702_v44  ;;  %3111 = vrot.lane.b32.xlu1 %v9367_v36, %s7435_s11  ;;  %v10834_v44 = vld [vmem:[#allocation17_spill] sm:$0xff]  ;;  %v9417_v38 = vmax.f32 %v3042_v45, 0.0  ;;  %v3044_v45 = vadd.f32 %v9261_v49, %v2967_v27 }
 0x33a   : > { %6858 = vmatprep.subr.bf16.mxu1 %v9200_v63  ;;  %v2891_v4 = vpop.f32.mrf.mxu1  ;;  %v10831_v63 = vld [vmem:[#allocation32_spill] sm:$0xff] }
 0x33b   : > { %v9384_v25 = vpop.f32.mrf.mxu0  ;;  %v9388_v23 = vadd.f32 %v2927_v8, %v10830_v46  ;;  %v2928_v59 = vadd.f32 %v2891_v4, %v9220_v31  ;;  %v2966_v31 = vadd.f32 %v2922_v26, %v10834_v44  ;;  %v3642_v4 = vpack.c.bf16 %v3634_v20, %v3634_v20  ;;  %v2956_v20 = vld [vmem:[#allocation3 + $0x18] sm:$0x3] }
 0x33c   : > { %v2893_v12 = vpop.f32.mrf.mxu1  ;;  %3209 = vrot.lane.b32.xlu0 %v9359_v18, %s7436_s12 }
 0x33d   : > { %v9392_v0 = vpop.f32.mrf.mxu0  ;;  %6866 = vmatpush1.bf16.msra.mxu1 %v10831_v63  ;;  %v9398_v16 = vadd.f32 %v2928_v59, %v10832_v48  ;;  %v2929_v15 = vadd.f32 %v2893_v12, %v10833_v33  ;;  %3211 = vrot.lane.b32.xlu1 %v9367_v36, %s7436_s12  ;;  %v3043_v47 = vadd.f32 %v9253_v14, %v2966_v31  ;;  %v10843_v33 = vld [vmem:[#allocation26_spill] sm:$0xff] }
 0x33e   : > { %v2897_v42 = vpop.f32.mrf.mxu1  ;;  %5299 = vmatmul.mubr.bf16.gmra.mxu1 %v10836_v3  ;;  %v10844_v31 = vld [vmem:[#allocation34_spill] sm:$0xff] }
 0x33f   : > { %v9404_v43 = vpop.f32.mrf.mxu0  ;;  %5476 = vmatmul.mubr.bf16.gmra.mxu0 %v10835_v6  ;;  %v9412_v10 = vadd.f32 %v2929_v15, %v10838_v34  ;;  %v2930_v1 = vadd.f32 %v2897_v42, %v10839_v7  ;;  %5308 = vmatprep.mubr.bf16.mxu1 %v10772_v17  ;;  %v9452_v42 = vmax.f32 %v3043_v47, 0.0  ;;  %v10845_v3 = vld [vmem:[#allocation38_spill] sm:$0xff]  ;;  %v9460_v7 = vmax.f32 %v3044_v45, 0.0 }
 0x340   : > { %5485 = vmatprep.mubr.bf16.mxu0 %v10772_v17  ;;  %v2899_v41 = vpop.f32.mrf.mxu1  ;;  %3113 = vrot.lane.b32.xlu0 %v9408_v55, %s7435_s11  ;;  %v2722_v28 = vadd.f32 %v9255_v11, %v10845_v3  ;;  %v3045_v47 = vadd.f32 %v9253_v14, %v9347_v21 }
 0x341   : > { %v9419_v60 = vpop.f32.mrf.mxu0  ;;  %v9424_v22 = vadd.f32 %v2930_v1, %v10840_v13  ;;  %v2931_v50 = vadd.f32 %v2899_v41, %v9235_v19  ;;  %3115 = vrot.lane.b32.xlu1 %v9417_v38, %s7435_s11  ;;  %v10842_v19 = vld [vmem:[#allocation36_spill] sm:$0xff] }
 0x342   : > { %v2901_v26 = vpop.f32.mrf.mxu1  ;;  %v2720_v48 = vadd.f32 %v9246_v40, %v10842_v19  ;;  %v10846_v40 = vld [vmem:[#allocation7_spill] sm:$0xff]  ;;  %v9482_v21 = vmax.f32 %v3045_v47, 0.0 }
 0x343   : > { %v9429_v8 = vpop.f32.mrf.mxu0  ;;  %v9433_v46 = vadd.f32 %v2931_v50, %v10841_v56  ;;  %v2932_v59 = vadd.f32 %v2901_v26, %v9237_v61  ;;  %v2957_v26 = vld [vmem:[#allocation3] sm:$0x3] }
 0x344   : > { %v2903_v63 = vpop.f32.mrf.mxu1  ;;  %3213 = vrot.lane.b32.xlu0 %v9408_v55, %s7436_s12 }
 0x345   : > { %v9437_v12 = vpop.f32.mrf.mxu0  ;;  %v9444_v15 = vadd.f32 %v2932_v59, %v10843_v33  ;;  %v2933_v44 = vadd.f32 %v2903_v63, %v9244_v24  ;;  %3215 = vrot.lane.b32.xlu1 %v9417_v38, %s7436_s12  ;;  %v3680_v24 = vld [vmem:[#allocation2 + $0x79] sm:$0x3]  ;;  %v3046_v59 = vadd.f32 %v9261_v49, %v9363_v53 }
 0x346   : > { %v2907_v6 = vpop.f32.mrf.mxu1  ;;  %5309 = vmatmul.mubr.bf16.gmra.mxu1 %v3642_v4 }
 0x347   : > { %v9449_v61 = vpop.f32.mrf.mxu0  ;;  %5486 = vmatmul.mubr.bf16.gmra.mxu0 %v10844_v31  ;;  %v9457_v27 = vadd.f32 %v2933_v44, %v10846_v40  ;;  %v2934_v34 = vadd.f32 %v2907_v6, %v2720_v48  ;;  %5495 = vmatprep.mubr.bf16.mxu1 %v10772_v17  ;;  %v3688_v17 = vpack.c.bf16 %v3680_v24, %v3680_v24  ;;  %v9485_v44 = vmax.f32 %v3046_v59, 0.0 }
 0x348   : > { %v2909_v41 = vpop.f32.mrf.mxu1  ;;  %3117 = vrot.lane.b32.xlu0 %v9452_v42, %s7435_s11  ;;  %v3047_v40 = vadd.f32 %v9253_v14, %v9379_v2  ;;  %v3049_v59 = vadd.f32 %v9253_v14, %v9398_v16 }
 0x349   : > { %v9462_v1 = vpop.f32.mrf.mxu0  ;;  %v2978_v13 = vadd.f32 %v2956_v20, %v2934_v34  ;;  %v2935_v50 = vadd.f32 %v2909_v41, %v2722_v28  ;;  %3119 = vrot.lane.b32.xlu1 %v9460_v7, %s7435_s11  ;;  %v3048_v34 = vadd.f32 %v9261_v49, %v9388_v23 }
 0x34a   : > { %v2911_v4 = vpop.f32.mrf.mxu1 }
 0x34b   : > { %v9468_v11 = vpop.f32.mrf.mxu0  ;;  %3000 = vst [vmem:[#allocation3 + $0x18] sm:$0x3] %v2978_v13  ;;  %v2979_v56 = vadd.f32 %v2957_v26, %v2935_v50  ;;  %v9504_v50 = vmax.f32 %v3047_v40, 0.0  ;;  %v9509_v26 = vmax.f32 %v3048_v34, 0.0 }
 0x34c   : > { %v2912_v63 = vpop.f32.mrf.mxu1  ;;  %3217 = vrot.lane.b32.xlu0 %v9452_v42, %s7436_s12 }
 0x34d   : > { %v9474_v45 = vpop.f32.mrf.mxu0  ;;  %3001 = vst [vmem:[#allocation3] sm:$0x3] %v2979_v56  ;;  %3219 = vrot.lane.b32.xlu1 %v9460_v7, %s7436_s12  ;;  %10847 = vst [vmem:[#allocation31_spill] sm:$0xff] %v9504_v50 }
 0x34e   : > { %v4006_v48 = vpop.f32.mrf.mxu1  ;;  %5496 = vmatmul.mubr.bf16.vlgmr.msra.gmra.mxu1 %v3688_v17  ;;  %10848 = vst [vmem:[#allocation19_spill] sm:$0xff] %v9509_v26 }
 0x34f   : > { %v9480_v19 = vpop.f32.mrf.mxu0  ;;  %v4007_v33 = vadd.f32 %v4006_v48, %v9273_v35  ;;  %v3050_v48 = vadd.f32 %v9261_v49, %v9412_v10 }
 0x350   : > { %v4008_v31 = vpop.f32.mrf.mxu1  ;;  %3121 = vrot.lane.b32.xlu0 %v9482_v21, %s7435_s11 }
 0x351   : > { %v9487_v53 = vpop.f32.mrf.mxu0  ;;  %v4009_v6 = vadd.f32 %v4008_v31, %v9285_v5  ;;  %3123 = vrot.lane.b32.xlu1 %v9485_v44, %s7435_s11  ;;  %v9537_v40 = vmax.f32 %v3050_v48, 0.0 }
 0x352   : > { %v4010_v28 = vpop.f32.mrf.mxu1 }
 0x353   : > { %v3889_v3 = vpop.f32.mrf.mxu0  ;;  %v4011_v35 = vadd.f32 %v4010_v28, %v9295_v57  ;;  %v9532_v28 = vmax.f32 %v3049_v59, 0.0  ;;  %10850 = vst [vmem:[#allocation28_spill] sm:$0xff] %v9537_v40 }
 0x354   : > { %v4012_v20 = vpop.f32.mrf.mxu1  ;;  %3221 = vrot.lane.b32.xlu0 %v9482_v21, %s7436_s12 }
 0x355   : > { %v3890_v24 = vpop.f32.mrf.mxu0  ;;  %v4013_v5 = vadd.f32 %v4012_v20, %v9299_v32  ;;  %3223 = vrot.lane.b32.xlu1 %v9485_v44, %s7436_s12  ;;  %10849 = vst [vmem:[#allocation29_spill] sm:$0xff] %v9532_v28 }
 0x356   : > { %v4016_v13 = vpop.f32.mrf.mxu1 }
 0x357   : > { %v4193_v41 = vpop.f32.mrf.mxu0  ;;  %v4017_v57 = vadd.f32 %v4016_v13, %v9308_v62 }
 0x358   : > { %v9506_v2 = vadd.f32 %v4193_v41, %v4007_v33  ;;  %v4018_v4 = vpop.f32.mrf.mxu1  ;;  %3125 = vrot.lane.b32.xlu0 %v9504_v50, %s7435_s11  ;;  %v3051_v41 = vadd.f32 %v9253_v14, %v9424_v22 }
 0x359   : > { %v4195_v23 = vpop.f32.mrf.mxu0  ;;  %v4019_v32 = vadd.f32 %v4018_v4, %v9321_v39  ;;  %3127 = vrot.lane.b32.xlu1 %v9509_v26, %s7435_s11 }
 0x35a   : > { %v9513_v17 = vadd.f32 %v4195_v23, %v4009_v6  ;;  %v4020_v56 = vpop.f32.mrf.mxu1 }
 0x35b   : > { %v4197_v47 = vpop.f32.mrf.mxu0  ;;  %v4021_v63 = vadd.f32 %v4020_v56, %v9333_v29  ;;  %v9560_v56 = vmax.f32 %v3051_v41, 0.0 }
 0x35c   : > { %v9520_v62 = vadd.f32 %v4197_v47, %v4011_v35  ;;  %v4022_v31 = vpop.f32.mrf.mxu1  ;;  %3225 = vrot.lane.b32.xlu0 %v9504_v50, %s7436_s12 }
 0x35d   : > { %v4199_v33 = vpop.f32.mrf.mxu0  ;;  %v4023_v6 = vadd.f32 %v4022_v31, %v9339_v51  ;;  %3227 = vrot.lane.b32.xlu1 %v9509_v26, %s7436_s12  ;;  %10851 = vst [vmem:[#allocation33_spill] sm:$0xff] %v9560_v56 }
 0x35e   : > { %v9527_v39 = vadd.f32 %v4199_v33, %v4013_v5  ;;  %v4026_v3 = vpop.f32.mrf.mxu1 }
 0x35f   : > { %v4203_v16 = vpop.f32.mrf.mxu0  ;;  %v4027_v10 = vadd.f32 %v4026_v3, %v9355_v54 }
 0x360   : > { %v9534_v29 = vadd.f32 %v4203_v16, %v4017_v57  ;;  %v4028_v34 = vpop.f32.mrf.mxu1  ;;  %3129 = vrot.lane.b32.xlu0 %v9532_v28, %s7435_s11  ;;  %v3052_v57 = vadd.f32 %v9261_v49, %v9433_v46  ;;  %v3053_v16 = vadd.f32 %v9253_v14, %v9444_v15 }
 0x361   : > { %v4205_v35 = vpop.f32.mrf.mxu0  ;;  %v4029_v51 = vadd.f32 %v4028_v34, %v9371_v37  ;;  %3131 = vrot.lane.b32.xlu1 %v9537_v40, %s7435_s11 }
 0x362   : > { %v9541_v24 = vadd.f32 %v4205_v35, %v4019_v32  ;;  %v4030_v5 = vpop.f32.mrf.mxu1  ;;  %v9565_v59 = vmax.f32 %v3052_v57, 0.0 }
 0x363   : > { %v4207_v20 = vpop.f32.mrf.mxu0  ;;  %v4031_v13 = vadd.f32 %v4030_v5, %v9384_v25  ;;  %v9588_v5 = vmax.f32 %v3053_v16, 0.0 }
 0x364   : > { %v9548_v54 = vadd.f32 %v4207_v20, %v4021_v63  ;;  %v4032_v4 = vpop.f32.mrf.mxu1  ;;  %3229 = vrot.lane.b32.xlu0 %v9532_v28, %s7436_s12  ;;  %10852 = vst [vmem:[#allocation15_spill] sm:$0xff] %v9565_v59 }
 0x365   : > { %v4209_v23 = vpop.f32.mrf.mxu0  ;;  %v4033_v32 = vadd.f32 %v4032_v4, %v9392_v0  ;;  %3231 = vrot.lane.b32.xlu1 %v9537_v40, %s7436_s12  ;;  %10853 = vst [vmem:[#allocation12_spill] sm:$0xff] %v9588_v5 }
 0x366   : > { %v9555_v37 = vadd.f32 %v4209_v23, %v4023_v6  ;;  %v4036_v47 = vpop.f32.mrf.mxu1 }
 0x367   : > { %v4213_v22 = vpop.f32.mrf.mxu0  ;;  %v4037_v46 = vadd.f32 %v4036_v47, %v9404_v43 }
 0x368   : > { %v9562_v25 = vadd.f32 %v4213_v22, %v4027_v10  ;;  %v4038_v48 = vpop.f32.mrf.mxu1  ;;  %3133 = vrot.lane.b32.xlu0 %v9560_v56, %s7435_s11  ;;  %v3054_v10 = vadd.f32 %v9261_v49, %v9457_v27 }
 0x369   : > { %v4215_v63 = vpop.f32.mrf.mxu0  ;;  %v4039_v0 = vadd.f32 %v4038_v48, %v9419_v60  ;;  %3135 = vrot.lane.b32.xlu1 %v9565_v59, %s7435_s11 }
 0x36a   : > { %v9569_v33 = vadd.f32 %v4215_v63, %v4029_v51  ;;  %v4040_v6 = vpop.f32.mrf.mxu1  ;;  %v9593_v41 = vmax.f32 %v3054_v10, 0.0 }
 0x36b   : > { %v4217_v31 = vpop.f32.mrf.mxu0  ;;  %v4041_v3 = vadd.f32 %v4040_v6, %v9429_v8 }
 0x36c   : > { %v9576_v43 = vadd.f32 %v4217_v31, %v4031_v13  ;;  %v4042_v34 = vpop.f32.mrf.mxu1  ;;  %3233 = vrot.lane.b32.xlu0 %v9560_v56, %s7436_s12  ;;  %10854 = vst [vmem:[#allocation13_spill] sm:$0xff] %v9593_v41  ;;  %v3022_v13 = vld [vmem:[#allocation3 + $0x18] sm:$0x3] }
 0x36d   : > { %v4219_v35 = vpop.f32.mrf.mxu0  ;;  %v4043_v51 = vadd.f32 %v4042_v34, %v9437_v12  ;;  %3235 = vrot.lane.b32.xlu1 %v9565_v59, %s7436_s12  ;;  %v3023_v12 = vld [vmem:[#allocation3] sm:$0x3] }
 0x36e   : > { %v9583_v60 = vadd.f32 %v4219_v35, %v4033_v32  ;;  %v4046_v20 = vpop.f32.mrf.mxu1  ;;  %v3056_v48 = vadd.f32 %v9261_v49, %v3023_v12 }
 0x36f   : > { %v4223_v15 = vpop.f32.mrf.mxu0  ;;  %v4047_v27 = vadd.f32 %v4046_v20, %v9449_v61  ;;  %v3055_v61 = vadd.f32 %v9253_v14, %v3022_v13 }
 0x370   : > { %v9590_v8 = vadd.f32 %v4223_v15, %v4037_v46  ;;  %v4048_v23 = vpop.f32.mrf.mxu1  ;;  %3137 = vrot.lane.b32.xlu0 %v9588_v5, %s7435_s11 }
 0x371   : > { %v4225_v57 = vpop.f32.mrf.mxu0  ;;  %v4049_v32 = vadd.f32 %v4048_v23, %v9462_v1  ;;  %3139 = vrot.lane.b32.xlu1 %v9593_v41, %s7435_s11 }
 0x372   : > { %v9597_v4 = vadd.f32 %v4225_v57, %v4039_v0  ;;  %v4050_v47 = vpop.f32.mrf.mxu1 }
 0x373   : > { %v4227_v22 = vpop.f32.mrf.mxu0  ;;  %v4051_v63 = vadd.f32 %v4050_v47, %v9468_v11  ;;  %v9618_v11 = vmax.f32 %v3056_v48, 0.0 }
 0x374   : > { %v9603_v46 = vadd.f32 %v4227_v22, %v4041_v3  ;;  %v4052_v6 = vpop.f32.mrf.mxu1  ;;  %3237 = vrot.lane.b32.xlu0 %v9588_v5, %s7436_s12  ;;  %v9614_v3 = vmax.f32 %v3055_v61, 0.0 }
 0x375   : > { %v4229_v31 = vpop.f32.mrf.mxu0  ;;  %v4053_v1 = vadd.f32 %v4052_v6, %v9474_v45  ;;  %3239 = vrot.lane.b32.xlu1 %v9593_v41, %s7436_s12  ;;  %10858 = vst [vmem:[#allocation9_spill] sm:$0xff] %v9618_v11 }
 0x376   : > { %v9609_v0 = vadd.f32 %v4229_v31, %v4043_v51  ;;  %v4056_v10 = vpop.f32.mrf.mxu1  ;;  %10856 = vst [vmem:[#allocation20_spill] sm:$0xff] %v9614_v3 }
 0x377   : > { %v4233_v16 = vpop.f32.mrf.mxu0  ;;  %v4057_v12 = vadd.f32 %v4056_v10, %v9480_v19 }
 0x378   : > { %10855 = vst [vmem:[#allocation16_spill] sm:$0xff] %v9609_v0  ;;  %v9616_v35 = vadd.f32 %v4233_v16, %v4047_v27  ;;  %v4058_v15 = vpop.f32.mrf.mxu1  ;;  %3141 = vrot.lane.b32.xlu0 %v9614_v3, %s7435_s11 }
 0x379   : > { %v4235_v34 = vpop.f32.mrf.mxu0  ;;  %3143 = vrot.lane.b32.xlu1 %v9618_v11, %s7435_s11  ;;  %v4059_v61 = vadd.f32 %v4058_v15, %v9487_v53 }
 0x37a   : > { %10857 = vst [vmem:[#allocation6_spill] sm:$0xff] %v9616_v35  ;;  %v9622_v51 = vadd.f32 %v4235_v34, %v4049_v32  ;;  %v4060_v20 = vpop.f32.mrf.mxu1 }
 0x37b   : > { %v4237_v45 = vpop.f32.mrf.mxu0 }
 0x37c   : > { %10859 = vst [vmem:[#allocation30_spill] sm:$0xff] %v9622_v51  ;;  %v9626_v13 = vadd.f32 %v4237_v45, %v4051_v63  ;;  %v4061_v23 = vpop.f32.mrf.mxu1  ;;  %3241 = vrot.lane.b32.xlu0 %v9614_v3, %s7436_s12 }
 0x37d   : > { %v4239_v57 = vpop.f32.mrf.mxu0  ;;  %3243 = vrot.lane.b32.xlu1 %v9618_v11, %s7436_s12 }
 0x37e   : > { %10860 = vst [vmem:[#allocation8_spill] sm:$0xff] %v9626_v13  ;;  %v9630_v27 = vadd.f32 %v4239_v57, %v4053_v1  ;;  %v4440_v22 = vpop.f32.mrf.mxu1 }
 0x37f   : > { %v4243_v32 = vpop.f32.mrf.mxu0 }
 0x380   : > { %10861 = vst [vmem:[#allocation27_spill] sm:$0xff] %v9630_v27  ;;  %v4270_v47 = vadd.f32 %v4243_v32, %v4057_v12  ;;  %v4442_v63 = vpop.f32.mrf.mxu1 }
 0x381   : > { %v4245_v48 = vpop.f32.mrf.mxu0 }
 0x382   : > { %v4271_v31 = vadd.f32 %v4245_v48, %v4059_v61  ;;  %4292 = vst [vmem:[#allocation3 + $0x18] sm:$0x3] %v4270_v47  ;;  %v4444_v16 = vpop.f32.mrf.mxu1 }
 0x383   : > { %v4247_v6 = vpop.f32.mrf.mxu0 }
 0x384   : > { %4293 = vst [vmem:[#allocation3] sm:$0x3] %v4271_v31  ;;  %v4446_v1 = vpop.f32.mrf.mxu1 }
 0x385   : > { %v4248_v34 = vpop.f32.mrf.mxu0 }
 0x386   : > { %v4450_v20 = vpop.f32.mrf.mxu1 }
 0x387   : > { %v4611_v45 = vpop.f32.mrf.mxu0 }
 0x388   : > { %v9636_v19 = vadd.f32 %v4611_v45, %v4440_v22  ;;  %v4452_v57 = vpop.f32.mrf.mxu1 }
 0x389   : > { %v4613_v10 = vpop.f32.mrf.mxu0 }
 0x38a   : > { %v9638_v23 = vadd.f32 %v4613_v10, %v4442_v63  ;;  %v4454_v32 = vpop.f32.mrf.mxu1 }
 0x38b   : > { %v4615_v12 = vpop.f32.mrf.mxu0 }
 0x38c   : > { %v9640_v53 = vadd.f32 %v4615_v12, %v4444_v16  ;;  %v4456_v61 = vpop.f32.mrf.mxu1 }
 0x38d   : > { %v4617_v15 = vpop.f32.mrf.mxu0 }
 0x38e   : > { %v9642_v47 = vadd.f32 %v4617_v15, %v4446_v1  ;;  %v4460_v31 = vpop.f32.mrf.mxu1 }
 0x38f   : > { %v4621_v48 = vpop.f32.mrf.mxu0 }
 0x390   : > { %v9644_v6 = vadd.f32 %v4621_v48, %v4450_v20  ;;  %v4462_v3 = vpop.f32.mrf.mxu1 }
 0x391   : > { %v4623_v34 = vpop.f32.mrf.mxu0 }
 0x392   : > { %v9646_v22 = vadd.f32 %v4623_v34, %v4452_v57  ;;  %v4464_v11 = vpop.f32.mrf.mxu1 }
 0x393   : > { %v4625_v45 = vpop.f32.mrf.mxu0 }
 0x394   : > { %v9648_v63 = vadd.f32 %v4625_v45, %v4454_v32  ;;  %v4466_v5 = vpop.f32.mrf.mxu1 }
 0x395   : > { %v4627_v10 = vpop.f32.mrf.mxu0 }
 0x396   : > { %v9650_v16 = vadd.f32 %v4627_v10, %v4456_v61  ;;  %v4470_v41 = vpop.f32.mrf.mxu1 }
 0x397   : > { %v4631_v12 = vpop.f32.mrf.mxu0 }
 0x398   : > { %v9652_v1 = vadd.f32 %v4631_v12, %v4460_v31  ;;  %v4472_v56 = vpop.f32.mrf.mxu1 }
 0x399   : > { %v4633_v15 = vpop.f32.mrf.mxu0 }
 0x39a   : > { %v9654_v20 = vadd.f32 %v4633_v15, %v4462_v3  ;;  %v4474_v57 = vpop.f32.mrf.mxu1  ;;  %v3102_v59 = vpop.permute.xlu0 %3101 }
 0x39b   : > { %v4635_v48 = vpop.f32.mrf.mxu0  ;;  %v3104_v32 = vpop.permute.xlu1 %3103 }
 0x39c   : > { %v9656_v34 = vadd.f32 %v4635_v48, %v4464_v11  ;;  %v4476_v28 = vpop.f32.mrf.mxu1  ;;  %v3146_v61 = vsel %vm3145_vm8, %v3102_v59, %v3104_v32  ;;  %v3180_v40 = vmax.f32 %v9281_v30, %v3104_v32 }
 0x39d   : > { %v4637_v45 = vpop.f32.mrf.mxu0  ;;  %v3179_v15 = vmax.f32 %v9269_v9, %v3146_v61 }
 0x39e   : > { %v9659_v10 = vadd.f32 %v4637_v45, %v4466_v5  ;;  %v4480_v12 = vpop.f32.mrf.mxu1  ;;  %v3202_v50 = vpop.permute.xlu0 %3201 }
 0x39f   : > { %v4641_v31 = vpop.f32.mrf.mxu0  ;;  %v3204_v11 = vpop.permute.xlu1 %3203 }
 0x3a0   : > { %v9662_v3 = vadd.f32 %v4641_v31, %v4470_v41  ;;  %v4482_v26 = vpop.f32.mrf.mxu1  ;;  %v3246_v49 = vsel %vm3245_vm9, %v3202_v50, %v3204_v11  ;;  %v9666_v14 = vmax.f32 %v3180_v40, %v3204_v11 }
 0x3a1   : > { %v4643_v48 = vpop.f32.mrf.mxu0  ;;  %v9670_v5 = vmax.f32 %v3179_v15, %v3246_v49 }
 0x3a2   : > { %v9668_v59 = vadd.f32 %v4643_v48, %v4472_v56  ;;  %v4484_v27 = vpop.f32.mrf.mxu1  ;;  %v3106_v30 = vpop.permute.xlu0 %3105 }
 0x3a3   : > { %v4645_v45 = vpop.f32.mrf.mxu0  ;;  %v3108_v41 = vpop.permute.xlu1 %3107 }
 0x3a4   : > { %v9672_v13 = vadd.f32 %v4645_v45, %v4474_v57  ;;  %v4486_v9 = vpop.f32.mrf.mxu1 }
 0x3a5   : > { %v4647_v32 = vpop.f32.mrf.mxu0 }
 0x3a6   : > { %v9674_v61 = vadd.f32 %v4647_v32, %v4476_v28  ;;  %v9676_v51 = vpop.f32.mrf.mxu1  ;;  %v3206_v40 = vpop.permute.xlu0 %3205 }
 0x3a7   : > { %v4651_v31 = vpop.f32.mrf.mxu0  ;;  %10863 = vst [vmem:[#allocation22_spill] sm:$0xff] %v9676_v51  ;;  %v3208_v56 = vpop.permute.xlu1 %3207 }
 0x3a8   : > { %10862 = vst [vmem:[#allocation21_spill] sm:$0xff] %v9674_v61  ;;  %v9678_v50 = vadd.f32 %v4651_v31, %v4480_v12  ;;  %v9680_v49 = vpop.f32.mrf.mxu1 }
 0x3a9   : > { %v4653_v11 = vpop.f32.mrf.mxu0  ;;  %10865 = vst [vmem:[#allocation23_spill] sm:$0xff] %v9680_v49 }
 0x3aa   : > { %10864 = vst [vmem:[#allocation32_spill] sm:$0xff] %v9678_v50  ;;  %v9682_v15 = vadd.f32 %v4653_v11, %v4482_v26  ;;  %v4494_v48 = vpop.f32.mrf.mxu1  ;;  %v3110_v35 = vpop.permute.xlu0 %3109 }
 0x3ab   : > { %v4655_v57 = vpop.f32.mrf.mxu0  ;;  %v9686_v0 = vpop.permute.xlu1 %3111 }
 0x3ac   : > { %v9684_v45 = vadd.f32 %v4655_v57, %v4484_v27  ;;  %v4495_v32 = vpop.f32.mrf.mxu1  ;;  %v3147_v27 = vsel %vm3145_vm8, %v3106_v30, %v3108_v41 }
 0x3ad   : > { %v4657_v28 = vpop.f32.mrf.mxu0  ;;  %v3181_v30 = vmax.f32 %v9312_v58, %v3147_v27 }
 0x3ae   : > { %10866 = vst [vmem:[#allocation35_spill] sm:$0xff] %v9684_v45  ;;  %v9688_v61 = vadd.f32 %v4657_v28, %v4486_v9  ;;  %v4798_v31 = vpop.f32.mrf.mxu1  ;;  %v3210_v50 = vpop.permute.xlu0 %3209  ;;  %v3182_v28 = vmax.f32 %v9317_v52, %v3108_v41 }
 0x3af   : > { %v9690_v12 = vpop.f32.mrf.mxu0  ;;  %v4855_v51 = vadd.f32 %v4798_v31, %v9636_v19  ;;  %v3212_v49 = vpop.permute.xlu1 %3211 }
 0x3b0   : > { %10867 = vst [vmem:[#allocation17_spill] sm:$0xff] %v9688_v61  ;;  %10868 = vst [vmem:[#allocation14_spill] sm:$0xff] %v9690_v12  ;;  %v4800_v11 = vpop.f32.mrf.mxu1  ;;  %v3247_v61 = vsel %vm3245_vm9, %v3206_v40, %v3208_v56 }
 0x3b1   : > { %v9693_v26 = vpop.f32.mrf.mxu0  ;;  %v9697_v57 = vadd.f32 %v4855_v51, %v9506_v2  ;;  %v4856_v48 = vadd.f32 %v4800_v11, %v9638_v23  ;;  %v9707_v51 = vmax.f32 %v3182_v28, %v3208_v56  ;;  %v9715_v40 = vmax.f32 %v3181_v30, %v3247_v61 }
 0x3b2   : > { %10869 = vst [vmem:[#allocation24_spill] sm:$0xff] %v9693_v26  ;;  %v4802_v9 = vpop.f32.mrf.mxu1  ;;  %v3114_v26 = vpop.permute.xlu0 %3113  ;;  %v3324_v56 = vrot.slane %v9670_v5, 1  ;;  %v3184_v30 = vmax.f32 %v9367_v36, %v9686_v0 }
 0x3b3   : > { %v4665_v32 = vpop.f32.mrf.mxu0  ;;  %v9703_v19 = vadd.f32 %v4856_v48, %v9513_v17  ;;  %v4857_v31 = vadd.f32 %v4802_v9, %v9640_v53  ;;  %v3116_v12 = vpop.permute.xlu1 %3115  ;;  %10870 = vst [vmem:[#allocation18_spill] sm:$0xff] %v9715_v40  ;;  %v10719_v28 = vrot.slane %v9715_v40, 1  ;;  %v10717_v36 = vrot.slane %v9707_v51, 2 }
 0x3b4   : > { %v4804_v2 = vpop.f32.mrf.mxu1  ;;  %v3149_v48 = vsel %vm3145_vm8, %v3114_v26, %v3116_v12  ;;  %v3186_v61 = vmax.f32 %v9417_v38, %v3116_v12  ;;  %v10720_v32 = vrot.slane %v9707_v51, 1 }
 0x3b5   : > { %v4666_v45 = vpop.f32.mrf.mxu0  ;;  %v9710_v23 = vadd.f32 %v4857_v31, %v9520_v62  ;;  %v4858_v52 = vadd.f32 %v4804_v2, %v9642_v47  ;;  %v3327_v62 = vrot.slane %v9666_v14, 1  ;;  %v3248_v2 = vsel %vm3245_vm9, %v3210_v50, %v3212_v49 }
 0x3b6   : > { %v4808_v17 = vpop.f32.mrf.mxu1  ;;  %v3214_v45 = vpop.permute.xlu0 %3213 }
 0x3b7   : > { %v9713_v41 = vpop.f32.mrf.mxu0  ;;  %v9718_v53 = vadd.f32 %v4858_v52, %v9527_v39  ;;  %v4859_v58 = vadd.f32 %v4808_v17, %v9644_v6  ;;  %v3216_v11 = vpop.permute.xlu1 %3215  ;;  %v3148_v39 = vsel %vm3145_vm8, %v3110_v35, %v9686_v0 }
 0x3b8   : > { %v4810_v47 = vpop.f32.mrf.mxu1  ;;  %v3249_v38 = vsel %vm3245_vm9, %v3214_v45, %v3216_v11  ;;  %v9740_v12 = vmax.f32 %v3186_v61, %v3216_v11  ;;  %v3183_v0 = vmax.f32 %v9359_v18, %v3148_v39  ;;  %v9753_v11 = vmax.f32 %v3184_v30, %v3212_v49 }
 0x3b9   : > { %v9723_v27 = vpop.f32.mrf.mxu0  ;;  %v9731_v6 = vadd.f32 %v4859_v58, %v9534_v29  ;;  %v4860_v9 = vadd.f32 %v4810_v47, %v9646_v22  ;;  %v3185_v22 = vmax.f32 %v9408_v55, %v3149_v48  ;;  %v10718_v58 = vrot.slane %v9715_v40, 2 }
 0x3ba   : > { %v4812_v26 = vpop.f32.mrf.mxu1  ;;  %10871 = vst [vmem:[#allocation10_spill] sm:$0xff] %v9740_v12  ;;  %v3118_v52 = vpop.permute.xlu0 %3117  ;;  %v3406_v48 = vrot.slane %v9670_v5, 2  ;;  %v3409_v18 = vrot.slane %v9666_v14, 2  ;;  %v9770_v49 = vmax.f32 %v3183_v0, %v3248_v2 }
 0x3bb   : > { %v9735_v31 = vpop.f32.mrf.mxu0  ;;  %v9744_v35 = vadd.f32 %v4860_v9, %v9541_v24  ;;  %v4861_v29 = vadd.f32 %v4812_v26, %v9648_v63  ;;  %v3120_v17 = vpop.permute.xlu1 %3119  ;;  %v9758_v24 = vsel %vm3323_vm10, %v3327_v62, %v10720_v32  ;;  %v9764_v47 = vmax.f32 %v3185_v22, %v3249_v38 }
 0x3bc   : > { %v4814_v50 = vpop.f32.mrf.mxu1  ;;  %10873 = vst [vmem:[#allocation11_spill] sm:$0xff] %v9770_v49  ;;  %v10721_v9 = vrot.slane %v9740_v12, 1  ;;  %v9787_v2 = vsel %vm559_vm1, %v3406_v48, %v10718_v58 }
 0x3bd   : > { %v9751_v45 = vpop.f32.mrf.mxu0  ;;  %v9761_v55 = vadd.f32 %v4861_v29, %v9548_v54  ;;  %v4862_v63 = vadd.f32 %v4814_v50, %v9650_v16  ;;  %10872 = vst [vmem:[#allocation37_spill] sm:$0xff] %v9764_v47  ;;  %v9776_v54 = vsel %vm3323_vm10, %v3324_v56, %v10719_v28  ;;  %v9792_v56 = vsel %vm559_vm1, %v3409_v18, %v10717_v36 }
 0x3be   : > { %v4818_v39 = vpop.f32.mrf.mxu1  ;;  %v3218_v30 = vpop.permute.xlu0 %3217  ;;  %v10723_v0 = vrot.slane %v9764_v47, 1  ;;  %v10724_v18 = vrot.slane %v9770_v49, 1  ;;  %v10725_v38 = vrot.slane %v9764_v47, 2 }
 0x3bf   : > { %v9768_v61 = vpop.f32.mrf.mxu0  ;;  %v9779_v16 = vadd.f32 %v4862_v63, %v9555_v37  ;;  %v4863_v62 = vadd.f32 %v4818_v39, %v9652_v1  ;;  %v3220_v26 = vpop.permute.xlu1 %3219  ;;  %v10722_v37 = vrot.slane %v9753_v11, 1  ;;  %v3150_v63 = vsel %vm3145_vm8, %v3118_v52, %v3120_v17 }
 0x3c0   : > { %v4820_v1 = vpop.f32.mrf.mxu1  ;;  %v3250_v58 = vsel %vm3245_vm9, %v3218_v30, %v3220_v26  ;;  %v3187_v39 = vmax.f32 %v9452_v42, %v3150_v63  ;;  %v10726_v42 = vrot.slane %v9770_v49, 2 }
 0x3c1   : > { %v9795_v29 = vpop.f32.mrf.mxu0  ;;  %v9798_v22 = vadd.f32 %v4863_v62, %v9562_v25  ;;  %v4864_v50 = vadd.f32 %v4820_v1, %v9654_v20  ;;  %v3337_v25 = vsel %vm3323_vm10, %v10722_v37, %v10721_v9  ;;  %v3188_v9 = vmax.f32 %v9460_v7, %v3120_v17 }
 0x3c2   : > { %v4822_v62 = vpop.f32.mrf.mxu1  ;;  %v3122_v28 = vpop.permute.xlu0 %3121  ;;  %v9839_v17 = vmax.f32 %v3187_v39, %v3250_v58 }
 0x3c3   : > { %v9807_v36 = vpop.f32.mrf.mxu0  ;;  %v9816_v52 = vadd.f32 %v4864_v50, %v9569_v33  ;;  %v4865_v1 = vadd.f32 %v4822_v62, %v9656_v34  ;;  %v3124_v32 = vpop.permute.xlu1 %3123  ;;  %v3335_v33 = vsel %vm3323_vm10, %v10724_v18, %v10723_v0  ;;  %v3391_v34 = vmax.f32 %v9753_v11, %v3337_v25 }
 0x3c4   : > { %v4824_v37 = vpop.f32.mrf.mxu1  ;;  %v3151_v20 = vsel %vm3145_vm8, %v3122_v28, %v3124_v32  ;;  %10874 = vst [vmem:[#allocation25_spill] sm:$0xff] %v9839_v17  ;;  %v9841_v28 = vmax.f32 %v3188_v9, %v3220_v26  ;;  %v3190_v62 = vmax.f32 %v9485_v44, %v3124_v32  ;;  %v10876_v0 = vrot.slane %v9740_v12, 2 }
 0x3c5   : > { %v9820_v48 = vpop.f32.mrf.mxu0  ;;  %v9833_v30 = vadd.f32 %v4865_v1, %v9576_v43  ;;  %v4866_v50 = vadd.f32 %v4824_v37, %v9659_v10  ;;  %v10877_v25 = vrot.slane %v9753_v11, 2  ;;  %v3189_v37 = vmax.f32 %v9482_v21, %v3151_v20 }
 0x3c6   : > { %v4828_v7 = vpop.f32.mrf.mxu1  ;;  %10875 = vst [vmem:[#allocation36_spill] sm:$0xff] %v9841_v28  ;;  %v3222_v18 = vpop.permute.xlu0 %3221  ;;  %v3390_v9 = vmax.f32 %v9770_v49, %v3335_v33  ;;  %v3417_v44 = vsel %vm559_vm1, %v10726_v42, %v10725_v38  ;;  %v10901_v49 = vld [vmem:[#allocation39_spill] sm:$0xff] }
 0x3c7   : > { %v9837_v63 = vpop.f32.mrf.mxu0  ;;  %v3419_v43 = vsel %vm559_vm1, %v10877_v25, %v10876_v0  ;;  %v9850_v1 = vadd.f32 %v4866_v50, %v9583_v60  ;;  %v4867_v10 = vadd.f32 %v4828_v7, %v9662_v3  ;;  %v3224_v58 = vpop.permute.xlu1 %3223  ;;  %v10729_v50 = vrot.slane %v9839_v17, 1 }
 0x3c8   : > { %v4830_v26 = vpop.f32.mrf.mxu1  ;;  %v3251_v60 = vsel %vm3245_vm9, %v3222_v18, %v3224_v58  ;;  %v9863_v0 = vmax.f32 %v3190_v62, %v3224_v58  ;;  %v9865_v3 = vmax.f32 %v3391_v34, %v3419_v43  ;;  %v10733_v7 = vrot.slane %v9841_v28, 1 }
 0x3c9   : > { %v9860_v32 = vpop.f32.mrf.mxu0  ;;  %v9868_v21 = vadd.f32 %v4867_v10, %v9590_v8  ;;  %v4868_v39 = vadd.f32 %v4830_v26, %v9668_v59  ;;  %v9871_v20 = vmax.f32 %v3189_v37, %v3251_v60  ;;  %v10731_v58 = vrot.slane %v9841_v28, 2 }
 0x3ca   : > { %10878 = vst [vmem:[#allocation26_spill] sm:$0xff] %v9863_v0  ;;  %10879 = vst [vmem:[#allocation34_spill] sm:$0xff] %v9865_v3  ;;  %v4832_v25 = vpop.f32.mrf.mxu1  ;;  %v10727_v18 = vrot.slane %v9863_v0, 1  ;;  %v10730_v62 = vrot.slane %v9863_v0, 2  ;;  %v9894_v60 = vmax.f32 %v3390_v9, %v3417_v44  ;;  %v10883_v37 = vmax.f32 %v9666_v14, %v9758_v24  ;;  %v10886_v14 = vld [vmem:[#allocation32_spill] sm:$0xff] }
 0x3cb   : > { %10880 = vst [vmem:[#allocation38_spill] sm:$0xff] %v9871_v20  ;;  %v9873_v33 = vpop.f32.mrf.mxu0  ;;  %v9880_v34 = vadd.f32 %v4868_v39, %v9597_v4  ;;  %v4869_v8 = vadd.f32 %v4832_v25, %v9672_v13  ;;  %v10728_v59 = vrot.slane %v9871_v20, 1  ;;  %v10732_v43 = vrot.slane %v9871_v20, 2  ;;  %v10882_v39 = vld [vmem:[#allocation21_spill] sm:$0xff] }
 0x3cc   : > { %v4834_v26 = vpop.f32.mrf.mxu1  ;;  %v3345_v4 = vsel %vm3323_vm10, %v10733_v7, %v10727_v18  ;;  %10881 = vst [vmem:[#allocation7_spill] sm:$0xff] %v9894_v60  ;;  %v3469_v18 = vmax.f32 %v10883_v37, %v9792_v56 }
 0x3cd   : > { %v9885_v10 = vpop.f32.mrf.mxu0  ;;  %v9897_v13 = vadd.f32 %v4869_v8, %v9603_v46  ;;  %v4870_v25 = vadd.f32 %v4834_v26, %v10882_v39  ;;  %v3343_v38 = vsel %vm3323_vm10, %v10729_v50, %v10728_v59  ;;  %v3395_v42 = vmax.f32 %v9841_v28, %v3345_v4  ;;  %v10885_v39 = vld [vmem:[#allocation16_spill] sm:$0xff] }
 0x3ce   : > { %v4838_v44 = vpop.f32.mrf.mxu1  ;;  %v3394_v46 = vmax.f32 %v9839_v17, %v3343_v38  ;;  %v3427_v8 = vsel %vm559_vm1, %v10731_v58, %v10730_v62  ;;  %v10884_v26 = vmax.f32 %v9670_v5, %v9776_v54  ;;  %v10887_v38 = vrot.slane %v9839_v17, 2  ;;  %v10890_v54 = vld [vmem:[#allocation6_spill] sm:$0xff] }
 0x3cf   : > { %v9910_v9 = vpop.f32.mrf.mxu0  ;;  %v9923_v59 = vadd.f32 %v4870_v25, %v10885_v39  ;;  %v4871_v24 = vadd.f32 %v4838_v44, %v10886_v14  ;;  %v9931_v37 = vmax.f32 %v3395_v42, %v3427_v8  ;;  %v3489_v44 = vmax.f32 %v3469_v18, %v9865_v3  ;;  %v10891_v8 = vld [vmem:[#allocation30_spill] sm:$0xff]  ;;  %v516_v18 = vld [vmem:[%s10683_s4 + $0x8] sm:$0xff] }
 0x3d0   : > { %v3468_v4 = vmax.f32 %v10884_v26, %v9787_v2  ;;  %v3425_v56 = vsel %vm559_vm1, %v10887_v38, %v10732_v43  ;;  %v4840_v62 = vpop.f32.mrf.mxu1  ;;  %v10892_v38 = vld [vmem:[#allocation35_spill] sm:$0xff] }
 0x3d1   : > { %10888 = vst [vmem:[#allocation21_spill] sm:$0xff] %v9931_v37  ;;  %v9933_v50 = vpop.f32.mrf.mxu0  ;;  %v9935_v58 = vmax.f32 %v3394_v46, %v3425_v56  ;;  %v9939_v2 = vadd.f32 %v4871_v24, %v10890_v54  ;;  %v4872_v25 = vadd.f32 %v4840_v62, %v9682_v15  ;;  %v3501_v24 = vmax.f32 %v3489_v44, %v9931_v37  ;;  %v10893_v62 = vld [vmem:[#allocation22_spill] sm:$0xff]  ;;  %v10897_v44 = vld [vmem:[#allocation23_spill] sm:$0xff] }
 0x3d2   : > { %v3488_v5 = vmax.f32 %v3468_v4, %v9894_v60  ;;  %v4842_v39 = vpop.f32.mrf.mxu1  ;;  %v515_v4 = vld [vmem:[%s10683_s4] sm:$0xff] }
 0x3d3   : > { %10889 = vst [vmem:[#allocation16_spill] sm:$0xff] %v9935_v58  ;;  %v9943_v26 = vpop.f32.mrf.mxu0  ;;  %v9947_v14 = vadd.f32 %v4872_v25, %v10891_v8  ;;  %v4873_v46 = vadd.f32 %v4842_v39, %v10892_v38  ;;  %v10895_v25 = vld [vmem:[#allocation8_spill] sm:$0xff]  ;;  %v10896_v39 = vld [vmem:[#allocation17_spill] sm:$0xff]  ;;  %v10899_v37 = vld [vmem:[#allocation27_spill] sm:$0xff]  ;;  %v3513_v47 = vmul.f32 %v3501_v24, %v516_v18 }
 0x3d4   : > { %v3500_v42 = vmax.f32 %v3488_v5, %v9935_v58  ;;  %v4844_v15 = vpop.f32.mrf.mxu1  ;;  %v10894_v5 = vld [vmem:[#allocation14_spill] sm:$0xff]  ;;  %v10898_v58 = vld [vmem:[#allocation24_spill] sm:$0xff] }
 0x3d5   : > { %v9954_v56 = vpop.f32.mrf.mxu0  ;;  %v4662_v54 = vadd.f32 %v10894_v5, %v10893_v62  ;;  %v9962_v8 = vadd.f32 %v4873_v46, %v10895_v25  ;;  %v4874_v38 = vadd.f32 %v4844_v15, %v10896_v39  ;;  %v4664_v3 = vadd.f32 %v10898_v58, %v10897_v44  ;;  %v4897_v62 = vld [vmem:[#allocation3 + $0x18] sm:$0x3] }
 0x3d6   : > { %v4848_v7 = vpop.f32.mrf.mxu1  ;;  %v3512_v60 = vmul.f32 %v3500_v42, %v515_v4  ;;  %v3525_v15 = vsel %vm3524_vm11, %v3513_v47, 0.0  ;;  %v4898_v42 = vld [vmem:[#allocation3] sm:$0x3] }
 0x3d7   : > { %v9965_v43 = vpop.f32.mrf.mxu0  ;;  %v9970_v20 = vadd.f32 %v4874_v38, %v10899_v37  ;;  %v4875_v0 = vadd.f32 %v4848_v7, %v4662_v54 }
 0x3d8   : > { %v4850_v46 = vpop.f32.mrf.mxu1  ;;  %v9977_v12 = vadd.f32 %v3525_v15, %v3512_v60 }
 0x3d9   : > { %v9972_v17 = vpop.f32.mrf.mxu0  ;;  %v4919_v5 = vadd.f32 %v4897_v62, %v4875_v0  ;;  %v4876_v25 = vadd.f32 %v4850_v46, %v4664_v3 }
 0x3da   : > { %v4852_v4 = vpop.f32.mrf.mxu1  ;;  %10900 = vst [vmem:[#allocation32_spill] sm:$0xff] %v9977_v12 }
 0x3db   : > { %v9975_v39 = vpop.f32.mrf.mxu0  ;;  %4941 = vst [vmem:[#allocation3 + $0x18] sm:$0x3] %v4919_v5  ;;  %v4920_v58 = vadd.f32 %v4898_v42, %v4876_v25 }
 0x3dc   : > { %v4853_v7 = vpop.f32.mrf.mxu1 }
 0x3dd   : > { %v9979_v37 = vpop.f32.mrf.mxu0  ;;  %4942 = vst [vmem:[#allocation3] sm:$0x3] %v4920_v58 }
 0x3de   : > { %v5260_v18 = vpop.f32.mrf.mxu1 }
 0x3df   : > { %v9981_v24 = vpop.f32.mrf.mxu0  ;;  %v5261_v62 = vadd.f32 %v5260_v18, %v9713_v41 }
 0x3e0   : > { %v5262_v0 = vpop.f32.mrf.mxu1 }
 0x3e1   : > { %v9983_v54 = vpop.f32.mrf.mxu0  ;;  %v5263_v25 = vadd.f32 %v5262_v0, %v9723_v27 }
 0x3e2   : > { %v5264_v47 = vpop.f32.mrf.mxu1 }
 0x3e3   : > { %v5143_v3 = vpop.f32.mrf.mxu0  ;;  %v5265_v7 = vadd.f32 %v5264_v47, %v9735_v31 }
 0x3e4   : > { %v5266_v44 = vpop.f32.mrf.mxu1 }
 0x3e5   : > { %v5144_v38 = vpop.f32.mrf.mxu0  ;;  %v5267_v40 = vadd.f32 %v5266_v44, %v9751_v45  ;;  %v10902_v44 = vld [vmem:[#allocation40_spill] sm:$0xff] }
 0x3e6   : > { %v5270_v46 = vpop.f32.mrf.mxu1 }
 0x3e7   : > { %v5447_v60 = vpop.f32.mrf.mxu0 }
 0x3e8   : > { %v5504_v5 = vadd.f32 %v5447_v60, %v5261_v62  ;;  %v5272_v42 = vpop.f32.mrf.mxu1  ;;  %v5271_v60 = vadd.f32 %v5270_v46, %v9768_v61 }
 0x3e9   : > { %v5449_v15 = vpop.f32.mrf.mxu0 }
 0x3ea   : > { %v5548_v4 = vadd.f32 %v5504_v5, %v9697_v57  ;;  %v5505_v58 = vadd.f32 %v5449_v15, %v5263_v25  ;;  %v5274_v28 = vpop.f32.mrf.mxu1 }
 0x3eb   : > { %v5451_v12 = vpop.f32.mrf.mxu0  ;;  %v5275_v61 = vadd.f32 %v5274_v28, %v9807_v36 }
 0x3ec   : > { %v5549_v3 = vadd.f32 %v5505_v58, %v9703_v19  ;;  %v5506_v38 = vadd.f32 %v5451_v12, %v5265_v7  ;;  %v5276_v18 = vpop.f32.mrf.mxu1  ;;  %v5614_v62 = vadd.f32 %v5548_v4, %v10901_v49  ;;  %v5273_v19 = vadd.f32 %v5272_v42, %v9795_v29 }
 0x3ed   : > { %v5453_v41 = vpop.f32.mrf.mxu0  ;;  %v5277_v7 = vadd.f32 %v5276_v18, %v9820_v48 }
 0x3ee   : > { %v5550_v27 = vadd.f32 %v5506_v38, %v9710_v23  ;;  %v5507_v0 = vadd.f32 %v5453_v41, %v5267_v40  ;;  %v5280_v5 = vpop.f32.mrf.mxu1  ;;  %v9994_v25 = vmax.f32 %v5614_v62, 0.0  ;;  %v5615_v15 = vadd.f32 %v5549_v3, %v10902_v44 }
 0x3ef   : > { %v5457_v57 = vpop.f32.mrf.mxu0  ;;  %v5281_v28 = vadd.f32 %v5280_v5, %v9837_v63 }
 0x3f0   : > { %v5551_v31 = vadd.f32 %v5507_v0, %v9718_v53  ;;  %v5508_v47 = vadd.f32 %v5457_v57, %v5271_v60  ;;  %v5282_v45 = vpop.f32.mrf.mxu1  ;;  %5680 = vrot.lane.b32.xlu1 %v9994_v25, %s7435_s11  ;;  %v10003_v58 = vmax.f32 %v5615_v15, 0.0  ;;  %v5616_v53 = vadd.f32 %v5550_v27, %v10901_v49 }
 0x3f1   : > { %v5459_v12 = vpop.f32.mrf.mxu0  ;;  %v5283_v18 = vadd.f32 %v5282_v45, %v9860_v32 }
 0x3f2   : > { %v5552_v23 = vadd.f32 %v5508_v47, %v9731_v6  ;;  %v5509_v40 = vadd.f32 %v5459_v12, %v5273_v19  ;;  %v5284_v4 = vpop.f32.mrf.mxu1  ;;  %5682 = vrot.lane.b32.xlu0 %v10003_v58, %s7435_s11  ;;  %v10014_v27 = vmax.f32 %v5616_v53, 0.0 }
 0x3f3   : > { %v5461_v46 = vpop.f32.mrf.mxu0  ;;  %v5285_v63 = vadd.f32 %v5284_v4, %v9873_v33 }
 0x3f4   : > { %v5553_v29 = vadd.f32 %v5509_v40, %v9744_v35  ;;  %v5510_v42 = vadd.f32 %v5461_v46, %v5275_v61  ;;  %v5286_v3 = vpop.f32.mrf.mxu1  ;;  %5779 = vrot.lane.b32.xlu1 %v9994_v25, %s7436_s12  ;;  %v5617_v35 = vadd.f32 %v5551_v31, %v10902_v44 }
 0x3f5   : > { %v5463_v38 = vpop.f32.mrf.mxu0  ;;  %v5287_v12 = vadd.f32 %v5286_v3, %v9885_v10 }
 0x3f6   : > { %v5554_v6 = vadd.f32 %v5510_v42, %v9761_v55  ;;  %v5511_v36 = vadd.f32 %v5463_v38, %v5277_v7  ;;  %v5290_v62 = vpop.f32.mrf.mxu1  ;;  %5781 = vrot.lane.b32.xlu0 %v10003_v58, %s7436_s12  ;;  %v10025_v19 = vmax.f32 %v5617_v35, 0.0  ;;  %v5619_v10 = vadd.f32 %v5553_v29, %v10902_v44 }
 0x3f7   : > { %v5467_v41 = vpop.f32.mrf.mxu0  ;;  %v5291_v40 = vadd.f32 %v5290_v62, %v9910_v9 }
 0x3f8   : > { %v5555_v48 = vadd.f32 %v5511_v36, %v9779_v16  ;;  %v5512_v0 = vadd.f32 %v5467_v41, %v5281_v28  ;;  %v5292_v57 = vpop.f32.mrf.mxu1  ;;  %5684 = vrot.lane.b32.xlu1 %v10014_v27, %s7435_s11  ;;  %v5618_v16 = vadd.f32 %v5552_v23, %v10901_v49  ;;  %v10055_v36 = vmax.f32 %v5619_v10, 0.0 }
 0x3f9   : > { %v5469_v60 = vpop.f32.mrf.mxu0  ;;  %v5293_v53 = vadd.f32 %v5292_v57, %v9933_v50  ;;  %v5620_v50 = vadd.f32 %v5554_v6, %v10901_v49 }
 0x3fa   : > { %v5556_v55 = vadd.f32 %v5512_v0, %v9798_v22  ;;  %v5513_v5 = vadd.f32 %v5469_v60, %v5283_v18  ;;  %v5294_v31 = vpop.f32.mrf.mxu1  ;;  %5686 = vrot.lane.b32.xlu0 %v10025_v19, %s7435_s11  ;;  %v10040_v46 = vmax.f32 %v5618_v16, 0.0 }
 0x3fb   : > { %v5471_v47 = vpop.f32.mrf.mxu0  ;;  %v5295_v38 = vadd.f32 %v5294_v31, %v9943_v26  ;;  %v10070_v60 = vmax.f32 %v5620_v50, 0.0 }
 0x3fc   : > { %v10029_v32 = vadd.f32 %v5513_v5, %v9816_v52  ;;  %v5514_v45 = vadd.f32 %v5471_v47, %v5285_v63  ;;  %v5296_v22 = vpop.f32.mrf.mxu1  ;;  %5783 = vrot.lane.b32.xlu1 %v10014_v27, %s7436_s12 }
 0x3fd   : > { %v5473_v15 = vpop.f32.mrf.mxu0  ;;  %v5297_v41 = vadd.f32 %v5296_v22, %v9954_v56  ;;  %v5621_v56 = vadd.f32 %v5555_v48, %v10902_v44 }
 0x3fe   : > { %v10037_v33 = vadd.f32 %v5514_v45, %v9833_v30  ;;  %v5515_v23 = vadd.f32 %v5473_v15, %v5287_v12  ;;  %v5300_v52 = vpop.f32.mrf.mxu1  ;;  %5785 = vrot.lane.b32.xlu0 %v10025_v19, %s7436_s12 }
 0x3ff   : > { %v5477_v61 = vpop.f32.mrf.mxu0  ;;  %v5301_v18 = vadd.f32 %v5300_v52, %v9965_v43 }
 0x400   : > { %v10044_v4 = vadd.f32 %v5515_v23, %v9850_v1  ;;  %v5516_v42 = vadd.f32 %v5477_v61, %v5291_v40  ;;  %v5302_v30 = vpop.f32.mrf.mxu1  ;;  %5688 = vrot.lane.b32.xlu1 %v10040_v46, %s7435_s11 }
 0x401   : > { %v5479_v7 = vpop.f32.mrf.mxu0  ;;  %v5303_v63 = vadd.f32 %v5302_v30, %v9972_v17  ;;  %v5622_v17 = vadd.f32 %v5556_v55, %v10901_v49  ;;  %v5547_v30 = vld [vmem:[#allocation3] sm:$0x3] }
 0x402   : > { %v10052_v9 = vadd.f32 %v5516_v42, %v9868_v21  ;;  %v5517_v29 = vadd.f32 %v5479_v7, %v5293_v53  ;;  %v5304_v1 = vpop.f32.mrf.mxu1  ;;  %5690 = vrot.lane.b32.xlu0 %v10055_v36, %s7435_s11  ;;  %v5546_v42 = vld [vmem:[#allocation3 + $0x18] sm:$0x3] }
 0x403   : > { %v5481_v3 = vpop.f32.mrf.mxu0  ;;  %v5305_v31 = vadd.f32 %v5304_v1, %v9975_v39  ;;  %v10096_v52 = vmax.f32 %v5622_v17, 0.0  ;;  %v5625_v1 = vadd.f32 %v10044_v4, %v10902_v44 }
 0x404   : > { %v10059_v28 = vadd.f32 %v5517_v29, %v9880_v34  ;;  %v5518_v62 = vadd.f32 %v5481_v3, %v5295_v38  ;;  %v5306_v21 = vpop.f32.mrf.mxu1  ;;  %5787 = vrot.lane.b32.xlu1 %v10040_v46, %s7436_s12  ;;  %v5626_v50 = vadd.f32 %v10052_v9, %v10901_v49 }
 0x405   : > { %v5483_v35 = vpop.f32.mrf.mxu0  ;;  %v5307_v15 = vadd.f32 %v5306_v21, %v9979_v37 }
 0x406   : > { %v10067_v26 = vadd.f32 %v5518_v62, %v9897_v13  ;;  %v5519_v6 = vadd.f32 %v5483_v35, %v5297_v41  ;;  %v5310_v34 = vpop.f32.mrf.mxu1  ;;  %5789 = vrot.lane.b32.xlu0 %v10055_v36, %s7436_s12  ;;  %v10130_v41 = vmax.f32 %v5626_v50, 0.0  ;;  %v5627_v4 = vadd.f32 %v10059_v28, %v10902_v44  ;;  %v3128_v62 = vpop.permute.xlu1 %3127 }
 0x407   : > { %v5487_v0 = vpop.f32.mrf.mxu0  ;;  %v5311_v23 = vadd.f32 %v5310_v34, %v9981_v24  ;;  %v3126_v35 = vpop.permute.xlu0 %3125 }
 0x408   : > { %v5563_v57 = vadd.f32 %v5519_v6, %v9923_v59  ;;  %v5520_v5 = vadd.f32 %v5487_v0, %v5301_v18  ;;  %v5312_v13 = vpop.f32.mrf.mxu1  ;;  %5692 = vrot.lane.b32.xlu1 %v10070_v60, %s7435_s11  ;;  %v10083_v59 = vmax.f32 %v5621_v56, 0.0  ;;  %v10138_v9 = vmax.f32 %v5627_v4, 0.0 }
 0x409   : > { %v5489_v47 = vpop.f32.mrf.mxu0  ;;  %v5313_v10 = vadd.f32 %v5312_v13, %v9983_v54  ;;  %v5628_v6 = vadd.f32 %v10067_v26, %v10901_v49 }
 0x40a   : > { %v10080_v43 = vadd.f32 %v5520_v5, %v9939_v2  ;;  %v5521_v16 = vadd.f32 %v5489_v47, %v5303_v63  ;;  %v5314_v12 = vpop.f32.mrf.mxu1  ;;  %5694 = vrot.lane.b32.xlu0 %v10083_v59, %s7435_s11  ;;  %v5629_v21 = vadd.f32 %v5563_v57, %v10902_v44  ;;  %v3228_v18 = vpop.permute.xlu1 %3227 }
 0x40b   : > { %v5491_v48 = vpop.f32.mrf.mxu0  ;;  %v3226_v0 = vpop.permute.xlu0 %3225  ;;  %v10153_v34 = vmax.f32 %v5628_v6, 0.0 }
 0x40c   : > { %v5565_v45 = vadd.f32 %v5521_v16, %v9947_v14  ;;  %v5522_v22 = vadd.f32 %v5491_v48, %v5305_v31  ;;  %v5315_v2 = vpop.f32.mrf.mxu1  ;;  %5791 = vrot.lane.b32.xlu1 %v10070_v60, %s7436_s12  ;;  %v5623_v14 = vadd.f32 %v10029_v32, %v10902_v44  ;;  %v5624_v32 = vadd.f32 %v10037_v33, %v10901_v49 }
 0x40d   : > { %v5493_v40 = vpop.f32.mrf.mxu0  ;;  %v10122_v33 = vmax.f32 %v5625_v1, 0.0  ;;  %v10145_v28 = vmax.f32 %v5629_v21, 0.0  ;;  %v5630_v5 = vadd.f32 %v10080_v43, %v10901_v49  ;;  %v10912_v1 = vld [vmem:[#allocation18_spill] sm:$0xff] }
 0x40e   : > { %v10093_v39 = vadd.f32 %v5522_v22, %v9962_v8  ;;  %v5523_v61 = vadd.f32 %v5493_v40, %v5307_v15  ;;  %v5497_v55 = vpop.f32.mrf.mxu1  ;;  %5793 = vrot.lane.b32.xlu0 %v10083_v59, %s7436_s12  ;;  %v10106_v38 = vmax.f32 %v5623_v14, 0.0  ;;  %v10114_v3 = vmax.f32 %v5624_v32, 0.0  ;;  %v3132_v57 = vpop.permute.xlu1 %3131  ;;  %v10916_v21 = vld [vmem:[#allocation10_spill] sm:$0xff] }
 0x40f   : > { %v5524_v53 = vadd.f32 %v5497_v55, %v5311_v23  ;;  %v5631_v56 = vadd.f32 %v5565_v45, %v10902_v44  ;;  %v3130_v63 = vpop.permute.xlu0 %3129  ;;  %v10168_v13 = vmax.f32 %v5630_v5, 0.0  ;;  %v3152_v55 = vsel %vm3145_vm8, %v3126_v35, %v3128_v62 }
 0x410   : > { %v5567_v37 = vadd.f32 %v5523_v61, %v9970_v20  ;;  %v5499_v8 = vpop.f32.mrf.mxu1  ;;  %5696 = vrot.lane.b32.xlu1 %v10096_v52, %s7435_s11  ;;  %v5632_v43 = vadd.f32 %v10093_v39, %v10901_v49  ;;  %v10909_v32 = vrot.slane %v9707_v51, 1  ;;  %v10913_v50 = vrot.slane %v10912_v1, 1 }
 0x411   : > { %v5568_v24 = vadd.f32 %v5546_v42, %v5524_v53  ;;  %v5525_v7 = vadd.f32 %v5499_v8, %v5313_v10  ;;  %v10160_v26 = vmax.f32 %v5631_v56, 0.0  ;;  %v10907_v53 = vld [vmem:[#allocation31_spill] sm:$0xff]  ;;  %v10918_v56 = vld [vmem:[#allocation28_spill] sm:$0xff] }
 0x412   : > { %v5501_v20 = vpop.f32.mrf.mxu1  ;;  %5698 = vrot.lane.b32.xlu0 %v10106_v38, %s7435_s11  ;;  %v3232_v47 = vpop.permute.xlu1 %3231  ;;  %v5633_v31 = vadd.f32 %v5567_v37, %v10902_v44  ;;  %v10185_v15 = vmax.f32 %v5632_v43, 0.0  ;;  %v3252_v37 = vsel %vm3245_vm9, %v3226_v0, %v3228_v18  ;;  %v3191_v42 = vmax.f32 %v10907_v53, %v3152_v55 }
 0x413   : > { %5590 = vst [vmem:[#allocation3 + $0x18] sm:$0x3] %v5568_v24  ;;  %v5569_v54 = vadd.f32 %v5547_v30, %v5525_v7  ;;  %v3230_v16 = vpop.permute.xlu0 %3229  ;;  %v10908_v30 = vrot.slane %v9753_v11, 1  ;;  %v3194_v5 = vmax.f32 %v10918_v56, %v3132_v57  ;;  %v3153_v43 = vsel %vm3145_vm8, %v3130_v63, %v3132_v57 }
 0x414   : > { %5795 = vrot.lane.b32.xlu1 %v10096_v52, %s7436_s12  ;;  %v5502_v29 = vpop.f32.mrf.mxu1  ;;  %v10175_v48 = vmax.f32 %v5633_v31, 0.0  ;;  %10903 = vst [vmem:[#allocation6_spill] sm:$0xff] %v10185_v15  ;;  %v10924_v63 = vrot.slane %v10912_v1, 2 }
 0x415   : > { %5591 = vst [vmem:[#allocation3] sm:$0x3] %v5569_v54  ;;  %v3333_v20 = vsel %vm3323_vm10, %v10909_v32, %v10908_v30  ;;  %v10910_v54 = vld [vmem:[#allocation11_spill] sm:$0xff]  ;;  %v3253_v30 = vsel %vm3245_vm9, %v3230_v16, %v3232_v47 }
 0x416   : > { %5797 = vrot.lane.b32.xlu0 %v10106_v38, %s7436_s12  ;;  %v10179_v12 = vpop.permute.xlu1 %3135  ;;  %v10911_v29 = vrot.slane %v10910_v54, 1  ;;  %v3389_v53 = vmax.f32 %v9707_v51, %v3333_v20  ;;  %v10923_v57 = vrot.slane %v10910_v54, 2  ;;  %v10931_v54 = vrot.slane %v10916_v21, 2 }
 0x417   : > { %v3134_v45 = vpop.permute.xlu0 %3133 }
 0x418   : > { %5700 = vrot.lane.b32.xlu1 %v10114_v3, %s7435_s11  ;;  %v3331_v4 = vsel %vm3323_vm10, %v10913_v50, %v10911_v29  ;;  %v3413_v29 = vsel %vm559_vm1, %v10924_v63, %v10923_v57  ;;  %v10925_v50 = vrot.slane %v9753_v11, 2 }
 0x41a   : > { %5799 = vrot.lane.b32.xlu0 %v10114_v3, %s7436_s12  ;;  %v5612_v40 = vld [vmem:[#allocation3 + $0x18] sm:$0x3]  ;;  %v3236_v2 = vpop.permute.xlu1 %3235 }
 0x41b   : > { %v5634_v23 = vadd.f32 %v5612_v40, %v10901_v49  ;;  %v3234_v61 = vpop.permute.xlu0 %3233  ;;  %v10211_v49 = vmax.f32 %v3191_v42, %v3252_v37  ;;  %v3388_v37 = vmax.f32 %v10912_v1, %v3331_v4  ;;  %v10927_v4 = vld [vmem:[#allocation26_spill] sm:$0xff] }
 0x41c   : > { %5801 = vrot.lane.b32.xlu1 %v10122_v33, %s7436_s12  ;;  %v5613_v17 = vld [vmem:[#allocation3] sm:$0x3]  ;;  %v10928_v56 = vrot.slane %v10927_v4, 1 }
 0x41d   : > { %v5635_v22 = vadd.f32 %v5613_v17, %v10902_v44  ;;  %v10905_v44 = vld [vmem:[#allocation19_spill] sm:$0xff]  ;;  %v10202_v10 = vmax.f32 %v5634_v23, 0.0  ;;  %v3346_v31 = vrot.slane %v10211_v49, 1  ;;  %v10921_v23 = vld [vmem:[#allocation37_spill] sm:$0xff] }
 0x41e   : > { %5702 = vrot.lane.b32.xlu0 %v10122_v33, %s7435_s11  ;;  %v3192_v14 = vmax.f32 %v10905_v44, %v3128_v62  ;;  %v3140_v8 = vpop.permute.xlu1 %3139  ;;  %v10914_v62 = vld [vmem:[#allocation36_spill] sm:$0xff]  ;;  %v10922_v55 = vrot.slane %v10921_v23, 1 }
 0x41f   : > { %v10192_v39 = vmax.f32 %v5635_v22, 0.0  ;;  %10906 = vst [vmem:[#allocation35_spill] sm:$0xff] %v10202_v10  ;;  %v3138_v7 = vpop.permute.xlu0 %3137  ;;  %v10915_v35 = vrot.slane %v10914_v62, 1  ;;  %v10919_v22 = vld [vmem:[#allocation25_spill] sm:$0xff]  ;;  %v10930_v16 = vrot.slane %v10914_v62, 2 }
 0x420   : > { %5704 = vrot.lane.b32.xlu1 %v10130_v41, %s7435_s11  ;;  %v10205_v24 = vmax.f32 %v3192_v14, %v3228_v18  ;;  %v10917_v18 = vrot.slane %v10916_v21, 1  ;;  %v10920_v40 = vrot.slane %v10919_v22, 1  ;;  %v10239_v14 = vmax.f32 %v3194_v5, %v3232_v47 }
 0x421   : > { %10904 = vst [vmem:[#allocation30_spill] sm:$0xff] %v10192_v39  ;;  %v3423_v1 = vsel %vm559_vm1, %v10931_v54, %v10930_v16  ;;  %v10935_v16 = vrot.slane %v10919_v22, 2  ;;  %v3428_v54 = vrot.slane %v10211_v49, 2 }
 0x422   : > { %5803 = vrot.lane.b32.xlu0 %v10130_v41, %s7436_s12  ;;  %v3341_v6 = vsel %vm3323_vm10, %v10917_v18, %v10915_v35  ;;  %v3348_v0 = vrot.slane %v10205_v24, 1  ;;  %v3240_v17 = vpop.permute.xlu1 %3239  ;;  %v3339_v44 = vsel %vm3323_vm10, %v10922_v55, %v10920_v40  ;;  %v10926_v35 = vrot.slane %v9707_v51, 2  ;;  %v10932_v40 = vld [vmem:[#allocation38_spill] sm:$0xff] }
 0x423   : > { %v3393_v42 = vmax.f32 %v10916_v21, %v3341_v6  ;;  %v3238_v32 = vpop.permute.xlu0 %3237  ;;  %v10929_v6 = vld [vmem:[#allocation29_spill] sm:$0xff]  ;;  %v3392_v47 = vmax.f32 %v10921_v23, %v3339_v44  ;;  %v10933_v11 = vrot.slane %v10932_v40, 1  ;;  %v3430_v55 = vrot.slane %v10205_v24, 2  ;;  %v10934_v44 = vld [vmem:[#allocation15_spill] sm:$0xff] }
 0x424   : > { %5805 = vrot.lane.b32.xlu1 %v10138_v9, %s7436_s12  ;;  %v3415_v18 = vsel %vm559_vm1, %v10926_v35, %v10925_v50  ;;  %v3349_v20 = vsel %vm3323_vm10, %v10928_v56, %v3348_v0  ;;  %v3193_v5 = vmax.f32 %v10929_v6, %v3153_v43  ;;  %v3352_v63 = vrot.slane %v10239_v14, 1 }
 0x425   : > { %v3347_v51 = vsel %vm3323_vm10, %v10933_v11, %v3346_v31  ;;  %v3154_v43 = vsel %vm3145_vm8, %v3134_v45, %v10179_v12  ;;  %v3196_v62 = vmax.f32 %v10934_v44, %v10179_v12  ;;  %v3471_v50 = vmax.f32 %v3389_v53, %v3415_v18  ;;  %v10938_v18 = vld [vmem:[#allocation33_spill] sm:$0xff] }
 0x426   : > { %5706 = vrot.lane.b32.xlu0 %v10138_v9, %s7435_s11  ;;  %v10269_v57 = vmax.f32 %v3193_v5, %v3253_v30  ;;  %v10276_v21 = vmax.f32 %v3393_v42, %v3423_v1  ;;  %v3397_v35 = vmax.f32 %v10927_v4, %v3349_v20  ;;  %v3144_v56 = vpop.permute.xlu1 %3143  ;;  %v3470_v6 = vmax.f32 %v3388_v37, %v3413_v29 }
 0x427   : > { %v10936_v30 = vrot.slane %v10921_v23, 2  ;;  %v3254_v45 = vsel %vm3245_vm9, %v3234_v61, %v3236_v2  ;;  %v10286_v11 = vmax.f32 %v3196_v62, %v3236_v2  ;;  %v3396_v12 = vmax.f32 %v10932_v40, %v3347_v51  ;;  %v3142_v29 = vpop.permute.xlu0 %3141  ;;  %v10939_v61 = vld [vmem:[#allocation13_spill] sm:$0xff] }
 0x428   : > { %5710 = vrot.lane.b32.xlu1 %v10145_v28, %s7435_s11  ;;  %v10937_v53 = vrot.slane %v10927_v4, 2  ;;  %v3195_v37 = vmax.f32 %v10938_v18, %v3154_v43  ;;  %v3350_v23 = vrot.slane %v10269_v57, 1  ;;  %v3353_v20 = vsel %vm3323_vm10, %v3348_v0, %v3352_v63  ;;  %v10942_v18 = vld [vmem:[#allocation9_spill] sm:$0xff] }
 0x429   : > { %v3421_v5 = vsel %vm559_vm1, %v10936_v30, %v10935_v16  ;;  %v3155_v1 = vsel %vm3145_vm8, %v3138_v7, %v3140_v8  ;;  %v3198_v2 = vmax.f32 %v10939_v61, %v3140_v8  ;;  %v3434_v51 = vrot.slane %v10239_v14, 2  ;;  %v10941_v7 = vld [vmem:[#allocation12_spill] sm:$0xff] }
 0x42a   : > { %5708 = vrot.lane.b32.xlu0 %v10153_v34, %s7435_s11  ;;  %v3431_v42 = vsel %vm559_vm1, %v10937_v53, %v3430_v55  ;;  %v10293_v22 = vmax.f32 %v3392_v47, %v3421_v5  ;;  %v10302_v4 = vmax.f32 %v3195_v37, %v3254_v45  ;;  %v3491_v62 = vmax.f32 %v3471_v50, %v10276_v21  ;;  %v3244_v5 = vpop.permute.xlu1 %3243 }
 0x42b   : > { %v10299_v44 = vmax.f32 %v3397_v35, %v3431_v42  ;;  %v10940_v43 = vrot.slane %v10932_v40, 2  ;;  %v3356_v16 = vrot.slane %v10286_v11, 1  ;;  %v3255_v0 = vsel %vm3245_vm9, %v3238_v32, %v3240_v17 }
 0x42c   : > { %5809 = vrot.lane.b32.xlu1 %v10145_v28, %s7436_s12  ;;  %v10310_v30 = vmax.f32 %v3198_v2, %v3240_v17  ;;  %v3399_v8 = vmax.f32 %v10205_v24, %v3353_v20  ;;  %v3197_v35 = vmax.f32 %v10941_v7, %v3155_v1  ;;  %v3490_v45 = vmax.f32 %v3470_v6, %v10293_v22  ;;  %v3242_v20 = vpop.permute.xlu0 %3241  ;;  %v10943_v2 = vld [vmem:[#allocation20_spill] sm:$0xff] }
 0x42d   : > { %v3429_v47 = vsel %vm559_vm1, %v10940_v43, %v3428_v54  ;;  %v3351_v50 = vsel %vm3323_vm10, %v3346_v31, %v3350_v23  ;;  %v3432_v40 = vrot.slane %v10269_v57, 2  ;;  %v3156_v42 = vsel %vm3145_vm8, %v3142_v29, %v3144_v56 }
 0x42e   : > { %5807 = vrot.lane.b32.xlu0 %v10153_v34, %s7436_s12  ;;  %v10314_v53 = vmax.f32 %v3396_v12, %v3429_v47  ;;  %v3200_v37 = vmax.f32 %v10942_v18, %v3144_v56  ;;  %v3435_v17 = vsel %vm559_vm1, %v3430_v55, %v3434_v51  ;;  %v3354_v32 = vrot.slane %v10302_v4, 1  ;;  %v10333_v55 = vld [vmem:[%s10683_s4 + $0x18] sm:$0xff] }
 0x42f   : > { %v10323_v24 = vmax.f32 %v3197_v35, %v3255_v0  ;;  %v3503_v12 = vmax.f32 %v3491_v62, %v10299_v44  ;;  %v3357_v1 = vsel %vm3323_vm10, %v3352_v63, %v3356_v16  ;;  %v3360_v6 = vrot.slane %v10310_v30, 1  ;;  %v10944_v63 = vld [vmem:[#allocation21_spill] sm:$0xff]  ;;  %v10945_v0 = vld [vmem:[#allocation34_spill] sm:$0xff] }
 0x430   : > { %5714 = vrot.lane.b32.xlu1 %v10160_v26, %s7435_s11  ;;  %v3256_v31 = vsel %vm3245_vm9, %v3242_v20, %v3244_v5  ;;  %v3300_v61 = vmax.f32 %v3200_v37, %v3244_v5  ;;  %v3199_v29 = vmax.f32 %v10943_v2, %v3156_v42  ;;  %v3398_v56 = vmax.f32 %v10211_v49, %v3351_v50 }
 0x431   : > { %v3481_v43 = vmax.f32 %v3399_v8, %v3435_v17  ;;  %v3438_v47 = vrot.slane %v10286_v11, 2  ;;  %v3502_v62 = vmax.f32 %v3490_v45, %v10314_v53  ;;  %v3493_v7 = vmax.f32 %v10945_v0, %v10944_v63  ;;  %v10350_v45 = vld [vmem:[%s10683_s4 + $0x10] sm:$0xff] }
 0x432   : > { %5712 = vrot.lane.b32.xlu0 %v10168_v13, %s7435_s11  ;;  %v3355_v35 = vsel %vm3323_vm10, %v3350_v23, %v3354_v32  ;;  %v3401_v5 = vmax.f32 %v10239_v14, %v3357_v1  ;;  %v3358_v42 = vrot.slane %v10323_v24, 1  ;;  %v3299_v18 = vmax.f32 %v3199_v29, %v3256_v31 }
 0x433   : > { %v3361_v37 = vsel %vm3323_vm10, %v3356_v16, %v3360_v6  ;;  %v3364_v20 = vrot.slane %v3300_v61, 1  ;;  %v3515_v49 = vmul.f32 %v3503_v12, %v10333_v55  ;;  %v3433_v8 = vsel %vm559_vm1, %v3428_v54, %v3432_v40  ;;  %v10357_v16 = vld [vmem:[%s10683_s4 + $0x28] sm:$0xff]  ;;  %v10947_v54 = vld [vmem:[#allocation7_spill] sm:$0xff] }
 0x434   : > { %5813 = vrot.lane.b32.xlu1 %v10160_v26, %s7436_s12  ;;  %v3436_v50 = vrot.slane %v10302_v4, 2  ;;  %v3480_v23 = vmax.f32 %v3398_v56, %v3433_v8  ;;  %v3505_v17 = vmax.f32 %v3493_v7, %v3481_v43  ;;  %v3439_v14 = vsel %vm559_vm1, %v3434_v51, %v3438_v47  ;;  %v10946_v12 = vld [vmem:[#allocation16_spill] sm:$0xff] }
 0x435   : > { %v3442_v1 = vrot.slane %v10310_v30, 2  ;;  %v3492_v31 = vmax.f32 %v10947_v54, %v10946_v12  ;;  %v3400_v2 = vmax.f32 %v10269_v57, %v3355_v35  ;;  %v3359_v29 = vsel %vm3323_vm10, %v3354_v32, %v3358_v42 }
 0x436   : > { %5811 = vrot.lane.b32.xlu0 %v10168_v13, %s7436_s12  ;;  %v3403_v0 = vmax.f32 %v10286_v11, %v3361_v37  ;;  %v3362_v56 = vrot.slane %v3299_v18, 1  ;;  %v3483_v7 = vmax.f32 %v3401_v5, %v3439_v14  ;;  %v3365_v51 = vsel %vm3323_vm10, %v3360_v6, %v3364_v20  ;;  %v10378_v6 = vld [vmem:[%s10683_s4 + $0x20] sm:$0xff] }
 0x437   : > { %v3514_v8 = vmul.f32 %v3502_v62, %v10350_v45  ;;  %v3504_v54 = vmax.f32 %v3492_v31, %v3480_v23  ;;  %v3517_v57 = vmul.f32 %v3505_v17, %v10357_v16  ;;  %v3437_v32 = vsel %vm559_vm1, %v3432_v40, %v3436_v50 }
 0x438   : > { %5718 = vrot.lane.b32.xlu1 %v10175_v48, %s7435_s11  ;;  %v3443_v11 = vsel %vm559_vm1, %v3438_v47, %v3442_v1  ;;  %v3446_v35 = vrot.slane %v3300_v61, 2  ;;  %v3482_v62 = vmax.f32 %v3400_v2, %v3437_v32  ;;  %v3363_v37 = vsel %vm3323_vm10, %v3358_v42, %v3362_v56  ;;  %v10386_v61 = vld [vmem:[%s10683_s4 + $0x38] sm:$0xff] }
 0x439   : > { %v3405_v20 = vmax.f32 %v10310_v30, %v3365_v51  ;;  %v3485_v17 = vmax.f32 %v3403_v0, %v3443_v11  ;;  %v3494_v47 = vmax.f32 %v10293_v22, %v10314_v53  ;;  %v3444_v14 = vrot.slane %v3299_v18, 2  ;;  %v10948_v51 = vld [vmem:[#allocation32_spill] sm:$0xff]  ;;  %v10400_v18 = vld [vmem:[%s10683_s4 + $0x30] sm:$0xff] }
 0x43a   : > { %5716 = vrot.lane.b32.xlu0 %v10185_v15, %s7435_s11  ;;  %v3516_v31 = vmul.f32 %v3504_v54, %v10378_v6  ;;  %v3497_v42 = vmax.f32 %v10944_v63, %v3481_v43  ;;  %v3404_v30 = vmax.f32 %v10323_v24, %v3363_v37  ;;  %v3533_v22 = vsel %vm3524_vm11, %v3517_v57, 0.0 }
 0x43c   : > { %5817 = vrot.lane.b32.xlu1 %v10175_v48, %s7436_s12  ;;  %v3509_v63 = vmax.f32 %v3497_v42, %v3485_v17  ;;  %v3534_v32 = vadd.f32 %v3533_v22, %v3516_v31  ;;  %v10430_v31 = vld [vmem:[%s10683_s4 + $0x50] sm:$0xff] }
 0x43e   : > { %5815 = vrot.lane.b32.xlu0 %v10185_v15, %s7436_s12  ;;  %v3440_v15 = vrot.slane %v10323_v24, 2  ;;  %v10406_v24 = vld [vmem:[%s10683_s4 + $0x48] sm:$0xff] }
 0x440   : > { %5722 = vrot.lane.b32.xlu1 %v10192_v39, %s7435_s11 }
 0x442   : > { %5720 = vrot.lane.b32.xlu0 %v10202_v10, %s7435_s11 }
 0x444   : > { %5821 = vrot.lane.b32.xlu1 %v10192_v39, %s7436_s12  ;;  %v3495_v39 = vmax.f32 %v10276_v21, %v10299_v44  ;;  %v3402_v21 = vmax.f32 %v10302_v4, %v3359_v29  ;;  %v3441_v4 = vsel %vm559_vm1, %v3436_v50, %v3440_v15  ;;  %v3506_v29 = vmax.f32 %v3494_v47, %v3482_v62 }
 0x445   : > { %v3496_v50 = vmax.f32 %v10946_v12, %v3480_v23  ;;  %v3521_v23 = vmul.f32 %v3509_v63, %v10406_v24 }
 0x446   : > { %5819 = vrot.lane.b32.xlu0 %v10202_v10, %s7436_s12  ;;  %v3529_v10 = vsel %vm3524_vm11, %v3515_v49, 0.0  ;;  %v3507_v49 = vmax.f32 %v3495_v39, %v3483_v7  ;;  %v3447_v39 = vsel %vm559_vm1, %v3442_v1, %v3446_v35  ;;  %v3484_v0 = vmax.f32 %v3402_v21, %v3441_v4 }
 0x447   : > { %v3530_v40 = vadd.f32 %v3529_v10, %v3514_v8  ;;  %v3487_v56 = vmax.f32 %v3405_v20, %v3447_v39  ;;  %v3445_v1 = vsel %vm559_vm1, %v3440_v15, %v3444_v14  ;;  %v3499_v8 = vmax.f32 %v10299_v44, %v3483_v7  ;;  %v10416_v20 = vld [vmem:[%s10683_s4 + $0x40] sm:$0xff]  ;;  %v10422_v15 = vld [vmem:[%s10683_s4 + $0x58] sm:$0xff] }
 0x448   : > { %v3519_v43 = vmul.f32 %v3507_v49, %v10386_v61  ;;  %v3518_v11 = vmul.f32 %v3506_v29, %v10400_v18  ;;  %v3508_v35 = vmax.f32 %v3496_v50, %v3484_v0  ;;  %v3486_v21 = vmax.f32 %v3404_v30, %v3445_v1 }
 0x449   : > { %v3511_v12 = vmax.f32 %v3499_v8, %v3487_v56  ;;  %v3498_v44 = vmax.f32 %v10314_v53, %v3482_v62  ;;  %v3541_v14 = vsel %vm3524_vm11, %v3521_v23, 0.0 }
 0x44a   : > { %v3537_v37 = vsel %vm3524_vm11, %v3519_v43, 0.0 }
 0x44b   : > { %v3538_v17 = vadd.f32 %v3537_v37, %v3518_v11  ;;  %v3510_v47 = vmax.f32 %v3498_v44, %v3486_v21  ;;  %v3523_v4 = vmul.f32 %v3511_v12, %v10422_v15 }
 0x44d   : > { %v3522_v53 = vmul.f32 %v3510_v47, %v10430_v31  ;;  %v3545_v62 = vsel %vm3524_vm11, %v3523_v4, 0.0 }
 0x44f   : > { %v3546_v56 = vadd.f32 %v3545_v62, %v3522_v53 }
 0x462   : > { %v10373_v5 = vpop.permute.xlu1 %5680 }
 0x464   : > { %v5683_v10 = vpop.permute.xlu0 %5682 }
 0x465   : > { %3527 = vadd.xlane.f32.xlu0 %v10948_v51  ;;  %v5724_v63 = vsel %vm3145_vm8, %v10373_v5, %v5683_v10 }
 0x466   : > { %v5780_v2 = vpop.permute.xlu1 %5779  ;;  %v5757_v23 = vmax.f32 %v9994_v25, %v5724_v63 }
 0x468   : > { %3531 = vadd.xlane.f32.xlu1 %v3530_v40  ;;  %v5782_v54 = vpop.permute.xlu0 %5781  ;;  %v3520_v40 = vmul.f32 %v3508_v35, %v10416_v20  ;;  %v5758_v35 = vmax.f32 %v10003_v58, %v5683_v10 }
 0x469   : > { %v5823_v21 = vsel %vm3245_vm9, %v5780_v2, %v5782_v54 }
 0x46a   : > { %v5685_v57 = vpop.permute.xlu1 %5684  ;;  %v3542_v39 = vadd.f32 %v3541_v14, %v3520_v40  ;;  %v5857_v12 = vmax.f32 %v5758_v35, %v5782_v54 }
 0x46c   : > { %3535 = vadd.xlane.f32.xlu1 %v3534_v32  ;;  %v5687_v7 = vpop.permute.xlu0 %5686  ;;  %v5903_v40 = vrot.slane %v5857_v12, 1 }
 0x46d   : > { %v5725_v43 = vsel %vm3145_vm8, %v5685_v57, %v5687_v7  ;;  %v5760_v50 = vmax.f32 %v10025_v19, %v5687_v7  ;;  %v5856_v7 = vmax.f32 %v5757_v23, %v5823_v21 }
 0x46e   : > { %v5784_v49 = vpop.permute.xlu1 %5783  ;;  %v5759_v11 = vmax.f32 %v10014_v27, %v5725_v43 }
 0x46f   : > { %v5982_v23 = vrot.slane %v5856_v7, 2 }
 0x470   : > { %3539 = vadd.xlane.f32.xlu1 %v3538_v17  ;;  %v5786_v42 = vpop.permute.xlu0 %5785 }
 0x471   : > { %v5824_v1 = vsel %vm3245_vm9, %v5784_v49, %v5786_v42  ;;  %v10443_v37 = vmax.f32 %v5760_v50, %v5786_v42 }
 0x472   : > { %v5689_v30 = vpop.permute.xlu1 %5688  ;;  %v10446_v57 = vmax.f32 %v5759_v11, %v5824_v1 }
 0x473   : > { %v5904_v27 = vrot.slane %v10443_v37, 1 }
 0x474   : > { %3543 = vadd.xlane.f32.xlu1 %v3542_v39  ;;  %v5691_v29 = vpop.permute.xlu0 %5690  ;;  %v5901_v2 = vrot.slane %v10446_v57, 1  ;;  %v5983_v1 = vrot.slane %v10446_v57, 2 }
 0x475   : > { %v5726_v5 = vsel %vm3145_vm8, %v5689_v30, %v5691_v29  ;;  %v5762_v17 = vmax.f32 %v10055_v36, %v5691_v29  ;;  %v5905_v62 = vsel %vm3323_vm10, %v5903_v40, %v5904_v27 }
 0x476   : > { %v5788_v0 = vpop.permute.xlu1 %5787  ;;  %v5761_v25 = vmax.f32 %v10040_v46, %v5726_v5  ;;  %v5963_v50 = vmax.f32 %v5857_v12, %v5905_v62  ;;  %v5985_v5 = vrot.slane %v5857_v12, 2 }
 0x478   : > { %3547 = vadd.xlane.f32.xlu1 %v3546_v56  ;;  %v5790_v51 = vpop.permute.xlu0 %5789 }
 0x479   : > { %v5825_v58 = vsel %vm3245_vm9, %v5788_v0, %v5790_v51  ;;  %v5861_v30 = vmax.f32 %v5762_v17, %v5790_v51  ;;  %v5984_v17 = vsel %vm559_vm1, %v5982_v23, %v5983_v1 }
 0x47a   : > { %v5693_v22 = vpop.permute.xlu1 %5692  ;;  %v10459_v42 = vmax.f32 %v5761_v25, %v5825_v58 }
 0x47b   : > { %v5908_v63 = vrot.slane %v5861_v30, 1 }
 0x47c   : > { %v5695_v8 = vpop.permute.xlu0 %5694  ;;  %v5906_v43 = vrot.slane %v10459_v42, 1 }
 0x47d   : > { %v5764_v49 = vmax.f32 %v10083_v59, %v5695_v8  ;;  %v5727_v10 = vsel %vm3145_vm8, %v5693_v22, %v5695_v8  ;;  %v5900_v59 = vrot.slane %v5856_v7, 1  ;;  %v5986_v22 = vrot.slane %v10443_v37, 2 }
 0x47e   : > { %v5792_v32 = vpop.permute.xlu1 %5791  ;;  %v5763_v39 = vmax.f32 %v10070_v60, %v5727_v10  ;;  %v5909_v58 = vsel %vm3323_vm10, %v5904_v27, %v5908_v63 }
 0x47f   : > { %v5902_v53 = vsel %vm3323_vm10, %v5900_v59, %v5901_v2  ;;  %v5987_v40 = vsel %vm559_vm1, %v5985_v5, %v5986_v22  ;;  %v5965_v27 = vmax.f32 %v10443_v37, %v5909_v58 }
 0x480   : > { %v5794_v19 = vpop.permute.xlu0 %5793  ;;  %v5962_v60 = vmax.f32 %v5856_v7, %v5902_v53 }
 0x481   : > { %v10456_v54 = vmax.f32 %v5764_v49, %v5794_v19  ;;  %v5826_v47 = vsel %vm3245_vm9, %v5792_v32, %v5794_v19  ;;  %v5990_v19 = vrot.slane %v5861_v30, 2 }
 0x482   : > { %v5697_v44 = vpop.permute.xlu1 %5696  ;;  %v10464_v46 = vmax.f32 %v5763_v39, %v5826_v47 }
 0x483   : > { %v5912_v36 = vrot.slane %v10456_v54, 1  ;;  %v5994_v10 = vrot.slane %v10456_v54, 2  ;;  %v5991_v59 = vsel %vm559_vm1, %v5986_v22, %v5990_v19 }
 0x484   : > { %v5699_v14 = vpop.permute.xlu0 %5698  ;;  %v5910_v32 = vrot.slane %v10464_v46, 1 }
 0x485   : > { %v5728_v29 = vsel %vm3145_vm8, %v5697_v44, %v5699_v14  ;;  %v5766_v51 = vmax.f32 %v10106_v38, %v5699_v14  ;;  %v5913_v11 = vsel %vm3323_vm10, %v5908_v63, %v5912_v36  ;;  %v5907_v38 = vsel %vm3323_vm10, %v5901_v2, %v5906_v43 }
 0x486   : > { %v5796_v4 = vpop.permute.xlu1 %5795  ;;  %v5765_v35 = vmax.f32 %v10096_v52, %v5728_v29  ;;  %v5967_v47 = vmax.f32 %v5861_v30, %v5913_v11  ;;  %v10483_v52 = vmax.f32 %v5963_v50, %v5987_v40  ;;  %v5911_v7 = vsel %vm3323_vm10, %v5906_v43, %v5910_v32 }
 0x487   : > { %v10487_v14 = vmax.f32 %v5962_v60, %v5984_v17  ;;  %v5964_v2 = vmax.f32 %v10446_v57, %v5907_v38  ;;  %v5995_v30 = vsel %vm559_vm1, %v5990_v19, %v5994_v10  ;;  %v5966_v43 = vmax.f32 %v10459_v42, %v5911_v7 }
 0x488   : > { %v5798_v0 = vpop.permute.xlu0 %5797  ;;  %v5992_v63 = vrot.slane %v10464_v46, 2  ;;  %v10498_v57 = vmax.f32 %v5967_v47, %v5995_v30 }
 0x489   : > { %v5827_v8 = vsel %vm3245_vm9, %v5796_v4, %v5798_v0  ;;  %v10476_v21 = vmax.f32 %v5766_v51, %v5798_v0  ;;  %v5988_v4 = vrot.slane %v10459_v42, 2 }
 0x48a   : > { %v5701_v56 = vpop.permute.xlu1 %5700  ;;  %v5864_v25 = vmax.f32 %v5765_v35, %v5827_v8  ;;  %v10507_v8 = vmax.f32 %v5965_v27, %v5991_v59 }
 0x48b   : > { %v5916_v12 = vrot.slane %v10476_v21, 1  ;;  %v5998_v22 = vrot.slane %v10476_v21, 2  ;;  %v5993_v19 = vsel %vm559_vm1, %v5988_v4, %v5992_v63 }
 0x48c   : > { %v5800_v44 = vpop.permute.xlu0 %5799  ;;  %v5914_v62 = vrot.slane %v5864_v25, 1  ;;  %v10522_v17 = vmax.f32 %v5966_v43, %v5993_v19 }
 0x48d   : > { %v5917_v51 = vsel %vm3323_vm10, %v5912_v36, %v5916_v12  ;;  %v5999_v38 = vsel %vm559_vm1, %v5994_v10, %v5998_v22 }
 0x48e   : > { %v5802_v49 = vpop.permute.xlu1 %5801  ;;  %v5915_v23 = vsel %vm3323_vm10, %v5910_v32, %v5914_v62  ;;  %v6065_v32 = vmax.f32 %v10483_v52, %v10498_v57 }
 0x48f   : > { %v5828_v60 = vsel %vm3245_vm9, %v5800_v44, %v5802_v49  ;;  %v5969_v44 = vmax.f32 %v10456_v54, %v5917_v51  ;;  %v5968_v40 = vmax.f32 %v10464_v46, %v5915_v23 }
 0x490   : > { %v5703_v39 = vpop.permute.xlu0 %5702 }
 0x491   : > { %v5729_v29 = vsel %vm3145_vm8, %v5701_v56, %v5703_v39  ;;  %v5768_v0 = vmax.f32 %v10122_v33, %v5703_v39  ;;  %v5989_v56 = vsel %vm559_vm1, %v5983_v1, %v5988_v4  ;;  %v5996_v33 = vrot.slane %v5864_v25, 2 }
 0x492   : > { %v5705_v53 = vpop.permute.xlu1 %5704  ;;  %v5767_v37 = vmax.f32 %v10114_v3, %v5729_v29  ;;  %v10514_v5 = vmax.f32 %v5964_v2, %v5989_v56  ;;  %v10533_v39 = vmax.f32 %v5969_v44, %v5999_v38 }
 0x493   : > { %v10504_v50 = vmax.f32 %v5768_v0, %v5802_v49  ;;  %v5997_v47 = vsel %vm559_vm1, %v5992_v63, %v5996_v33 }
 0x494   : > { %v10509_v42 = vmax.f32 %v5767_v37, %v5828_v60  ;;  %v5804_v11 = vpop.permute.xlu0 %5803  ;;  %v10548_v63 = vmax.f32 %v5968_v40, %v5997_v47  ;;  %v7353_v40 = vld [vmem:[%s10683_s4] sm:$0xff] }
 0x495   : > { %v5920_v3 = vrot.slane %v10504_v50, 1  ;;  %v6002_v36 = vrot.slane %v10504_v50, 2 }
 0x496   : > { %v5806_v35 = vpop.permute.xlu1 %5805  ;;  %v5918_v1 = vrot.slane %v10509_v42, 1  ;;  %v6000_v49 = vrot.slane %v10509_v42, 2 }
 0x497   : > { %v5921_v58 = vsel %vm3323_vm10, %v5916_v12, %v5920_v3  ;;  %v6003_v4 = vsel %vm559_vm1, %v5998_v22, %v6002_v36 }
 0x498   : > { %v5919_v7 = vsel %vm3323_vm10, %v5914_v62, %v5918_v1  ;;  %v5971_v54 = vmax.f32 %v10476_v21, %v5921_v58  ;;  %v5707_v2 = vpop.permute.xlu0 %5706  ;;  %v6001_v46 = vsel %vm559_vm1, %v5996_v33, %v6000_v49  ;;  %v5829_v62 = vsel %vm3245_vm9, %v5804_v11, %v5806_v35 }
 0x499   : > { %v5730_v10 = vsel %vm3145_vm8, %v5705_v53, %v5707_v2  ;;  %v5770_v12 = vmax.f32 %v10138_v9, %v5707_v2  ;;  %v5970_v59 = vmax.f32 %v5864_v25, %v5919_v7  ;;  %v6064_v25 = vmax.f32 %v10487_v14, %v10522_v17 }
 0x49a   : > { %v5711_v27 = vpop.permute.xlu1 %5710  ;;  %v5769_v52 = vmax.f32 %v10130_v41, %v5730_v10  ;;  %v10537_v30 = vmax.f32 %v5971_v54, %v6003_v4  ;;  %v6067_v11 = vmax.f32 %v10507_v8, %v10533_v39  ;;  %v7354_v8 = vld [vmem:[%s10683_s4 + $0x8] sm:$0xff] }
 0x49b   : > { %v5869_v21 = vmax.f32 %v5770_v12, %v5806_v35  ;;  %v5772_v29 = vmax.f32 %v10145_v28, %v5711_v27  ;;  %v10541_v0 = vmax.f32 %v5970_v59, %v6001_v46 }
 0x49c   : > { %v10543_v43 = vmax.f32 %v5769_v52, %v5829_v62  ;;  %v5709_v53 = vpop.permute.xlu0 %5708  ;;  %v6077_v41 = vmax.f32 %v6065_v32, %v10537_v30 }
 0x49d   : > { %v5924_v37 = vrot.slane %v5869_v21, 1  ;;  %v6006_v51 = vrot.slane %v5869_v21, 2  ;;  %v5731_v22 = vsel %vm3145_vm8, %v5709_v53, %v5711_v27  ;;  %v6076_v33 = vmax.f32 %v6064_v25, %v10541_v0 }
 0x49e   : > { %v5810_v9 = vpop.permute.xlu1 %5809  ;;  %v5922_v28 = vrot.slane %v10543_v43, 1  ;;  %v6004_v56 = vrot.slane %v10543_v43, 2  ;;  %v5771_v35 = vmax.f32 %v10153_v34, %v5731_v22  ;;  %v6089_v34 = vmul.f32 %v7354_v8, %v6077_v41 }
 0x49f   : > { %v10551_v60 = vmax.f32 %v5772_v29, %v5810_v9  ;;  %v5925_v14 = vsel %vm3323_vm10, %v5920_v3, %v5924_v37  ;;  %v6088_v47 = vmul.f32 %v7353_v40, %v6076_v33  ;;  %v6007_v3 = vsel %vm559_vm1, %v6002_v36, %v6006_v51 }
 0x4a0   : > { %v5923_v44 = vsel %vm3323_vm10, %v5918_v1, %v5922_v28  ;;  %v5973_v38 = vmax.f32 %v10504_v50, %v5925_v14  ;;  %v5808_v58 = vpop.permute.xlu0 %5807  ;;  %v6100_v27 = vsel %vm3524_vm11, %v6089_v34, 0.0  ;;  %v6005_v59 = vsel %vm559_vm1, %v6000_v49, %v6004_v56 }
 0x4a1   : > { %v5928_v23 = vrot.slane %v10551_v60, 1  ;;  %v6010_v19 = vrot.slane %v10551_v60, 2  ;;  %v5830_v50 = vsel %vm3245_vm9, %v5808_v58, %v5810_v9  ;;  %v5972_v4 = vmax.f32 %v10509_v42, %v5923_v44 }
 0x4a2   : > { %v5715_v32 = vpop.permute.xlu1 %5714  ;;  %v10574_v2 = vmax.f32 %v5771_v35, %v5830_v50  ;;  %v6101_v12 = vadd.f32 %v6100_v27, %v6088_v47  ;;  %v10580_v52 = vmax.f32 %v5973_v38, %v6007_v3 }
 0x4a3   : > { %v5929_v7 = vsel %vm3323_vm10, %v5924_v37, %v5928_v23  ;;  %v6011_v1 = vsel %vm559_vm1, %v6006_v51, %v6010_v19  ;;  %v5774_v10 = vmax.f32 %v10160_v26, %v5715_v32  ;;  %v10583_v29 = vmax.f32 %v5972_v4, %v6005_v59 }
 0x4a4   : > { %v5975_v54 = vmax.f32 %v5869_v21, %v5929_v7  ;;  %v5926_v36 = vrot.slane %v10574_v2, 1  ;;  %v5713_v46 = vpop.permute.xlu0 %5712  ;;  %v6066_v21 = vmax.f32 %v10514_v5, %v10548_v63  ;;  %v6008_v42 = vrot.slane %v10574_v2, 2  ;;  %6102 = vadd.xlane.f32.xlu0 %v6101_v12  ;;  %v10949_v12 = vld [vmem:[#allocation6_spill] sm:$0xff] }
 0x4a5   : > { %v5732_v26 = vsel %vm3145_vm8, %v5713_v46, %v5715_v32  ;;  %v6079_v49 = vmax.f32 %v6067_v11, %v10580_v52  ;;  %v6069_v37 = vmax.f32 %v10498_v57, %v10537_v30  ;;  %v6068_v32 = vmax.f32 %v10522_v17, %v10541_v0 }
 0x4a6   : > { %v5814_v62 = vpop.permute.xlu1 %5813  ;;  %v10587_v53 = vmax.f32 %v5975_v54, %v6011_v1  ;;  %v5927_v25 = vsel %vm3323_vm10, %v5922_v28, %v5926_v36  ;;  %v6078_v41 = vmax.f32 %v6066_v21, %v10583_v29  ;;  %v5773_v14 = vmax.f32 %v10168_v13, %v5732_v26 }
 0x4a7   : > { %v10591_v9 = vmax.f32 %v5774_v10, %v5814_v62  ;;  %v6091_v22 = vmul.f32 %v6079_v49, %v10333_v55  ;;  %v5974_v33 = vmax.f32 %v10543_v43, %v5927_v25  ;;  %v6009_v58 = vsel %vm559_vm1, %v6004_v56, %v6008_v42 }
 0x4a8   : > { %v5812_v35 = vpop.permute.xlu0 %5811  ;;  %v6090_v11 = vmul.f32 %v6078_v41, %v10350_v45  ;;  %v6081_v28 = vmax.f32 %v6069_v37, %v10587_v53 }
 0x4a9   : > { %v5932_v5 = vrot.slane %v10591_v9, 1  ;;  %v6014_v51 = vrot.slane %v10591_v9, 2  ;;  %v5831_v57 = vsel %vm3245_vm9, %v5812_v35, %v5814_v62  ;;  %v6104_v13 = vsel %vm3524_vm11, %v6091_v22, 0.0  ;;  %v10950_v22 = vld [vmem:[#allocation30_spill] sm:$0xff] }
 0x4aa   : > { %v5719_v44 = vpop.permute.xlu1 %5718  ;;  %v5872_v43 = vmax.f32 %v5773_v14, %v5831_v57  ;;  %v10612_v40 = vmax.f32 %v5974_v33, %v6009_v58  ;;  %v6105_v8 = vadd.f32 %v6104_v13, %v6090_v11 }
 0x4ab   : > { %v5933_v38 = vsel %vm3323_vm10, %v5928_v23, %v5932_v5  ;;  %v6015_v45 = vsel %vm559_vm1, %v6010_v19, %v6014_v51  ;;  %v5776_v47 = vmax.f32 %v10175_v48, %v5719_v44  ;;  %v6093_v23 = vmul.f32 %v6081_v28, %v10357_v16 }
 0x4ac   : > { %v5977_v55 = vmax.f32 %v10551_v60, %v5933_v38  ;;  %v5930_v34 = vrot.slane %v5872_v43, 1  ;;  %v5717_v3 = vpop.permute.xlu0 %5716  ;;  %v6080_v7 = vmax.f32 %v6068_v32, %v10612_v40  ;;  %v6012_v60 = vrot.slane %v5872_v43, 2  ;;  %6106 = vadd.xlane.f32.xlu0 %v6105_v8 }
 0x4ad   : > { %v5733_v1 = vsel %vm3145_vm8, %v5717_v3, %v5719_v44  ;;  %v6071_v19 = vmax.f32 %v10533_v39, %v10580_v52  ;;  %v6108_v27 = vsel %vm3524_vm11, %v6093_v23, 0.0 }
 0x4ae   : > { %v5818_v56 = vpop.permute.xlu1 %5817  ;;  %v10618_v17 = vmax.f32 %v5977_v55, %v6015_v45  ;;  %v5931_v48 = vsel %vm3323_vm10, %v5926_v36, %v5930_v34  ;;  %v6092_v54 = vmul.f32 %v6080_v7, %v10378_v6  ;;  %v5775_v59 = vmax.f32 %v10949_v12, %v5733_v1  ;;  %v10951_v45 = vld [vmem:[#allocation35_spill] sm:$0xff] }
 0x4af   : > { %v5875_v50 = vmax.f32 %v5776_v47, %v5818_v56  ;;  %v5976_v4 = vmax.f32 %v10574_v2, %v5931_v48  ;;  %v6013_v36 = vsel %vm559_vm1, %v6008_v42, %v6012_v60  ;;  %v6070_v6 = vmax.f32 %v10548_v63, %v10583_v29 }
 0x4b0   : > { %v6083_v10 = vmax.f32 %v6071_v19, %v10618_v17  ;;  %v5816_v62 = vpop.permute.xlu0 %5815  ;;  %v6109_v21 = vadd.f32 %v6108_v27, %v6092_v54 }
 0x4b1   : > { %v5936_v16 = vrot.slane %v5875_v50, 1  ;;  %v6018_v46 = vrot.slane %v5875_v50, 2  ;;  %v5832_v39 = vsel %vm3245_vm9, %v5816_v62, %v5818_v56  ;;  %v6058_v41 = vmax.f32 %v5976_v4, %v6013_v36 }
 0x4b2   : > { %v5723_v26 = vpop.permute.xlu1 %5722  ;;  %v5874_v2 = vmax.f32 %v5775_v59, %v5832_v39  ;;  %6110 = vadd.xlane.f32.xlu0 %v6109_v21  ;;  %v6095_v37 = vmul.f32 %v6083_v10, %v10386_v61 }
 0x4b3   : > { %v5937_v49 = vsel %vm3323_vm10, %v5932_v5, %v5936_v16  ;;  %v5778_v33 = vmax.f32 %v10950_v22, %v5723_v26  ;;  %v6019_v14 = vsel %vm559_vm1, %v6014_v51, %v6018_v46  ;;  %v6082_v28 = vmax.f32 %v6070_v6, %v6058_v41 }
 0x4b4   : > { %v5979_v25 = vmax.f32 %v10591_v9, %v5937_v49  ;;  %v5934_v35 = vrot.slane %v5874_v2, 1  ;;  %v6016_v5 = vrot.slane %v5874_v2, 2  ;;  %v5721_v44 = vpop.permute.xlu0 %5720  ;;  %v6073_v9 = vmax.f32 %v10537_v30, %v10587_v53 }
 0x4b5   : > { %v5734_v42 = vsel %vm3145_vm8, %v5721_v44, %v5723_v26  ;;  %v6094_v61 = vmul.f32 %v6082_v28, %v10400_v18  ;;  %v6112_v58 = vsel %vm3524_vm11, %v6095_v37, 0.0  ;;  %v6072_v18 = vmax.f32 %v10541_v0, %v10612_v40 }
 0x4b6   : > { %v5822_v11 = vpop.permute.xlu1 %5821  ;;  %v6061_v63 = vmax.f32 %v5979_v25, %v6019_v14  ;;  %v5935_v57 = vsel %vm3323_vm10, %v5930_v34, %v5934_v35  ;;  %v5777_v47 = vmax.f32 %v10951_v45, %v5734_v42  ;;  %v6017_v3 = vsel %vm559_vm1, %v6012_v60, %v6016_v5 }
 0x4b7   : > { %v5877_v38 = vmax.f32 %v5778_v33, %v5822_v11  ;;  %v5978_v55 = vmax.f32 %v5872_v43, %v5935_v57  ;;  %v6113_v23 = vadd.f32 %v6112_v58, %v6094_v61  ;;  %v6075_v60 = vmax.f32 %v10580_v52, %v10618_v17 }
 0x4b8   : > { %v6085_v13 = vmax.f32 %v6073_v9, %v6061_v63  ;;  %v5820_v8 = vpop.permute.xlu0 %5819  ;;  %v6074_v59 = vmax.f32 %v10583_v29, %v6058_v41 }
 0x4b9   : > { %v5940_v32 = vrot.slane %v5877_v38, 1  ;;  %v6022_v51 = vrot.slane %v5877_v38, 2  ;;  %v5833_v30 = vsel %vm3245_vm9, %v5820_v8, %v5822_v11  ;;  %v6060_v53 = vmax.f32 %v5978_v55, %v6017_v3  ;;  %6114 = vadd.xlane.f32.xlu0 %v6113_v23 }
 0x4ba   : > { %v5876_v7 = vmax.f32 %v5777_v47, %v5833_v30  ;;  %v6097_v43 = vmul.f32 %v6085_v13, %v10406_v24 }
 0x4bb   : > { %v5941_v56 = vsel %vm3323_vm10, %v5936_v16, %v5940_v32  ;;  %v6023_v1 = vsel %vm559_vm1, %v6018_v46, %v6022_v51  ;;  %v6084_v19 = vmax.f32 %v6072_v18, %v6060_v53 }
 0x4bc   : > { %v5981_v34 = vmax.f32 %v5875_v50, %v5941_v56  ;;  %v5938_v54 = vrot.slane %v5876_v7, 1  ;;  %v6020_v27 = vrot.slane %v5876_v7, 2  ;;  %v6116_v0 = vsel %vm3524_vm11, %v6097_v43, 0.0 }
 0x4bd   : > { %v6096_v16 = vmul.f32 %v6084_v19, %v10416_v20 }
 0x4be   : > { %v6063_v48 = vmax.f32 %v5981_v34, %v6023_v1  ;;  %v5939_v4 = vsel %vm3323_vm10, %v5934_v35, %v5938_v54  ;;  %v6021_v24 = vsel %vm559_vm1, %v6016_v5, %v6020_v27 }
 0x4bf   : > { %v5980_v50 = vmax.f32 %v5874_v2, %v5939_v4  ;;  %v6117_v10 = vadd.f32 %v6116_v0, %v6096_v16 }
 0x4c0   : > { %v6087_v40 = vmax.f32 %v6075_v60, %v6063_v48 }
 0x4c1   : > { %6118 = vadd.xlane.f32.xlu0 %v6117_v10  ;;  %v6062_v12 = vmax.f32 %v5980_v50, %v6021_v24 }
 0x4c2   : > { %v6099_v46 = vmul.f32 %v6087_v40, %v10422_v15 }
 0x4c3   : > { %v6086_v62 = vmax.f32 %v6074_v59, %v6062_v12 }
 0x4c4   : > { %v6120_v20 = vsel %vm3524_vm11, %v6099_v46, 0.0 }
 0x4c5   : > { %v6098_v52 = vmul.f32 %v6086_v62, %v10430_v31 }
 0x4c7   : > { %v6121_v17 = vadd.f32 %v6120_v20, %v6098_v52 }
 0x4c9   : > { %6122 = vadd.xlane.f32.xlu0 %v6121_v17 }
 0x4ee   : > { %v3528_v39 = vpop.xlane.xlu0 %3527 }
 0x4f1   : > { %v3532_v21 = vpop.xlane.xlu1 %3531 }
 0x4f2   : > { %v3549_v25 = vadd.f32 %v3532_v21, %v3528_v39 }
 0x4f5   : > { %v3536_v26 = vpop.xlane.xlu1 %3535 }
 0x4f6   : > { %v3550_v2 = vadd.f32 %v3549_v25, %v3536_v26 }
 0x4f9   : > { %v3540_v49 = vpop.xlane.xlu1 %3539 }
 0x4fa   : > { %v3551_v22 = vadd.f32 %v3550_v2, %v3540_v49 }
 0x4fd   : > { %v3544_v36 = vpop.xlane.xlu1 %3543 }
 0x4fe   : > { %v3552_v41 = vadd.f32 %v3551_v22, %v3544_v36 }
 0x501   : > { %v3548_v29 = vpop.xlane.xlu1 %3547 }
 0x502   : > { %v3553_v33 = vadd.f32 %v3552_v41, %v3548_v29 }
 0x504   : > { %v3554_v14 = vrot.slane %v3553_v33, 4 }
 0x506   : > { %v3555_v11 = vadd.f32 %v3554_v14, %v3553_v33 }
 0x508   : > { %v3556_v63 = vrot.slane %v3555_v11, 2 }
 0x50a   : > { %v3557_v61 = vadd.f32 %v3556_v63, %v3555_v11 }
 0x50c   : > { %v3558_v51 = vrot.slane %v3557_v61, 1 }
 0x50e   : > { %v3559_v45 = vadd.f32 %v3558_v51, %v3557_v61 }
 0x52d   : > { %v6103_v6 = vpop.xlane.xlu0 %6102 }
 0x535   : > { %v6107_v37 = vpop.xlane.xlu0 %6106 }
 0x536   : > { %v6124_v35 = vadd.f32 %v6107_v37, %v6103_v6 }
 0x53b   : > { %v6111_v15 = vpop.xlane.xlu0 %6110 }
 0x53c   : > { %v6125_v5 = vadd.f32 %v6124_v35, %v6111_v15 }
 0x542   : > { %v6115_v31 = vpop.xlane.xlu0 %6114 }
 0x543   : > { %v6126_v28 = vadd.f32 %v6125_v5, %v6115_v31 }
 0x54a   : > { %v6119_v44 = vpop.xlane.xlu0 %6118 }
 0x54b   : > { %v6127_v42 = vadd.f32 %v6126_v28, %v6119_v44 }
 0x552   : > { %v6123_v38 = vpop.xlane.xlu0 %6122 }
 0x553   : > { %v6128_v9 = vadd.f32 %v6127_v42, %v6123_v38 }
 0x555   : > { %v6129_v57 = vrot.slane %v6128_v9, 4 }
 0x557   : > { %v6130_v58 = vadd.f32 %v6129_v57, %v6128_v9 }
 0x559   : > { %v6131_v32 = vrot.slane %v6130_v58, 2 }
 0x55b   : > { %v6132_v55 = vadd.f32 %v6131_v32, %v6130_v58 }
 0x55d   : > { %v6133_v13 = vrot.slane %v6132_v55, 1 }
 0x55f   : > { %v6134_v47 = vadd.f32 %v6133_v13, %v6132_v55 }
 0x561   : > { %v6136_v8 = vsel %vm6135_vm12, %v3559_v45, %v6134_v47 }
 0x562   : > { %6138 = vst.msk [vmem:[%s502_s6] sm:$0x1] %vm6137_vm13, %v6136_v8 }
 0x563 PF: > { %p12_p9 = scmp.ge.s32.totalorder %s7484_s22, 4   ;;  %s10952_s18 = smov %s7421_s19 }
 0x564   : > { %s10953_s19 = smov %s7493_s25  ;;  %s10954_s20 = smov %s7484_s22 }
 0x565   :  { %14 = sbr.rel (!%p12_p9) target bundleno = 2 (0x2), region = 186 }

</bundles_post_ra>
